<compile_context>
chip_gen: v5e
topology: v5e:2x2
jax: 0.10.0
libtpu: 0.0.40
codegen_flags: <defaults>
</compile_context>

<pallas_src>
import functools
import math

import jax
import jax.numpy as jnp
from jax.experimental import pallas as pl
from jax.experimental.pallas import tpu as pltpu


def _ca_res_block_kernel(x_ref, mask_ref, w1_ref, b1_ref, w2_ref, b2_ref,
                         eca_ref, *rest, H, W, HW, batch_block, cin, cout,
                         eca_k, residual, identity_ds, fused_ds):
    separate_ds = residual and (not identity_ds) and (not fused_ds)
    if separate_ds:
        wd_ref, bd_ref, out_ref, col_ref = rest
    else:
        out_ref, col_ref = rest

    M = batch_block * HW
    taps = [(dy, dx, dy * W + dx) for dy in (-1, 0, 1) for dx in (-1, 0, 1)]

    def fill_taps(h, C):
        # h: [M, C] f32 (already ReLU'ed).  Streams 9 masked bf16 taps into the
        # persistent im2col scratch, lanes [0, 9*C).
        for t, (dy, dx, s) in enumerate(taps):
            if dy == 0 and dx == 0:
                piece = h                                   # mask is all ones
            else:
                # rolled[p] = h[(p + s) mod M]; mask zeroes every wrap /
                # out-of-image / cross-image position.
                rolled = pltpu.roll(h, (-s) % M, axis=0)
                piece = rolled * mask_ref[:, t:t + 1]
            col_ref[:, t * C:(t + 1) * C] = piece.astype(jnp.bfloat16)

    x = x_ref[...]                                          # [M, cin] f32

    # ---- conv1 (optionally fused with the 1x1 downsample) ----
    fill_taps(jnp.maximum(x, 0.0), cin)
    k1 = 9 * cin
    if fused_ds:
        col_ref[:, 9 * cin:10 * cin] = x.astype(jnp.bfloat16)   # raw-x tap (wd)
        k1 = 10 * cin
    acc1 = jnp.dot(col_ref[:, :k1], w1_ref[...],
                   preferred_element_type=jnp.float32) + b1_ref[...]
    if fused_ds:
        y1, resid = acc1[:, :cout], acc1[:, cout:]
    else:
        y1, resid = acc1, None

    # ---- conv2 (reuses the same im2col scratch) ----
    fill_taps(jnp.maximum(y1, 0.0), cout)
    y2 = jnp.dot(col_ref[:, :9 * cout], w2_ref[...],
                 preferred_element_type=jnp.float32) + b2_ref[...]   # [M, cout]

    # ---- separate 1x1 downsample (v5e-friendly path) ----
    if separate_ds:
        resid = jnp.dot(x.astype(jnp.bfloat16), wd_ref[...],
                        preferred_element_type=jnp.float32) + bd_ref[...]

    # ---- per-image ECA gate + residual + store ----
    pad = (eca_k - 1) // 2
    for bb in range(batch_block):
        rows = slice(bb * HW, (bb + 1) * HW)
        y2b = y2[rows, :]                                    # [HW, cout]
        pooled = jnp.mean(y2b, axis=0, keepdims=True)        # [1, cout] f32
        if pad:
            zp = jnp.zeros((1, pad), jnp.float32)
            pooled_pad = jnp.concatenate([zp, pooled, zp], axis=1)
        else:
            pooled_pad = pooled
        logits = jnp.zeros((1, cout), jnp.float32)
        for j in range(eca_k):                               # k shifted VPU FMAs
            logits = logits + eca_ref[j] * pooled_pad[:, j:j + cout]
        gate = jax.nn.sigmoid(logits)                        # [1, cout]
        out = y2b * gate
        if residual:
            out = out + (x[rows, :] if identity_ds else resid[rows, :])
        out_ref[rows, :] = out.astype(out_ref.dtype)


def ca_res_block_forward(x_nchw, params, *, residual=True, batch_block=None,
                         fuse_downsample=True):
    B, Cin, H, W = x_nchw.shape
    Cout = params["w1"].shape[-1]
    HW = H * W
    identity_ds = (Cin == Cout)

    if batch_block is None:
        # Largest divisor of B that keeps >= 2 grid steps: both v7x TensorCores
        # get work; each step's M = batch_block*HW amortizes per-step pipeline
        # overhead and MXU weight-load passes (v5e/v6e win for larger B).
        batch_block = 1
        for d in range(B // 2, 1, -1):
            if B % d == 0:
                batch_block = d
                break
    if B % batch_block != 0:
        raise ValueError(f"batch_block={batch_block} must divide B={B}")
    num_steps = B // batch_block
    M = batch_block * HW

    x_flat = jnp.transpose(x_nchw, (0, 2, 3, 1)).reshape(B * HW, Cin)
    x_flat = x_flat.astype(jnp.float32)

    # Boundary masks for the 9 roll-based taps, hoisted out of the kernel.
    # mask[p, t] == 1 iff tap t's neighbour of flattened position p lies inside
    # the HxW image.  The roll+mask scheme is batch-merge safe: every wrap /
    # cross-image roll lands exactly on an out-of-image (masked) position.
    p = jnp.arange(M)
    yy = (p % HW) // W
    xx = p % W
    cols = []
    for dy in (-1, 0, 1):
        for dx in (-1, 0, 1):
            cols.append((yy + dy >= 0) & (yy + dy < H) &
                        (xx + dx >= 0) & (xx + dx < W))
    mask = jnp.stack(cols, axis=1).astype(jnp.float32)            # [M, 9]

    # Conv weights flattened tap-major to [9*C, Cout]; bf16 operands for MXU.
    w1 = params["w1"].reshape(9 * Cin, Cout)
    b1 = params["b1"].reshape(1, Cout).astype(jnp.float32)
    w2 = params["w2"].reshape(9 * Cout, Cout).astype(jnp.bfloat16)
    b2 = params["b2"].reshape(1, Cout).astype(jnp.float32)

    fused_ds = bool(residual and not identity_ds and fuse_downsample)
    if fused_ds:
        # Block-diagonal RHS [[w1_flat, 0], [0, wd]]: one K=10*Cin, N=2*Cout
        # matmul yields conv1 pre-act and the 1x1-downsample residual together.
        wcat = jnp.zeros((10 * Cin, 2 * Cout), jnp.float32)
        wcat = wcat.at[:9 * Cin, :Cout].set(w1)
        wcat = wcat.at[9 * Cin:, Cout:].set(params["wd"])
        w1_in = wcat.astype(jnp.bfloat16)
        b1_in = jnp.concatenate(
            [b1, params["bd"].reshape(1, Cout).astype(jnp.float32)], axis=1)
    else:
        w1_in = w1.astype(jnp.bfloat16)
        b1_in = b1

    # ECA Conv1d taps as [k, 1, Cout] lane vectors (pure VPU math in-kernel).
    kern = params["eca_kern"].astype(jnp.float32)
    eca_k = kern.shape[0]
    eca = jnp.broadcast_to(kern[:, None, None], (eca_k, 1, Cout))

    k_max = max((10 if fused_ds else 9) * Cin, 9 * Cout)

    args = [x_flat, mask, w1_in, b1_in, w2, b2, eca]
    in_specs = [
        pl.BlockSpec((M, Cin), lambda g: (g, 0)),                 # x rows
        pl.BlockSpec((M, 9), lambda g: (0, 0)),                   # tap masks
        pl.BlockSpec(w1_in.shape, lambda g: (0, 0)),              # w1 (+wd fused)
        pl.BlockSpec(b1_in.shape, lambda g: (0, 0)),              # b1 (+bd fused)
        pl.BlockSpec(w2.shape, lambda g: (0, 0)),                 # w2
        pl.BlockSpec(b2.shape, lambda g: (0, 0)),                 # b2
        pl.BlockSpec((eca_k, 1, Cout), lambda g: (0, 0, 0)),      # ECA taps
    ]
    if residual and not identity_ds and not fused_ds:
        args += [params["wd"].astype(jnp.bfloat16),
                 params["bd"].reshape(1, Cout).astype(jnp.float32)]
        in_specs += [pl.BlockSpec((Cin, Cout), lambda g: (0, 0)),
                     pl.BlockSpec((1, Cout), lambda g: (0, 0))]

    kernel = functools.partial(
        _ca_res_block_kernel, H=H, W=W, HW=HW, batch_block=batch_block,
        cin=Cin, cout=Cout, eca_k=eca_k, residual=residual,
        identity_ds=identity_ds, fused_ds=fused_ds)

    out_flat = pl.pallas_call(
        kernel,
        out_shape=jax.ShapeDtypeStruct((B * HW, Cout), jnp.float32),
        grid_spec=pltpu.PrefetchScalarGridSpec(
            num_scalar_prefetch=0,
            grid=(num_steps,),
            in_specs=in_specs,
            out_specs=pl.BlockSpec((M, Cout), lambda g: (g, 0)),
            scratch_shapes=[pltpu.VMEM((M, k_max), jnp.bfloat16)],  # im2col
        ),
        compiler_params=pltpu.CompilerParams(
            dimension_semantics=("parallel",)),
    )(*args)

    return jnp.transpose(out_flat.reshape(B, H, W, Cout), (0, 3, 1, 2))


def ca_res_block_reference(x_nchw, params, *, residual=True):
    """Pure-JAX NHWC reference for correctness checking."""
    hp = jax.lax.Precision.HIGHEST
    x = jnp.transpose(x_nchw, (0, 2, 3, 1)).astype(jnp.float32)
    Cout = params["w1"].shape[-1]

    def conv3(h, w):
        return jax.lax.conv_general_dilated(
            h, w, window_strides=(1, 1), padding=((1, 1), (1, 1)),
            dimension_numbers=("NHWC", "HWIO", "NHWC"), precision=hp)

    y1 = conv3(jax.nn.relu(x), params["w1"]) + params["b1"][0]
    y2 = conv3(jax.nn.relu(y1), params["w2"]) + params["b2"][0]

    pooled = jnp.mean(y2, axis=(1, 2))                        # [B, Cout]
    kern = params["eca_kern"]
    k = kern.shape[0]
    pad = (k - 1) // 2
    pp = jnp.pad(pooled, ((0, 0), (pad, pad)))
    logits = jnp.zeros_like(pooled)
    for j in range(k):
        logits = logits + kern[j] * pp[:, j:j + Cout]
    gate = jax.nn.sigmoid(logits)[:, None, None, :]           # [B,1,1,Cout]

    out = y2 * gate
    if residual:
        if "wd" in params:
            r = jnp.einsum("bhwc,cd->bhwd", x, params["wd"],
                           precision=hp) + params["bd"][0]
        else:
            r = x
        out = out + r
    return jnp.transpose(out, (0, 3, 1, 2))


def init_params(rng, in_dim, out_dim):
    t = int((abs(math.log2(out_dim)) + 1) // 2)
    k = t if t % 2 else t + 1
    ks = jax.random.split(rng, 7)

    def uinit(key, shape, fan_in):
        b = 1.0 / math.sqrt(fan_in)
        return jax.random.uniform(key, shape, jnp.float32, -b, b)

    p = {
        "w1": uinit(ks[0], (3, 3, in_dim, out_dim), 9 * in_dim),
        "b1": uinit(ks[1], (1, out_dim), 9 * in_dim),
        "w2": uinit(ks[2], (3, 3, out_dim, out_dim), 9 * out_dim),
        "b2": uinit(ks[3], (1, out_dim), 9 * out_dim),
        "eca_kern": uinit(ks[4], (k,), k),
    }
    if in_dim != out_dim:
        p["wd"] = uinit(ks[5], (in_dim, out_dim), in_dim)
        p["bd"] = uinit(ks[6], (1, out_dim), in_dim)
    return p


if __name__ == "__main__":
    root = jax.random.PRNGKey(0)
    cases = [
        # (cfg, forward kwargs)
        (dict(B=2, in_dim=64, out_dim=64, H=16, W=16), dict()),                # identity residual, k=3
        (dict(B=2, in_dim=64, out_dim=128, H=16, W=16), dict()),               # fused 1x1 downsample, k=5
        (dict(B=2, in_dim=64, out_dim=128, H=16, W=16),
         dict(batch_block=2)),                                                 # batch merged into matmul M
        (dict(B=2, in_dim=64, out_dim=128, H=16, W=16),
         dict(fuse_downsample=False)),                                         # separate downsample (v5e path)
        (dict(B=2, in_dim=64, out_dim=64, H=16, W=16), dict(residual=False)),  # no residual
    ]
    for i, (cfg, kw) in enumerate(cases):
        kp, kx = jax.random.split(jax.random.fold_in(root, i))
        params = init_params(kp, cfg["in_dim"], cfg["out_dim"])
        x = jax.random.normal(
            kx, (cfg["B"], cfg["in_dim"], cfg["H"], cfg["W"]), jnp.float32)
        residual = kw.get("residual", True)

        fwd = jax.jit(functools.partial(ca_res_block_forward, **kw))
        out = jax.block_until_ready(fwd(x, params))
        ref = jax.block_until_ready(
            ca_res_block_reference(x, params, residual=residual))

        assert out.shape == ref.shape, (i, out.shape, ref.shape)
        assert bool(jnp.all(jnp.isfinite(out))), i
        max_err = float(jnp.max(jnp.abs(out - ref)))
        assert jnp.allclose(out, ref, rtol=2e-2, atol=2e-2), (i, max_err)
    print("KERNEL_OK")
</pallas_src>

<mosaic_0001>
module attributes {stable_mosaic.version = 11 : i64} {
  func.func @_ca_res_block_kernel(%arg0: i32, %arg1: memref<256x64xf32, #tpu.memory_space<vmem>>, %arg2: memref<256x9xf32, #tpu.memory_space<vmem>>, %arg3: memref<576x64xbf16, #tpu.memory_space<vmem>>, %arg4: memref<1x64xf32, #tpu.memory_space<vmem>>, %arg5: memref<576x64xbf16, #tpu.memory_space<vmem>>, %arg6: memref<1x64xf32, #tpu.memory_space<vmem>>, %arg7: memref<3x1x64xf32, #tpu.memory_space<vmem>>, %arg8: memref<256x64xf32, #tpu.memory_space<vmem>>, %arg9: memref<256x576xbf16, #tpu.memory_space<vmem>>) attributes {dimension_semantics = [#tpu.dimension_semantics<parallel>], iteration_bounds = array<i64: 2>, scalar_prefetch = 0 : i64, scratch_operands = 1 : i64, tpu.core_type = #tpu.core_type<tc>, window_params = [{transform_indices = @transform_0, window_bounds = array<i64: 256, 64>}, {pipeline_mode = #tpu.pipeline_mode<synchronous>, transform_indices = @transform_1, window_bounds = array<i64: 256, 9>}, {pipeline_mode = #tpu.pipeline_mode<synchronous>, transform_indices = @transform_2, window_bounds = array<i64: 576, 64>}, {pipeline_mode = #tpu.pipeline_mode<synchronous>, transform_indices = @transform_3, window_bounds = array<i64: 1, 64>}, {pipeline_mode = #tpu.pipeline_mode<synchronous>, transform_indices = @transform_4, window_bounds = array<i64: 576, 64>}, {pipeline_mode = #tpu.pipeline_mode<synchronous>, transform_indices = @transform_5, window_bounds = array<i64: 1, 64>}, {pipeline_mode = #tpu.pipeline_mode<synchronous>, transform_indices = @transform_6, window_bounds = array<i64: 3, 1, 64>}, {transform_indices = @transform_7, window_bounds = array<i64: 256, 64>}]} {
    %c0 = arith.constant 0 : index
    %c0_0 = arith.constant 0 : index
    %0 = vector.load %arg1[%c0, %c0_0] : memref<256x64xf32, #tpu.memory_space<vmem>>, vector<256x64xf32>
    %cst = arith.constant 0.000000e+00 : f32
    %1 = vector.broadcast %cst : f32 to vector<256x64xf32>
    %2 = arith.maximumf %0, %1 : vector<256x64xf32>
    %c17_i32 = arith.constant 17 : i32
    %3 = tpu.dynamic_rotate %2 by %c17_i32 dim 0 : vector<256x64xf32>, i32 -> vector<256x64xf32>
    %c0_1 = arith.constant 0 : index
    %c0_2 = arith.constant 0 : index
    %4 = vector.load %arg2[%c0_1, %c0_2] : memref<256x9xf32, #tpu.memory_space<vmem>>, vector<256x1xf32>
    %5 = vector.broadcast %4 : vector<256x1xf32> to vector<256x64xf32>
    %6 = arith.mulf %3, %5 : vector<256x64xf32>
    %7 = arith.truncf %6 : vector<256x64xf32> to vector<256x64xbf16>
    %c0_3 = arith.constant 0 : index
    %c0_4 = arith.constant 0 : index
    %8 = vector.load %arg9[%c0_3, %c0_4] : memref<256x576xbf16, #tpu.memory_space<vmem>>, vector<256x64xbf16>
    tpu.vector_store %arg9[%c0_3, %c0_4], %7 {strides = array<i32>} : memref<256x576xbf16, #tpu.memory_space<vmem>>, vector<256x64xbf16>,
    %c16_i32 = arith.constant 16 : i32
    %9 = tpu.dynamic_rotate %2 by %c16_i32 dim 0 : vector<256x64xf32>, i32 -> vector<256x64xf32>
    %c0_5 = arith.constant 0 : index
    %c1 = arith.constant 1 : index
    %10 = vector.load %arg2[%c0_5, %c1] : memref<256x9xf32, #tpu.memory_space<vmem>>, vector<256x1xf32>
    %11 = vector.broadcast %10 : vector<256x1xf32> to vector<256x64xf32>
    %12 = arith.mulf %9, %11 : vector<256x64xf32>
    %13 = arith.truncf %12 : vector<256x64xf32> to vector<256x64xbf16>
    %c0_6 = arith.constant 0 : index
    %c64 = arith.constant 64 : index
    %14 = vector.load %arg9[%c0_6, %c64] : memref<256x576xbf16, #tpu.memory_space<vmem>>, vector<256x64xbf16>
    tpu.vector_store %arg9[%c0_6, %c64], %13 {strides = array<i32>} : memref<256x576xbf16, #tpu.memory_space<vmem>>, vector<256x64xbf16>,
    %c15_i32 = arith.constant 15 : i32
    %15 = tpu.dynamic_rotate %2 by %c15_i32 dim 0 : vector<256x64xf32>, i32 -> vector<256x64xf32>
    %c0_7 = arith.constant 0 : index
    %c2 = arith.constant 2 : index
    %16 = vector.load %arg2[%c0_7, %c2] : memref<256x9xf32, #tpu.memory_space<vmem>>, vector<256x1xf32>
    %17 = vector.broadcast %16 : vector<256x1xf32> to vector<256x64xf32>
    %18 = arith.mulf %15, %17 : vector<256x64xf32>
    %19 = arith.truncf %18 : vector<256x64xf32> to vector<256x64xbf16>
    %c0_8 = arith.constant 0 : index
    %c128 = arith.constant 128 : index
    %20 = vector.load %arg9[%c0_8, %c128] : memref<256x576xbf16, #tpu.memory_space<vmem>>, vector<256x64xbf16>
    tpu.vector_store %arg9[%c0_8, %c128], %19 {strides = array<i32>} : memref<256x576xbf16, #tpu.memory_space<vmem>>, vector<256x64xbf16>,
    %c1_i32 = arith.constant 1 : i32
    %21 = tpu.dynamic_rotate %2 by %c1_i32 dim 0 : vector<256x64xf32>, i32 -> vector<256x64xf32>
    %c0_9 = arith.constant 0 : index
    %c3 = arith.constant 3 : index
    %22 = vector.load %arg2[%c0_9, %c3] : memref<256x9xf32, #tpu.memory_space<vmem>>, vector<256x1xf32>
    %23 = vector.broadcast %22 : vector<256x1xf32> to vector<256x64xf32>
    %24 = arith.mulf %21, %23 : vector<256x64xf32>
    %25 = arith.truncf %24 : vector<256x64xf32> to vector<256x64xbf16>
    %c0_10 = arith.constant 0 : index
    %c192 = arith.constant 192 : index
    %26 = vector.load %arg9[%c0_10, %c192] : memref<256x576xbf16, #tpu.memory_space<vmem>>, vector<256x64xbf16>
    tpu.vector_store %arg9[%c0_10, %c192], %25 {strides = array<i32>} : memref<256x576xbf16, #tpu.memory_space<vmem>>, vector<256x64xbf16>,
    %27 = arith.truncf %2 : vector<256x64xf32> to vector<256x64xbf16>
    %c0_11 = arith.constant 0 : index
    %c256 = arith.constant 256 : index
    %28 = vector.load %arg9[%c0_11, %c256] : memref<256x576xbf16, #tpu.memory_space<vmem>>, vector<256x64xbf16>
    tpu.vector_store %arg9[%c0_11, %c256], %27 {strides = array<i32>} : memref<256x576xbf16, #tpu.memory_space<vmem>>, vector<256x64xbf16>,
    %c255_i32 = arith.constant 255 : i32
    %29 = tpu.dynamic_rotate %2 by %c255_i32 dim 0 : vector<256x64xf32>, i32 -> vector<256x64xf32>
    %c0_12 = arith.constant 0 : index
    %c5 = arith.constant 5 : index
    %30 = vector.load %arg2[%c0_12, %c5] : memref<256x9xf32, #tpu.memory_space<vmem>>, vector<256x1xf32>
    %31 = vector.broadcast %30 : vector<256x1xf32> to vector<256x64xf32>
    %32 = arith.mulf %29, %31 : vector<256x64xf32>
    %33 = arith.truncf %32 : vector<256x64xf32> to vector<256x64xbf16>
    %c0_13 = arith.constant 0 : index
    %c320 = arith.constant 320 : index
    %34 = vector.load %arg9[%c0_13, %c320] : memref<256x576xbf16, #tpu.memory_space<vmem>>, vector<256x64xbf16>
    tpu.vector_store %arg9[%c0_13, %c320], %33 {strides = array<i32>} : memref<256x576xbf16, #tpu.memory_space<vmem>>, vector<256x64xbf16>,
    %c241_i32 = arith.constant 241 : i32
    %35 = tpu.dynamic_rotate %2 by %c241_i32 dim 0 : vector<256x64xf32>, i32 -> vector<256x64xf32>
    %c0_14 = arith.constant 0 : index
    %c6 = arith.constant 6 : index
    %36 = vector.load %arg2[%c0_14, %c6] : memref<256x9xf32, #tpu.memory_space<vmem>>, vector<256x1xf32>
    %37 = vector.broadcast %36 : vector<256x1xf32> to vector<256x64xf32>
    %38 = arith.mulf %35, %37 : vector<256x64xf32>
    %39 = arith.truncf %38 : vector<256x64xf32> to vector<256x64xbf16>
    %c0_15 = arith.constant 0 : index
    %c384 = arith.constant 384 : index
    %40 = vector.load %arg9[%c0_15, %c384] : memref<256x576xbf16, #tpu.memory_space<vmem>>, vector<256x64xbf16>
    tpu.vector_store %arg9[%c0_15, %c384], %39 {strides = array<i32>} : memref<256x576xbf16, #tpu.memory_space<vmem>>, vector<256x64xbf16>,
    %c240_i32 = arith.constant 240 : i32
    %41 = tpu.dynamic_rotate %2 by %c240_i32 dim 0 : vector<256x64xf32>, i32 -> vector<256x64xf32>
    %c0_16 = arith.constant 0 : index
    %c7 = arith.constant 7 : index
    %42 = vector.load %arg2[%c0_16, %c7] : memref<256x9xf32, #tpu.memory_space<vmem>>, vector<256x1xf32>
    %43 = vector.broadcast %42 : vector<256x1xf32> to vector<256x64xf32>
    %44 = arith.mulf %41, %43 : vector<256x64xf32>
    %45 = arith.truncf %44 : vector<256x64xf32> to vector<256x64xbf16>
    %c0_17 = arith.constant 0 : index
    %c448 = arith.constant 448 : index
    %46 = vector.load %arg9[%c0_17, %c448] : memref<256x576xbf16, #tpu.memory_space<vmem>>, vector<256x64xbf16>
    tpu.vector_store %arg9[%c0_17, %c448], %45 {strides = array<i32>} : memref<256x576xbf16, #tpu.memory_space<vmem>>, vector<256x64xbf16>,
    %c239_i32 = arith.constant 239 : i32
    %47 = tpu.dynamic_rotate %2 by %c239_i32 dim 0 : vector<256x64xf32>, i32 -> vector<256x64xf32>
    %c0_18 = arith.constant 0 : index
    %c8 = arith.constant 8 : index
    %48 = vector.load %arg2[%c0_18, %c8] : memref<256x9xf32, #tpu.memory_space<vmem>>, vector<256x1xf32>
    %49 = vector.broadcast %48 : vector<256x1xf32> to vector<256x64xf32>
    %50 = arith.mulf %47, %49 : vector<256x64xf32>
    %51 = arith.truncf %50 : vector<256x64xf32> to vector<256x64xbf16>
    %c0_19 = arith.constant 0 : index
    %c512 = arith.constant 512 : index
    %52 = vector.load %arg9[%c0_19, %c512] : memref<256x576xbf16, #tpu.memory_space<vmem>>, vector<256x64xbf16>
    tpu.vector_store %arg9[%c0_19, %c512], %51 {strides = array<i32>} : memref<256x576xbf16, #tpu.memory_space<vmem>>, vector<256x64xbf16>,
    %c0_20 = arith.constant 0 : index
    %c0_21 = arith.constant 0 : index
    %53 = vector.load %arg9[%c0_20, %c0_21] : memref<256x576xbf16, #tpu.memory_space<vmem>>, vector<256x576xbf16>
    %c0_22 = arith.constant 0 : index
    %c0_23 = arith.constant 0 : index
    %54 = vector.load %arg3[%c0_22, %c0_23] : memref<576x64xbf16, #tpu.memory_space<vmem>>, vector<576x64xbf16>
    %cst_24 = arith.constant dense<0.000000e+00> : vector<256x64xf32>
    %55 = tpu.matmul %53, %54, %cst_24 {dimension_numbers = #tpu.dot_dimension_numbers<[1], [0], [0], [1], [0, 0, 1, 1], [], []>} : vector<256x576xbf16>, vector<576x64xbf16>, vector<256x64xf32> -> vector<256x64xf32>
    %c0_25 = arith.constant 0 : index
    %c0_26 = arith.constant 0 : index
    %56 = vector.load %arg4[%c0_25, %c0_26] : memref<1x64xf32, #tpu.memory_space<vmem>>, vector<1x64xf32>
    %57 = vector.broadcast %56 : vector<1x64xf32> to vector<256x64xf32>
    %58 = arith.addf %55, %57 : vector<256x64xf32>
    %cst_27 = arith.constant 0.000000e+00 : f32
    %59 = vector.broadcast %cst_27 : f32 to vector<256x64xf32>
    %60 = arith.maximumf %58, %59 : vector<256x64xf32>
    %c17_i32_28 = arith.constant 17 : i32
    %61 = tpu.dynamic_rotate %60 by %c17_i32_28 dim 0 : vector<256x64xf32>, i32 -> vector<256x64xf32>
    %c0_29 = arith.constant 0 : index
    %c0_30 = arith.constant 0 : index
    %62 = vector.load %arg2[%c0_29, %c0_30] : memref<256x9xf32, #tpu.memory_space<vmem>>, vector<256x1xf32>
    %63 = vector.broadcast %62 : vector<256x1xf32> to vector<256x64xf32>
    %64 = arith.mulf %61, %63 : vector<256x64xf32>
    %65 = arith.truncf %64 : vector<256x64xf32> to vector<256x64xbf16>
    %c0_31 = arith.constant 0 : index
    %c0_32 = arith.constant 0 : index
    %66 = vector.load %arg9[%c0_31, %c0_32] : memref<256x576xbf16, #tpu.memory_space<vmem>>, vector<256x64xbf16>
    tpu.vector_store %arg9[%c0_31, %c0_32], %65 {strides = array<i32>} : memref<256x576xbf16, #tpu.memory_space<vmem>>, vector<256x64xbf16>,
    %c16_i32_33 = arith.constant 16 : i32
    %67 = tpu.dynamic_rotate %60 by %c16_i32_33 dim 0 : vector<256x64xf32>, i32 -> vector<256x64xf32>
    %c0_34 = arith.constant 0 : index
    %c1_35 = arith.constant 1 : index
    %68 = vector.load %arg2[%c0_34, %c1_35] : memref<256x9xf32, #tpu.memory_space<vmem>>, vector<256x1xf32>
    %69 = vector.broadcast %68 : vector<256x1xf32> to vector<256x64xf32>
    %70 = arith.mulf %67, %69 : vector<256x64xf32>
    %71 = arith.truncf %70 : vector<256x64xf32> to vector<256x64xbf16>
    %c0_36 = arith.constant 0 : index
    %c64_37 = arith.constant 64 : index
    %72 = vector.load %arg9[%c0_36, %c64_37] : memref<256x576xbf16, #tpu.memory_space<vmem>>, vector<256x64xbf16>
    tpu.vector_store %arg9[%c0_36, %c64_37], %71 {strides = array<i32>} : memref<256x576xbf16, #tpu.memory_space<vmem>>, vector<256x64xbf16>,
    %c15_i32_38 = arith.constant 15 : i32
    %73 = tpu.dynamic_rotate %60 by %c15_i32_38 dim 0 : vector<256x64xf32>, i32 -> vector<256x64xf32>
    %c0_39 = arith.constant 0 : index
    %c2_40 = arith.constant 2 : index
    %74 = vector.load %arg2[%c0_39, %c2_40] : memref<256x9xf32, #tpu.memory_space<vmem>>, vector<256x1xf32>
    %75 = vector.broadcast %74 : vector<256x1xf32> to vector<256x64xf32>
    %76 = arith.mulf %73, %75 : vector<256x64xf32>
    %77 = arith.truncf %76 : vector<256x64xf32> to vector<256x64xbf16>
    %c0_41 = arith.constant 0 : index
    %c128_42 = arith.constant 128 : index
    %78 = vector.load %arg9[%c0_41, %c128_42] : memref<256x576xbf16, #tpu.memory_space<vmem>>, vector<256x64xbf16>
    tpu.vector_store %arg9[%c0_41, %c128_42], %77 {strides = array<i32>} : memref<256x576xbf16, #tpu.memory_space<vmem>>, vector<256x64xbf16>,
    %c1_i32_43 = arith.constant 1 : i32
    %79 = tpu.dynamic_rotate %60 by %c1_i32_43 dim 0 : vector<256x64xf32>, i32 -> vector<256x64xf32>
    %c0_44 = arith.constant 0 : index
    %c3_45 = arith.constant 3 : index
    %80 = vector.load %arg2[%c0_44, %c3_45] : memref<256x9xf32, #tpu.memory_space<vmem>>, vector<256x1xf32>
    %81 = vector.broadcast %80 : vector<256x1xf32> to vector<256x64xf32>
    %82 = arith.mulf %79, %81 : vector<256x64xf32>
    %83 = arith.truncf %82 : vector<256x64xf32> to vector<256x64xbf16>
    %c0_46 = arith.constant 0 : index
    %c192_47 = arith.constant 192 : index
    %84 = vector.load %arg9[%c0_46, %c192_47] : memref<256x576xbf16, #tpu.memory_space<vmem>>, vector<256x64xbf16>
    tpu.vector_store %arg9[%c0_46, %c192_47], %83 {strides = array<i32>} : memref<256x576xbf16, #tpu.memory_space<vmem>>, vector<256x64xbf16>,
    %85 = arith.truncf %60 : vector<256x64xf32> to vector<256x64xbf16>
    %c0_48 = arith.constant 0 : index
    %c256_49 = arith.constant 256 : index
    %86 = vector.load %arg9[%c0_48, %c256_49] : memref<256x576xbf16, #tpu.memory_space<vmem>>, vector<256x64xbf16>
    tpu.vector_store %arg9[%c0_48, %c256_49], %85 {strides = array<i32>} : memref<256x576xbf16, #tpu.memory_space<vmem>>, vector<256x64xbf16>,
    %c255_i32_50 = arith.constant 255 : i32
    %87 = tpu.dynamic_rotate %60 by %c255_i32_50 dim 0 : vector<256x64xf32>, i32 -> vector<256x64xf32>
    %c0_51 = arith.constant 0 : index
    %c5_52 = arith.constant 5 : index
    %88 = vector.load %arg2[%c0_51, %c5_52] : memref<256x9xf32, #tpu.memory_space<vmem>>, vector<256x1xf32>
    %89 = vector.broadcast %88 : vector<256x1xf32> to vector<256x64xf32>
    %90 = arith.mulf %87, %89 : vector<256x64xf32>
    %91 = arith.truncf %90 : vector<256x64xf32> to vector<256x64xbf16>
    %c0_53 = arith.constant 0 : index
    %c320_54 = arith.constant 320 : index
    %92 = vector.load %arg9[%c0_53, %c320_54] : memref<256x576xbf16, #tpu.memory_space<vmem>>, vector<256x64xbf16>
    tpu.vector_store %arg9[%c0_53, %c320_54], %91 {strides = array<i32>} : memref<256x576xbf16, #tpu.memory_space<vmem>>, vector<256x64xbf16>,
    %c241_i32_55 = arith.constant 241 : i32
    %93 = tpu.dynamic_rotate %60 by %c241_i32_55 dim 0 : vector<256x64xf32>, i32 -> vector<256x64xf32>
    %c0_56 = arith.constant 0 : index
    %c6_57 = arith.constant 6 : index
    %94 = vector.load %arg2[%c0_56, %c6_57] : memref<256x9xf32, #tpu.memory_space<vmem>>, vector<256x1xf32>
    %95 = vector.broadcast %94 : vector<256x1xf32> to vector<256x64xf32>
    %96 = arith.mulf %93, %95 : vector<256x64xf32>
    %97 = arith.truncf %96 : vector<256x64xf32> to vector<256x64xbf16>
    %c0_58 = arith.constant 0 : index
    %c384_59 = arith.constant 384 : index
    %98 = vector.load %arg9[%c0_58, %c384_59] : memref<256x576xbf16, #tpu.memory_space<vmem>>, vector<256x64xbf16>
    tpu.vector_store %arg9[%c0_58, %c384_59], %97 {strides = array<i32>} : memref<256x576xbf16, #tpu.memory_space<vmem>>, vector<256x64xbf16>,
    %c240_i32_60 = arith.constant 240 : i32
    %99 = tpu.dynamic_rotate %60 by %c240_i32_60 dim 0 : vector<256x64xf32>, i32 -> vector<256x64xf32>
    %c0_61 = arith.constant 0 : index
    %c7_62 = arith.constant 7 : index
    %100 = vector.load %arg2[%c0_61, %c7_62] : memref<256x9xf32, #tpu.memory_space<vmem>>, vector<256x1xf32>
    %101 = vector.broadcast %100 : vector<256x1xf32> to vector<256x64xf32>
    %102 = arith.mulf %99, %101 : vector<256x64xf32>
    %103 = arith.truncf %102 : vector<256x64xf32> to vector<256x64xbf16>
    %c0_63 = arith.constant 0 : index
    %c448_64 = arith.constant 448 : index
    %104 = vector.load %arg9[%c0_63, %c448_64] : memref<256x576xbf16, #tpu.memory_space<vmem>>, vector<256x64xbf16>
    tpu.vector_store %arg9[%c0_63, %c448_64], %103 {strides = array<i32>} : memref<256x576xbf16, #tpu.memory_space<vmem>>, vector<256x64xbf16>,
    %c239_i32_65 = arith.constant 239 : i32
    %105 = tpu.dynamic_rotate %60 by %c239_i32_65 dim 0 : vector<256x64xf32>, i32 -> vector<256x64xf32>
    %c0_66 = arith.constant 0 : index
    %c8_67 = arith.constant 8 : index
    %106 = vector.load %arg2[%c0_66, %c8_67] : memref<256x9xf32, #tpu.memory_space<vmem>>, vector<256x1xf32>
    %107 = vector.broadcast %106 : vector<256x1xf32> to vector<256x64xf32>
    %108 = arith.mulf %105, %107 : vector<256x64xf32>
    %109 = arith.truncf %108 : vector<256x64xf32> to vector<256x64xbf16>
    %c0_68 = arith.constant 0 : index
    %c512_69 = arith.constant 512 : index
    %110 = vector.load %arg9[%c0_68, %c512_69] : memref<256x576xbf16, #tpu.memory_space<vmem>>, vector<256x64xbf16>
    tpu.vector_store %arg9[%c0_68, %c512_69], %109 {strides = array<i32>} : memref<256x576xbf16, #tpu.memory_space<vmem>>, vector<256x64xbf16>,
    %c0_70 = arith.constant 0 : index
    %c0_71 = arith.constant 0 : index
    %111 = vector.load %arg9[%c0_70, %c0_71] : memref<256x576xbf16, #tpu.memory_space<vmem>>, vector<256x576xbf16>
    %c0_72 = arith.constant 0 : index
    %c0_73 = arith.constant 0 : index
    %112 = vector.load %arg5[%c0_72, %c0_73] : memref<576x64xbf16, #tpu.memory_space<vmem>>, vector<576x64xbf16>
    %cst_74 = arith.constant dense<0.000000e+00> : vector<256x64xf32>
    %113 = tpu.matmul %111, %112, %cst_74 {dimension_numbers = #tpu.dot_dimension_numbers<[1], [0], [0], [1], [0, 0, 1, 1], [], []>} : vector<256x576xbf16>, vector<576x64xbf16>, vector<256x64xf32> -> vector<256x64xf32>
    %c0_75 = arith.constant 0 : index
    %c0_76 = arith.constant 0 : index
    %114 = vector.load %arg6[%c0_75, %c0_76] : memref<1x64xf32, #tpu.memory_space<vmem>>, vector<1x64xf32>
    %115 = vector.broadcast %114 : vector<1x64xf32> to vector<256x64xf32>
    %116 = arith.addf %113, %115 : vector<256x64xf32>
    %cst_77 = arith.constant dense<0.000000e+00> : vector<64xf32>
    %117 = vector.multi_reduction <add>, %116, %cst_77 [0] : vector<256x64xf32> to vector<64xf32>
    %118 = vector.shape_cast %117 : vector<64xf32> to vector<1x64xf32>
    %cst_78 = arith.constant 2.560000e+02 : f32
    %119 = vector.broadcast %cst_78 : f32 to vector<1x64xf32>
    %120 = arith.divf %118, %119 : vector<1x64xf32>
    %cst_79 = arith.constant 0.000000e+00 : f32
    %121 = vector.broadcast %cst_79 : f32 to vector<1x1xf32>
    %122 = tpu.concatenate %121, %120, %121 in 1 : vector<1x1xf32>, vector<1x64xf32>, vector<1x1xf32> -> vector<1x66xf32>
    %cst_80 = arith.constant 0.000000e+00 : f32
    %123 = vector.broadcast %cst_80 : f32 to vector<1x64xf32>
    %c0_81 = arith.constant 0 : index
    %c0_82 = arith.constant 0 : index
    %c0_83 = arith.constant 0 : index
    %124 = vector.load %arg7[%c0_81, %c0_82, %c0_83] : memref<3x1x64xf32, #tpu.memory_space<vmem>>, vector<1x1x64xf32>
    %125 = vector.shape_cast %124 : vector<1x1x64xf32> to vector<1x64xf32>
    %126 = vector.extract_strided_slice %122 {offsets = [0, 0], sizes = [1, 64], strides = [1, 1]} : vector<1x66xf32> to vector<1x64xf32>
    %127 = arith.mulf %125, %126 : vector<1x64xf32>
    %128 = arith.addf %123, %127 : vector<1x64xf32>
    %c1_84 = arith.constant 1 : index
    %c0_85 = arith.constant 0 : index
    %c0_86 = arith.constant 0 : index
    %129 = vector.load %arg7[%c1_84, %c0_85, %c0_86] : memref<3x1x64xf32, #tpu.memory_space<vmem>>, vector<1x1x64xf32>
    %130 = vector.shape_cast %129 : vector<1x1x64xf32> to vector<1x64xf32>
    %131 = vector.extract_strided_slice %122 {offsets = [0, 1], sizes = [1, 64], strides = [1, 1]} : vector<1x66xf32> to vector<1x64xf32>
    %132 = arith.mulf %130, %131 : vector<1x64xf32>
    %133 = arith.addf %128, %132 : vector<1x64xf32>
    %c2_87 = arith.constant 2 : index
    %c0_88 = arith.constant 0 : index
    %c0_89 = arith.constant 0 : index
    %134 = vector.load %arg7[%c2_87, %c0_88, %c0_89] : memref<3x1x64xf32, #tpu.memory_space<vmem>>, vector<1x1x64xf32>
    %135 = vector.shape_cast %134 : vector<1x1x64xf32> to vector<1x64xf32>
    %136 = vector.extract_strided_slice %122 {offsets = [0, 2], sizes = [1, 64], strides = [1, 1]} : vector<1x66xf32> to vector<1x64xf32>
    %137 = arith.mulf %135, %136 : vector<1x64xf32>
    %138 = arith.addf %133, %137 : vector<1x64xf32>
    %139 = arith.negf %138 : vector<1x64xf32>
    %140 = math.exp %139 : vector<1x64xf32>
    %cst_90 = arith.constant 1.000000e+00 : f32
    %141 = vector.broadcast %cst_90 : f32 to vector<1x64xf32>
    %142 = arith.addf %141, %140 : vector<1x64xf32>
    %143 = arith.divf %141, %142 : vector<1x64xf32>
    %144 = vector.broadcast %143 : vector<1x64xf32> to vector<256x64xf32>
    %145 = arith.mulf %116, %144 : vector<256x64xf32>
    %146 = arith.addf %145, %0 : vector<256x64xf32>
    %c0_91 = arith.constant 0 : index
    %c0_92 = arith.constant 0 : index
    %147 = vector.load %arg8[%c0_91, %c0_92] : memref<256x64xf32, #tpu.memory_space<vmem>>, vector<256x64xf32>
    tpu.vector_store %arg8[%c0_91, %c0_92], %146 {strides = array<i32>} : memref<256x64xf32, #tpu.memory_space<vmem>>, vector<256x64xf32>,
    return
  }
  func.func @transform_0(%arg0: i32) -> (i32, i32) {
    %c0_i32 = arith.constant 0 : i32
    %c0_i32_0 = arith.constant 0 : i32
    return %arg0, %c0_i32 : i32, i32
  }
  func.func @transform_1(%arg0: i32) -> (i32, i32) {
    %c0_i32 = arith.constant 0 : i32
    %c0_i32_0 = arith.constant 0 : i32
    %c0_i32_1 = arith.constant 0 : i32
    return %c0_i32, %c0_i32_0 : i32, i32
  }
  func.func @transform_2(%arg0: i32) -> (i32, i32) {
    %c0_i32 = arith.constant 0 : i32
    %c0_i32_0 = arith.constant 0 : i32
    %c0_i32_1 = arith.constant 0 : i32
    return %c0_i32, %c0_i32_0 : i32, i32
  }
  func.func @transform_3(%arg0: i32) -> (i32, i32) {
    %c0_i32 = arith.constant 0 : i32
    %c0_i32_0 = arith.constant 0 : i32
    %c0_i32_1 = arith.constant 0 : i32
    return %c0_i32, %c0_i32_0 : i32, i32
  }
  func.func @transform_4(%arg0: i32) -> (i32, i32) {
    %c0_i32 = arith.constant 0 : i32
    %c0_i32_0 = arith.constant 0 : i32
    %c0_i32_1 = arith.constant 0 : i32
    return %c0_i32, %c0_i32_0 : i32, i32
  }
  func.func @transform_5(%arg0: i32) -> (i32, i32) {
    %c0_i32 = arith.constant 0 : i32
    %c0_i32_0 = arith.constant 0 : i32
    %c0_i32_1 = arith.constant 0 : i32
    return %c0_i32, %c0_i32_0 : i32, i32
  }
  func.func @transform_6(%arg0: i32) -> (i32, i32, i32) {
    %c0_i32 = arith.constant 0 : i32
    %c0_i32_0 = arith.constant 0 : i32
    %c0_i32_1 = arith.constant 0 : i32
    %c0_i32_2 = arith.constant 0 : i32
    return %c0_i32, %c0_i32_0, %c0_i32_1 : i32, i32, i32
  }
  func.func @transform_7(%arg0: i32) -> (i32, i32) {
    %c0_i32 = arith.constant 0 : i32
    %c0_i32_0 = arith.constant 0 : i32
    return %arg0, %c0_i32 : i32, i32
  }
}

</mosaic_0001>

<bundles_post_ra>
// kernel: ca_res_block_forward.1
= control target key start
LH: loop header
LB: loop body
LE: loop exit
PB: predicated region body
PF: predicated region fallthrough
CT: control target
= control target key end

     0   :  { %12 = vsyncpa [#allocation4], 0  ;;  %s16623_s0 = inlined_call_operand.vmem [shape: f32[512,64], index: 0, kind: input, shape index: {}]   ;;  %s16624_s1 = inlined_call_operand.vmem [shape: f32[256,9], index: 1, kind: input, shape index: {}]   ;;  %s16625_s2 = inlined_call_operand.vmem [shape: bf16[576,64], index: 2, kind: input, shape index: {}]   ;;  %s16626_s3 = inlined_call_operand.vmem [shape: f32[1,64], index: 3, kind: input, shape index: {}]   ;;  %s16627_s4 = inlined_call_operand.vmem [shape: bf16[576,64], index: 4, kind: input, shape index: {}]   ;;  %s16628_s5 = inlined_call_operand.vmem [shape: f32[1,64], index: 5, kind: input, shape index: {}]   ;;  %s16629_s6 = inlined_call_operand.vmem [shape: f32[3,1,64], index: 6, kind: input, shape index: {}]   ;;  %s16630_s7 = inlined_call_operand.hbm [shape: f32[512,64], index: 7, kind: output, shape index: {}]  }
   0x1   :  { %14 = vsyncpa [#allocation4 + $0x1], 0  ;;  %s10802_s24 = smov 0   ;;  %s10804_s25 = smov 0  }
   0x2   :  { %s10806_s26 = smov 0   ;;  %s10808_s27 = smov 0  }
   0x3 LB: > { %s10823_s28 = sadd.s32 4294967295, %s10745_s27   ;;  %s9261_s29 = sadd.s32 4294967294, %s10745_s27   ;;  %s10745_s27 = sphi %s10808_s27, %s17712_s27   ;;  %s10741_s26 = sphi %s10806_s26, %s17711_s26   ;;  %s10737_s25 = sphi %s10804_s25, %s17710_s25   ;;  %s10733_s24 = sphi %s10802_s24, %s17709_s24  }
   0x4   : > { %s10827_s30 = sadd.s32 1, %s10745_s27   ;;  %s179_s8 = sadd.s32 1, %s10741_s26 }
   0x5   : > { %s176_s9 = ssub.s32 %s10745_s27, %s10827_s30  ;;  %p189_p0 = scmp.ne.s32.totalorder %s10741_s26, %s10737_s25 }
   0x6   : > { %p177_p1 = scmp.eq.s32.totalorder %s176_s9, 0  ;;  %p190_p2 = scmp.eq.s32.totalorder %s10823_s28, 1 }
   0x7   : > { %p195_p3 = scmp.ne.s32.totalorder %s10737_s25, %s10733_s24  ;;  %p196_p4 = scmp.eq.s32.totalorder %s9261_s29, 1 }
   0x8   : > { %s10838_s10 = scalar_select %p177_p1, %s10741_s26, %s179_s8  }
   0x9   : > { %p10840_p5 = por %p190_p2, %p189_p0  ;;  %p10844_p6 = por %p196_p4, %p195_p3 }
   0xa   : > { %p9264_p7 = scmp.ge.s32.totalorder %s10745_s27, 1  ;;  %p241_p8 = scmp.lt.s32.totalorder %s10745_s27, 3 }
   0xc   : > { %p242_p9 = pnand %p9264_p7, %p241_p8 }
   0xe   : > { %245 = sbr.rel (%p242_p9) target bundleno = 3686 (0xe66), region = 48 }
  0x13   : > { %v10853_v0 = vld [vmem:[%s16624_s1 + $0x20] sm:$0xff]  ;;  %v10858_v1 = vld [vmem:[%s16624_s1 + $0x10] sm:$0xff]  ;;  %v16633_v2 = vmov 0   ;;  %v16631_v3 = vmov 1   ;;  %v10868_v4 = vld [vmem:[%s16624_s1 + $0x8] sm:$0xff]  ;;  %s9266_s19 = sshll.u32 %s10823_s28, 5  ;;  %v377_v35 = vlaneseq }
  0x14   : > { %10540 = vset.pattern.permute.xlu2 %v16633_v2  ;;  %10539 = vset.pattern.permute.xlu1 %v16633_v2  ;;  %v10874_v5 = vld [vmem:[%s16624_s1 + $0x28] sm:$0xff]  ;;  %v10879_v6 = vld [vmem:[%s16624_s1 + $0x18] sm:$0xff]  ;;  %v10886_v7 = vld [vmem:[%s16624_s1 + $0x30] sm:$0xff]  ;;  %p274_p10 = scmp.lt.s32.totalorder %s9266_s19, 63  ;;  %vm668_vm1 = vcmask 519168   ;;  %s10749_s9 = smov 64  }
  0x15   : > { %466 = vperm.xlu2 %10540, %v10853_v0   ;;  %456 = vperm.xlu1 %10539, %v10858_v1   ;;  %v10892_v8 = vld [vmem:[%s16624_s1 + $0x40] sm:$0xff]  ;;  %v10897_v9 = vld [vmem:[%s16624_s1 + $0x38] sm:$0xff]  ;;  %v10904_v10 = vld [vmem:[%s16624_s1 + $0x48] sm:$0xff]  ;;  %v11058_v39 = vshrl.u32 %v377_v35, 7  ;;  %vm1085_vm2 = vcmask 1043968   ;;  %vm4147_vm4 = vcmask 523264  }
  0x16   : > { %10542 = vset.pattern.permute.xlu0 %v16631_v3  ;;  %v10910_v11 = vld [vmem:[%s16624_s1 + $0x58] sm:$0xff]  ;;  %v10915_v12 = vld [vmem:[%s16624_s1 + $0x50] sm:$0xff]  ;;  %v10922_v13 = vld [vmem:[%s16624_s1 + $0x60] sm:$0xff]  ;;  %s17714_s19 = smov (!%p274_p10, %s9266_s19), 63  ;;  %s10757_s8 = smov 1   ;;  %vm9043_vm6 = vcmask 7168  }
  0x17   : > { %740 = vperm.xlu0 %10542, %v10868_v4   ;;  %v10928_v14 = vld [vmem:[%s16624_s1 + $0x70] sm:$0xff]  ;;  %v10933_v15 = vld [vmem:[%s16624_s1 + $0x68] sm:$0xff]  ;;  %v10940_v16 = vld [vmem:[%s16624_s1 + $0x78] sm:$0xff]  ;;  %s9267_s16 = sshll.u32 %s17714_s19, 3  ;;  %17048 = vst [vmem:[#allocation17_spill] sm:$0xff] %v11058_v39  ;;  %vm379_vm0 = vcmp.lt.s32.totalorder %v11058_v39, 1 }
  0x18   : > { %17037 = vst [vmem:[#allocation6_spill] sm:$0xff] %v10928_v14  ;;  %v10946_v17 = vld [vmem:[%s16624_s1 + $0x88] sm:$0xff]  ;;  %v10951_v18 = vld [vmem:[%s16624_s1 + $0x80] sm:$0xff]  ;;  %v10958_v19 = vld [vmem:[%s16624_s1 + $0x90] sm:$0xff]  ;;  %s11036_s22 = scalar_lea.vmem %s16623_s0, %s9267_s16  ;;  %vm9045_vm7 = vcmask 531456   ;;  %s10758_s13 = smov 126  }
  0x19   : > { %17038 = vst [vmem:[#allocation7_spill] sm:$0xff] %v10946_v17  ;;  %v10964_v20 = vld [vmem:[%s16624_s1 + $0xa0] sm:$0xff]  ;;  %v10969_v21 = vld [vmem:[%s16624_s1 + $0x98] sm:$0xff]  ;;  %v10976_v22 = vld [vmem:[%s16624_s1 + $0xa8] sm:$0xff]  ;;  %s10759_s14 = smov 127   ;;  %s270_s19 = sand.u32 1, %s10737_s25  }
  0x1a   : > { %17039 = vst [vmem:[#allocation8_spill] sm:$0xff] %v10964_v20  ;;  %v10982_v23 = vld [vmem:[%s16624_s1 + $0xb8] sm:$0xff]  ;;  %v10987_v24 = vld [vmem:[%s16624_s1 + $0xb0] sm:$0xff]  ;;  %v10994_v25 = vld [vmem:[%s16624_s1 + $0xc0] sm:$0xff]  ;;  %s9265_s23 = sshll.u32 %s270_s19, 8  ;;  %s10468_s29 = sshll.u32 %s10823_s28, 8 }
  0x1b   : > { %17040 = vst [vmem:[#allocation9_spill] sm:$0xff] %v10969_v21  ;;  %v11001_v26 = vld [vmem:[%s16624_s1 + $0xd0] sm:$0xff]  ;;  %v11006_v27 = vld [vmem:[%s16624_s1 + $0xc8] sm:$0xff]  ;;  %v11011_v28 = vld [vmem:[%s16624_s1 + $0xd8] sm:$0xff]  ;;  %s9184_s16 = scalar_lea.sflag [#allocation4], %s270_s19  ;;  %s10703_s21 = scalar_lea.hbm %s16630_s7, 512 }
  0x1c   : > { %17041 = vst [vmem:[#allocation10_spill] sm:$0xff] %v10982_v23  ;;  %v11019_v29 = vld [vmem:[%s16624_s1 + $0xe8] sm:$0xff]  ;;  %v11024_v30 = vld [vmem:[%s16624_s1 + $0xe0] sm:$0xff]  ;;  %v11029_v31 = vld [vmem:[%s16624_s1 + $0xf0] sm:$0xff] }
  0x1d   : > { %471 = vperm.xlu2 %10540, %v10874_v5   ;;  %461 = vperm.xlu1 %10539, %v10879_v6   ;;  %17042 = vst [vmem:[#allocation11_spill] sm:$0xff] %v10987_v24  ;;  %v11042_v32 = vld [vmem:[%s16624_s1 + $0xf8] sm:$0xff]  ;;  %v282_v33 = vld [vmem:[%s11036_s22 + $0x8] sm:$0xff]  ;;  %v283_v34 = vld [vmem:[%s11036_s22 + $0x10] sm:$0xff] }
  0x1e   : > { %17043 = vst [vmem:[#allocation12_spill] sm:$0xff] %v11006_v27  ;;  %v11049_v36 = vld [vmem:[%s16624_s1] sm:$0xff]  ;;  %v11053_v37 = vmax.f32 %v282_v33, 0.0  ;;  %v11055_v38 = vmax.f32 %v283_v34, 0.0  ;;  %v284_v42 = vld [vmem:[%s11036_s22 + $0x18] sm:$0xff]  ;;  %v286_v49 = vld [vmem:[%s11036_s22 + $0x28] sm:$0xff] }
  0x1f   : > { %765 = vperm.xlu0 %10542, %v10886_v7   ;;  %17044 = vst [vmem:[#allocation13_spill] sm:$0xff] %v11011_v28  ;;  %v11071_v44 = vmax.f32 %v284_v42, 0.0  ;;  %v287_v50 = vld [vmem:[%s11036_s22 + $0x30] sm:$0xff]  ;;  %v11086_v52 = vmax.f32 %v286_v49, 0.0  ;;  %v289_v58 = vld [vmem:[%s11036_s22 + $0x40] sm:$0xff]  ;;  %v290_v60 = vld [vmem:[%s11036_s22 + $0x48] sm:$0xff] }
  0x20   : > { %17045 = vst [vmem:[#allocation14_spill] sm:$0xff] %v11029_v31  ;;  %v346_v40 = vrot.slane %v11053_v37, 7  ;;  %v347_v41 = vrot.slane %v11055_v38, 7  ;;  %v11088_v53 = vmax.f32 %v287_v50, 0.0  ;;  %v281_v61 = vld [vmem:[%s11036_s22] sm:$0xff]  ;;  %v312_v62 = vld [vmem:[%s11036_s22 + $0xf8] sm:$0xff] }
  0x21   : > { %17046 = vst [vmem:[#allocation15_spill] sm:$0xff] %v11053_v37  ;;  %v16637_v47 = vrot.slane %v11071_v44, 7  ;;  %v16640_v56 = vrot.slane %v11086_v52, 7  ;;  %v11099_v63 = vmax.f32 %v289_v58, 0.0  ;;  %v11110_v34 = vmax.f32 %v290_v60, 0.0 }
  0x22   : > { %17047 = vst [vmem:[#allocation16_spill] sm:$0xff] %v11055_v38  ;;  %v11069_v43 = vsel %vm379_vm0, %v346_v40, %v347_v41  ;;  %v16636_v57 = vrot.slane %v11088_v53, 7  ;;  %v11112_v35 = vmax.f32 %v281_v61, 0.0 }
  0x23   : > { %17049 = vst [vmem:[#allocation18_spill] sm:$0xff] %v11069_v43  ;;  %v11084_v51 = vsel %vm379_vm0, %v347_v41, %v16637_v47  ;;  %v11114_v41 = vmax.f32 %v312_v62, 0.0  ;;  %v295_v47 = vld [vmem:[%s11036_s22 + $0x70] sm:$0xff] }
  0x24   : > { %17050 = vst [vmem:[#allocation19_spill] sm:$0xff] %v11071_v44  ;;  %v11108_v33 = vsel %vm379_vm0, %v16640_v56, %v16636_v57  ;;  %v345_v49 = vrot.slane %v11112_v35, 7 }
  0x25   : > { %486 = vperm.xlu2 %10540, %v10892_v8   ;;  %481 = vperm.xlu1 %10539, %v10897_v9   ;;  %17051 = vst [vmem:[#allocation20_spill] sm:$0xff] %v11084_v51  ;;  %v16638_v50 = vrot.slane %v11114_v41, 7 }
  0x26   : > { %17052 = vst [vmem:[#allocation21_spill] sm:$0xff] %v11086_v52 }
  0x27   : > { %780 = vperm.xlu0 %10542, %v10904_v10   ;;  %17053 = vst [vmem:[#allocation22_spill] sm:$0xff] %v11099_v63  ;;  %v11142_v62 = vsel %vm379_vm0, %v16638_v50, %v345_v49  ;;  %v296_v50 = vld [vmem:[%s11036_s22 + $0x78] sm:$0xff] }
  0x28   : > { %17054 = vst [vmem:[#allocation23_spill] sm:$0xff] %v11108_v33 }
  0x29   : > { %17055 = vst [vmem:[#allocation24_spill] sm:$0xff] %v11112_v35 }
  0x2a   : > { %17056 = vst [vmem:[#allocation25_spill] sm:$0xff] %v11114_v41 }
  0x2b   : > { %17059 = vst [vmem:[#allocation28_spill] sm:$0xff] %v11142_v62 }
  0x2d   : > { %501 = vperm.xlu2 %10540, %v10910_v11   ;;  %496 = vperm.xlu1 %10539, %v10915_v12  }
  0x2f   : > { %795 = vperm.xlu0 %10542, %v10922_v13  }
  0x35   : > { %516 = vperm.xlu2 %10540, %v10928_v14   ;;  %511 = vperm.xlu1 %10539, %v10933_v15  }
  0x37   : > { %810 = vperm.xlu0 %10542, %v10940_v16  }
  0x3d   : > { %531 = vperm.xlu2 %10540, %v10946_v17   ;;  %526 = vperm.xlu1 %10539, %v10951_v18  }
  0x3f   : > { %825 = vperm.xlu0 %10542, %v10958_v19  }
  0x45   : > { %546 = vperm.xlu2 %10540, %v10964_v20   ;;  %541 = vperm.xlu1 %10539, %v10969_v21  }
  0x47   : > { %840 = vperm.xlu0 %10542, %v10976_v22  }
  0x4d   : > { %561 = vperm.xlu2 %10540, %v10982_v23   ;;  %556 = vperm.xlu1 %10539, %v10987_v24  }
  0x4f   : > { %855 = vperm.xlu0 %10542, %v10994_v25  }
  0x55   : > { %576 = vperm.xlu2 %10540, %v11001_v26   ;;  %571 = vperm.xlu1 %10539, %v11006_v27  }
  0x57   : > { %870 = vperm.xlu0 %10542, %v11011_v28  }
  0x5d   : > { %591 = vperm.xlu2 %10540, %v11019_v29   ;;  %586 = vperm.xlu1 %10539, %v11024_v30  }
  0x5f   : > { %885 = vperm.xlu0 %10542, %v11029_v31  }
  0x65   : > { %10541 = vset.pattern.permute.xlu2 %v16631_v3  ;;  %601 = vperm.xlu1 %10539, %v11042_v32  }
  0x66   : > { %735 = vperm.xlu2 %10541, %v11049_v36  }
  0x6d   : > { %10543 = vset.pattern.permute.xlu1 %v16631_v3 }
  0x6e   : > { %750 = vperm.xlu2 %10541, %v10879_v6   ;;  %745 = vperm.xlu1 %10543, %v10858_v1  }
  0x6f   : > { %v467_v45 = vpop.permute.xlu2 %466 }
  0x70   : > { %v608_v46 = vmul.f32 %v467_v45, %v11069_v43 }
  0x72   : > { %v640_v48 = vpack.c.bf16 %v608_v46, %v608_v46  ;;  %v16639_v46 = vrot.slane %v11099_v63, 7 }
  0x74   : > { %673 = vst.msk [vmem:[#allocation2 + $0x50] sm:$0xf] %vm668_vm1, %v640_v48  ;;  %v16635_v48 = vrot.slane %v11110_v34, 7 }
  0x76   : > { %760 = vperm.xlu2 %10541, %v10874_v5   ;;  %755 = vperm.xlu1 %10543, %v10853_v0   ;;  %v11136_v61 = vsel %vm379_vm0, %v16639_v46, %v16635_v48  ;;  %v285_v46 = vld [vmem:[%s11036_s22 + $0x20] sm:$0xff] }
  0x77   : > { %v472_v54 = vpop.permute.xlu2 %471  ;;  %17058 = vst [vmem:[#allocation27_spill] sm:$0xff] %v11136_v61 }
  0x78   : > { %v609_v55 = vmul.f32 %v472_v54, %v11084_v51  ;;  %v292_v54 = vld [vmem:[%s11036_s22 + $0x58] sm:$0xff] }
  0x79   : > { %v288_v51 = vld [vmem:[%s11036_s22 + $0x38] sm:$0xff] }
  0x7a   : > { %v641_v59 = vpack.c.bf16 %v609_v55, %v609_v55  ;;  %v293_v55 = vld [vmem:[%s11036_s22 + $0x60] sm:$0xff] }
  0x7b   : > { %v11127_v60 = vmax.f32 %v293_v55, 0.0 }
  0x7c   : > { %674 = vst.msk [vmem:[#allocation2 + $0x64] sm:$0xf] %vm668_vm1, %v641_v59  ;;  %v11125_v59 = vmax.f32 %v292_v54, 0.0 }
  0x7d   : > { %v16643_v3 = vrot.slane %v11127_v60, 7 }
  0x7e   : > { %775 = vperm.xlu2 %10541, %v10892_v8   ;;  %770 = vperm.xlu1 %10543, %v10897_v9   ;;  %17057 = vst [vmem:[#allocation26_spill] sm:$0xff] %v11125_v59 }
  0x7f   : > { %v487_v42 = vpop.permute.xlu2 %486 }
  0x80   : > { %v612_v45 = vmul.f32 %v487_v42, %v11108_v33 }
  0x82   : > { %v644_v58 = vpack.c.bf16 %v612_v45, %v612_v45 }
  0x84   : > { %677 = vst.msk [vmem:[#allocation2 + $0xa0] sm:$0xf] %vm668_vm1, %v644_v58  ;;  %v16644_v58 = vrot.slane %v11125_v59, 7 }
  0x86   : > { %790 = vperm.xlu2 %10541, %v10910_v11   ;;  %785 = vperm.xlu1 %10543, %v10915_v12  }
  0x87   : > { %v502_v42 = vpop.permute.xlu2 %501  ;;  %v457_v45 = vpop.permute.xlu1 %456 }
  0x88   : > { %v615_v54 = vmul.f32 %v502_v42, %v11136_v61  ;;  %v606_v55 = vmul.f32 %v457_v45, %v11142_v62  ;;  %v11160_v42 = vsel %vm379_vm0, %v16644_v58, %v16643_v3  ;;  %v11173_v61 = vmax.f32 %v285_v46, 0.0  ;;  %v299_v3 = vld [vmem:[%s11036_s22 + $0x90] sm:$0xff] }
  0x89   : > { %v741_v2 = vpop.permute.xlu0 %740  ;;  %17060 = vst [vmem:[#allocation29_spill] sm:$0xff] %v11160_v42  ;;  %v11189_v43 = vmax.f32 %v299_v3, 0.0 }
  0x8a   : > { %v647_v48 = vpack.c.bf16 %v615_v54, %v615_v54  ;;  %v638_v57 = vpack.c.bf16 %v606_v55, %v606_v55  ;;  %v894_v56 = vmul.f32 %v741_v2, %v11114_v41  ;;  %v11167_v54 = vsel %vm379_vm0, %v345_v49, %v346_v40  ;;  %17064 = vst [vmem:[#allocation33_spill] sm:$0xff] %v11173_v61  ;;  %v305_v41 = vld [vmem:[%s11036_s22 + $0xc0] sm:$0xff] }
  0x8b   : > { %17061 = vst [vmem:[#allocation30_spill] sm:$0xff] %v11167_v54  ;;  %v11169_v55 = vmax.f32 %v295_v47, 0.0  ;;  %v11171_v2 = vmax.f32 %v296_v50, 0.0  ;;  %v298_v50 = vld [vmem:[%s11036_s22 + $0x88] sm:$0xff]  ;;  %v11257_v28 = vmax.f32 %v305_v41, 0.0 }
  0x8c   : > { %v926_v45 = vpack.c.bf16 %v894_v56, %v894_v56  ;;  %671 = vst.msk [vmem:[#allocation2 + $0x28] sm:$0xf] %vm668_vm1, %v638_v57  ;;  %v11187_v62 = vmax.f32 %v298_v50, 0.0 }
  0x8d   : > { %17062 = vst [vmem:[#allocation31_spill] sm:$0xff] %v11169_v55  ;;  %v16655_v49 = vrot.slane %v11169_v55, 7  ;;  %v16653_v46 = vrot.slane %v11171_v2, 7 }
  0x8e   : > { %17063 = vst [vmem:[#allocation32_spill] sm:$0xff] %v11171_v2  ;;  %805 = vperm.xlu2 %10541, %v10928_v14   ;;  %800 = vperm.xlu1 %10543, %v10933_v15  }
  0x8f   : > { %680 = vst.msk [vmem:[#allocation2 + $0xdc] sm:$0xf] %vm668_vm1, %v647_v48  ;;  %v517_v56 = vpop.permute.xlu2 %516  ;;  %v462_v57 = vpop.permute.xlu1 %461  ;;  %991 = vrot.lane.b32.xlu0 %v926_v45, %s10749_s9  ;;  %v16654_v48 = vrot.slane %v11173_v61, 7  ;;  %v11198_v45 = vsel %vm379_vm0, %v16655_v49, %v16653_v46  ;;  %v16665_v46 = vrot.slane %v11187_v62, 7 }
  0x90   : > { %v618_v40 = vmul.f32 %v517_v56, %v11160_v42  ;;  %v607_v47 = vmul.f32 %v462_v57, %v11167_v54  ;;  %17065 = vst [vmem:[#allocation34_spill] sm:$0xff] %v11187_v62  ;;  %v17068_v56 = vrot.slane %v11086_v52, 7  ;;  %v301_v42 = vld [vmem:[%s11036_s22 + $0xa0] sm:$0xff]  ;;  %v291_v54 = vld [vmem:[%s11036_s22 + $0x50] sm:$0xff] }
  0x91   : > { %17066 = vst [vmem:[#allocation35_spill] sm:$0xff] %v11189_v43 }
  0x92   : > { %v650_v58 = vpack.c.bf16 %v618_v40, %v618_v40  ;;  %v639_v33 = vpack.c.bf16 %v607_v47, %v607_v47  ;;  %17067 = vst [vmem:[#allocation36_spill] sm:$0xff] %v11198_v45  ;;  %v11206_v3 = vsel %vm379_vm0, %v16654_v48, %v17068_v56  ;;  %v16664_v56 = vrot.slane %v11189_v43, 7 }
  0x93   : > { %17069 = vst [vmem:[#allocation37_spill] sm:$0xff] %v11206_v3 }
  0x94   : > { %672 = vst.msk [vmem:[#allocation2 + $0x3c] sm:$0xf] %vm668_vm1, %v639_v33  ;;  %v11208_v33 = vmax.f32 %v288_v51, 0.0 }
  0x95   : > { %683 = vst.msk [vmem:[#allocation2 + $0x118] sm:$0xf] %vm668_vm1, %v650_v58  ;;  %v302_v58 = vld [vmem:[%s11036_s22 + $0xa8] sm:$0xff] }
  0x96   : > { %17070 = vst [vmem:[#allocation38_spill] sm:$0xff] %v11208_v33  ;;  %820 = vperm.xlu2 %10541, %v10946_v17   ;;  %815 = vperm.xlu1 %10543, %v10951_v18   ;;  %v16666_v48 = vrot.slane %v11208_v33, 7  ;;  %v294_v17 = vld [vmem:[%s11036_s22 + $0x68] sm:$0xff] }
  0x97   : > { %v532_v57 = vpop.permute.xlu2 %531  ;;  %v482_v40 = vpop.permute.xlu1 %481  ;;  %17077 = vst [vmem:[#allocation44_spill] sm:$0xff] %v11257_v28 }
  0x98   : > { %v621_v47 = vmul.f32 %v532_v57, %v11198_v45  ;;  %v611_v50 = vmul.f32 %v482_v40, %v11206_v3  ;;  %v11227_v57 = vsel %vm379_vm0, %v16665_v46, %v16664_v56  ;;  %v17072_v40 = vrot.slane %v11099_v63, 7 }
  0x99   : > { %17071 = vst [vmem:[#allocation39_spill] sm:$0xff] %v11227_v57  ;;  %v11240_v45 = vmax.f32 %v302_v58, 0.0  ;;  %v11242_v3 = vmax.f32 %v291_v54, 0.0  ;;  %v304_v54 = vld [vmem:[%s11036_s22 + $0xb8] sm:$0xff] }
  0x9a   : > { %v653_v51 = vpack.c.bf16 %v621_v47, %v621_v47  ;;  %v643_v49 = vpack.c.bf16 %v611_v50, %v611_v50  ;;  %v11236_v47 = vsel %vm379_vm0, %v16666_v48, %v17072_v40  ;;  %v11238_v50 = vmax.f32 %v301_v42, 0.0 }
  0x9b   : > { %17073 = vst [vmem:[#allocation40_spill] sm:$0xff] %v11236_v47  ;;  %v16673_v58 = vrot.slane %v11240_v45, 7  ;;  %v16675_v48 = vrot.slane %v11242_v3, 7 }
  0x9c   : > { %676 = vst.msk [vmem:[#allocation2 + $0x8c] sm:$0xf] %vm668_vm1, %v643_v49  ;;  %v16674_v42 = vrot.slane %v11238_v50, 7 }
  0x9d   : > { %17074 = vst [vmem:[#allocation41_spill] sm:$0xff] %v11238_v50 }
  0x9e   : > { %17075 = vst [vmem:[#allocation42_spill] sm:$0xff] %v11240_v45  ;;  %835 = vperm.xlu2 %10541, %v10964_v20   ;;  %830 = vperm.xlu1 %10543, %v10969_v21   ;;  %v11255_v20 = vmax.f32 %v304_v54, 0.0  ;;  %v297_v21 = vld [vmem:[%s11036_s22 + $0x80] sm:$0xff] }
  0x9f   : > { %686 = vst.msk [vmem:[#allocation2 + $0x154] sm:$0xf] %vm668_vm1, %v653_v51  ;;  %v547_v49 = vpop.permute.xlu2 %546  ;;  %v497_v56 = vpop.permute.xlu1 %496 }
  0xa0   : > { %v624_v46 = vmul.f32 %v547_v49, %v11227_v57  ;;  %v614_v40 = vmul.f32 %v497_v56, %v11236_v47  ;;  %17076 = vst [vmem:[#allocation43_spill] sm:$0xff] %v11255_v20  ;;  %v11266_v56 = vsel %vm379_vm0, %v16674_v42, %v16673_v58  ;;  %v17079_v49 = vrot.slane %v11125_v59, 7  ;;  %v307_v47 = vld [vmem:[%s11036_s22 + $0xd0] sm:$0xff] }
  0xa1   : > { %17078 = vst [vmem:[#allocation45_spill] sm:$0xff] %v11266_v56  ;;  %v368_v42 = vrot.slane %v11255_v20, 7 }
  0xa2   : > { %v656_v31 = vpack.c.bf16 %v624_v46, %v624_v46  ;;  %v646_v51 = vpack.c.bf16 %v614_v40, %v614_v40  ;;  %v11274_v41 = vsel %vm379_vm0, %v16675_v48, %v17079_v49  ;;  %v11276_v46 = vmax.f32 %v294_v17, 0.0 }
  0xa3   : > { %17080 = vst [vmem:[#allocation46_spill] sm:$0xff] %v11274_v41  ;;  %v16684_v49 = vrot.slane %v11257_v28, 7 }
  0xa4   : > { %679 = vst.msk [vmem:[#allocation2 + $0xc8] sm:$0xf] %vm668_vm1, %v646_v51  ;;  %v16687_v48 = vrot.slane %v11276_v46, 7 }
  0xa5   : > { %689 = vst.msk [vmem:[#allocation2 + $0x190] sm:$0xf] %vm668_vm1, %v656_v31  ;;  %v308_v31 = vld [vmem:[%s11036_s22 + $0xd8] sm:$0xff] }
  0xa6   : > { %850 = vperm.xlu2 %10541, %v10982_v23   ;;  %845 = vperm.xlu1 %10543, %v10987_v24   ;;  %v11293_v23 = vsel %vm379_vm0, %v368_v42, %v16684_v49 }
  0xa7   : > { %v562_v40 = vpop.permute.xlu2 %561  ;;  %v512_v54 = vpop.permute.xlu1 %511  ;;  %17081 = vst [vmem:[#allocation47_spill] sm:$0xff] %v11293_v23 }
  0xa8   : > { %v627_v51 = vmul.f32 %v562_v40, %v11266_v56  ;;  %v617_v58 = vmul.f32 %v512_v54, %v11274_v41  ;;  %v17082_v40 = vrot.slane %v11169_v55, 7  ;;  %v11308_v56 = vmax.f32 %v297_v21, 0.0 }
  0xaa   : > { %v659_v17 = vpack.c.bf16 %v627_v51, %v627_v51  ;;  %v649_v57 = vpack.c.bf16 %v617_v58, %v617_v58  ;;  %v11302_v54 = vsel %vm379_vm0, %v16687_v48, %v17082_v40  ;;  %v11304_v58 = vmax.f32 %v307_v47, 0.0 }
  0xab   : > { %17083 = vst [vmem:[#allocation48_spill] sm:$0xff] %v11302_v54  ;;  %v11306_v51 = vmax.f32 %v308_v31, 0.0  ;;  %v16696_v31 = vrot.slane %v11308_v56, 7 }
  0xac   : > { %682 = vst.msk [vmem:[#allocation2 + $0x104] sm:$0xf] %vm668_vm1, %v649_v57  ;;  %v371_v48 = vrot.slane %v11304_v58, 7 }
  0xad   : > { %17084 = vst [vmem:[#allocation49_spill] sm:$0xff] %v11304_v58  ;;  %v16689_v47 = vrot.slane %v11306_v51, 7 }
  0xae   : > { %692 = vst.msk [vmem:[#allocation2 + $0x1cc] sm:$0xf] %vm668_vm1, %v659_v17  ;;  %865 = vperm.xlu2 %10541, %v11001_v26   ;;  %860 = vperm.xlu1 %10543, %v11006_v27   ;;  %v300_v17 = vld [vmem:[%s11036_s22 + $0x98] sm:$0xff] }
  0xaf   : > { %v577_v57 = vpop.permute.xlu2 %576  ;;  %v527_v49 = vpop.permute.xlu1 %526  ;;  %v11324_v26 = vsel %vm379_vm0, %v371_v48, %v16689_v47 }
  0xb0   : > { %v630_v41 = vmul.f32 %v577_v57, %v11293_v23  ;;  %v620_v40 = vmul.f32 %v527_v49, %v11302_v54  ;;  %17085 = vst [vmem:[#allocation50_spill] sm:$0xff] %v11324_v26  ;;  %v17086_v49 = vrot.slane %v11187_v62, 7 }
  0xb2   : > { %v662_v21 = vpack.c.bf16 %v630_v41, %v630_v41  ;;  %v652_v24 = vpack.c.bf16 %v620_v40, %v620_v40  ;;  %v11332_v57 = vsel %vm379_vm0, %v16696_v31, %v17086_v49  ;;  %v11334_v41 = vmax.f32 %v300_v17, 0.0  ;;  %v311_v49 = vld [vmem:[%s11036_s22 + $0xf0] sm:$0xff]  ;;  %v766_v31 = vpop.permute.xlu0 %765 }
  0xb3   : > { %17087 = vst [vmem:[#allocation51_spill] sm:$0xff] %v11332_v57  ;;  %v303_v17 = vld [vmem:[%s11036_s22 + $0xb0] sm:$0xff] }
  0xb4   : > { %685 = vst.msk [vmem:[#allocation2 + $0x140] sm:$0xf] %vm668_vm1, %v652_v24  ;;  %v16699_v54 = vrot.slane %v11334_v41, 7 }
  0xb5   : > { %17088 = vst [vmem:[#allocation52_spill] sm:$0xff] %v11334_v41 }
  0xb6   : > { %695 = vst.msk [vmem:[#allocation2 + $0x208] sm:$0xf] %vm668_vm1, %v662_v21  ;;  %880 = vperm.xlu2 %10541, %v11019_v29   ;;  %875 = vperm.xlu1 %10543, %v11024_v30   ;;  %v17089_v29 = vrot.slane %v11238_v50, 7  ;;  %v11353_v21 = vmax.f32 %v311_v49, 0.0 }
  0xb7   : > { %v592_v24 = vpop.permute.xlu2 %591  ;;  %v542_v40 = vpop.permute.xlu1 %541 }
  0xb8   : > { %v633_v47 = vmul.f32 %v592_v24, %v11324_v26  ;;  %v623_v23 = vmul.f32 %v542_v40, %v11332_v57  ;;  %v11351_v30 = vsel %vm379_vm0, %v16699_v54, %v17089_v29  ;;  %17091 = vst [vmem:[#allocation54_spill] sm:$0xff] %v11353_v21  ;;  %v11355_v24 = vmax.f32 %v303_v17, 0.0  ;;  %v306_v54 = vld [vmem:[%s11036_s22 + $0xc8] sm:$0xff]  ;;  %v309_v57 = vld [vmem:[%s11036_s22 + $0xe0] sm:$0xff] }
  0xb9   : > { %17090 = vst [vmem:[#allocation53_spill] sm:$0xff] %v11351_v30 }
  0xba   : > { %v665_v27 = vpack.c.bf16 %v633_v47, %v633_v47  ;;  %v655_v14 = vpack.c.bf16 %v623_v23, %v623_v23  ;;  %17092 = vst [vmem:[#allocation55_spill] sm:$0xff] %v11355_v24  ;;  %v16706_v26 = vrot.slane %v11355_v24, 7  ;;  %v781_v17 = vpop.permute.xlu0 %780 }
  0xbc   : > { %688 = vst.msk [vmem:[#allocation2 + $0x17c] sm:$0xf] %vm668_vm1, %v655_v14 }
  0xbd   : > { %698 = vst.msk [vmem:[#allocation2 + $0x244] sm:$0xf] %vm668_vm1, %v665_v27  ;;  %v11369_v27 = vsel %vm379_vm0, %v16706_v26, %v368_v42  ;;  %v899_v42 = vmul.f32 %v766_v31, %v11173_v61 }
  0xbe   : > { %890 = vperm.xlu1 %10543, %v11042_v32   ;;  %17093 = vst [vmem:[#allocation56_spill] sm:$0xff] %v11369_v27  ;;  %v11371_v32 = vmax.f32 %v306_v54, 0.0 }
  0xbf   : > { %v557_v23 = vpop.permute.xlu1 %556 }
  0xc0   : > { %v626_v47 = vmul.f32 %v557_v23, %v11351_v30  ;;  %v736_v14 = vpop.permute.xlu2 %735  ;;  %17094 = vst [vmem:[#allocation57_spill] sm:$0xff] %v11371_v32 }
  0xc1   : > { %v893_v40 = vmul.f32 %v736_v14, %v11353_v21 }
  0xc2   : > { %v658_v29 = vpack.c.bf16 %v626_v47, %v626_v47  ;;  %v796_v26 = vpop.permute.xlu0 %795 }
  0xc3   : > { %v925_v49 = vpack.c.bf16 %v893_v40, %v893_v40  ;;  %v16711_v40 = vrot.slane %v11371_v32, 7 }
  0xc4   : > { %691 = vst.msk [vmem:[#allocation2 + $0x1b8] sm:$0xf] %vm668_vm1, %v658_v29 }
  0xc5   : > { %989 = vrot.lane.b32.xlu2 %v925_v49, %s10749_s9  ;;  %v310_v49 = vld [vmem:[%s11036_s22 + $0xe8] sm:$0xff]  ;;  %v11385_v54 = vsel %vm379_vm0, %v16711_v40, %v371_v48  ;;  %v902_v48 = vmul.f32 %v781_v17, %v11208_v33 }
  0xc6   : > { %17095 = vst [vmem:[#allocation58_spill] sm:$0xff] %v11385_v54 }
  0xc7   : > { %v572_v23 = vpop.permute.xlu1 %571  ;;  %v934_v40 = vpack.c.bf16 %v902_v48, %v902_v48 }
  0xc8   : > { %v629_v14 = vmul.f32 %v572_v23, %v11369_v27  ;;  %v751_v30 = vpop.permute.xlu2 %750  ;;  %v11387_v23 = vmax.f32 %v309_v57, 0.0 }
  0xc9   : > { %v896_v47 = vmul.f32 %v751_v30, %v11053_v37  ;;  %v11389_v30 = vmax.f32 %v310_v49, 0.0 }
  0xca   : > { %v661_v29 = vpack.c.bf16 %v629_v14, %v629_v14  ;;  %v16719_v31 = vrot.slane %v11387_v23, 7 }
  0xcb   : > { %v928_v21 = vpack.c.bf16 %v896_v47, %v896_v47  ;;  %17096 = vst [vmem:[#allocation59_spill] sm:$0xff] %v11389_v30 }
  0xcc   : > { %694 = vst.msk [vmem:[#allocation2 + $0x1f4] sm:$0xf] %vm668_vm1, %v661_v29  ;;  %v931_v29 = vpack.c.bf16 %v899_v42, %v899_v42 }
  0xcd   : > { %995 = vrot.lane.b32.xlu2 %v928_v21, %s10749_s9  ;;  %v16718_v21 = vrot.slane %v11389_v30, 7 }
  0xcf   : > { %v587_v14 = vpop.permute.xlu1 %586  ;;  %v11403_v57 = vsel %vm379_vm0, %v16719_v31, %v16718_v21 }
  0xd0   : > { %v632_v47 = vmul.f32 %v587_v14, %v11385_v54  ;;  %v761_v27 = vpop.permute.xlu2 %760  ;;  %17097 = vst [vmem:[#allocation60_spill] sm:$0xff] %v11403_v57 }
  0xd1   : > { %v898_v48 = vmul.f32 %v761_v27, %v11071_v44 }
  0xd2   : > { %v664_v37 = vpack.c.bf16 %v632_v47, %v632_v47  ;;  %v811_v47 = vpop.permute.xlu0 %810 }
  0xd3   : > { %v908_v39 = vmul.f32 %v811_v47, %v11276_v46 }
  0xd4   : > { %697 = vst.msk [vmem:[#allocation2 + $0x230] sm:$0xf] %vm668_vm1, %v664_v37  ;;  %v905_v37 = vmul.f32 %v796_v26, %v11242_v3 }
  0xd5   : > { %1001 = vrot.lane.b32.xlu2 %v931_v29, %s10749_s9  ;;  %v940_v26 = vpack.c.bf16 %v908_v39, %v908_v39 }
  0xd6   : > { %v937_v33 = vpack.c.bf16 %v905_v37, %v905_v37 }
  0xd7   : > { %v602_v49 = vpop.permute.xlu1 %601 }
  0xd8   : > { %v635_v42 = vmul.f32 %v602_v49, %v11403_v57  ;;  %v776_v14 = vpop.permute.xlu2 %775  ;;  %v930_v57 = vpack.c.bf16 %v898_v48, %v898_v48 }
  0xda   : > { %v667_v54 = vpack.c.bf16 %v635_v42, %v635_v42  ;;  %v826_v31 = vpop.permute.xlu0 %825 }
  0xdb   : > { %v911_v37 = vmul.f32 %v826_v31, %v11308_v56 }
  0xdc   : > { %700 = vst.msk [vmem:[#allocation2 + $0x26c] sm:$0xf] %vm668_vm1, %v667_v54 }
  0xdd   : > { %1007 = vrot.lane.b32.xlu2 %v934_v40, %s10749_s9  ;;  %v943_v47 = vpack.c.bf16 %v911_v37, %v911_v37 }
  0xe0   : > { %v791_v17 = vpop.permute.xlu2 %790  ;;  %v746_v29 = vpop.permute.xlu1 %745 }
  0xe1   : > { %v895_v61 = vmul.f32 %v746_v29, %v11112_v35 }
  0xe3   : > { %v927_v21 = vpack.c.bf16 %v895_v61, %v895_v61  ;;  %v841_v61 = vpop.permute.xlu0 %840 }
  0xe4   : > { %v914_v31 = vmul.f32 %v841_v61, %v11334_v41 }
  0xe5   : > { %1013 = vrot.lane.b32.xlu2 %v937_v33, %s10749_s9  ;;  %993 = vrot.lane.b32.xlu1 %v927_v21, %s10749_s9  ;;  %v901_v33 = vmul.f32 %v776_v14, %v11088_v53 }
  0xe8   : > { %v806_v54 = vpop.permute.xlu2 %805  ;;  %v756_v49 = vpop.permute.xlu1 %755 }
  0xe9   : > { %v897_v40 = vmul.f32 %v756_v49, %v11055_v38  ;;  %v933_v49 = vpack.c.bf16 %v901_v33, %v901_v33  ;;  %v907_v61 = vmul.f32 %v806_v54, %v11127_v60 }
  0xeb   : > { %v929_v42 = vpack.c.bf16 %v897_v40, %v897_v40  ;;  %v856_v48 = vpop.permute.xlu0 %855 }
  0xed   : > { %997 = vrot.lane.b32.xlu0 %v929_v42, %s10749_s9  ;;  %1019 = vrot.lane.b32.xlu2 %v940_v26, %s10749_s9  ;;  %v946_v42 = vpack.c.bf16 %v914_v31, %v914_v31 }
  0xee   : > { %999 = vrot.lane.b32.xlu1 %v930_v57, %s10749_s9  ;;  %v904_v57 = vmul.f32 %v791_v17, %v11110_v34  ;;  %v917_v17 = vmul.f32 %v856_v48, %v11355_v24 }
  0xf0   : > { %v821_v21 = vpop.permute.xlu2 %820  ;;  %v771_v27 = vpop.permute.xlu1 %770 }
  0xf1   : > { %v900_v39 = vmul.f32 %v771_v27, %v11086_v52  ;;  %v936_v27 = vpack.c.bf16 %v904_v57, %v904_v57  ;;  %v910_v48 = vmul.f32 %v821_v21, %v11171_v2 }
  0xf3   : > { %v932_v29 = vpack.c.bf16 %v900_v39, %v900_v39  ;;  %v16724_v39 = vmov 2  }
  0xf4   : > { %10545 = vset.pattern.permute.xlu2 %v16724_v39  ;;  %10544 = vset.pattern.permute.xlu1 %v16724_v39 }
  0xf5   : > { %1003 = vrot.lane.b32.xlu0 %v932_v29, %s10749_s9  ;;  %1025 = vrot.lane.b32.xlu2 %v943_v47, %s10749_s9  ;;  %v871_v29 = vpop.permute.xlu0 %870 }
  0xf6   : > { %1005 = vrot.lane.b32.xlu1 %v933_v49, %s10749_s9  ;;  %10546 = vset.pattern.permute.xlu0 %v16724_v39  ;;  %v949_v49 = vpack.c.bf16 %v917_v17, %v917_v17  ;;  %v942_v17 = vpack.c.bf16 %v910_v48, %v910_v48 }
  0xf8   : > { %v786_v26 = vpop.permute.xlu1 %785  ;;  %v836_v14 = vpop.permute.xlu2 %835 }
  0xf9   : > { %v903_v40 = vmul.f32 %v786_v26, %v11099_v63  ;;  %v939_v26 = vpack.c.bf16 %v907_v61, %v907_v61 }
  0xfb   : > { %v935_v37 = vpack.c.bf16 %v903_v40, %v903_v40  ;;  %v920_v40 = vmul.f32 %v871_v29, %v11371_v32 }
  0xfd   : > { %1009 = vrot.lane.b32.xlu0 %v935_v37, %s10749_s9  ;;  %1031 = vrot.lane.b32.xlu2 %v946_v42, %s10749_s9  ;;  %v952_v37 = vpack.c.bf16 %v920_v40, %v920_v40 }
  0xfe   : > { %1011 = vrot.lane.b32.xlu1 %v936_v27, %s10749_s9 }
 0x100   : > { %v801_v33 = vpop.permute.xlu1 %800  ;;  %v851_v31 = vpop.permute.xlu2 %850 }
 0x101   : > { %v906_v47 = vmul.f32 %v801_v33, %v11125_v59  ;;  %v886_v33 = vpop.permute.xlu0 %885  ;;  %v916_v48 = vmul.f32 %v851_v31, %v11240_v45 }
 0x102   : > { %v923_v61 = vmul.f32 %v886_v33, %v11387_v23 }
 0x103   : > { %v938_v57 = vpack.c.bf16 %v906_v47, %v906_v47  ;;  %v913_v47 = vmul.f32 %v836_v14, %v11189_v43  ;;  %v948_v14 = vpack.c.bf16 %v916_v48, %v916_v48 }
 0x105   : > { %1015 = vrot.lane.b32.xlu0 %v938_v57, %s10749_s9  ;;  %1037 = vrot.lane.b32.xlu2 %v949_v49, %s10749_s9  ;;  %v955_v49 = vpack.c.bf16 %v923_v61, %v923_v61 }
 0x106   : > { %1017 = vrot.lane.b32.xlu1 %v939_v26, %s10749_s9  ;;  %v945_v26 = vpack.c.bf16 %v913_v47, %v913_v47 }
 0x108   : > { %v816_v42 = vpop.permute.xlu1 %815  ;;  %v866_v39 = vpop.permute.xlu2 %865 }
 0x109   : > { %v909_v54 = vmul.f32 %v816_v42, %v11169_v55  ;;  %v919_v33 = vmul.f32 %v866_v39, %v11257_v28 }
 0x10b   : > { %v941_v27 = vpack.c.bf16 %v909_v54, %v909_v54  ;;  %v951_v31 = vpack.c.bf16 %v919_v33, %v919_v33  ;;  %v10316_v33 = vld [vmem:[%s16625_s2] sm:$0xff] }
 0x10d   : > { %1021 = vrot.lane.b32.xlu0 %v941_v27, %s10749_s9  ;;  %1043 = vrot.lane.b32.xlu2 %v952_v37, %s10749_s9 }
 0x10e   : > { %1023 = vrot.lane.b32.xlu1 %v942_v17, %s10749_s9 }
 0x110   : > { %v831_v29 = vpop.permute.xlu1 %830  ;;  %v881_v40 = vpop.permute.xlu2 %880 }
 0x111   : > { %v912_v21 = vmul.f32 %v831_v29, %v11187_v62 }
 0x113   : > { %v944_v57 = vpack.c.bf16 %v912_v21, %v912_v21 }
 0x115   : > { %1027 = vrot.lane.b32.xlu0 %v944_v57, %s10749_s9  ;;  %1049 = vrot.lane.b32.xlu2 %v955_v49, %s10749_s9 }
 0x116   : > { %1029 = vrot.lane.b32.xlu1 %v945_v26, %s10749_s9 }
 0x118   : > { %v846_v42 = vpop.permute.xlu1 %845 }
 0x119   : > { %v915_v54 = vmul.f32 %v846_v42, %v11238_v50 }
 0x11b   : > { %v947_v37 = vpack.c.bf16 %v915_v54, %v915_v54 }
 0x11d   : > { %1033 = vrot.lane.b32.xlu0 %v947_v37, %s10749_s9  ;;  %1222 = vperm.xlu2 %10545, %v10868_v4   ;;  %v922_v4 = vmul.f32 %v881_v40, %v11306_v51  ;;  %v17109_v37 = vld [vmem:[#allocation13_spill] sm:$0xff] }
 0x11e   : > { %1035 = vrot.lane.b32.xlu1 %v948_v14, %s10749_s9  ;;  %v17110_v14 = vld [vmem:[#allocation7_spill] sm:$0xff] }
 0x11f   : > { %v11456_v27 = vpop.permute.xlu2 %989  ;;  %v954_v57 = vpack.c.bf16 %v922_v4, %v922_v4  ;;  %v17114_v4 = vld [vmem:[#allocation8_spill] sm:$0xff] }
 0x120   : > { %17098 = vst [vmem:[#allocation61_spill] sm:$0xff] %v11456_v27  ;;  %v861_v17 = vpop.permute.xlu1 %860 }
 0x121   : > { %v918_v61 = vmul.f32 %v861_v17, %v11255_v20 }
 0x123   : > { %v950_v47 = vpack.c.bf16 %v918_v61, %v918_v61 }
 0x125   : > { %1039 = vrot.lane.b32.xlu0 %v950_v47, %s10749_s9  ;;  %1237 = vperm.xlu2 %10545, %v10853_v0  }
 0x126   : > { %1041 = vrot.lane.b32.xlu1 %v951_v31, %s10749_s9  ;;  %v17112_v31 = vld [vmem:[#allocation11_spill] sm:$0xff] }
 0x127   : > { %v996_v29 = vpop.permute.xlu2 %995 }
 0x128   : > { %1089 = vst.msk [vmem:[#allocation2 + $0x3c] sm:$0xf] %vm1085_vm2, %v996_v29  ;;  %v876_v21 = vpop.permute.xlu1 %875  ;;  %v17113_v29 = vld [vmem:[#allocation14_spill] sm:$0xff] }
 0x129   : > { %v921_v39 = vmul.f32 %v876_v21, %v11304_v58 }
 0x12b   : > { %v953_v49 = vpack.c.bf16 %v921_v39, %v921_v39 }
 0x12d   : > { %1045 = vrot.lane.b32.xlu0 %v953_v49, %s10749_s9  ;;  %1247 = vperm.xlu2 %10545, %v10886_v7  }
 0x12e   : > { %1047 = vrot.lane.b32.xlu1 %v954_v57, %s10749_s9  ;;  %v17116_v57 = vld [vmem:[#allocation25_spill] sm:$0xff] }
 0x12f   : > { %v11469_v0 = vpop.permute.xlu2 %1001 }
 0x130   : > { %17099 = vst [vmem:[#allocation62_spill] sm:$0xff] %v11469_v0  ;;  %v891_v26 = vpop.permute.xlu1 %890 }
 0x131   : > { %v924_v48 = vmul.f32 %v891_v26, %v11389_v30  ;;  %v16731_v26 = vrot.slane %v17116_v57, 1 }
 0x133   : > { %v956_v42 = vpack.c.bf16 %v924_v48, %v924_v48  ;;  %v16728_v48 = vrot.slane %v11112_v35, 1 }
 0x135   : > { %1051 = vrot.lane.b32.xlu0 %v956_v42, %s10749_s9  ;;  %1262 = vperm.xlu2 %10545, %v10904_v10   ;;  %v10323_v10 = vld [vmem:[%s16625_s2 + $0x38] sm:$0xff] }
 0x136   : > { %1217 = vperm.xlu1 %10544, %v11049_v36   ;;  %10469 = vmatpush.bf16.msra.mxu2 %v10323_v10  ;;  %v17117_v42 = vld [vmem:[#allocation17_spill] sm:$0xff] }
 0x137   : > { %v11475_v40 = vpop.permute.xlu2 %1007  ;;  %4196 = vmatpush.bf16.msra.mxu0 %v10323_v10  ;;  %vm1150_vm3 = vcmp.lt.s32.totalorder %v17117_v42, 7  ;;  %v11551_v10 = vld [vmem:[%s16624_s1 + $0x8] sm:$0xff] }
 0x138   : > { %17100 = vst [vmem:[#allocation63_spill] sm:$0xff] %v11475_v40  ;;  %v17130_v40 = vld [vmem:[#allocation54_spill] sm:$0xff] }
 0x139   : > { %v16752_v0 = vrot.slane %v17130_v40, 1 }
 0x13d   : > { %1227 = vperm.xlu0 %10546, %v10858_v1   ;;  %1277 = vperm.xlu2 %10545, %v10922_v13   ;;  %v10322_v1 = vld [vmem:[%s16625_s2 + $0x30] sm:$0xff] }
 0x13e   : > { %1232 = vperm.xlu1 %10544, %v10879_v6   ;;  %10470 = vmatpush.bf16.msra.mxu2 %v10322_v1 }
 0x13f   : > { %v11480_v7 = vpop.permute.xlu2 %1013  ;;  %4197 = vmatpush.bf16.msra.mxu0 %v10322_v1  ;;  %v17118_v1 = vld [vmem:[#allocation12_spill] sm:$0xff] }
 0x140   : > { %17101 = vst [vmem:[#allocation64_spill] sm:$0xff] %v11480_v7  ;;  %v16742_v7 = vrot.slane %v11308_v56, 1 }
 0x145   : > { %1252 = vperm.xlu0 %10546, %v10897_v9   ;;  %1292 = vperm.xlu2 %10545, %v10940_v16   ;;  %v11503_v9 = vpop.permute.xlu0 %991  ;;  %v10318_v16 = vld [vmem:[%s16625_s2 + $0x10] sm:$0xff] }
 0x146   : > { %1242 = vperm.xlu1 %10544, %v10874_v5   ;;  %v10321_v5 = vld [vmem:[%s16625_s2 + $0x28] sm:$0xff]  ;;  %17104 = vst [vmem:[#allocation67_spill] sm:$0xff] %v11503_v9 }
 0x147   : > { %v11485_v54 = vpop.permute.xlu2 %1019  ;;  %10471 = vmatpush.bf16.msra.mxu2 %v10321_v5  ;;  %4198 = vmatpush.bf16.msra.mxu0 %v10321_v5  ;;  %v16733_v5 = vmov 3   ;;  %v11736_v9 = vld [vmem:[%s16624_s1 + $0x68] sm:$0xff] }
 0x148   : > { %17102 = vst [vmem:[#allocation65_spill] sm:$0xff] %v11485_v54 }
 0x14d   : > { %1267 = vperm.xlu0 %10546, %v10915_v12   ;;  %1307 = vperm.xlu2 %10545, %v10958_v19  }
 0x14e   : > { %1257 = vperm.xlu1 %10544, %v10892_v8   ;;  %v10320_v8 = vld [vmem:[%s16625_s2 + $0x20] sm:$0xff] }
 0x14f   : > { %v11496_v6 = vpop.permute.xlu2 %1025  ;;  %10472 = vmatpush.bf16.msra.mxu2 %v10320_v8  ;;  %4199 = vmatpush.bf16.msra.mxu0 %v10320_v8  ;;  %v11561_v8 = vsel %vm1150_vm3, %v16731_v26, %v16728_v48  ;;  %v11637_v26 = vld [vmem:[%s16624_s1 + $0x10] sm:$0xff] }
 0x150   : > { %17103 = vst [vmem:[#allocation66_spill] sm:$0xff] %v11496_v6 }
 0x151   : > { %17119 = vst [vmem:[#allocation7_spill] sm:$0xff] %v11561_v8 }
 0x155   : > { %1282 = vperm.xlu0 %10546, %v10933_v15   ;;  %1322 = vperm.xlu2 %10545, %v10976_v22   ;;  %v10319_v15 = vld [vmem:[%s16625_s2 + $0x18] sm:$0xff] }
 0x156   : > { %1272 = vperm.xlu1 %10544, %v10910_v11   ;;  %10473 = vmatpush.bf16.msra.mxu2 %v10319_v15  ;;  %v17106_v11 = vld [vmem:[#allocation6_spill] sm:$0xff] }
 0x157   : > { %v11509_v12 = vpop.permute.xlu2 %1031  ;;  %v994_v13 = vpop.permute.xlu1 %993  ;;  %4200 = vmatpush.bf16.msra.mxu0 %v10319_v15 }
 0x158   : > { %17105 = vst [vmem:[#allocation68_spill] sm:$0xff] %v11509_v12  ;;  %v11703_v12 = vld [vmem:[%s16624_s1 + $0x50] sm:$0xff] }
 0x159   : > { %1088 = vst.msk [vmem:[#allocation2 + $0x28] sm:$0xf] %vm1085_vm2, %v994_v13  ;;  %v17120_v13 = vld [vmem:[#allocation10_spill] sm:$0xff] }
 0x15a   : > { %10474 = vmatpush.bf16.msra.mxu2 %v10318_v16 }
 0x15b   : > { %4201 = vmatpush.bf16.msra.mxu0 %v10318_v16 }
 0x15d   : > { %1297 = vperm.xlu0 %10546, %v10951_v18   ;;  %1337 = vperm.xlu2 %10545, %v10994_v25   ;;  %v10317_v18 = vld [vmem:[%s16625_s2 + $0x8] sm:$0xff]  ;;  %v17108_v25 = vld [vmem:[#allocation9_spill] sm:$0xff] }
 0x15e   : > { %1287 = vperm.xlu1 %10544, %v17106_v11   ;;  %10475 = vmatpush.bf16.msra.mxu2 %v10317_v18 }
 0x15f   : > { %v998_v19 = vpop.permute.xlu0 %997  ;;  %v11521_v22 = vpop.permute.xlu2 %1037  ;;  %4202 = vmatpush.bf16.msra.mxu0 %v10317_v18  ;;  %v16726_v18 = vrot.slane %v11071_v44, 1 }
 0x160   : > { %17107 = vst [vmem:[#allocation6_spill] sm:$0xff] %v11521_v22  ;;  %v1000_v36 = vpop.permute.xlu1 %999  ;;  %v16738_v22 = vrot.slane %v11276_v46, 1 }
 0x161   : > { %1090 = vst.msk [vmem:[#allocation2 + $0x50] sm:$0xf] %vm1085_vm2, %v998_v19 }
 0x162   : > { %1091 = vst.msk [vmem:[#allocation2 + $0x64] sm:$0xf] %vm1085_vm2, %v1000_v36  ;;  %10476 = vmatpush.bf16.msra.mxu2 %v10316_v33  ;;  %v16727_v36 = vrot.slane %v11055_v38, 1 }
 0x163   : > { %4203 = vmatpush.bf16.msra.mxu0 %v10316_v33  ;;  %v11583_v33 = vld [vmem:[%s16624_s1 + $0x20] sm:$0xff] }
 0x165   : > { %1312 = vperm.xlu0 %10546, %v17108_v25   ;;  %1352 = vperm.xlu2 %10545, %v17109_v37   ;;  %v11573_v37 = vld [vmem:[%s16624_s1 + $0xe0] sm:$0xff] }
 0x166   : > { %1302 = vperm.xlu1 %10544, %v17110_v14   ;;  %v11578_v14 = vld [vmem:[%s16624_s1 + $0xd0] sm:$0xff] }
 0x167   : > { %v1004_v17 = vpop.permute.xlu0 %1003  ;;  %v11534_v61 = vpop.permute.xlu2 %1043 }
 0x168   : > { %17111 = vst [vmem:[#allocation9_spill] sm:$0xff] %v11534_v61  ;;  %v1006_v47 = vpop.permute.xlu1 %1005 }
 0x169   : > { %1093 = vst.msk [vmem:[#allocation2 + $0x8c] sm:$0xf] %vm1085_vm2, %v1004_v17  ;;  %v11593_v17 = vsel %vm1150_vm3, %v16727_v36, %v16726_v18  ;;  %v17124_v36 = vld [vmem:[#allocation38_spill] sm:$0xff] }
 0x16a   : > { %1094 = vst.msk [vmem:[#allocation2 + $0xa0] sm:$0xf] %vm1085_vm2, %v1006_v47  ;;  %v16732_v48 = vrot.slane %v17124_v36, 1 }
 0x16b   : > { %17121 = vst [vmem:[#allocation11_spill] sm:$0xff] %v11593_v17 }
 0x16d   : > { %1327 = vperm.xlu0 %10546, %v17112_v31   ;;  %1367 = vperm.xlu2 %10545, %v17113_v29  }
 0x16e   : > { %1317 = vperm.xlu1 %10544, %v17114_v4  }
 0x16f   : > { %v1010_v21 = vpop.permute.xlu0 %1009  ;;  %v11541_v39 = vpop.permute.xlu2 %1049 }
 0x170   : > { %17115 = vst [vmem:[#allocation13_spill] sm:$0xff] %v11541_v39  ;;  %v1012_v49 = vpop.permute.xlu1 %1011 }
 0x171   : > { %1096 = vst.msk [vmem:[#allocation2 + $0xc8] sm:$0xf] %vm1085_vm2, %v1010_v21  ;;  %v17122_v21 = vld [vmem:[#allocation33_spill] sm:$0xff] }
 0x172   : > { %1097 = vst.msk [vmem:[#allocation2 + $0xdc] sm:$0xf] %vm1085_vm2, %v1012_v49  ;;  %v16729_v49 = vrot.slane %v17122_v21, 1 }
 0x175   : > { %1342 = vperm.xlu0 %10546, %v17118_v1   ;;  %10548 = vset.pattern.permute.xlu2 %v16733_v5  ;;  %v16730_v1 = vrot.slane %v11086_v52, 1 }
 0x176   : > { %1332 = vperm.xlu1 %10544, %v17120_v13   ;;  %1510 = vperm.xlu2 %10548, %v11551_v10  }
 0x177   : > { %v1016_v15 = vpop.permute.xlu0 %1015  ;;  %v1223_v11 = vpop.permute.xlu2 %1222 }
 0x178   : > { %1099 = vst.msk [vmem:[#allocation2 + $0x104] sm:$0xf] %vm1085_vm2, %v1016_v15  ;;  %v1376_v16 = vmul.f32 %v1223_v11, %v11561_v8  ;;  %v1018_v19 = vpop.permute.xlu1 %1017  ;;  %v11605_v15 = vld [vmem:[%s16624_s1 + $0xf8] sm:$0xff]  ;;  %v11610_v11 = vld [vmem:[%s16624_s1 + $0xe8] sm:$0xff] }
 0x179   : > { %1100 = vst.msk [vmem:[#allocation2 + $0x118] sm:$0xf] %vm1085_vm2, %v1018_v19  ;;  %v11625_v19 = vsel %vm1150_vm3, %v16729_v49, %v16730_v1  ;;  %v16735_v49 = vrot.slane %v11099_v63, 1 }
 0x17a   : > { %v1408_v25 = vpack.c.bf16 %v1376_v16, %v1376_v16  ;;  %v11615_v16 = vld [vmem:[%s16624_s1 + $0x30] sm:$0xff]  ;;  %17123 = vst [vmem:[#allocation14_spill] sm:$0xff] %v11625_v19 }
 0x17c   : > { %1440 = vst.msk [vmem:[#allocation2 + $0x18] sm:$0xf] %vm668_vm1, %v1408_v25 }
 0x17d   : > { %1357 = vperm.xlu0 %10546, %v11573_v37  }
 0x17e   : > { %1347 = vperm.xlu1 %10544, %v11578_v14   ;;  %1525 = vperm.xlu2 %10548, %v11583_v33  }
 0x17f   : > { %v1022_v47 = vpop.permute.xlu0 %1021  ;;  %v1238_v31 = vpop.permute.xlu2 %1237 }
 0x180   : > { %1102 = vst.msk [vmem:[#allocation2 + $0x140] sm:$0xf] %vm1085_vm2, %v1022_v47  ;;  %v1379_v29 = vmul.f32 %v1238_v31, %v11593_v17  ;;  %v1024_v4 = vpop.permute.xlu1 %1023 }
 0x181   : > { %1103 = vst.msk [vmem:[#allocation2 + $0x154] sm:$0xf] %vm1085_vm2, %v1024_v4 }
 0x182   : > { %v1411_v13 = vpack.c.bf16 %v1379_v29, %v1379_v29 }
 0x184   : > { %1443 = vst.msk [vmem:[#allocation2 + $0x54] sm:$0xf] %vm668_vm1, %v1411_v13 }
 0x185   : > { %1372 = vperm.xlu0 %10546, %v11605_v15  }
 0x186   : > { %1362 = vperm.xlu1 %10544, %v11610_v11   ;;  %1535 = vperm.xlu2 %10548, %v11615_v16  }
 0x187   : > { %v1028_v25 = vpop.permute.xlu0 %1027  ;;  %v1248_v47 = vpop.permute.xlu2 %1247  ;;  %v9430_v31 = vld [vmem:[#allocation2 + $0x140] sm:$0xf] }
 0x188   : > { %1105 = vst.msk [vmem:[#allocation2 + $0x17c] sm:$0xf] %vm1085_vm2, %v1028_v25  ;;  %v1381_v29 = vmul.f32 %v1248_v47, %v11625_v19  ;;  %v1030_v4 = vpop.permute.xlu1 %1029  ;;  %v10278_v13 = vld [vmem:[#allocation2 + $0x150] sm:$0xf0]  ;;  %v11643_v25 = vld [vmem:[%s16624_s1 + $0x48] sm:$0xff]  ;;  %v11648_v47 = vld [vmem:[%s16624_s1] sm:$0xff] }
 0x189   : > { %1106 = vst.msk [vmem:[#allocation2 + $0x190] sm:$0xf] %vm1085_vm2, %v1030_v4  ;;  %v9431_v18 = vor.u32 %v10278_v13, %v9430_v31  ;;  %v16736_v13 = vrot.slane %v11242_v3, 1 }
 0x18a   : > { %v1413_v1 = vpack.c.bf16 %v1381_v29, %v1381_v29 }
 0x18b   : > { %4244 = vmatmul.bf16.vlgmr.msra.gmra.mxu2 %v9431_v18  ;;  %v11657_v18 = vsel %vm1150_vm3, %v16732_v48, %v16735_v49  ;;  %v16737_v48 = vrot.slane %v11125_v59, 1  ;;  %v11671_v49 = vld [vmem:[%s16624_s1 + $0x38] sm:$0xff] }
 0x18c   : > { %1445 = vst.msk [vmem:[#allocation2 + $0x7c] sm:$0xf] %vm668_vm1, %v1413_v1 }
 0x18d   : > { %10549 = vset.pattern.permute.xlu0 %v16733_v5  ;;  %17125 = vst [vmem:[#allocation8_spill] sm:$0xff] %v11657_v18 }
 0x18e   : > { %10547 = vset.pattern.permute.xlu1 %v16733_v5  ;;  %1515 = vperm.xlu0 %10549, %v11637_v26  }
 0x18f   : > { %1550 = vperm.xlu2 %10548, %v11643_v25   ;;  %1505 = vperm.xlu1 %10547, %v11648_v47   ;;  %v1034_v1 = vpop.permute.xlu0 %1033  ;;  %v1263_v31 = vpop.permute.xlu2 %1262 }
 0x190   : > { %1108 = vst.msk [vmem:[#allocation2 + $0x1b8] sm:$0xf] %vm1085_vm2, %v1034_v1  ;;  %v1384_v29 = vmul.f32 %v1263_v31, %v11657_v18  ;;  %v1036_v4 = vpop.permute.xlu1 %1035  ;;  %v11677_v1 = vld [vmem:[%s16624_s1 + $0x60] sm:$0xff]  ;;  %v11682_v31 = vld [vmem:[%s16624_s1 + $0x18] sm:$0xff]  ;;  %v16761_v18 = vrot.slane %v11238_v50, 1 }
 0x191   : > { %1109 = vst.msk [vmem:[#allocation2 + $0x1cc] sm:$0xf] %vm1085_vm2, %v1036_v4 }
 0x192   : > { %v1416_v5 = vpack.c.bf16 %v1384_v29, %v1384_v29  ;;  %17126 = vst [vmem:[#allocation25_spill] sm:$0xff] %v11677_v1  ;;  %v11690_v29 = vsel %vm1150_vm3, %v16736_v13, %v16737_v48  ;;  %v16739_v13 = vrot.slane %v11169_v55, 1 }
 0x193   : > { %17127 = vst [vmem:[#allocation12_spill] sm:$0xff] %v11690_v29 }
 0x194   : > { %1448 = vst.msk [vmem:[#allocation2 + $0xb8] sm:$0xf] %vm668_vm1, %v1416_v5 }
 0x196   : > { %1540 = vperm.xlu0 %10549, %v11671_v49  }
 0x197   : > { %1565 = vperm.xlu2 %10548, %v11677_v1   ;;  %1520 = vperm.xlu1 %10547, %v11682_v31   ;;  %v1040_v5 = vpop.permute.xlu0 %1039  ;;  %v1278_v4 = vpop.permute.xlu2 %1277  ;;  %v11823_v1 = vld [vmem:[%s16624_s1 + $0x98] sm:$0xff] }
 0x198   : > { %1111 = vst.msk [vmem:[#allocation2 + $0x1f4] sm:$0xf] %vm1085_vm2, %v1040_v5  ;;  %v1387_v39 = vmul.f32 %v1278_v4, %v11690_v29  ;;  %v1042_v61 = vpop.permute.xlu1 %1041  ;;  %v11709_v5 = vld [vmem:[%s16624_s1 + $0x78] sm:$0xff]  ;;  %v16760_v29 = vrot.slane %v11334_v41, 1 }
 0x199   : > { %1112 = vst.msk [vmem:[#allocation2 + $0x208] sm:$0xf] %vm1085_vm2, %v1042_v61  ;;  %v11714_v61 = vld [vmem:[%s16624_s1 + $0x28] sm:$0xff] }
 0x19a   : > { %v1419_v48 = vpack.c.bf16 %v1387_v39, %v1387_v39  ;;  %17128 = vst [vmem:[#allocation10_spill] sm:$0xff] %v11709_v5  ;;  %v11722_v39 = vsel %vm1150_vm3, %v16738_v22, %v16739_v13  ;;  %v16743_v22 = vrot.slane %v11187_v62, 1 }
 0x19b   : > { %17129 = vst [vmem:[#allocation69_spill] sm:$0xff] %v11722_v39 }
 0x19c   : > { %1451 = vst.msk [vmem:[#allocation2 + $0xf4] sm:$0xf] %vm668_vm1, %v1419_v48 }
 0x19d   : > { %17142 = vst [vmem:[#allocation76_spill] sm:$0xff] %v11823_v1 }
 0x19e   : > { %1555 = vperm.xlu0 %10549, %v11703_v12  }
 0x19f   : > { %1580 = vperm.xlu2 %10548, %v11709_v5   ;;  %1530 = vperm.xlu1 %10547, %v11714_v61   ;;  %v1046_v48 = vpop.permute.xlu0 %1045  ;;  %v1293_v4 = vpop.permute.xlu2 %1292 }
 0x1a0   : > { %1114 = vst.msk [vmem:[#allocation2 + $0x230] sm:$0xf] %vm1085_vm2, %v1046_v48  ;;  %v1390_v6 = vmul.f32 %v1293_v4, %v11722_v39  ;;  %v1048_v54 = vpop.permute.xlu1 %1047  ;;  %v11742_v48 = vld [vmem:[%s16624_s1 + $0x90] sm:$0xff] }
 0x1a1   : > { %1115 = vst.msk [vmem:[#allocation2 + $0x244] sm:$0xf] %vm1085_vm2, %v1048_v54  ;;  %v11747_v54 = vld [vmem:[%s16624_s1 + $0x40] sm:$0xff] }
 0x1a2   : > { %v1422_v13 = vpack.c.bf16 %v1390_v6, %v1390_v6  ;;  %17131 = vst [vmem:[#allocation54_spill] sm:$0xff] %v11742_v48  ;;  %v11755_v6 = vsel %vm1150_vm3, %v16742_v7, %v16743_v22 }
 0x1a3   : > { %17132 = vst [vmem:[#allocation70_spill] sm:$0xff] %v11755_v6 }
 0x1a4   : > { %1454 = vst.msk [vmem:[#allocation2 + $0x130] sm:$0xf] %vm668_vm1, %v1422_v13  ;;  %v17133_v13 = vrot.slane %v17116_v57, 1 }
 0x1a6   : > { %1570 = vperm.xlu0 %10549, %v11736_v9   ;;  %v11764_v4 = vsel %vm1150_vm3, %v16752_v0, %v17133_v13  ;;  %v17135_v13 = vld [vmem:[#allocation15_spill] sm:$0xff] }
 0x1a7   : > { %17134 = vst [vmem:[#allocation71_spill] sm:$0xff] %v11764_v4  ;;  %1595 = vperm.xlu2 %10548, %v11742_v48   ;;  %1545 = vperm.xlu1 %10547, %v11747_v54   ;;  %v1052_v27 = vpop.permute.xlu0 %1051  ;;  %v1308_v8 = vpop.permute.xlu2 %1307  ;;  %v1119_v0 = vrot.slane %v17135_v13, 1  ;;  %v11777_v48 = vld [vmem:[%s16624_s1 + $0x80] sm:$0xff] }
 0x1a8   : > { %1117 = vst.msk [vmem:[#allocation2 + $0x26c] sm:$0xf] %vm1085_vm2, %v1052_v27  ;;  %v1393_v7 = vmul.f32 %v1308_v8, %v11755_v6  ;;  %v1218_v22 = vpop.permute.xlu1 %1217  ;;  %v11783_v27 = vld [vmem:[%s16624_s1 + $0xa8] sm:$0xff]  ;;  %v1124_v6 = vrot.slane %v11088_v53, 1 }
 0x1a9   : > { %v1375_v39 = vmul.f32 %v1218_v22, %v11764_v4  ;;  %17136 = vst [vmem:[#allocation72_spill] sm:$0xff] %v11783_v27  ;;  %v11788_v22 = vld [vmem:[%s16624_s1 + $0x58] sm:$0xff] }
 0x1aa   : > { %v1425_v19 = vpack.c.bf16 %v1393_v7, %v1393_v7  ;;  %v17137_v7 = vrot.slane %v11112_v35, 1 }
 0x1ab   : > { %v1407_v17 = vpack.c.bf16 %v1375_v39, %v1375_v39  ;;  %v17140_v39 = vrot.slane %v11055_v38, 1  ;;  %v16771_v38 = vrot.slane %v11355_v24, 1 }
 0x1ac   : > { %1457 = vst.msk [vmem:[#allocation2 + $0x16c] sm:$0xf] %vm668_vm1, %v1425_v19  ;;  %v11795_v8 = vsel %vm1150_vm3, %v17137_v7, %v1119_v0  ;;  %v11803_v19 = vsel %vm1150_vm3, %v16760_v29, %v16761_v18 }
 0x1ad   : > { %1439 = vst.msk [vmem:[#allocation2 + $0x4] sm:$0xf] %vm668_vm1, %v1407_v17  ;;  %v11810_v17 = vsel %vm1150_vm3, %v1119_v0, %v17140_v39  ;;  %v16772_v0 = vrot.slane %v11255_v20, 1 }
 0x1ae   : > { %17138 = vst [vmem:[#allocation73_spill] sm:$0xff] %v11795_v8  ;;  %1585 = vperm.xlu0 %10549, %v11777_v48  }
 0x1af   : > { %17139 = vst [vmem:[#allocation74_spill] sm:$0xff] %v11803_v19  ;;  %1610 = vperm.xlu2 %10548, %v11783_v27   ;;  %1560 = vperm.xlu1 %10547, %v11788_v22   ;;  %v1228_v7 = vpop.permute.xlu0 %1227  ;;  %v1323_v13 = vpop.permute.xlu2 %1322 }
 0x1b0   : > { %17141 = vst [vmem:[#allocation75_spill] sm:$0xff] %v11810_v17  ;;  %v1377_v35 = vmul.f32 %v1228_v7, %v11795_v8  ;;  %v1396_v4 = vmul.f32 %v1323_v13, %v11803_v19  ;;  %v1233_v29 = vpop.permute.xlu1 %1232  ;;  %v11834_v13 = vld [vmem:[%s16624_s1 + $0x70] sm:$0xff]  ;;  %v17149_v7 = vrot.slane %v11071_v44, 1  ;;  %v16784_v8 = vrot.slane %v11371_v32, 1 }
 0x1b1   : > { %v1378_v18 = vmul.f32 %v1233_v29, %v11810_v17  ;;  %v11829_v29 = vld [vmem:[%s16624_s1 + $0xc0] sm:$0xff]  ;;  %17144 = vst [vmem:[#allocation78_spill] sm:$0xff] %v11834_v13  ;;  %v1127_v17 = vrot.slane %v11110_v34, 1 }
 0x1b2   : > { %v1409_v39 = vpack.c.bf16 %v1377_v35, %v1377_v35  ;;  %v1428_v5 = vpack.c.bf16 %v1396_v4, %v1396_v4  ;;  %17143 = vst [vmem:[#allocation77_spill] sm:$0xff] %v11829_v29  ;;  %v17145_v35 = vrot.slane %v11086_v52, 1  ;;  %v11849_v4 = vsel %vm1150_vm3, %v16771_v38, %v16772_v0 }
 0x1b3   : > { %v1410_v27 = vpack.c.bf16 %v1378_v18, %v1378_v18  ;;  %17147 = vst [vmem:[#allocation80_spill] sm:$0xff] %v11849_v4 }
 0x1b4   : > { %1441 = vst.msk [vmem:[#allocation2 + $0x2c] sm:$0xf] %vm668_vm1, %v1409_v39  ;;  %v11841_v18 = vsel %vm1150_vm3, %v17145_v35, %v1124_v6 }
 0x1b5   : > { %1460 = vst.msk [vmem:[#allocation2 + $0x1a8] sm:$0xf] %vm668_vm1, %v1428_v5  ;;  %v17148_v5 = vrot.slane %v17122_v21, 1 }
 0x1b6   : > { %17146 = vst [vmem:[#allocation79_spill] sm:$0xff] %v11841_v18  ;;  %1600 = vperm.xlu0 %10549, %v11823_v1  }
 0x1b7   : > { %1442 = vst.msk [vmem:[#allocation2 + $0x40] sm:$0xf] %vm668_vm1, %v1410_v27  ;;  %v11859_v39 = vsel %vm1150_vm3, %v17149_v7, %v17148_v5  ;;  %1625 = vperm.xlu2 %10548, %v11829_v29   ;;  %1575 = vperm.xlu1 %10547, %v11834_v13   ;;  %v1253_v35 = vpop.permute.xlu0 %1252  ;;  %v1338_v52 = vpop.permute.xlu2 %1337  ;;  %v16785_v5 = vrot.slane %v11304_v58, 1  ;;  %v11872_v13 = vld [vmem:[%s16624_s1 + $0xb0] sm:$0xff] }
 0x1b8   : > { %17150 = vst [vmem:[#allocation81_spill] sm:$0xff] %v11859_v39  ;;  %v1382_v38 = vmul.f32 %v1253_v35, %v11841_v18  ;;  %v1399_v27 = vmul.f32 %v1338_v52, %v11849_v4  ;;  %v1243_v0 = vpop.permute.xlu1 %1242  ;;  %v11878_v52 = vld [vmem:[%s16624_s1 + $0xd8] sm:$0xff]  ;;  %v1130_v4 = vrot.slane %v11127_v60, 1 }
 0x1b9   : > { %v1380_v19 = vmul.f32 %v1243_v0, %v11859_v39  ;;  %17151 = vst [vmem:[#allocation82_spill] sm:$0xff] %v11872_v13  ;;  %v11883_v0 = vld [vmem:[%s16624_s1 + $0x88] sm:$0xff]  ;;  %v11898_v35 = vsel %vm1150_vm3, %v16784_v8, %v16785_v5  ;;  %v16796_v39 = vrot.slane %v11387_v23, 1 }
 0x1ba   : > { %v1414_v7 = vpack.c.bf16 %v1382_v38, %v1382_v38  ;;  %v1431_v1 = vpack.c.bf16 %v1399_v27, %v1399_v27  ;;  %17152 = vst [vmem:[#allocation83_spill] sm:$0xff] %v11878_v52  ;;  %v17153_v38 = vrot.slane %v11099_v63, 1 }
 0x1bb   : > { %v1412_v29 = vpack.c.bf16 %v1380_v19, %v1380_v19  ;;  %17155 = vst [vmem:[#allocation85_spill] sm:$0xff] %v11898_v35 }
 0x1bc   : > { %1446 = vst.msk [vmem:[#allocation2 + $0x90] sm:$0xf] %vm668_vm1, %v1414_v7  ;;  %v11890_v19 = vsel %vm1150_vm3, %v17153_v38, %v1127_v17 }
 0x1bd   : > { %1463 = vst.msk [vmem:[#allocation2 + $0x1e4] sm:$0xf] %vm668_vm1, %v1431_v1  ;;  %v17156_v1 = vrot.slane %v17124_v36, 1 }
 0x1be   : > { %17154 = vst [vmem:[#allocation84_spill] sm:$0xff] %v11890_v19  ;;  %1615 = vperm.xlu0 %10549, %v11872_v13   ;;  %v11919_v13 = vld [vmem:[%s16624_s1 + $0xc8] sm:$0xff] }
 0x1bf   : > { %1444 = vst.msk [vmem:[#allocation2 + $0x68] sm:$0xf] %vm668_vm1, %v1412_v29  ;;  %v11906_v27 = vsel %vm1150_vm3, %v1124_v6, %v17156_v1  ;;  %1640 = vperm.xlu2 %10548, %v11878_v52   ;;  %1590 = vperm.xlu1 %10547, %v11883_v0   ;;  %v1268_v7 = vpop.permute.xlu0 %1267  ;;  %v1353_v38 = vpop.permute.xlu2 %1352  ;;  %v16797_v6 = vrot.slane %v11389_v30, 1 }
 0x1c0   : > { %17157 = vst [vmem:[#allocation86_spill] sm:$0xff] %v11906_v27  ;;  %v1385_v63 = vmul.f32 %v1268_v7, %v11890_v19  ;;  %v1402_v8 = vmul.f32 %v1353_v38, %v11898_v35  ;;  %v1258_v5 = vpop.permute.xlu1 %1257  ;;  %v11930_v7 = vld [vmem:[%s16624_s1 + $0xa0] sm:$0xff]  ;;  %v1133_v35 = vrot.slane %v11171_v2, 1 }
 0x1c1   : > { %v1383_v29 = vmul.f32 %v1258_v5, %v11906_v27  ;;  %17158 = vst [vmem:[#allocation87_spill] sm:$0xff] %v11919_v13  ;;  %v11925_v5 = vld [vmem:[%s16624_s1 + $0xf0] sm:$0xff]  ;;  %v11945_v38 = vsel %vm1150_vm3, %v16796_v39, %v16797_v6 }
 0x1c2   : > { %v1417_v1 = vpack.c.bf16 %v1385_v63, %v1385_v63  ;;  %v1434_v18 = vpack.c.bf16 %v1402_v8, %v1402_v8  ;;  %v17159_v63 = vrot.slane %v11125_v59, 1  ;;  %17161 = vst [vmem:[#allocation89_spill] sm:$0xff] %v11945_v38 }
 0x1c3   : > { %v1415_v52 = vpack.c.bf16 %v1383_v29, %v1383_v29 }
 0x1c4   : > { %1449 = vst.msk [vmem:[#allocation2 + $0xcc] sm:$0xf] %vm668_vm1, %v1417_v1  ;;  %v11937_v8 = vsel %vm1150_vm3, %v17159_v63, %v1130_v4 }
 0x1c5   : > { %1466 = vst.msk [vmem:[#allocation2 + $0x220] sm:$0xf] %vm668_vm1, %v1434_v18  ;;  %v17162_v18 = vrot.slane %v11242_v3, 1 }
 0x1c6   : > { %17160 = vst [vmem:[#allocation88_spill] sm:$0xff] %v11937_v8  ;;  %1630 = vperm.xlu0 %10549, %v11919_v13  }
 0x1c7   : > { %1447 = vst.msk [vmem:[#allocation2 + $0xa4] sm:$0xf] %vm668_vm1, %v1415_v52  ;;  %v11953_v29 = vsel %vm1150_vm3, %v1127_v17, %v17162_v18  ;;  %1655 = vperm.xlu2 %10548, %v11925_v5   ;;  %1605 = vperm.xlu1 %10547, %v11930_v7   ;;  %v1283_v1 = vpop.permute.xlu0 %1282  ;;  %v1368_v63 = vpop.permute.xlu2 %1367  ;;  %v11965_v17 = vld [vmem:[%s16624_s1 + $0xb8] sm:$0xff]  ;;  %v17164_v18 = vrot.slane %v11169_v55, 1 }
 0x1c8   : > { %17163 = vst [vmem:[#allocation90_spill] sm:$0xff] %v11953_v29  ;;  %v1388_v59 = vmul.f32 %v1283_v1, %v11937_v8  ;;  %v1405_v39 = vmul.f32 %v1368_v63, %v11945_v38  ;;  %v1273_v6 = vpop.permute.xlu1 %1272 }
 0x1c9   : > { %v1386_v52 = vmul.f32 %v1273_v6, %v11953_v29  ;;  %v11972_v1 = vsel %vm1150_vm3, %v17164_v18, %v1133_v35  ;;  %v17168_v18 = vld [vmem:[#allocation30_spill] sm:$0xff] }
 0x1ca   : > { %v1420_v27 = vpack.c.bf16 %v1388_v59, %v1388_v59  ;;  %v1437_v19 = vpack.c.bf16 %v1405_v39, %v1405_v39  ;;  %17165 = vst [vmem:[#allocation91_spill] sm:$0xff] %v11972_v1  ;;  %v17166_v59 = vrot.slane %v11276_v46, 1 }
 0x1cb   : > { %v1418_v13 = vpack.c.bf16 %v1386_v52, %v1386_v52 }
 0x1cc   : > { %1452 = vst.msk [vmem:[#allocation2 + $0x108] sm:$0xf] %vm668_vm1, %v1420_v27  ;;  %v11980_v39 = vsel %vm1150_vm3, %v1130_v4, %v17166_v59  ;;  %v17169_v4 = vrot.slane %v11187_v62, 1 }
 0x1cd   : > { %1469 = vst.msk [vmem:[#allocation2 + $0x25c] sm:$0xf] %vm668_vm1, %v1437_v19 }
 0x1ce   : > { %1450 = vst.msk [vmem:[#allocation2 + $0xe0] sm:$0xf] %vm668_vm1, %v1418_v13  ;;  %1645 = vperm.xlu0 %10549, %v11573_v37   ;;  %v1136_v13 = vrot.slane %v11189_v43, 1 }
 0x1cf   : > { %17167 = vst [vmem:[#allocation92_spill] sm:$0xff] %v11980_v39  ;;  %1620 = vperm.xlu1 %10547, %v11965_v17   ;;  %v1298_v27 = vpop.permute.xlu0 %1297 }
 0x1d0   : > { %v1391_v19 = vmul.f32 %v1298_v27, %v11972_v1  ;;  %v1288_v6 = vpop.permute.xlu1 %1287  ;;  %v1511_v63 = vpop.permute.xlu2 %1510  ;;  %v11993_v59 = vsel %vm1150_vm3, %v17169_v4, %v1136_v13  ;;  %v17171_v27 = vrot.slane %v11308_v56, 1  ;;  %v1139_v4 = vrot.slane %v11240_v45, 1 }
 0x1d1   : > { %v1389_v52 = vmul.f32 %v1288_v6, %v11980_v39  ;;  %v1664_v55 = vmul.f32 %v1511_v63, %v17168_v18  ;;  %17170 = vst [vmem:[#allocation93_spill] sm:$0xff] %v11993_v59 }
 0x1d2   : > { %v1423_v37 = vpack.c.bf16 %v1391_v19, %v1391_v19  ;;  %v12001_v19 = vsel %vm1150_vm3, %v1133_v35, %v17171_v27 }
 0x1d3   : > { %v1421_v38 = vpack.c.bf16 %v1389_v52, %v1389_v52  ;;  %v1696_v29 = vpack.c.bf16 %v1664_v55, %v1664_v55  ;;  %17172 = vst [vmem:[#allocation94_spill] sm:$0xff] %v12001_v19  ;;  %v17173_v55 = vrot.slane %v17122_v21, 7 }
 0x1d4   : > { %1455 = vst.msk [vmem:[#allocation2 + $0x144] sm:$0xf] %vm668_vm1, %v1423_v37 }
 0x1d5   : > { %1453 = vst.msk [vmem:[#allocation2 + $0x11c] sm:$0xf] %vm668_vm1, %v1421_v38  ;;  %1761 = vrot.lane.b32.xlu2 %v1696_v29, %s10749_s9  ;;  %v17174_v38 = vrot.slane %v11071_v44, 7 }
 0x1d6   : > { %1660 = vperm.xlu0 %10549, %v11605_v15  }
 0x1d7   : > { %v12009_v6 = vsel %vm379_vm0, %v17174_v38, %v17173_v55  ;;  %1635 = vperm.xlu1 %10547, %v11578_v14   ;;  %v1313_v63 = vpop.permute.xlu0 %1312  ;;  %v17176_v14 = vrot.slane %v11238_v50, 1  ;;  %v17178_v38 = vrot.slane %v11334_v41, 1 }
 0x1d8   : > { %17175 = vst [vmem:[#allocation95_spill] sm:$0xff] %v12009_v6  ;;  %v1394_v29 = vmul.f32 %v1313_v63, %v11993_v59  ;;  %v1303_v15 = vpop.permute.xlu1 %1302  ;;  %v1526_v52 = vpop.permute.xlu2 %1525 }
 0x1d9   : > { %v1392_v37 = vmul.f32 %v1303_v15, %v12001_v19  ;;  %v1667_v35 = vmul.f32 %v1526_v52, %v12009_v6  ;;  %v12022_v55 = vsel %vm1150_vm3, %v17176_v14, %v1139_v4  ;;  %v12029_v63 = vsel %vm1150_vm3, %v1136_v13, %v17178_v38 }
 0x1da   : > { %v1426_v27 = vpack.c.bf16 %v1394_v29, %v1394_v29  ;;  %17177 = vst [vmem:[#allocation96_spill] sm:$0xff] %v12022_v55  ;;  %v17182_v13 = vrot.slane %v11355_v24, 1 }
 0x1db   : > { %v1424_v18 = vpack.c.bf16 %v1392_v37, %v1392_v37  ;;  %v1699_v62 = vpack.c.bf16 %v1667_v35, %v1667_v35  ;;  %17179 = vst [vmem:[#allocation97_spill] sm:$0xff] %v12029_v63  ;;  %v1142_v35 = vrot.slane %v11257_v28, 1 }
 0x1dc   : > { %1458 = vst.msk [vmem:[#allocation2 + $0x180] sm:$0xf] %vm668_vm1, %v1426_v27  ;;  %v12047_v38 = vsel %vm1150_vm3, %v1139_v4, %v17182_v13  ;;  %v17186_v13 = vrot.slane %v11371_v32, 1 }
 0x1dd   : > { %1456 = vst.msk [vmem:[#allocation2 + $0x158] sm:$0xf] %vm668_vm1, %v1424_v18  ;;  %1767 = vrot.lane.b32.xlu2 %v1699_v62, %s10749_s9  ;;  %v17180_v62 = vrot.slane %v11255_v20, 1 }
 0x1de   : > { %17183 = vst [vmem:[#allocation99_spill] sm:$0xff] %v12047_v38 }
 0x1df   : > { %1650 = vperm.xlu1 %10547, %v11610_v11   ;;  %v1328_v29 = vpop.permute.xlu0 %1327  ;;  %v12041_v11 = vsel %vm1150_vm3, %v17180_v62, %v1142_v35  ;;  %v17184_v62 = vrot.slane %v11304_v58, 1  ;;  %v17189_v58 = vrot.slane %v11389_v30, 1 }
 0x1e0   : > { %v1397_v15 = vmul.f32 %v1328_v29, %v12022_v55  ;;  %v1318_v18 = vpop.permute.xlu1 %1317  ;;  %v1536_v52 = vpop.permute.xlu2 %1535  ;;  %17181 = vst [vmem:[#allocation98_spill] sm:$0xff] %v12041_v11 }
 0x1e1   : > { %v1395_v37 = vmul.f32 %v1318_v18, %v12029_v63 }
 0x1e2   : > { %v1429_v27 = vpack.c.bf16 %v1397_v15, %v1397_v15 }
 0x1e3   : > { %v1427_v14 = vpack.c.bf16 %v1395_v37, %v1395_v37 }
 0x1e4   : > { %1461 = vst.msk [vmem:[#allocation2 + $0x1bc] sm:$0xf] %vm668_vm1, %v1429_v27 }
 0x1e5   : > { %1459 = vst.msk [vmem:[#allocation2 + $0x194] sm:$0xf] %vm668_vm1, %v1427_v14  ;;  %v1145_v14 = vrot.slane %v11306_v51, 1 }
 0x1e7   : > { %v1343_v29 = vpop.permute.xlu0 %1342  ;;  %v12058_v4 = vsel %vm1150_vm3, %v17184_v62, %v1145_v14  ;;  %v17188_v62 = vrot.slane %v17130_v40, 1 }
 0x1e8   : > { %v1400_v15 = vmul.f32 %v1343_v29, %v12041_v11  ;;  %v1333_v18 = vpop.permute.xlu1 %1332  ;;  %17185 = vst [vmem:[#allocation100_spill] sm:$0xff] %v12058_v4  ;;  %v12064_v29 = vsel %vm1150_vm3, %v1142_v35, %v17186_v13  ;;  %v17191_v13 = vrot.slane %v11387_v23, 1  ;;  %v17194_v11 = vld [vmem:[#allocation28_spill] sm:$0xff] }
 0x1e9   : > { %v1398_v37 = vmul.f32 %v1333_v18, %v12047_v38  ;;  %v1551_v27 = vpop.permute.xlu2 %1550  ;;  %17187 = vst [vmem:[#allocation101_spill] sm:$0xff] %v12064_v29  ;;  %v12076_v35 = vsel %vm1150_vm3, %v17189_v58, %v17188_v62  ;;  %v17193_v62 = vld [vmem:[#allocation18_spill] sm:$0xff] }
 0x1ea   : > { %v1432_v6 = vpack.c.bf16 %v1400_v15, %v1400_v15  ;;  %17190 = vst [vmem:[#allocation102_spill] sm:$0xff] %v12076_v35 }
 0x1eb   : > { %v1430_v20 = vpack.c.bf16 %v1398_v37, %v1398_v37 }
 0x1ec   : > { %1464 = vst.msk [vmem:[#allocation2 + $0x1f8] sm:$0xf] %vm668_vm1, %v1432_v6 }
 0x1ed   : > { %1462 = vst.msk [vmem:[#allocation2 + $0x1d0] sm:$0xf] %vm668_vm1, %v1430_v20 }
 0x1ef   : > { %v1358_v18 = vpop.permute.xlu0 %1357 }
 0x1f0   : > { %v1403_v15 = vmul.f32 %v1358_v18, %v12058_v4  ;;  %v1348_v37 = vpop.permute.xlu1 %1347  ;;  %v12082_v18 = vsel %vm1150_vm3, %v1145_v14, %v17191_v13 }
 0x1f1   : > { %v1401_v6 = vmul.f32 %v1348_v37, %v12064_v29  ;;  %v1566_v20 = vpop.permute.xlu2 %1565  ;;  %17192 = vst [vmem:[#allocation103_spill] sm:$0xff] %v12082_v18 }
 0x1f2   : > { %v1435_v50 = vpack.c.bf16 %v1403_v15, %v1403_v15 }
 0x1f3   : > { %v1433_v21 = vpack.c.bf16 %v1401_v6, %v1401_v6 }
 0x1f4   : > { %1467 = vst.msk [vmem:[#allocation2 + $0x234] sm:$0xf] %vm668_vm1, %v1435_v50 }
 0x1f5   : > { %1465 = vst.msk [vmem:[#allocation2 + $0x20c] sm:$0xf] %vm668_vm1, %v1433_v21 }
 0x1f7   : > { %v1373_v15 = vpop.permute.xlu0 %1372 }
 0x1f8   : > { %v1406_v37 = vmul.f32 %v1373_v15, %v12076_v35  ;;  %v1363_v50 = vpop.permute.xlu1 %1362 }
 0x1f9   : > { %v1404_v21 = vmul.f32 %v1363_v50, %v12082_v18  ;;  %v1581_v29 = vpop.permute.xlu2 %1580  ;;  %v17196_v50 = vrot.slane %v11088_v53, 7 }
 0x1fa   : > { %v1438_v6 = vpack.c.bf16 %v1406_v37, %v1406_v37  ;;  %v17195_v37 = vrot.slane %v17124_v36, 7 }
 0x1fb   : > { %v1436_v44 = vpack.c.bf16 %v1404_v21, %v1404_v21 }
 0x1fc   : > { %1470 = vst.msk [vmem:[#allocation2 + $0x270] sm:$0xf] %vm668_vm1, %v1438_v6 }
 0x1fd   : > { %1468 = vst.msk [vmem:[#allocation2 + $0x248] sm:$0xf] %vm668_vm1, %v1436_v44  ;;  %v12100_v44 = vsel %vm379_vm0, %v17196_v50, %v17195_v37  ;;  %v17202_v50 = vld [vmem:[#allocation23_spill] sm:$0xff] }
 0x1fe   : > { %17197 = vst [vmem:[#allocation104_spill] sm:$0xff] %v12100_v44 }
 0x200   : > { %v1516_v58 = vpop.permute.xlu0 %1515 }
 0x201   : > { %v1665_v4 = vmul.f32 %v1516_v58, %v17193_v62  ;;  %v1506_v38 = vpop.permute.xlu1 %1505  ;;  %v12091_v15 = vpop.permute.xlu2 %1595  ;;  %v1669_v62 = vmul.f32 %v1536_v52, %v17202_v50  ;;  %v17205_v52 = vrot.slane %v11127_v60, 7 }
 0x202   : > { %v1663_v14 = vmul.f32 %v1506_v38, %v17194_v11  ;;  %v17200_v11 = vrot.slane %v11110_v34, 7 }
 0x203   : > { %v1697_v13 = vpack.c.bf16 %v1665_v4, %v1665_v4  ;;  %v17198_v4 = vld [vmem:[#allocation20_spill] sm:$0xff] }
 0x204   : > { %v1695_v63 = vpack.c.bf16 %v1663_v14, %v1663_v14 }
 0x205   : > { %1763 = vrot.lane.b32.xlu0 %v1697_v13, %s10749_s9 }
 0x206   : > { %1759 = vrot.lane.b32.xlu1 %v1695_v63, %s10749_s9  ;;  %v17199_v63 = vrot.slane %v11242_v3, 7 }
 0x208   : > { %v1541_v21 = vpop.permute.xlu0 %1540  ;;  %v12112_v37 = vsel %vm379_vm0, %v17200_v11, %v17199_v63  ;;  %v17204_v11 = vrot.slane %v11276_v46, 7 }
 0x209   : > { %v1670_v6 = vmul.f32 %v1541_v21, %v12100_v44  ;;  %v1521_v38 = vpop.permute.xlu1 %1520  ;;  %17201 = vst [vmem:[#allocation105_spill] sm:$0xff] %v12112_v37  ;;  %v12115_v21 = vpop.permute.xlu2 %1610 }
 0x20a   : > { %v1666_v58 = vmul.f32 %v1521_v38, %v17198_v4  ;;  %v12128_v63 = vsel %vm379_vm0, %v17205_v52, %v17204_v11  ;;  %v17209_v11 = vrot.slane %v11308_v56, 7 }
 0x20b   : > { %v1702_v14 = vpack.c.bf16 %v1670_v6, %v1670_v6  ;;  %17206 = vst [vmem:[#allocation106_spill] sm:$0xff] %v12128_v63 }
 0x20c   : > { %v1698_v13 = vpack.c.bf16 %v1666_v58, %v1666_v58  ;;  %v17203_v58 = vld [vmem:[#allocation37_spill] sm:$0xff] }
 0x20d   : > { %1773 = vrot.lane.b32.xlu2 %v1702_v14, %s10749_s9 }
 0x20e   : > { %1765 = vrot.lane.b32.xlu1 %v1698_v13, %s10749_s9  ;;  %v1701_v13 = vpack.c.bf16 %v1669_v62, %v1669_v62 }
 0x210   : > { %v1556_v44 = vpop.permute.xlu0 %1555 }
 0x211   : > { %v1673_v6 = vmul.f32 %v1556_v44, %v12112_v37  ;;  %v1531_v38 = vpop.permute.xlu1 %1530  ;;  %v17207_v44 = vld [vmem:[#allocation27_spill] sm:$0xff] }
 0x212   : > { %v1668_v14 = vmul.f32 %v1531_v38, %v17203_v58  ;;  %v1672_v50 = vmul.f32 %v1551_v27, %v17207_v44  ;;  %v17210_v27 = vrot.slane %v11171_v2, 7 }
 0x213   : > { %v1705_v4 = vpack.c.bf16 %v1673_v6, %v1673_v6 }
 0x214   : > { %v1700_v36 = vpack.c.bf16 %v1668_v14, %v1668_v14  ;;  %v12132_v14 = vpop.permute.xlu2 %1625  ;;  %v12144_v52 = vsel %vm379_vm0, %v17210_v27, %v17209_v11  ;;  %v17214_v11 = vrot.slane %v11334_v41, 7 }
 0x215   : > { %1779 = vrot.lane.b32.xlu2 %v1705_v4, %s10749_s9  ;;  %v17208_v4 = vld [vmem:[#allocation40_spill] sm:$0xff]  ;;  %17211 = vst [vmem:[#allocation107_spill] sm:$0xff] %v12144_v52 }
 0x216   : > { %1769 = vrot.lane.b32.xlu0 %v1700_v36, %s10749_s9  ;;  %1771 = vrot.lane.b32.xlu1 %v1701_v13, %s10749_s9  ;;  %v1704_v13 = vpack.c.bf16 %v1672_v50, %v1672_v50 }
 0x218   : > { %v1571_v38 = vpop.permute.xlu0 %1570 }
 0x219   : > { %v1676_v62 = vmul.f32 %v1571_v38, %v12128_v63  ;;  %v1546_v6 = vpop.permute.xlu1 %1545  ;;  %v17212_v38 = vld [vmem:[#allocation29_spill] sm:$0xff] }
 0x21a   : > { %v1671_v36 = vmul.f32 %v1546_v6, %v17208_v4  ;;  %v1675_v44 = vmul.f32 %v1566_v20, %v17212_v38  ;;  %v17215_v20 = vrot.slane %v11189_v43, 7  ;;  %v17218_v38 = vld [vmem:[#allocation48_spill] sm:$0xff] }
 0x21b   : > { %v1708_v37 = vpack.c.bf16 %v1676_v62, %v1676_v62 }
 0x21c   : > { %v1703_v58 = vpack.c.bf16 %v1671_v36, %v1671_v36  ;;  %v17213_v36 = vld [vmem:[#allocation46_spill] sm:$0xff]  ;;  %v12149_v63 = vpop.permute.xlu2 %1640  ;;  %v12160_v27 = vsel %vm379_vm0, %v17215_v20, %v17214_v11  ;;  %v17219_v11 = vrot.slane %v11355_v24, 7 }
 0x21d   : > { %1785 = vrot.lane.b32.xlu2 %v1708_v37, %s10749_s9  ;;  %17216 = vst [vmem:[#allocation108_spill] sm:$0xff] %v12160_v27 }
 0x21e   : > { %1775 = vrot.lane.b32.xlu0 %v1703_v58, %s10749_s9  ;;  %1777 = vrot.lane.b32.xlu1 %v1704_v13, %s10749_s9  ;;  %v1707_v58 = vpack.c.bf16 %v1675_v44, %v1675_v44 }
 0x220   : > { %v1586_v6 = vpop.permute.xlu0 %1585 }
 0x221   : > { %v1679_v50 = vmul.f32 %v1586_v6, %v12144_v52  ;;  %v1561_v62 = vpop.permute.xlu1 %1560  ;;  %v17217_v6 = vld [vmem:[#allocation36_spill] sm:$0xff] }
 0x222   : > { %v1674_v37 = vmul.f32 %v1561_v62, %v17213_v36 }
 0x223   : > { %v1711_v4 = vpack.c.bf16 %v1679_v50, %v1679_v50  ;;  %v1678_v50 = vmul.f32 %v1581_v29, %v17217_v6  ;;  %v17220_v29 = vrot.slane %v11240_v45, 7 }
 0x224   : > { %v1706_v13 = vpack.c.bf16 %v1674_v37, %v1674_v37 }
 0x225   : > { %1791 = vrot.lane.b32.xlu2 %v1711_v4, %s10749_s9  ;;  %v12176_v20 = vsel %vm379_vm0, %v17220_v29, %v17219_v11  ;;  %v17224_v11 = vrot.slane %v11257_v28, 7 }
 0x226   : > { %1781 = vrot.lane.b32.xlu0 %v1706_v13, %s10749_s9  ;;  %1783 = vrot.lane.b32.xlu1 %v1707_v58, %s10749_s9  ;;  %v1710_v13 = vpack.c.bf16 %v1678_v50, %v1678_v50  ;;  %v12166_v58 = vpop.permute.xlu2 %1655 }
 0x228   : > { %v1601_v44 = vpop.permute.xlu0 %1600 }
 0x229   : > { %v1682_v62 = vmul.f32 %v1601_v44, %v12160_v27  ;;  %v1576_v37 = vpop.permute.xlu1 %1575  ;;  %v17221_v44 = vld [vmem:[#allocation39_spill] sm:$0xff]  ;;  %v16845_v27 = vmov 5  }
 0x22a   : > { %v1677_v4 = vmul.f32 %v1576_v37, %v17218_v38  ;;  %v1681_v50 = vmul.f32 %v12091_v15, %v17221_v44  ;;  %10550 = vset.pattern.permute.xlu0 %v16845_v27  ;;  %v17223_v15 = vrot.slane %v11371_v32, 7  ;;  %10552 = vset.pattern.permute.xlu2 %v16845_v27 }
 0x22b   : > { %v1714_v36 = vpack.c.bf16 %v1682_v62, %v1682_v62  ;;  %10551 = vset.pattern.permute.xlu1 %v16845_v27 }
 0x22c   : > { %v1709_v52 = vpack.c.bf16 %v1677_v4, %v1677_v4  ;;  %v17222_v4 = vld [vmem:[#allocation51_spill] sm:$0xff]  ;;  %v1713_v38 = vpack.c.bf16 %v1681_v50, %v1681_v50  ;;  %v12192_v29 = vsel %vm379_vm0, %v17224_v11, %v17223_v15  ;;  %v17227_v11 = vrot.slane %v11387_v23, 7 }
 0x22d   : > { %1797 = vrot.lane.b32.xlu2 %v1714_v36, %s10749_s9 }
 0x22e   : > { %1787 = vrot.lane.b32.xlu0 %v1709_v52, %s10749_s9  ;;  %1789 = vrot.lane.b32.xlu1 %v1710_v13, %s10749_s9 }
 0x230   : > { %v1616_v62 = vpop.permute.xlu0 %1615 }
 0x231   : > { %v1685_v36 = vmul.f32 %v1616_v62, %v12176_v20  ;;  %v1591_v37 = vpop.permute.xlu1 %1590  ;;  %v1762_v62 = vpop.permute.xlu2 %1761 }
 0x232   : > { %v1680_v6 = vmul.f32 %v1591_v37, %v17222_v4  ;;  %1856 = vst.msk [vmem:[#allocation2 + $0x18] sm:$0xf] %vm1085_vm2, %v1762_v62  ;;  %v17228_v62 = vrot.slane %v11306_v51, 7 }
 0x233   : > { %v1717_v52 = vpack.c.bf16 %v1685_v36, %v1685_v36 }
 0x234   : > { %v1712_v13 = vpack.c.bf16 %v1680_v6, %v1680_v6  ;;  %v17225_v6 = vld [vmem:[#allocation45_spill] sm:$0xff] }
 0x235   : > { %1803 = vrot.lane.b32.xlu2 %v1717_v52, %s10749_s9  ;;  %v1684_v50 = vmul.f32 %v12115_v21, %v17225_v6  ;;  %v17226_v52 = vld [vmem:[#allocation53_spill] sm:$0xff]  ;;  %v12210_v21 = vsel %vm379_vm0, %v17228_v62, %v17227_v11  ;;  %v375_v6 = vrot.slane %v17130_v40, 7 }
 0x236   : > { %1793 = vrot.lane.b32.xlu0 %v1712_v13, %s10749_s9  ;;  %1795 = vrot.lane.b32.xlu1 %v1713_v38, %s10749_s9  ;;  %17229 = vst [vmem:[#allocation109_spill] sm:$0xff] %v12210_v21 }
 0x237   : > { %v1716_v4 = vpack.c.bf16 %v1684_v50, %v1684_v50  ;;  %v10331_v50 = vld [vmem:[%s16625_s2 + $0x78] sm:$0xff] }
 0x238   : > { %v1631_v36 = vpop.permute.xlu0 %1630  ;;  %4285 = vmatpush.bf16.msra.mxu1 %v10331_v50  ;;  %10477 = vmatpush.bf16.msra.mxu3 %v10331_v50  ;;  %v10330_v50 = vld [vmem:[%s16625_s2 + $0x70] sm:$0xff] }
 0x239   : > { %v1688_v38 = vmul.f32 %v1631_v36, %v12192_v29  ;;  %v1606_v37 = vpop.permute.xlu1 %1605  ;;  %v1768_v36 = vpop.permute.xlu2 %1767 }
 0x23a   : > { %v1683_v13 = vmul.f32 %v1606_v37, %v17226_v52  ;;  %1859 = vst.msk [vmem:[#allocation2 + $0x54] sm:$0xf] %vm1085_vm2, %v1768_v36 }
 0x23b   : > { %v1720_v44 = vpack.c.bf16 %v1688_v38, %v1688_v38 }
 0x23c   : > { %v1715_v15 = vpack.c.bf16 %v1683_v13, %v1683_v13  ;;  %4286 = vmatpush.bf16.msra.mxu1 %v10330_v50  ;;  %10478 = vmatpush.bf16.msra.mxu3 %v10330_v50  ;;  %v10328_v50 = vld [vmem:[%s16625_s2 + $0x60] sm:$0xff] }
 0x23d   : > { %1809 = vrot.lane.b32.xlu2 %v1720_v44, %s10749_s9  ;;  %v17230_v44 = vld [vmem:[#allocation47_spill] sm:$0xff] }
 0x23e   : > { %1799 = vrot.lane.b32.xlu0 %v1715_v15, %s10749_s9  ;;  %1801 = vrot.lane.b32.xlu1 %v1716_v4, %s10749_s9  ;;  %v1687_v38 = vmul.f32 %v12132_v14, %v17230_v44  ;;  %v17231_v15 = vld [vmem:[#allocation56_spill] sm:$0xff]  ;;  %v17232_v14 = vrot.slane %v17116_v57, 7 }
 0x240   : > { %v1646_v37 = vpop.permute.xlu0 %1645  ;;  %v1719_v62 = vpack.c.bf16 %v1687_v38, %v1687_v38  ;;  %v12228_v36 = vsel %vm379_vm0, %v375_v6, %v17232_v14  ;;  %v17233_v38 = vld [vmem:[#allocation50_spill] sm:$0xff] }
 0x241   : > { %v1691_v4 = vmul.f32 %v1646_v37, %v12210_v21  ;;  %v1621_v13 = vpop.permute.xlu1 %1620  ;;  %v1690_v37 = vmul.f32 %v12149_v63, %v17233_v38  ;;  %v17235_v21 = vrot.slane %v11389_v30, 7 }
 0x242   : > { %v1686_v27 = vmul.f32 %v1621_v13, %v17231_v15 }
 0x243   : > { %v1723_v11 = vpack.c.bf16 %v1691_v4, %v1691_v4  ;;  %v1722_v44 = vpack.c.bf16 %v1690_v37, %v1690_v37  ;;  %v12244_v63 = vsel %vm379_vm0, %v17235_v21, %v375_v6  ;;  %v17236_v21 = vld [vmem:[#allocation60_spill] sm:$0xff] }
 0x244   : > { %v1718_v52 = vpack.c.bf16 %v1686_v27, %v1686_v27  ;;  %v1693_v37 = vmul.f32 %v12166_v58, %v12244_v63  ;;  %v10326_v58 = vld [vmem:[%s16625_s2 + $0x50] sm:$0xff] }
 0x245   : > { %1815 = vrot.lane.b32.xlu2 %v1723_v11, %s10749_s9  ;;  %v17234_v11 = vld [vmem:[#allocation58_spill] sm:$0xff] }
 0x246   : > { %1805 = vrot.lane.b32.xlu0 %v1718_v52, %s10749_s9  ;;  %1807 = vrot.lane.b32.xlu1 %v1719_v62, %s10749_s9  ;;  %v10329_v52 = vld [vmem:[%s16625_s2 + $0x68] sm:$0xff] }
 0x247   : > { %4287 = vmatpush.bf16.msra.mxu1 %v10329_v52  ;;  %10479 = vmatpush.bf16.msra.mxu3 %v10329_v52 }
 0x248   : > { %v1661_v27 = vpop.permute.xlu0 %1660 }
 0x249   : > { %v1694_v4 = vmul.f32 %v1661_v27, %v12228_v36  ;;  %v1636_v13 = vpop.permute.xlu1 %1635  ;;  %v10327_v27 = vld [vmem:[%s16625_s2 + $0x58] sm:$0xff] }
 0x24a   : > { %v1689_v62 = vmul.f32 %v1636_v13, %v17234_v11 }
 0x24b   : > { %v1726_v14 = vpack.c.bf16 %v1694_v4, %v1694_v4  ;;  %4288 = vmatpush.bf16.msra.mxu1 %v10328_v50  ;;  %10480 = vmatpush.bf16.msra.mxu3 %v10328_v50  ;;  %v1725_v4 = vpack.c.bf16 %v1693_v37, %v1693_v37  ;;  %v17241_v37 = vld [vmem:[#allocation82_spill] sm:$0xff] }
 0x24c   : > { %v1721_v15 = vpack.c.bf16 %v1689_v62, %v1689_v62  ;;  %v17240_v62 = vld [vmem:[#allocation10_spill] sm:$0xff] }
 0x24d   : > { %1821 = vrot.lane.b32.xlu2 %v1726_v14, %s10749_s9 }
 0x24e   : > { %1811 = vrot.lane.b32.xlu0 %v1721_v15, %s10749_s9  ;;  %1813 = vrot.lane.b32.xlu1 %v1722_v44, %s10749_s9  ;;  %v10325_v44 = vld [vmem:[%s16625_s2 + $0x48] sm:$0xff] }
 0x24f   : > { %4289 = vmatpush.bf16.msra.mxu1 %v10327_v27  ;;  %10481 = vmatpush.bf16.msra.mxu3 %v10327_v27  ;;  %v17242_v27 = vld [vmem:[#allocation54_spill] sm:$0xff] }
 0x251   : > { %v1651_v6 = vpop.permute.xlu1 %1650 }
 0x252   : > { %v1692_v52 = vmul.f32 %v1651_v6, %v17236_v21 }
 0x253   : > { %4290 = vmatpush.bf16.msra.mxu1 %v10326_v58  ;;  %10482 = vmatpush.bf16.msra.mxu3 %v10326_v58 }
 0x254   : > { %v1724_v15 = vpack.c.bf16 %v1692_v52, %v1692_v52 }
 0x255   : > { %1995 = vperm.xlu2 %10552, %v11637_v26   ;;  %v10324_v26 = vld [vmem:[%s16625_s2 + $0x40] sm:$0xff] }
 0x256   : > { %1817 = vrot.lane.b32.xlu0 %v1724_v15, %s10749_s9  ;;  %1819 = vrot.lane.b32.xlu1 %v1725_v4, %s10749_s9 }
 0x257   : > { %4291 = vmatpush.bf16.msra.mxu1 %v10325_v44  ;;  %10483 = vmatpush.bf16.msra.mxu3 %v10325_v44  ;;  %v17243_v44 = vld [vmem:[#allocation87_spill] sm:$0xff] }
 0x25b   : > { %4292 = vmatpush.bf16.msra.mxu1 %v10324_v26  ;;  %10484 = vmatpush.bf16.msra.mxu3 %v10324_v26 }
 0x25d   : > { %2005 = vperm.xlu2 %10552, %v11583_v33  }
 0x25e   : > { %1985 = vperm.xlu0 %10550, %v11648_v47   ;;  %1990 = vperm.xlu1 %10551, %v11551_v10  }
 0x265   : > { %2020 = vperm.xlu2 %10552, %v11671_v49  }
 0x266   : > { %2010 = vperm.xlu0 %10550, %v11714_v61   ;;  %2000 = vperm.xlu1 %10551, %v11682_v31   ;;  %v9272_v61 = vld [vmem:[#allocation2 + $0x14] sm:$0xf0] }
 0x267   : > { %v1774_v13 = vpop.permute.xlu2 %1773 }
 0x268   : > { %1862 = vst.msk [vmem:[#allocation2 + $0x90] sm:$0xf] %vm1085_vm2, %v1774_v13 }
 0x26d   : > { %2035 = vperm.xlu2 %10552, %v11703_v12   ;;  %v17237_v12 = vld [vmem:[#allocation78_spill] sm:$0xff] }
 0x26e   : > { %2025 = vperm.xlu0 %10550, %v11747_v54   ;;  %2015 = vperm.xlu1 %10551, %v11615_v16   ;;  %v17238_v16 = vld [vmem:[#allocation25_spill] sm:$0xff] }
 0x26f   : > { %v1780_v10 = vpop.permute.xlu2 %1779 }
 0x270   : > { %1865 = vst.msk [vmem:[#allocation2 + $0xcc] sm:$0xf] %vm1085_vm2, %v1780_v10 }
 0x275   : > { %2050 = vperm.xlu2 %10552, %v11736_v9  }
 0x276   : > { %2040 = vperm.xlu0 %10550, %v11788_v22   ;;  %2030 = vperm.xlu1 %10551, %v11643_v25   ;;  %v17239_v22 = vld [vmem:[#allocation76_spill] sm:$0xff] }
 0x277   : > { %v1786_v33 = vpop.permute.xlu2 %1785  ;;  %v1764_v49 = vpop.permute.xlu0 %1763 }
 0x278   : > { %v1760_v47 = vpop.permute.xlu1 %1759  ;;  %1868 = vst.msk [vmem:[#allocation2 + $0x108] sm:$0xf] %vm1085_vm2, %v1786_v33  ;;  %v12313_v33 = vld [vmem:[%s16624_s1 + $0xe0] sm:$0xff] }
 0x279   : > { %1855 = vst.msk [vmem:[#allocation2 + $0x4] sm:$0xf] %vm1085_vm2, %v1760_v47 }
 0x27a   : > { %1857 = vst.msk [vmem:[#allocation2 + $0x2c] sm:$0xf] %vm1085_vm2, %v1764_v49  ;;  %v17245_v49 = vld [vmem:[#allocation77_spill] sm:$0xff] }
 0x27d   : > { %2065 = vperm.xlu2 %10552, %v11777_v48  }
 0x27e   : > { %2055 = vperm.xlu0 %10550, %v17237_v12   ;;  %2045 = vperm.xlu1 %10551, %v17238_v16  }
 0x27f   : > { %v1792_v9 = vpop.permute.xlu2 %1791 }
 0x280   : > { %v1766_v31 = vpop.permute.xlu1 %1765  ;;  %1871 = vst.msk [vmem:[#allocation2 + $0x144] sm:$0xf] %vm1085_vm2, %v1792_v9  ;;  %v10236_v25 = vld [vmem:[#allocation2 + $0x4] sm:$0xf] }
 0x281   : > { %1858 = vst.msk [vmem:[#allocation2 + $0x40] sm:$0xf] %vm1085_vm2, %v1766_v31  ;;  %v9275_v54 = vor.u32 %v10236_v25, %v9272_v61  ;;  %v10241_v6 = vld [vmem:[#allocation2 + $0x2c] sm:$0xf]  ;;  %v10246_v31 = vld [vmem:[#allocation2 + $0x54] sm:$0xf] }
 0x282   : > { %v12329_v61 = vld [vmem:[%s16624_s1 + $0xf8] sm:$0xff] }
 0x283   : > { %4293 = vmatmul.bf16.vlgmr.msra.gmra.mxu1 %v9275_v54  ;;  %v12334_v54 = vld [vmem:[%s16624_s1 + $0xe8] sm:$0xff] }
 0x285   : > { %2080 = vperm.xlu2 %10552, %v17239_v22   ;;  %v17246_v22 = vld [vmem:[#allocation83_spill] sm:$0xff] }
 0x286   : > { %2070 = vperm.xlu0 %10550, %v11883_v0   ;;  %2060 = vperm.xlu1 %10551, %v17240_v62  }
 0x287   : > { %v1798_v48 = vpop.permute.xlu2 %1797 }
 0x288   : > { %v1770_v14 = vpop.permute.xlu0 %1769  ;;  %v1772_v50 = vpop.permute.xlu1 %1771  ;;  %1874 = vst.msk [vmem:[#allocation2 + $0x180] sm:$0xf] %vm1085_vm2, %v1798_v48  ;;  %v9292_v52 = vld [vmem:[#allocation2 + $0x3c] sm:$0xf0] }
 0x289   : > { %1860 = vst.msk [vmem:[#allocation2 + $0x68] sm:$0xf] %vm1085_vm2, %v1770_v14  ;;  %v9295_v58 = vor.u32 %v10241_v6, %v9292_v52  ;;  %v17247_v52 = vld [vmem:[#allocation11_spill] sm:$0xff] }
 0x28a   : > { %1861 = vst.msk [vmem:[#allocation2 + $0x7c] sm:$0xf] %vm1085_vm2, %v1772_v50 }
 0x28d   : > { %2095 = vperm.xlu2 %10552, %v17241_v37  }
 0x28e   : > { %2085 = vperm.xlu0 %10550, %v11930_v7   ;;  %2075 = vperm.xlu1 %10551, %v17242_v27   ;;  %v17244_v7 = vld [vmem:[#allocation72_spill] sm:$0xff] }
 0x28f   : > { %v1804_v0 = vpop.permute.xlu2 %1803 }
 0x290   : > { %v1776_v4 = vpop.permute.xlu0 %1775  ;;  %v1778_v15 = vpop.permute.xlu1 %1777  ;;  %1877 = vst.msk [vmem:[#allocation2 + $0x1bc] sm:$0xf] %vm1085_vm2, %v1804_v0  ;;  %v9312_v47 = vld [vmem:[#allocation2 + $0x64] sm:$0xf0] }
 0x291   : > { %1863 = vst.msk [vmem:[#allocation2 + $0xa4] sm:$0xf] %vm1085_vm2, %v1776_v4  ;;  %v9315_v25 = vor.u32 %v10246_v31, %v9312_v47  ;;  %v10251_v50 = vld [vmem:[#allocation2 + $0x7c] sm:$0xf]  ;;  %v9332_v4 = vld [vmem:[#allocation2 + $0x8c] sm:$0xf0] }
 0x292   : > { %1864 = vst.msk [vmem:[#allocation2 + $0xb8] sm:$0xf] %vm1085_vm2, %v1778_v15  ;;  %v10276_v15 = vld [vmem:[#allocation2 + $0x144] sm:$0xf] }
 0x293   : > { %4298 = vmatmul.bf16.gmra.mxu1 %v9295_v58 }
 0x295   : > { %2110 = vperm.xlu2 %10552, %v17243_v44   ;;  %v9335_v44 = vor.u32 %v10251_v50, %v9332_v4 }
 0x296   : > { %2100 = vperm.xlu0 %10550, %v11965_v17   ;;  %2090 = vperm.xlu1 %10551, %v17244_v7   ;;  %v12318_v17 = vld [vmem:[%s16624_s1 + $0xd0] sm:$0xff] }
 0x297   : > { %v1810_v26 = vpop.permute.xlu2 %1809 }
 0x298   : > { %v1782_v13 = vpop.permute.xlu0 %1781  ;;  %v1784_v10 = vpop.permute.xlu1 %1783  ;;  %1880 = vst.msk [vmem:[#allocation2 + $0x1f8] sm:$0xf] %vm1085_vm2, %v1810_v26 }
 0x299   : > { %1866 = vst.msk [vmem:[#allocation2 + $0xe0] sm:$0xf] %vm1085_vm2, %v1782_v13  ;;  %v9352_v47 = vld [vmem:[#allocation2 + $0xb4] sm:$0xf0] }
 0x29a   : > { %1867 = vst.msk [vmem:[#allocation2 + $0xf4] sm:$0xf] %vm1085_vm2, %v1784_v10 }
 0x29d   : > { %2125 = vperm.xlu2 %10552, %v12313_v33  }
 0x29e   : > { %2115 = vperm.xlu0 %10550, %v12318_v17   ;;  %2105 = vperm.xlu1 %10551, %v17245_v49   ;;  %v10256_v49 = vld [vmem:[#allocation2 + $0xa4] sm:$0xf] }
 0x29f   : > { %v1816_v12 = vpop.permute.xlu2 %1815 }
 0x2a0   : > { %v1788_v16 = vpop.permute.xlu0 %1787  ;;  %v1790_v9 = vpop.permute.xlu1 %1789  ;;  %1883 = vst.msk [vmem:[#allocation2 + $0x234] sm:$0xf] %vm1085_vm2, %v1816_v12 }
 0x2a1   : > { %1869 = vst.msk [vmem:[#allocation2 + $0x11c] sm:$0xf] %vm1085_vm2, %v1788_v16 }
 0x2a2   : > { %1870 = vst.msk [vmem:[#allocation2 + $0x130] sm:$0xf] %vm1085_vm2, %v1790_v9 }
 0x2a3   : > { %4303 = vmatmul.bf16.gmra.mxu1 %v9315_v25  ;;  %v9452_v25 = vld [vmem:[#allocation2 + $0x17c] sm:$0xf0] }
 0x2a5   : > { %2140 = vperm.xlu2 %10552, %v12329_v61  }
 0x2a6   : > { %2130 = vperm.xlu0 %10550, %v12334_v54   ;;  %2120 = vperm.xlu1 %10551, %v17246_v22   ;;  %v9355_v22 = vor.u32 %v10256_v49, %v9352_v47 }
 0x2a7   : > { %v1822_v62 = vpop.permute.xlu2 %1821 }
 0x2a8   : > { %v1794_v48 = vpop.permute.xlu0 %1793  ;;  %v1796_v14 = vpop.permute.xlu1 %1795  ;;  %1886 = vst.msk [vmem:[#allocation2 + $0x270] sm:$0xf] %vm1085_vm2, %v1822_v62 }
 0x2a9   : > { %1872 = vst.msk [vmem:[#allocation2 + $0x158] sm:$0xf] %vm1085_vm2, %v1794_v48 }
 0x2aa   : > { %1873 = vst.msk [vmem:[#allocation2 + $0x16c] sm:$0xf] %vm1085_vm2, %v1796_v14 }
 0x2ae   : > { %2135 = vperm.xlu1 %10551, %v11925_v5  }
 0x2af   : > { %v1996_v37 = vpop.permute.xlu2 %1995 }
 0x2b0   : > { %v1800_v27 = vpop.permute.xlu0 %1799  ;;  %v1802_v6 = vpop.permute.xlu1 %1801  ;;  %v2145_v0 = vmul.f32 %v1996_v37, %v17247_v52  ;;  %v9432_v58 = vld [vmem:[#allocation2 + $0x154] sm:$0xf0]  ;;  %v9372_v37 = vld [vmem:[#allocation2 + $0xdc] sm:$0xf0]  ;;  %v1900_v52 = vpack.c.bf16 %v11276_v46, %v11276_v46 }
 0x2b1   : > { %1875 = vst.msk [vmem:[#allocation2 + $0x194] sm:$0xf] %vm1085_vm2, %v1800_v27  ;;  %v9435_v7 = vor.u32 %v10276_v15, %v9432_v58  ;;  %v10281_v12 = vld [vmem:[#allocation2 + $0x16c] sm:$0xf] }
 0x2b2   : > { %1876 = vst.msk [vmem:[#allocation2 + $0x1a8] sm:$0xf] %vm1085_vm2, %v1802_v6  ;;  %v2177_v26 = vpack.c.bf16 %v2145_v0, %v2145_v0  ;;  %v9455_v62 = vor.u32 %v10281_v12, %v9452_v25  ;;  %v10261_v58 = vld [vmem:[#allocation2 + $0xcc] sm:$0xf] }
 0x2b3   : > { %4308 = vmatmul.bf16.gmra.mxu1 %v9335_v44  ;;  %4333 = vmatmul.bf16.vlgmr.msra.gmra.mxu3 %v9435_v7  ;;  %v17248_v44 = vld [vmem:[#allocation73_spill] sm:$0xff]  ;;  %1932 = vst.msk [vmem:[#allocation2 + $0x10c] sm:$0xf] %vm668_vm1, %v1900_v52 }
 0x2b4   : > { %2243 = vrot.lane.b32.xlu2 %v2177_v26, %s10749_s9  ;;  %v17249_v26 = vld [vmem:[#allocation75_spill] sm:$0xff]  ;;  %v17285_v52 = vld [vmem:[#allocation49_spill] sm:$0xff] }
 0x2b7   : > { %v2006_v5 = vpop.permute.xlu2 %2005 }
 0x2b8   : > { %v1806_v13 = vpop.permute.xlu0 %1805  ;;  %v1808_v10 = vpop.permute.xlu1 %1807  ;;  %v10286_v27 = vld [vmem:[#allocation2 + $0x194] sm:$0xf] }
 0x2b9   : > { %1878 = vst.msk [vmem:[#allocation2 + $0x1d0] sm:$0xf] %vm1085_vm2, %v1806_v13  ;;  %v9472_v6 = vld [vmem:[#allocation2 + $0x1a4] sm:$0xf0] }
 0x2ba   : > { %1879 = vst.msk [vmem:[#allocation2 + $0x1e4] sm:$0xf] %vm1085_vm2, %v1808_v10  ;;  %v9375_v10 = vor.u32 %v10261_v58, %v9372_v37  ;;  %v9475_v49 = vor.u32 %v10286_v27, %v9472_v6  ;;  %v10266_v58 = vld [vmem:[#allocation2 + $0xf4] sm:$0xf] }
 0x2bf   : > { %v2021_v16 = vpop.permute.xlu2 %2020 }
 0x2c0   : > { %v1812_v9 = vpop.permute.xlu0 %1811  ;;  %v1814_v31 = vpop.permute.xlu1 %1813 }
 0x2c1   : > { %1881 = vst.msk [vmem:[#allocation2 + $0x20c] sm:$0xf] %vm1085_vm2, %v1812_v9 }
 0x2c2   : > { %1882 = vst.msk [vmem:[#allocation2 + $0x220] sm:$0xf] %vm1085_vm2, %v1814_v31  ;;  %v17250_v31 = vld [vmem:[#allocation14_spill] sm:$0xff] }
 0x2c3   : > { %4313 = vmatmul.bf16.gmra.mxu1 %v9355_v22  ;;  %4338 = vmatmul.bf16.gmra.mxu3 %v9455_v62  ;;  %v2147_v25 = vmul.f32 %v2006_v5, %v17250_v31  ;;  %v17253_v5 = vld [vmem:[#allocation8_spill] sm:$0xff] }
 0x2c4   : > { %v12549_v31 = vld [vmem:[%s16624_s1 + $0x50] sm:$0xff] }
 0x2c5   : > { %v2179_v6 = vpack.c.bf16 %v2147_v25, %v2147_v25 }
 0x2c7   : > { %v2036_v48 = vpop.permute.xlu2 %2035 }
 0x2c8   : > { %v1818_v14 = vpop.permute.xlu0 %1817  ;;  %v1820_v50 = vpop.permute.xlu1 %1819 }
 0x2c9   : > { %1884 = vst.msk [vmem:[#allocation2 + $0x248] sm:$0xf] %vm1085_vm2, %v1818_v14  ;;  %v17251_v14 = vld [vmem:[#allocation79_spill] sm:$0xff] }
 0x2ca   : > { %1885 = vst.msk [vmem:[#allocation2 + $0x25c] sm:$0xf] %vm1085_vm2, %v1820_v50 }
 0x2cf   : > { %v2051_v0 = vpop.permute.xlu2 %2050 }
 0x2d0   : > { %v1986_v4 = vpop.permute.xlu0 %1985  ;;  %v1991_v15 = vpop.permute.xlu1 %1990 }
 0x2d1   : > { %v2143_v7 = vmul.f32 %v1986_v4, %v17248_v44  ;;  %v2144_v13 = vmul.f32 %v1991_v15, %v17249_v26  ;;  %v17252_v4 = vld [vmem:[#allocation81_spill] sm:$0xff]  ;;  %v17256_v44 = vld [vmem:[#allocation12_spill] sm:$0xff] }
 0x2d3   : > { %v2175_v47 = vpack.c.bf16 %v2143_v7, %v2143_v7  ;;  %v2176_v12 = vpack.c.bf16 %v2144_v13, %v2144_v13  ;;  %4318 = vmatmul.bf16.gmra.mxu1 %v9375_v10  ;;  %4343 = vmatmul.bf16.gmra.mxu3 %v9475_v49  ;;  %v9492_v7 = vld [vmem:[#allocation2 + $0x1cc] sm:$0xf0]  ;;  %v2150_v10 = vmul.f32 %v2021_v16, %v17253_v5 }
 0x2d4   : > { %v2153_v5 = vmul.f32 %v2036_v48, %v17256_v44 }
 0x2d5   : > { %2239 = vrot.lane.b32.xlu0 %v2175_v47, %s10749_s9  ;;  %2241 = vrot.lane.b32.xlu1 %v2176_v12, %s10749_s9  ;;  %v9392_v12 = vld [vmem:[#allocation2 + $0x104] sm:$0xf0] }
 0x2d6   : > { %v9395_v42 = vor.u32 %v10266_v58, %v9392_v12  ;;  %v17257_v58 = vld [vmem:[#allocation90_spill] sm:$0xff] }
 0x2d7   : > { %v12357_v9 = vpop.permute.xlu2 %2065 }
 0x2d8   : > { %v2011_v22 = vpop.permute.xlu0 %2010  ;;  %v2001_v62 = vpop.permute.xlu1 %2000 }
 0x2d9   : > { %v2148_v50 = vmul.f32 %v2011_v22, %v17251_v14  ;;  %v2146_v15 = vmul.f32 %v2001_v62, %v17252_v4  ;;  %v10291_v22 = vld [vmem:[#allocation2 + $0x1bc] sm:$0xf]  ;;  %v17254_v62 = vld [vmem:[#allocation84_spill] sm:$0xff] }
 0x2db   : > { %v2180_v37 = vpack.c.bf16 %v2148_v50, %v2148_v50  ;;  %v2178_v27 = vpack.c.bf16 %v2146_v15, %v2146_v15  ;;  %v17255_v15 = vld [vmem:[#allocation86_spill] sm:$0xff] }
 0x2dd   : > { %2245 = vrot.lane.b32.xlu0 %v2178_v27, %s10749_s9  ;;  %2249 = vrot.lane.b32.xlu2 %v2180_v37, %s10749_s9  ;;  %v9495_v27 = vor.u32 %v10291_v22, %v9492_v7 }
 0x2de   : > { %2247 = vrot.lane.b32.xlu1 %v2179_v6, %s10749_s9  ;;  %v2182_v6 = vpack.c.bf16 %v2150_v10, %v2150_v10  ;;  %v9412_v10 = vld [vmem:[#allocation2 + $0x12c] sm:$0xf0] }
 0x2df   : > { %v12365_v13 = vpop.permute.xlu2 %2080 }
 0x2e0   : > { %v2026_v49 = vpop.permute.xlu0 %2025  ;;  %v2016_v47 = vpop.permute.xlu1 %2015 }
 0x2e1   : > { %v2151_v50 = vmul.f32 %v2026_v49, %v17254_v62  ;;  %v2149_v25 = vmul.f32 %v2016_v47, %v17255_v15  ;;  %v12567_v62 = vld [vmem:[%s16624_s1 + $0x78] sm:$0xff]  ;;  %v12577_v15 = vld [vmem:[%s16624_s1 + $0x68] sm:$0xff] }
 0x2e3   : > { %v2183_v26 = vpack.c.bf16 %v2151_v50, %v2151_v50  ;;  %v2181_v37 = vpack.c.bf16 %v2149_v25, %v2149_v25  ;;  %4323 = vmatmul.bf16.gmra.mxu1 %v9395_v42  ;;  %4348 = vmatmul.bf16.gmra.mxu3 %v9495_v27  ;;  %v2185_v42 = vpack.c.bf16 %v2153_v5, %v2153_v5  ;;  %v10296_v50 = vld [vmem:[#allocation2 + $0x1e4] sm:$0xf]  ;;  %v17258_v25 = vld [vmem:[#allocation69_spill] sm:$0xff] }
 0x2e4   : > { %v2156_v48 = vmul.f32 %v2051_v0, %v17258_v25  ;;  %v17259_v0 = vld [vmem:[#allocation70_spill] sm:$0xff] }
 0x2e5   : > { %2251 = vrot.lane.b32.xlu0 %v2181_v37, %s10749_s9  ;;  %2255 = vrot.lane.b32.xlu2 %v2183_v26, %s10749_s9  ;;  %v10271_v26 = vld [vmem:[#allocation2 + $0x11c] sm:$0xf] }
 0x2e6   : > { %2253 = vrot.lane.b32.xlu1 %v2182_v6, %s10749_s9  ;;  %v9512_v6 = vld [vmem:[#allocation2 + $0x1f4] sm:$0xf0] }
 0x2e7   : > { %v2096_v16 = vpop.permute.xlu2 %2095  ;;  %v9515_v5 = vor.u32 %v10296_v50, %v9512_v6 }
 0x2e8   : > { %v2041_v14 = vpop.permute.xlu0 %2040  ;;  %v2031_v49 = vpop.permute.xlu1 %2030 }
 0x2e9   : > { %v2154_v47 = vmul.f32 %v2041_v14, %v11937_v8  ;;  %v2152_v7 = vmul.f32 %v2031_v49, %v17257_v58 }
 0x2eb   : > { %v2186_v12 = vpack.c.bf16 %v2154_v47, %v2154_v47  ;;  %v2184_v22 = vpack.c.bf16 %v2152_v7, %v2152_v7  ;;  %v9415_v47 = vor.u32 %v10271_v26, %v9412_v10 }
 0x2ed   : > { %2257 = vrot.lane.b32.xlu0 %v2184_v22, %s10749_s9  ;;  %2261 = vrot.lane.b32.xlu2 %v2186_v12, %s10749_s9  ;;  %v2188_v12 = vpack.c.bf16 %v2156_v48, %v2156_v48  ;;  %v9532_v48 = vld [vmem:[#allocation2 + $0x21c] sm:$0xf0] }
 0x2ee   : > { %2259 = vrot.lane.b32.xlu1 %v2185_v42, %s10749_s9  ;;  %v2159_v42 = vmul.f32 %v12357_v9, %v17259_v0  ;;  %v17263_v0 = vld [vmem:[#allocation98_spill] sm:$0xff] }
 0x2ef   : > { %v2111_v7 = vpop.permute.xlu2 %2110 }
 0x2f0   : > { %v2056_v27 = vpop.permute.xlu0 %2055  ;;  %v2046_v37 = vpop.permute.xlu1 %2045  ;;  %v2191_v6 = vpack.c.bf16 %v2159_v42, %v2159_v42 }
 0x2f1   : > { %v2157_v14 = vmul.f32 %v2056_v27, %v11972_v1  ;;  %v2155_v49 = vmul.f32 %v2046_v37, %v11980_v39  ;;  %v1899_v1 = vpack.c.bf16 %v11127_v60, %v11127_v60 }
 0x2f3   : > { %v2189_v22 = vpack.c.bf16 %v2157_v14, %v2157_v14  ;;  %v2187_v44 = vpack.c.bf16 %v2155_v49, %v2155_v49  ;;  %4328 = vmatmul.bf16.gmra.mxu1 %v9415_v47  ;;  %4353 = vmatmul.bf16.gmra.mxu3 %v9515_v5  ;;  %v17260_v49 = vld [vmem:[#allocation74_spill] sm:$0xff]  ;;  %1931 = vst.msk [vmem:[#allocation2 + $0xf8] sm:$0xf] %vm668_vm1, %v1899_v1 }
 0x2f4   : > { %v2162_v9 = vmul.f32 %v12365_v13, %v17260_v49  ;;  %v1903_v1 = vpack.c.bf16 %v11308_v56, %v11308_v56 }
 0x2f5   : > { %2263 = vrot.lane.b32.xlu0 %v2187_v44, %s10749_s9  ;;  %2267 = vrot.lane.b32.xlu2 %v2189_v22, %s10749_s9  ;;  %v10301_v44 = vld [vmem:[#allocation2 + $0x20c] sm:$0xf] }
 0x2f6   : > { %2265 = vrot.lane.b32.xlu1 %v2188_v12, %s10749_s9  ;;  %1935 = vst.msk [vmem:[#allocation2 + $0x148] sm:$0xf] %vm668_vm1, %v1903_v1  ;;  %v1916_v1 = vpack.c.bf16 %v11389_v30, %v11389_v30 }
 0x2f7   : > { %v2126_v14 = vpop.permute.xlu2 %2125 }
 0x2f8   : > { %v2071_v27 = vpop.permute.xlu0 %2070  ;;  %v2061_v25 = vpop.permute.xlu1 %2060  ;;  %1948 = vst.msk [vmem:[#allocation2 + $0x24c] sm:$0xf] %vm668_vm1, %v1916_v1  ;;  %v12660_v1 = vld [vmem:[%s16624_s1 + $0xb8] sm:$0xff] }
 0x2f9   : > { %v2160_v26 = vmul.f32 %v2071_v27, %v11993_v59  ;;  %v2158_v10 = vmul.f32 %v2061_v25, %v12001_v19  ;;  %v17261_v25 = vld [vmem:[#allocation97_spill] sm:$0xff]  ;;  %v9535_v27 = vor.u32 %v10301_v44, %v9532_v48  ;;  %v17264_v19 = vld [vmem:[#allocation99_spill] sm:$0xff]  ;;  %v16851_v44 = vmov 6  }
 0x2fa   : > { %10554 = vset.pattern.permute.xlu0 %v16851_v44  ;;  %10555 = vset.pattern.permute.xlu1 %v16851_v44  ;;  %v12543_v59 = vld [vmem:[%s16624_s1 + $0x58] sm:$0xff] }
 0x2fb   : > { %v2192_v50 = vpack.c.bf16 %v2160_v26, %v2160_v26  ;;  %v2190_v37 = vpack.c.bf16 %v2158_v10, %v2158_v10  ;;  %v2194_v10 = vpack.c.bf16 %v2162_v9, %v2162_v9  ;;  %10553 = vset.pattern.permute.xlu2 %v16851_v44  ;;  %v17268_v44 = vld [vmem:[#allocation101_spill] sm:$0xff] }
 0x2fd   : > { %2269 = vrot.lane.b32.xlu0 %v2190_v37, %s10749_s9  ;;  %2273 = vrot.lane.b32.xlu2 %v2192_v50, %s10749_s9  ;;  %v17262_v37 = vld [vmem:[#allocation80_spill] sm:$0xff] }
 0x2fe   : > { %2271 = vrot.lane.b32.xlu1 %v2191_v6, %s10749_s9  ;;  %v2165_v13 = vmul.f32 %v2096_v16, %v17262_v37  ;;  %v9552_v16 = vld [vmem:[#allocation2 + $0x244] sm:$0xf0] }
 0x2ff   : > { %v2141_v50 = vpop.permute.xlu2 %2140 }
 0x300   : > { %v2086_v47 = vpop.permute.xlu0 %2085  ;;  %v2076_v5 = vpop.permute.xlu1 %2075 }
 0x301   : > { %v2163_v22 = vmul.f32 %v2086_v47, %v12022_v55  ;;  %v2161_v12 = vmul.f32 %v2076_v5, %v17261_v25  ;;  %v17282_v55 = vld [vmem:[#allocation34_spill] sm:$0xff] }
 0x302   : > { %v1904_v58 = vpack.c.bf16 %v17282_v55, %v17282_v55 }
 0x303   : > { %v2195_v42 = vpack.c.bf16 %v2163_v22, %v2163_v22  ;;  %v2193_v26 = vpack.c.bf16 %v2161_v12, %v2161_v12  ;;  %4358 = vmatmul.bf16.gmra.mxu3 %v9535_v27  ;;  %v2197_v22 = vpack.c.bf16 %v2165_v13, %v2165_v13  ;;  %v17265_v12 = vld [vmem:[#allocation16_spill] sm:$0xff] }
 0x304   : > { %1936 = vst.msk [vmem:[#allocation2 + $0x15c] sm:$0xf] %vm668_vm1, %v1904_v58  ;;  %v12538_v58 = vld [vmem:[%s16624_s1 + $0x60] sm:$0xff] }
 0x305   : > { %2275 = vrot.lane.b32.xlu0 %v2193_v26, %s10749_s9  ;;  %2279 = vrot.lane.b32.xlu2 %v2195_v42, %s10749_s9  ;;  %v17266_v42 = vld [vmem:[#allocation85_spill] sm:$0xff] }
 0x306   : > { %2277 = vrot.lane.b32.xlu1 %v2194_v10, %s10749_s9  ;;  %v2168_v26 = vmul.f32 %v2111_v7, %v17266_v42  ;;  %v17269_v7 = vld [vmem:[#allocation21_spill] sm:$0xff] }
 0x307   : > { %v17270_v42 = vld [vmem:[#allocation89_spill] sm:$0xff] }
 0x308   : > { %v2101_v6 = vpop.permute.xlu0 %2100  ;;  %v2091_v49 = vpop.permute.xlu1 %2090 }
 0x309   : > { %v2166_v47 = vmul.f32 %v2101_v6, %v17263_v0  ;;  %v2164_v5 = vmul.f32 %v2091_v49, %v17264_v19  ;;  %v1889_v49 = vpack.c.bf16 %v17265_v12, %v17265_v12  ;;  %v2200_v19 = vpack.c.bf16 %v2168_v26, %v2168_v26 }
 0x30b   : > { %v2198_v48 = vpack.c.bf16 %v2166_v47, %v2166_v47  ;;  %v2196_v9 = vpack.c.bf16 %v2164_v5, %v2164_v5  ;;  %v10306_v47 = vld [vmem:[#allocation2 + $0x234] sm:$0xf]  ;;  %1921 = vst.msk [vmem:[#allocation2 + $0x30] sm:$0xf] %vm668_vm1, %v1889_v49  ;;  %v1892_v49 = vpack.c.bf16 %v17269_v7, %v17269_v7 }
 0x30c   : > { %v17267_v5 = vld [vmem:[#allocation100_spill] sm:$0xff]  ;;  %v9555_v37 = vor.u32 %v10306_v47, %v9552_v16 }
 0x30d   : > { %2281 = vrot.lane.b32.xlu0 %v2196_v9, %s10749_s9  ;;  %2285 = vrot.lane.b32.xlu2 %v2198_v48, %s10749_s9  ;;  %1924 = vst.msk [vmem:[#allocation2 + $0x6c] sm:$0xf] %vm668_vm1, %v1892_v49  ;;  %v9572_v49 = vld [vmem:[#allocation2 + $0x26c] sm:$0xf0] }
 0x30e   : > { %2283 = vrot.lane.b32.xlu1 %v2197_v22, %s10749_s9  ;;  %v2244_v27 = vpop.permute.xlu2 %2243 }
 0x30f   : > { %2337 = vst.msk [vmem:[#allocation2 + $0x30] sm:$0xf] %vm1085_vm2, %v2244_v27 }
 0x310   : > { %v2116_v10 = vpop.permute.xlu0 %2115  ;;  %v2106_v6 = vpop.permute.xlu1 %2105 }
 0x311   : > { %v2169_v13 = vmul.f32 %v2116_v10, %v17267_v5  ;;  %v2167_v9 = vmul.f32 %v2106_v6, %v17268_v44  ;;  %v2171_v10 = vmul.f32 %v2126_v14, %v17270_v42  ;;  %v4245_v42 = vpop.f32.mrf.mxu2 }
 0x313   : > { %v2201_v48 = vpack.c.bf16 %v2169_v13, %v2169_v13  ;;  %v2199_v22 = vpack.c.bf16 %v2167_v9, %v2167_v9  ;;  %4363 = vmatmul.bf16.gmra.mxu3 %v9555_v37  ;;  %v2203_v47 = vpack.c.bf16 %v2171_v10, %v2171_v10  ;;  %v17271_v13 = vld [vmem:[#allocation22_spill] sm:$0xff]  ;;  %v17272_v9 = vld [vmem:[#allocation7_spill] sm:$0xff] }
 0x314   : > { %v1895_v14 = vpack.c.bf16 %v17271_v13, %v17271_v13  ;;  %v12435_v10 = vld [vmem:[%s16624_s1] sm:$0xff] }
 0x315   : > { %2287 = vrot.lane.b32.xlu0 %v2199_v22, %s10749_s9  ;;  %2291 = vrot.lane.b32.xlu2 %v2201_v48, %s10749_s9  ;;  %v2174_v48 = vmul.f32 %v2141_v50, %v17272_v9  ;;  %v17274_v50 = vld [vmem:[#allocation24_spill] sm:$0xff]  ;;  %v10639_v9 = vld [vmem:[%s16626_s3] ss:$0 sm:$0xff] }
 0x316   : > { %2289 = vrot.lane.b32.xlu1 %v2200_v19, %s10749_s9  ;;  %v10311_v19 = vld [vmem:[#allocation2 + $0x25c] sm:$0xf]  ;;  %1927 = vst.msk [vmem:[#allocation2 + $0xa8] sm:$0xf] %vm668_vm1, %v1895_v14  ;;  %v17276_v14 = vld [vmem:[#allocation26_spill] sm:$0xff]  ;;  %v4246_v44 = vadd.f32 %v10639_v9, %v4245_v42  ;;  %v12510_v42 = vld [vmem:[%s16624_s1 + $0x48] sm:$0xff] }
 0x317   : > { %v12521_v9 = vld [vmem:[%s16624_s1 + $0x38] sm:$0xff] }
 0x318   : > { %v2131_v25 = vpop.permute.xlu0 %2130  ;;  %v2121_v6 = vpop.permute.xlu1 %2120 }
 0x319   : > { %v2172_v16 = vmul.f32 %v2131_v25, %v12076_v35  ;;  %v2170_v37 = vmul.f32 %v2121_v6, %v12082_v18  ;;  %v17273_v25 = vld [vmem:[#allocation71_spill] sm:$0xff]  ;;  %v1893_v35 = vpack.c.bf16 %v11088_v53, %v11088_v53 }
 0x31a   : > { %v12486_v18 = vld [vmem:[%s16624_s1 + $0x28] sm:$0xff] }
 0x31b   : > { %v2204_v27 = vpack.c.bf16 %v2172_v16, %v2172_v16  ;;  %v2202_v26 = vpack.c.bf16 %v2170_v37, %v2170_v37  ;;  %v9575_v16 = vor.u32 %v10311_v19, %v9572_v49  ;;  %v12456_v49 = vld [vmem:[%s16624_s1 + $0x18] sm:$0xff]  ;;  %1925 = vst.msk [vmem:[#allocation2 + $0x80] sm:$0xf] %vm668_vm1, %v1893_v35  ;;  %v1896_v35 = vpack.c.bf16 %v11110_v34, %v11110_v34 }
 0x31d   : > { %2293 = vrot.lane.b32.xlu0 %v2202_v26, %s10749_s9  ;;  %2297 = vrot.lane.b32.xlu2 %v2204_v27, %s10749_s9  ;;  %v2206_v27 = vpack.c.bf16 %v2174_v48, %v2174_v48  ;;  %v1887_v26 = vpack.c.bf16 %v17274_v50, %v17274_v50  ;;  %v12451_v48 = vld [vmem:[%s16624_s1 + $0x8] sm:$0xff]  ;;  %1928 = vst.msk [vmem:[#allocation2 + $0xbc] sm:$0xf] %vm668_vm1, %v1896_v35 }
 0x31e   : > { %2295 = vrot.lane.b32.xlu1 %v2203_v47, %s10749_s9  ;;  %v17275_v47 = vld [vmem:[#allocation15_spill] sm:$0xff]  ;;  %v1913_v50 = vpack.c.bf16 %v17285_v52, %v17285_v52 }
 0x31f   : > { %v1888_v19 = vpack.c.bf16 %v17275_v47, %v17275_v47  ;;  %1919 = vst.msk [vmem:[#allocation2 + $0x8] sm:$0xf] %vm668_vm1, %v1887_v26 }
 0x320   : > { %v2136_v22 = vpop.permute.xlu1 %2135  ;;  %1945 = vst.msk [vmem:[#allocation2 + $0x210] sm:$0xf] %vm668_vm1, %v1913_v50  ;;  %v12627_v50 = vld [vmem:[%s16624_s1 + $0xa8] sm:$0xff] }
 0x321   : > { %v2173_v6 = vmul.f32 %v2136_v22, %v17273_v25  ;;  %v1898_v22 = vpack.c.bf16 %v17276_v14, %v17276_v14  ;;  %1920 = vst.msk [vmem:[#allocation2 + $0x1c] sm:$0xf] %vm668_vm1, %v1888_v19  ;;  %v17279_v19 = vld [vmem:[#allocation31_spill] sm:$0xff]  ;;  %v12481_v25 = vld [vmem:[%s16624_s1 + $0x30] sm:$0xff] }
 0x323   : > { %v2205_v37 = vpack.c.bf16 %v2173_v6, %v2173_v6  ;;  %4368 = vmatmul.bf16.gmra.mxu3 %v9575_v16  ;;  %1930 = vst.msk [vmem:[#allocation2 + $0xe4] sm:$0xf] %vm668_vm1, %v1898_v22  ;;  %v12462_v6 = vld [vmem:[%s16624_s1 + $0x10] sm:$0xff]  ;;  %v17277_v16 = vld [vmem:[#allocation19_spill] sm:$0xff]  ;;  %v1901_v22 = vpack.c.bf16 %v17279_v19, %v17279_v19 }
 0x325   : > { %2299 = vrot.lane.b32.xlu0 %v2205_v37, %s10749_s9  ;;  %2401 = vperm.xlu2 %10553, %v12435_v10   ;;  %v1890_v37 = vpack.c.bf16 %v17277_v16, %v17277_v16  ;;  %1933 = vst.msk [vmem:[#allocation2 + $0x120] sm:$0xf] %vm668_vm1, %v1901_v22  ;;  %v17281_v22 = vld [vmem:[#allocation38_spill] sm:$0xff] }
 0x326   : > { %2301 = vrot.lane.b32.xlu1 %v2206_v27, %s10749_s9  ;;  %v17278_v27 = vld [vmem:[#allocation33_spill] sm:$0xff]  ;;  %v1894_v39 = vpack.c.bf16 %v17281_v22, %v17281_v22 }
 0x327   : > { %v1891_v26 = vpack.c.bf16 %v17278_v27, %v17278_v27  ;;  %1922 = vst.msk [vmem:[#allocation2 + $0x44] sm:$0xf] %vm668_vm1, %v1890_v37  ;;  %v12492_v37 = vld [vmem:[%s16624_s1 + $0x20] sm:$0xff] }
 0x328   : > { %1926 = vst.msk [vmem:[#allocation2 + $0x94] sm:$0xf] %vm668_vm1, %v1894_v39  ;;  %v1897_v39 = vpack.c.bf16 %v11242_v3, %v11242_v3 }
 0x329   : > { %1923 = vst.msk [vmem:[#allocation2 + $0x58] sm:$0xf] %vm668_vm1, %v1891_v26 }
 0x32a   : > { %1929 = vst.msk [vmem:[#allocation2 + $0xd0] sm:$0xf] %vm668_vm1, %v1897_v39 }
 0x32d   : > { %2406 = vperm.xlu0 %10554, %v12451_v48   ;;  %2416 = vperm.xlu2 %10553, %v12456_v49  }
 0x32e   : > { %2411 = vperm.xlu1 %10555, %v12462_v6  }
 0x335   : > { %2431 = vperm.xlu0 %10554, %v12481_v25   ;;  %2426 = vperm.xlu2 %10553, %v12486_v18  }
 0x336   : > { %2421 = vperm.xlu1 %10555, %v12492_v37   ;;  %v4334_v26 = vpop.f32.mrf.mxu3 }
 0x337   : > { %v12499_v5 = vadd.f32 %v4334_v26, %v4246_v44  ;;  %v2250_v0 = vpop.permute.xlu2 %2249  ;;  %v12515_v44 = vld [vmem:[%s16624_s1 + $0x40] sm:$0xff]  ;;  %v17283_v26 = vld [vmem:[#allocation41_spill] sm:$0xff] }
 0x338   : > { %2340 = vst.msk [vmem:[#allocation2 + $0x6c] sm:$0xf] %vm1085_vm2, %v2250_v0 }
 0x339   : > { %17280 = vst [vmem:[#allocation50_spill] sm:$0xff] %v12499_v5  ;;  %v1907_v5 = vpack.c.bf16 %v17283_v26, %v17283_v26  ;;  %v1912_v26 = vpack.c.bf16 %v11371_v32, %v11371_v32  ;;  %v1915_v32 = vpack.c.bf16 %v11387_v23, %v11387_v23 }
 0x33b   : > { %1939 = vst.msk [vmem:[#allocation2 + $0x198] sm:$0xf] %vm668_vm1, %v1907_v5  ;;  %v17284_v5 = vld [vmem:[#allocation43_spill] sm:$0xff] }
 0x33c   : > { %v1910_v8 = vpack.c.bf16 %v17284_v5, %v17284_v5  ;;  %v12607_v5 = vld [vmem:[%s16624_s1 + $0x80] sm:$0xff]  ;;  %1944 = vst.msk [vmem:[#allocation2 + $0x1fc] sm:$0xf] %vm668_vm1, %v1912_v26 }
 0x33d   : > { %2446 = vperm.xlu0 %10554, %v12510_v42   ;;  %2441 = vperm.xlu2 %10553, %v12515_v44   ;;  %1947 = vst.msk [vmem:[#allocation2 + $0x238] sm:$0xf] %vm668_vm1, %v1915_v32  ;;  %v16870_v32 = vmov 7  }
 0x33e   : > { %2436 = vperm.xlu1 %10555, %v12521_v9   ;;  %1942 = vst.msk [vmem:[#allocation2 + $0x1d4] sm:$0xf] %vm668_vm1, %v1910_v8  ;;  %v12597_v8 = vld [vmem:[%s16624_s1 + $0x90] sm:$0xff] }
 0x33f   : > { %v2256_v0 = vpop.permute.xlu2 %2255 }
 0x340   : > { %2343 = vst.msk [vmem:[#allocation2 + $0xa8] sm:$0xf] %vm1085_vm2, %v2256_v0 }
 0x345   : > { %2461 = vperm.xlu0 %10554, %v12538_v58   ;;  %2456 = vperm.xlu2 %10553, %v12543_v59  }
 0x346   : > { %2451 = vperm.xlu1 %10555, %v12549_v31  }
 0x347   : > { %v2240_v35 = vpop.permute.xlu0 %2239  ;;  %v2242_v0 = vpop.permute.xlu1 %2241 }
 0x348   : > { %2335 = vst.msk [vmem:[#allocation2 + $0x8] sm:$0xf] %vm1085_vm2, %v2240_v35  ;;  %v2262_v39 = vpop.permute.xlu2 %2261  ;;  %v12572_v35 = vld [vmem:[%s16624_s1 + $0x70] sm:$0xff] }
 0x349   : > { %2336 = vst.msk [vmem:[#allocation2 + $0x1c] sm:$0xf] %vm1085_vm2, %v2242_v0 }
 0x34a   : > { %2346 = vst.msk [vmem:[#allocation2 + $0xe4] sm:$0xf] %vm1085_vm2, %v2262_v39  ;;  %v1902_v39 = vpack.c.bf16 %v11171_v2, %v11171_v2 }
 0x34c   : > { %1934 = vst.msk [vmem:[#allocation2 + $0x134] sm:$0xf] %vm668_vm1, %v1902_v39  ;;  %v1906_v39 = vpack.c.bf16 %v11334_v41, %v11334_v41 }
 0x34d   : > { %2476 = vperm.xlu0 %10554, %v12567_v62   ;;  %2471 = vperm.xlu2 %10553, %v12572_v35  }
 0x34e   : > { %2466 = vperm.xlu1 %10555, %v12577_v15   ;;  %1938 = vst.msk [vmem:[#allocation2 + $0x184] sm:$0xf] %vm668_vm1, %v1906_v39  ;;  %v12655_v39 = vld [vmem:[%s16624_s1 + $0xc0] sm:$0xff] }
 0x34f   : > { %v2246_v0 = vpop.permute.xlu0 %2245 }
 0x350   : > { %2338 = vst.msk [vmem:[#allocation2 + $0x44] sm:$0xf] %vm1085_vm2, %v2246_v0  ;;  %v2248_v4 = vpop.permute.xlu1 %2247  ;;  %v2268_v47 = vpop.permute.xlu2 %2267  ;;  %v12602_v0 = vld [vmem:[%s16624_s1 + $0x88] sm:$0xff] }
 0x351   : > { %2339 = vst.msk [vmem:[#allocation2 + $0x58] sm:$0xf] %vm1085_vm2, %v2248_v4 }
 0x352   : > { %2349 = vst.msk [vmem:[#allocation2 + $0x120] sm:$0xf] %vm1085_vm2, %v2268_v47  ;;  %v1905_v47 = vpack.c.bf16 %v11189_v43, %v11189_v43  ;;  %v12637_v43 = vld [vmem:[%s16624_s1 + $0x98] sm:$0xff] }
 0x354   : > { %1937 = vst.msk [vmem:[#allocation2 + $0x170] sm:$0xf] %vm668_vm1, %v1905_v47  ;;  %v1909_v47 = vpack.c.bf16 %v11355_v24, %v11355_v24 }
 0x355   : > { %2491 = vperm.xlu0 %10554, %v12597_v8   ;;  %2486 = vperm.xlu2 %10553, %v12602_v0  }
 0x356   : > { %2481 = vperm.xlu1 %10555, %v12607_v5   ;;  %1941 = vst.msk [vmem:[#allocation2 + $0x1c0] sm:$0xf] %vm668_vm1, %v1909_v47  ;;  %v12687_v47 = vld [vmem:[%s16624_s1 + $0xc8] sm:$0xff] }
 0x357   : > { %v2252_v4 = vpop.permute.xlu0 %2251 }
 0x358   : > { %2341 = vst.msk [vmem:[#allocation2 + $0x80] sm:$0xf] %vm1085_vm2, %v2252_v4  ;;  %v2254_v52 = vpop.permute.xlu1 %2253  ;;  %v2274_v2 = vpop.permute.xlu2 %2273  ;;  %v12632_v4 = vld [vmem:[%s16624_s1 + $0xa0] sm:$0xff] }
 0x359   : > { %2342 = vst.msk [vmem:[#allocation2 + $0x94] sm:$0xf] %vm1085_vm2, %v2254_v52  ;;  %v1908_v52 = vpack.c.bf16 %v11240_v45, %v11240_v45 }
 0x35a   : > { %2352 = vst.msk [vmem:[#allocation2 + $0x15c] sm:$0xf] %vm1085_vm2, %v2274_v2 }
 0x35b   : > { %1940 = vst.msk [vmem:[#allocation2 + $0x1ac] sm:$0xf] %vm668_vm1, %v1908_v52  ;;  %v12682_v52 = vld [vmem:[%s16624_s1 + $0xd8] sm:$0xff] }
 0x35d   : > { %2506 = vperm.xlu0 %10554, %v12627_v50   ;;  %2501 = vperm.xlu2 %10553, %v12632_v4  }
 0x35e   : > { %2496 = vperm.xlu1 %10555, %v12637_v43  }
 0x35f   : > { %v2258_v2 = vpop.permute.xlu0 %2257 }
 0x360   : > { %2344 = vst.msk [vmem:[#allocation2 + $0xbc] sm:$0xf] %vm1085_vm2, %v2258_v2  ;;  %v2260_v30 = vpop.permute.xlu1 %2259  ;;  %v2280_v41 = vpop.permute.xlu2 %2279  ;;  %v12665_v2 = vld [vmem:[%s16624_s1 + $0xb0] sm:$0xff] }
 0x361   : > { %2345 = vst.msk [vmem:[#allocation2 + $0xd0] sm:$0xf] %vm1085_vm2, %v2260_v30  ;;  %v1911_v30 = vpack.c.bf16 %v11257_v28, %v11257_v28 }
 0x362   : > { %2355 = vst.msk [vmem:[#allocation2 + $0x198] sm:$0xf] %vm1085_vm2, %v2280_v41 }
 0x363   : > { %1943 = vst.msk [vmem:[#allocation2 + $0x1e8] sm:$0xf] %vm668_vm1, %v1911_v30  ;;  %v1917_v30 = vpack.c.bf16 %v17130_v40, %v17130_v40 }
 0x365   : > { %2521 = vperm.xlu0 %10554, %v12655_v39   ;;  %2516 = vperm.xlu2 %10553, %v12660_v1   ;;  %1949 = vst.msk [vmem:[#allocation2 + $0x260] sm:$0xf] %vm668_vm1, %v1917_v30 }
 0x366   : > { %2511 = vperm.xlu1 %10555, %v12665_v2  }
 0x367   : > { %v2264_v41 = vpop.permute.xlu0 %2263 }
 0x368   : > { %2347 = vst.msk [vmem:[#allocation2 + $0xf8] sm:$0xf] %vm1085_vm2, %v2264_v41  ;;  %v2266_v45 = vpop.permute.xlu1 %2265  ;;  %v2286_v24 = vpop.permute.xlu2 %2285 }
 0x369   : > { %2348 = vst.msk [vmem:[#allocation2 + $0x10c] sm:$0xf] %vm1085_vm2, %v2266_v45 }
 0x36a   : > { %2358 = vst.msk [vmem:[#allocation2 + $0x1d4] sm:$0xf] %vm1085_vm2, %v2286_v24  ;;  %v1914_v24 = vpack.c.bf16 %v11306_v51, %v11306_v51 }
 0x36c   : > { %1946 = vst.msk [vmem:[#allocation2 + $0x224] sm:$0xf] %vm668_vm1, %v1914_v24 }
 0x36d   : > { %2536 = vperm.xlu0 %10554, %v12682_v52   ;;  %2531 = vperm.xlu2 %10553, %v12318_v17   ;;  %v12704_v17 = vld [vmem:[%s16624_s1 + $0xf0] sm:$0xff] }
 0x36e   : > { %2526 = vperm.xlu1 %10555, %v12687_v47  }
 0x36f   : > { %v2270_v45 = vpop.permute.xlu0 %2269 }
 0x370   : > { %2350 = vst.msk [vmem:[#allocation2 + $0x134] sm:$0xf] %vm1085_vm2, %v2270_v45  ;;  %v2272_v41 = vpop.permute.xlu1 %2271  ;;  %v2292_v28 = vpop.permute.xlu2 %2291 }
 0x371   : > { %2351 = vst.msk [vmem:[#allocation2 + $0x148] sm:$0xf] %vm1085_vm2, %v2272_v41  ;;  %v1918_v41 = vpack.c.bf16 %v17116_v57, %v17116_v57 }
 0x372   : > { %2361 = vst.msk [vmem:[#allocation2 + $0x210] sm:$0xf] %vm1085_vm2, %v2292_v28 }
 0x373   : > { %1950 = vst.msk [vmem:[#allocation2 + $0x274] sm:$0xf] %vm668_vm1, %v1918_v41 }
 0x375   : > { %2551 = vperm.xlu0 %10554, %v12704_v17   ;;  %2546 = vperm.xlu2 %10553, %v12334_v54  }
 0x376   : > { %2541 = vperm.xlu1 %10555, %v12313_v33  }
 0x377   : > { %v2276_v26 = vpop.permute.xlu0 %2275 }
 0x378   : > { %2353 = vst.msk [vmem:[#allocation2 + $0x170] sm:$0xf] %vm1085_vm2, %v2276_v26  ;;  %v2278_v28 = vpop.permute.xlu1 %2277  ;;  %v2298_v45 = vpop.permute.xlu2 %2297  ;;  %v17286_v26 = vld [vmem:[#allocation18_spill] sm:$0xff] }
 0x379   : > { %2354 = vst.msk [vmem:[#allocation2 + $0x184] sm:$0xf] %vm1085_vm2, %v2278_v28 }
 0x37a   : > { %2364 = vst.msk [vmem:[#allocation2 + $0x24c] sm:$0xf] %vm1085_vm2, %v2298_v45  ;;  %v17287_v45 = vld [vmem:[#allocation37_spill] sm:$0xff] }
 0x37d   : > { %10557 = vset.pattern.permute.xlu0 %v16870_v32  ;;  %10556 = vset.pattern.permute.xlu2 %v16870_v32 }
 0x37e   : > { %2556 = vperm.xlu1 %10555, %v12329_v61   ;;  %2694 = vperm.xlu0 %10557, %v12451_v48  }
 0x37f   : > { %v2282_v33 = vpop.permute.xlu0 %2281  ;;  %2689 = vperm.xlu2 %10556, %v12435_v10  }
 0x380   : > { %2356 = vst.msk [vmem:[#allocation2 + $0x1ac] sm:$0xf] %vm1085_vm2, %v2282_v33  ;;  %v2284_v54 = vpop.permute.xlu1 %2283  ;;  %v2402_v24 = vpop.permute.xlu2 %2401 }
 0x381   : > { %2357 = vst.msk [vmem:[#allocation2 + $0x1c0] sm:$0xf] %vm1085_vm2, %v2284_v54  ;;  %v2559_v30 = vmul.f32 %v2402_v24, %v17286_v26  ;;  %v17288_v54 = vld [vmem:[#allocation104_spill] sm:$0xff] }
 0x383   : > { %v2591_v28 = vpack.c.bf16 %v2559_v30, %v2559_v30  ;;  %v17289_v30 = vld [vmem:[#allocation105_spill] sm:$0xff] }
 0x385   : > { %2623 = vst.msk [vmem:[#allocation2 + $0xc] sm:$0xf] %vm668_vm1, %v2591_v28 }
 0x386   : > { %10558 = vset.pattern.permute.xlu1 %v16870_v32  ;;  %2719 = vperm.xlu0 %10557, %v12481_v25  }
 0x387   : > { %2699 = vperm.xlu1 %10558, %v12462_v6   ;;  %v2288_v61 = vpop.permute.xlu0 %2287  ;;  %2704 = vperm.xlu2 %10556, %v12456_v49  }
 0x388   : > { %2359 = vst.msk [vmem:[#allocation2 + $0x1e8] sm:$0xf] %vm1085_vm2, %v2288_v61  ;;  %v2290_v10 = vpop.permute.xlu1 %2289  ;;  %v2417_v48 = vpop.permute.xlu2 %2416 }
 0x389   : > { %2360 = vst.msk [vmem:[#allocation2 + $0x1fc] sm:$0xf] %vm1085_vm2, %v2290_v10  ;;  %v2562_v41 = vmul.f32 %v2417_v48, %v17287_v45  ;;  %v17291_v45 = vld [vmem:[#allocation95_spill] sm:$0xff] }
 0x38b   : > { %v2594_v33 = vpack.c.bf16 %v2562_v41, %v2562_v41 }
 0x38d   : > { %2626 = vst.msk [vmem:[#allocation2 + $0x48] sm:$0xf] %vm668_vm1, %v2594_v33  ;;  %v17292_v33 = vld [vmem:[#allocation106_spill] sm:$0xff] }
 0x38e   : > { %2734 = vperm.xlu0 %10557, %v12510_v42  }
 0x38f   : > { %2709 = vperm.xlu1 %10558, %v12492_v37   ;;  %v2294_v25 = vpop.permute.xlu0 %2293  ;;  %2714 = vperm.xlu2 %10556, %v12486_v18  }
 0x390   : > { %2362 = vst.msk [vmem:[#allocation2 + $0x224] sm:$0xf] %vm1085_vm2, %v2294_v25  ;;  %v2296_v49 = vpop.permute.xlu1 %2295  ;;  %v2427_v6 = vpop.permute.xlu2 %2426 }
 0x391   : > { %2363 = vst.msk [vmem:[#allocation2 + $0x238] sm:$0xf] %vm1085_vm2, %v2296_v49  ;;  %v2564_v24 = vmul.f32 %v2427_v6, %v17288_v54 }
 0x393   : > { %v2596_v26 = vpack.c.bf16 %v2564_v24, %v2564_v24 }
 0x395   : > { %2628 = vst.msk [vmem:[#allocation2 + $0x70] sm:$0xf] %vm668_vm1, %v2596_v26 }
 0x396   : > { %2749 = vperm.xlu0 %10557, %v12538_v58  }
 0x397   : > { %2724 = vperm.xlu1 %10558, %v12521_v9   ;;  %v2300_v42 = vpop.permute.xlu0 %2299  ;;  %2729 = vperm.xlu2 %10556, %v12515_v44   ;;  %v17290_v9 = vld [vmem:[#allocation20_spill] sm:$0xff] }
 0x398   : > { %2365 = vst.msk [vmem:[#allocation2 + $0x260] sm:$0xf] %vm1085_vm2, %v2300_v42  ;;  %v2302_v18 = vpop.permute.xlu1 %2301  ;;  %v2442_v37 = vpop.permute.xlu2 %2441 }
 0x399   : > { %2366 = vst.msk [vmem:[#allocation2 + $0x274] sm:$0xf] %vm1085_vm2, %v2302_v18  ;;  %v2567_v28 = vmul.f32 %v2442_v37, %v17289_v30  ;;  %v17294_v18 = vld [vmem:[#allocation23_spill] sm:$0xff] }
 0x39b   : > { %v2599_v61 = vpack.c.bf16 %v2567_v28, %v2567_v28  ;;  %v17295_v28 = vld [vmem:[#allocation107_spill] sm:$0xff] }
 0x39d   : > { %2631 = vst.msk [vmem:[#allocation2 + $0xac] sm:$0xf] %vm668_vm1, %v2599_v61 }
 0x39e   : > { %2764 = vperm.xlu0 %10557, %v12567_v62  }
 0x39f   : > { %2739 = vperm.xlu1 %10558, %v12549_v31   ;;  %v2407_v58 = vpop.permute.xlu0 %2406  ;;  %2744 = vperm.xlu2 %10556, %v12543_v59   ;;  %v17293_v31 = vld [vmem:[#allocation40_spill] sm:$0xff] }
 0x3a0   : > { %v2560_v44 = vmul.f32 %v2407_v58, %v17290_v9  ;;  %v2412_v10 = vpop.permute.xlu1 %2411  ;;  %v2457_v48 = vpop.permute.xlu2 %2456 }
 0x3a1   : > { %v2561_v41 = vmul.f32 %v2412_v10, %v17291_v45  ;;  %v2570_v25 = vmul.f32 %v2457_v48, %v17292_v33 }
 0x3a2   : > { %v2592_v49 = vpack.c.bf16 %v2560_v44, %v2560_v44 }
 0x3a3   : > { %v2593_v6 = vpack.c.bf16 %v2561_v41, %v2561_v41  ;;  %v2602_v24 = vpack.c.bf16 %v2570_v25, %v2570_v25  ;;  %v17297_v41 = vld [vmem:[#allocation27_spill] sm:$0xff] }
 0x3a4   : > { %2624 = vst.msk [vmem:[#allocation2 + $0x20] sm:$0xf] %vm668_vm1, %v2592_v49  ;;  %v17298_v49 = vld [vmem:[#allocation108_spill] sm:$0xff] }
 0x3a5   : > { %2625 = vst.msk [vmem:[#allocation2 + $0x34] sm:$0xf] %vm668_vm1, %v2593_v6 }
 0x3a6   : > { %2779 = vperm.xlu0 %10557, %v12597_v8   ;;  %2634 = vst.msk [vmem:[#allocation2 + $0xe8] sm:$0xf] %vm668_vm1, %v2602_v24 }
 0x3a7   : > { %2754 = vperm.xlu1 %10558, %v12577_v15   ;;  %v2432_v59 = vpop.permute.xlu0 %2431  ;;  %2759 = vperm.xlu2 %10556, %v12572_v35   ;;  %v17296_v35 = vld [vmem:[#allocation46_spill] sm:$0xff] }
 0x3a8   : > { %v2565_v62 = vmul.f32 %v2432_v59, %v17293_v31  ;;  %v2422_v26 = vpop.permute.xlu1 %2421  ;;  %v2472_v42 = vpop.permute.xlu2 %2471 }
 0x3a9   : > { %v2563_v37 = vmul.f32 %v2422_v26, %v17294_v18  ;;  %v2573_v61 = vmul.f32 %v2472_v42, %v17295_v28  ;;  %v17300_v42 = vld [vmem:[#allocation29_spill] sm:$0xff] }
 0x3aa   : > { %v2597_v58 = vpack.c.bf16 %v2565_v62, %v2565_v62 }
 0x3ab   : > { %v2595_v9 = vpack.c.bf16 %v2563_v37, %v2563_v37  ;;  %v2605_v44 = vpack.c.bf16 %v2573_v61, %v2573_v61 }
 0x3ac   : > { %2629 = vst.msk [vmem:[#allocation2 + $0x84] sm:$0xf] %vm668_vm1, %v2597_v58 }
 0x3ad   : > { %2627 = vst.msk [vmem:[#allocation2 + $0x5c] sm:$0xf] %vm668_vm1, %v2595_v9 }
 0x3ae   : > { %2794 = vperm.xlu0 %10557, %v12627_v50   ;;  %2637 = vst.msk [vmem:[#allocation2 + $0x124] sm:$0xf] %vm668_vm1, %v2605_v44 }
 0x3af   : > { %2769 = vperm.xlu1 %10558, %v12607_v5   ;;  %v2447_v15 = vpop.permute.xlu0 %2446  ;;  %2774 = vperm.xlu2 %10556, %v12602_v0   ;;  %v17299_v0 = vld [vmem:[#allocation48_spill] sm:$0xff] }
 0x3b0   : > { %v2568_v8 = vmul.f32 %v2447_v15, %v17296_v35  ;;  %v2437_v10 = vpop.permute.xlu1 %2436  ;;  %v2487_v48 = vpop.permute.xlu2 %2486  ;;  %v17302_v35 = vld [vmem:[#allocation36_spill] sm:$0xff] }
 0x3b1   : > { %v2566_v25 = vmul.f32 %v2437_v10, %v17297_v41  ;;  %v2576_v6 = vmul.f32 %v2487_v48, %v17298_v49 }
 0x3b2   : > { %v2600_v24 = vpack.c.bf16 %v2568_v8, %v2568_v8 }
 0x3b3   : > { %v2598_v59 = vpack.c.bf16 %v2566_v25, %v2566_v25  ;;  %v2608_v31 = vpack.c.bf16 %v2576_v6, %v2576_v6  ;;  %v17303_v6 = vld [vmem:[#allocation53_spill] sm:$0xff] }
 0x3b4   : > { %2632 = vst.msk [vmem:[#allocation2 + $0xc0] sm:$0xf] %vm668_vm1, %v2600_v24 }
 0x3b5   : > { %2630 = vst.msk [vmem:[#allocation2 + $0x98] sm:$0xf] %vm668_vm1, %v2598_v59 }
 0x3b6   : > { %2809 = vperm.xlu0 %10557, %v12655_v39   ;;  %2640 = vst.msk [vmem:[#allocation2 + $0x160] sm:$0xf] %vm668_vm1, %v2608_v31 }
 0x3b7   : > { %2784 = vperm.xlu1 %10558, %v12637_v43   ;;  %v2462_v5 = vpop.permute.xlu0 %2461  ;;  %2789 = vperm.xlu2 %10556, %v12632_v4   ;;  %v17301_v4 = vld [vmem:[#allocation51_spill] sm:$0xff] }
 0x3b8   : > { %v2571_v50 = vmul.f32 %v2462_v5, %v17299_v0  ;;  %v2452_v62 = vpop.permute.xlu1 %2451  ;;  %v2502_v26 = vpop.permute.xlu2 %2501  ;;  %v17304_v5 = vld [vmem:[#allocation39_spill] sm:$0xff] }
 0x3b9   : > { %v2569_v18 = vmul.f32 %v2452_v62, %v17300_v42  ;;  %v2579_v37 = vmul.f32 %v2502_v26, %v12176_v20 }
 0x3ba   : > { %v2603_v61 = vpack.c.bf16 %v2571_v50, %v2571_v50  ;;  %v17305_v50 = vld [vmem:[#allocation109_spill] sm:$0xff] }
 0x3bb   : > { %v2601_v58 = vpack.c.bf16 %v2569_v18, %v2569_v18  ;;  %v2611_v9 = vpack.c.bf16 %v2579_v37, %v2579_v37 }
 0x3bc   : > { %2635 = vst.msk [vmem:[#allocation2 + $0xfc] sm:$0xf] %vm668_vm1, %v2603_v61  ;;  %v17306_v61 = vld [vmem:[#allocation56_spill] sm:$0xff] }
 0x3bd   : > { %2633 = vst.msk [vmem:[#allocation2 + $0xd4] sm:$0xf] %vm668_vm1, %v2601_v58 }
 0x3be   : > { %2824 = vperm.xlu0 %10557, %v12682_v52   ;;  %2643 = vst.msk [vmem:[#allocation2 + $0x19c] sm:$0xf] %vm668_vm1, %v2611_v9 }
 0x3bf   : > { %2799 = vperm.xlu1 %10558, %v12665_v2   ;;  %v2477_v43 = vpop.permute.xlu0 %2476  ;;  %2804 = vperm.xlu2 %10556, %v12660_v1   ;;  %v12797_v2 = vld [vmem:[%s16624_s1 + $0xd0] sm:$0xff] }
 0x3c0   : > { %v2574_v39 = vmul.f32 %v2477_v43, %v17301_v4  ;;  %v2467_v44 = vpop.permute.xlu1 %2466  ;;  %v2517_v15 = vpop.permute.xlu2 %2516  ;;  %v17307_v4 = vld [vmem:[#allocation45_spill] sm:$0xff] }
 0x3c1   : > { %v2572_v8 = vmul.f32 %v2467_v44, %v17302_v35  ;;  %v2582_v10 = vmul.f32 %v2517_v15, %v12192_v29 }
 0x3c2   : > { %v2606_v48 = vpack.c.bf16 %v2574_v39, %v2574_v39 }
 0x3c3   : > { %v2604_v41 = vpack.c.bf16 %v2572_v8, %v2572_v8  ;;  %v2614_v25 = vpack.c.bf16 %v2582_v10, %v2582_v10  ;;  %v12829_v10 = vld [vmem:[%s16624_s1 + $0xf8] sm:$0xff] }
 0x3c4   : > { %2638 = vst.msk [vmem:[#allocation2 + $0x138] sm:$0xf] %vm668_vm1, %v2606_v48 }
 0x3c5   : > { %2636 = vst.msk [vmem:[#allocation2 + $0x110] sm:$0xf] %vm668_vm1, %v2604_v41 }
 0x3c6   : > { %2839 = vperm.xlu0 %10557, %v12704_v17   ;;  %2646 = vst.msk [vmem:[#allocation2 + $0x1d8] sm:$0xf] %vm668_vm1, %v2614_v25  ;;  %v12816_v17 = vld [vmem:[%s16624_s1 + $0xe8] sm:$0xff] }
 0x3c7   : > { %2814 = vperm.xlu1 %10558, %v12687_v47   ;;  %v2492_v52 = vpop.permute.xlu0 %2491  ;;  %2819 = vperm.xlu2 %10556, %v12797_v2   ;;  %v12811_v47 = vld [vmem:[%s16624_s1 + $0xe0] sm:$0xff] }
 0x3c8   : > { %v2577_v24 = vmul.f32 %v2492_v52, %v17303_v6  ;;  %v2482_v59 = vpop.permute.xlu1 %2481  ;;  %v2532_v31 = vpop.permute.xlu2 %2531  ;;  %v17308_v52 = vld [vmem:[#allocation47_spill] sm:$0xff] }
 0x3c9   : > { %v2575_v0 = vmul.f32 %v2482_v59, %v17304_v5  ;;  %v2585_v62 = vmul.f32 %v2532_v31, %v17305_v50 }
 0x3ca   : > { %v2609_v26 = vpack.c.bf16 %v2577_v24, %v2577_v24 }
 0x3cb   : > { %v2607_v42 = vpack.c.bf16 %v2575_v0, %v2575_v0  ;;  %v2617_v18 = vpack.c.bf16 %v2585_v62, %v2585_v62 }
 0x3cc   : > { %2641 = vst.msk [vmem:[#allocation2 + $0x174] sm:$0xf] %vm668_vm1, %v2609_v26 }
 0x3cd   : > { %2639 = vst.msk [vmem:[#allocation2 + $0x14c] sm:$0xf] %vm668_vm1, %v2607_v42 }
 0x3ce   : > { %2649 = vst.msk [vmem:[#allocation2 + $0x214] sm:$0xf] %vm668_vm1, %v2617_v18 }
 0x3cf   : > { %2829 = vperm.xlu1 %10558, %v12811_v47   ;;  %v2507_v37 = vpop.permute.xlu0 %2506  ;;  %2834 = vperm.xlu2 %10556, %v12816_v17  }
 0x3d0   : > { %v2580_v58 = vmul.f32 %v2507_v37, %v17306_v61  ;;  %v2497_v9 = vpop.permute.xlu1 %2496  ;;  %v2547_v43 = vpop.permute.xlu2 %2546 }
 0x3d1   : > { %v2578_v39 = vmul.f32 %v2497_v9, %v17307_v4  ;;  %v2588_v44 = vmul.f32 %v2547_v43, %v12228_v36  ;;  %v17309_v43 = vld [vmem:[#allocation28_spill] sm:$0xff] }
 0x3d2   : > { %v2612_v15 = vpack.c.bf16 %v2580_v58, %v2580_v58 }
 0x3d3   : > { %v2610_v35 = vpack.c.bf16 %v2578_v39, %v2578_v39  ;;  %v2620_v8 = vpack.c.bf16 %v2588_v44, %v2588_v44 }
 0x3d4   : > { %2644 = vst.msk [vmem:[#allocation2 + $0x1b0] sm:$0xf] %vm668_vm1, %v2612_v15 }
 0x3d5   : > { %2642 = vst.msk [vmem:[#allocation2 + $0x188] sm:$0xf] %vm668_vm1, %v2610_v35 }
 0x3d6   : > { %2652 = vst.msk [vmem:[#allocation2 + $0x250] sm:$0xf] %vm668_vm1, %v2620_v8  ;;  %v17310_v8 = vld [vmem:[#allocation30_spill] sm:$0xff] }
 0x3d7   : > { %2844 = vperm.xlu1 %10558, %v12829_v10   ;;  %v2522_v48 = vpop.permute.xlu0 %2521 }
 0x3d8   : > { %v2583_v41 = vmul.f32 %v2522_v48, %v17234_v11  ;;  %v2512_v25 = vpop.permute.xlu1 %2511 }
 0x3d9   : > { %v2581_v6 = vmul.f32 %v2512_v25, %v17308_v52  ;;  %v2690_v24 = vpop.permute.xlu2 %2689 }
 0x3da   : > { %v2615_v59 = vpack.c.bf16 %v2583_v41, %v2583_v41  ;;  %v2847_v31 = vmul.f32 %v2690_v24, %v17265_v12 }
 0x3db   : > { %v2613_v5 = vpack.c.bf16 %v2581_v6, %v2581_v6 }
 0x3dc   : > { %2647 = vst.msk [vmem:[#allocation2 + $0x1ec] sm:$0xf] %vm668_vm1, %v2615_v59  ;;  %v2879_v0 = vpack.c.bf16 %v2847_v31, %v2847_v31 }
 0x3dd   : > { %2645 = vst.msk [vmem:[#allocation2 + $0x1c4] sm:$0xf] %vm668_vm1, %v2613_v5 }
 0x3de   : > { %2943 = vrot.lane.b32.xlu2 %v2879_v0, %s10749_s9 }
 0x3df   : > { %v2537_v62 = vpop.permute.xlu0 %2536 }
 0x3e0   : > { %v2586_v26 = vmul.f32 %v2537_v62, %v17236_v21  ;;  %v2527_v42 = vpop.permute.xlu1 %2526 }
 0x3e1   : > { %v2584_v11 = vmul.f32 %v2527_v42, %v17233_v38  ;;  %v2705_v18 = vpop.permute.xlu2 %2704 }
 0x3e2   : > { %v2618_v37 = vpack.c.bf16 %v2586_v26, %v2586_v26  ;;  %v2850_v61 = vmul.f32 %v2705_v18, %v17269_v7 }
 0x3e3   : > { %v2616_v58 = vpack.c.bf16 %v2584_v11, %v2584_v11 }
 0x3e4   : > { %2650 = vst.msk [vmem:[#allocation2 + $0x228] sm:$0xf] %vm668_vm1, %v2618_v37  ;;  %v2882_v12 = vpack.c.bf16 %v2850_v61, %v2850_v61 }
 0x3e5   : > { %2648 = vst.msk [vmem:[#allocation2 + $0x200] sm:$0xf] %vm668_vm1, %v2616_v58 }
 0x3e6   : > { %2949 = vrot.lane.b32.xlu2 %v2882_v12, %s10749_s9 }
 0x3e7   : > { %v2552_v9 = vpop.permute.xlu0 %2551 }
 0x3e8   : > { %v2589_v4 = vmul.f32 %v2552_v9, %v17309_v43  ;;  %v2542_v39 = vpop.permute.xlu1 %2541 }
 0x3e9   : > { %v2587_v21 = vmul.f32 %v2542_v39, %v12244_v63  ;;  %v2715_v44 = vpop.permute.xlu2 %2714 }
 0x3ea   : > { %v2621_v38 = vpack.c.bf16 %v2589_v4, %v2589_v4 }
 0x3eb   : > { %v2619_v15 = vpack.c.bf16 %v2587_v21, %v2587_v21 }
 0x3ec   : > { %2653 = vst.msk [vmem:[#allocation2 + $0x264] sm:$0xf] %vm668_vm1, %v2621_v38 }
 0x3ed   : > { %2651 = vst.msk [vmem:[#allocation2 + $0x23c] sm:$0xf] %vm668_vm1, %v2619_v15 }
 0x3f0   : > { %v2557_v7 = vpop.permute.xlu1 %2556  ;;  %v2695_v35 = vpop.permute.xlu0 %2694 }
 0x3f1   : > { %v2590_v48 = vmul.f32 %v2557_v7, %v17310_v8  ;;  %v2848_v41 = vmul.f32 %v2695_v35, %v17277_v16  ;;  %v2730_v25 = vpop.permute.xlu2 %2729  ;;  %v2852_v16 = vmul.f32 %v2715_v44, %v17281_v22 }
 0x3f3   : > { %v2622_v52 = vpack.c.bf16 %v2590_v48, %v2590_v48  ;;  %v2880_v6 = vpack.c.bf16 %v2848_v41, %v2848_v41  ;;  %v2884_v61 = vpack.c.bf16 %v2852_v16, %v2852_v16 }
 0x3f5   : > { %2654 = vst.msk [vmem:[#allocation2 + $0x278] sm:$0xf] %vm668_vm1, %v2622_v52  ;;  %2945 = vrot.lane.b32.xlu0 %v2880_v6, %s10749_s9  ;;  %v17312_v6 = vld [vmem:[#allocation32_spill] sm:$0xff] }
 0x3f8   : > { %v2720_v24 = vpop.permute.xlu0 %2719 }
 0x3f9   : > { %v2853_v59 = vmul.f32 %v2720_v24, %v17271_v13  ;;  %v2700_v31 = vpop.permute.xlu1 %2699  ;;  %v2745_v5 = vpop.permute.xlu2 %2744 }
 0x3fa   : > { %v2849_v0 = vmul.f32 %v2700_v31, %v17278_v27  ;;  %v2855_v27 = vmul.f32 %v2730_v25, %v11242_v3  ;;  %v2858_v44 = vmul.f32 %v2745_v5, %v11276_v46  ;;  %v17311_v46 = vld [vmem:[#allocation41_spill] sm:$0xff]  ;;  %v17313_v5 = vld [vmem:[#allocation52_spill] sm:$0xff] }
 0x3fb   : > { %v2885_v62 = vpack.c.bf16 %v2853_v59, %v2853_v59 }
 0x3fc   : > { %v2881_v26 = vpack.c.bf16 %v2849_v0, %v2849_v0  ;;  %v2887_v4 = vpack.c.bf16 %v2855_v27, %v2855_v27  ;;  %v2890_v7 = vpack.c.bf16 %v2858_v44, %v2858_v44  ;;  %v16868_v44 = vmov 8  }
 0x3fd   : > { %2955 = vrot.lane.b32.xlu2 %v2885_v62, %s10749_s9  ;;  %10559 = vset.pattern.permute.xlu1 %v16868_v44 }
 0x3fe   : > { %2947 = vrot.lane.b32.xlu1 %v2881_v26, %s10749_s9  ;;  %10561 = vset.pattern.permute.xlu0 %v16868_v44 }
 0x3ff   : > { %10560 = vset.pattern.permute.xlu2 %v16868_v44 }
 0x400   : > { %v2735_v42 = vpop.permute.xlu0 %2734 }
 0x401   : > { %v2856_v11 = vmul.f32 %v2735_v42, %v17276_v14  ;;  %v2710_v18 = vpop.permute.xlu1 %2709  ;;  %v2760_v37 = vpop.permute.xlu2 %2759 }
 0x402   : > { %v2851_v13 = vmul.f32 %v2710_v18, %v11088_v53  ;;  %v2861_v48 = vmul.f32 %v2760_v37, %v11308_v56  ;;  %v17314_v56 = vld [vmem:[#allocation43_spill] sm:$0xff] }
 0x403   : > { %v2888_v58 = vpack.c.bf16 %v2856_v11, %v2856_v11  ;;  %v17315_v11 = vld [vmem:[#allocation35_spill] sm:$0xff] }
 0x404   : > { %v2883_v12 = vpack.c.bf16 %v2851_v13, %v2851_v13 }
 0x405   : > { %2961 = vrot.lane.b32.xlu2 %v2888_v58, %s10749_s9  ;;  %v17316_v58 = vld [vmem:[#allocation55_spill] sm:$0xff] }
 0x406   : > { %2951 = vrot.lane.b32.xlu0 %v2883_v12, %s10749_s9  ;;  %2953 = vrot.lane.b32.xlu1 %v2884_v61, %s10749_s9 }
 0x408   : > { %v2750_v9 = vpop.permute.xlu0 %2749 }
 0x409   : > { %v2859_v22 = vmul.f32 %v2750_v9, %v17279_v19  ;;  %v2725_v43 = vpop.permute.xlu1 %2724  ;;  %v2775_v14 = vpop.permute.xlu2 %2774  ;;  %v17317_v9 = vld [vmem:[#allocation49_spill] sm:$0xff] }
 0x40a   : > { %v2854_v39 = vmul.f32 %v2725_v43, %v11110_v34  ;;  %v2864_v0 = vmul.f32 %v2775_v14, %v17313_v5 }
 0x40b   : > { %v2891_v21 = vpack.c.bf16 %v2859_v22, %v2859_v22 }
 0x40c   : > { %v2886_v53 = vpack.c.bf16 %v2854_v39, %v2854_v39  ;;  %v2896_v42 = vpack.c.bf16 %v2864_v0, %v2864_v0 }
 0x40d   : > { %2967 = vrot.lane.b32.xlu2 %v2891_v21, %s10749_s9 }
 0x40e   : > { %2957 = vrot.lane.b32.xlu0 %v2886_v53, %s10749_s9  ;;  %2959 = vrot.lane.b32.xlu1 %v2887_v4, %s10749_s9  ;;  %v17318_v4 = vld [vmem:[#allocation42_spill] sm:$0xff] }
 0x410   : > { %v2765_v38 = vpop.permute.xlu0 %2764 }
 0x411   : > { %v2862_v3 = vmul.f32 %v2765_v38, %v17282_v55  ;;  %v2740_v15 = vpop.permute.xlu1 %2739  ;;  %v2790_v19 = vpop.permute.xlu2 %2789  ;;  %v2893_v55 = vpack.c.bf16 %v2861_v48, %v2861_v48  ;;  %v17319_v38 = vld [vmem:[#allocation57_spill] sm:$0xff] }
 0x412   : > { %v2857_v35 = vmul.f32 %v2740_v15, %v11127_v60  ;;  %v2867_v12 = vmul.f32 %v2790_v19, %v17316_v58  ;;  %v10347_v19 = vld [vmem:[%s16625_s2 + $0xf8] sm:$0xff]  ;;  %v10342_v58 = vld [vmem:[%s16625_s2 + $0xd0] sm:$0xff] }
 0x413   : > { %v2894_v8 = vpack.c.bf16 %v2862_v3, %v2862_v3  ;;  %4463 = vmatpush.bf16.msrb.mxu3 %v10347_v19  ;;  %v12984_v19 = vld [vmem:[%s16624_s1 + $0x48] sm:$0xff] }
 0x414   : > { %v2889_v34 = vpack.c.bf16 %v2857_v35, %v2857_v35  ;;  %v2899_v14 = vpack.c.bf16 %v2867_v12, %v2867_v12  ;;  %v17320_v35 = vld [vmem:[#allocation59_spill] sm:$0xff] }
 0x415   : > { %2973 = vrot.lane.b32.xlu2 %v2894_v8, %s10749_s9 }
 0x416   : > { %2963 = vrot.lane.b32.xlu0 %v2889_v34, %s10749_s9  ;;  %2965 = vrot.lane.b32.xlu1 %v2890_v7, %s10749_s9 }
 0x418   : > { %v2780_v41 = vpop.permute.xlu0 %2779 }
 0x419   : > { %v2865_v25 = vmul.f32 %v2780_v41, %v17311_v46  ;;  %v2755_v52 = vpop.permute.xlu1 %2754  ;;  %v2805_v59 = vpop.permute.xlu2 %2804  ;;  %v17321_v41 = vld [vmem:[#allocation44_spill] sm:$0xff] }
 0x41a   : > { %v2860_v24 = vmul.f32 %v2755_v52, %v17312_v6  ;;  %v2870_v3 = vmul.f32 %v2805_v59, %v17319_v38  ;;  %v10346_v6 = vld [vmem:[%s16625_s2 + $0xf0] sm:$0xff] }
 0x41b   : > { %v2897_v31 = vpack.c.bf16 %v2865_v25, %v2865_v25  ;;  %4464 = vmatpush.bf16.msrb.mxu3 %v10346_v6 }
 0x41c   : > { %v2892_v60 = vpack.c.bf16 %v2860_v24, %v2860_v24  ;;  %v2902_v48 = vpack.c.bf16 %v2870_v3, %v2870_v3  ;;  %v12975_v3 = vld [vmem:[%s16624_s1 + $0x38] sm:$0xff] }
 0x41d   : > { %2979 = vrot.lane.b32.xlu2 %v2897_v31, %s10749_s9  ;;  %v10345_v31 = vld [vmem:[%s16625_s2 + $0xe8] sm:$0xff] }
 0x41e   : > { %2969 = vrot.lane.b32.xlu0 %v2892_v60, %s10749_s9  ;;  %2971 = vrot.lane.b32.xlu1 %v2893_v55, %s10749_s9  ;;  %v17322_v60 = vld [vmem:[#allocation24_spill] sm:$0xff] }
 0x41f   : > { %4465 = vmatpush.bf16.msrb.mxu3 %v10345_v31 }
 0x420   : > { %v2795_v62 = vpop.permute.xlu0 %2794 }
 0x421   : > { %v2868_v26 = vmul.f32 %v2795_v62, %v17314_v56  ;;  %v2770_v16 = vpop.permute.xlu1 %2769  ;;  %v2820_v13 = vpop.permute.xlu2 %2819 }
 0x422   : > { %v2863_v18 = vmul.f32 %v2770_v16, %v17315_v11  ;;  %v2873_v55 = vmul.f32 %v2820_v13, %v11387_v23 }
 0x423   : > { %v2900_v37 = vpack.c.bf16 %v2868_v26, %v2868_v26 }
 0x424   : > { %v2895_v61 = vpack.c.bf16 %v2863_v18, %v2863_v18  ;;  %v2905_v62 = vpack.c.bf16 %v2873_v55, %v2873_v55  ;;  %v13017_v55 = vld [vmem:[%s16624_s1 + $0x78] sm:$0xff] }
 0x425   : > { %2985 = vrot.lane.b32.xlu2 %v2900_v37, %s10749_s9 }
 0x426   : > { %2975 = vrot.lane.b32.xlu0 %v2895_v61, %s10749_s9  ;;  %2977 = vrot.lane.b32.xlu1 %v2896_v42, %s10749_s9  ;;  %v10344_v42 = vld [vmem:[%s16625_s2 + $0xe0] sm:$0xff] }
 0x427   : > { %4466 = vmatpush.bf16.msrb.mxu3 %v10344_v42 }
 0x428   : > { %v2810_v27 = vpop.permute.xlu0 %2809 }
 0x429   : > { %v2871_v22 = vmul.f32 %v2810_v27, %v17317_v9  ;;  %v2785_v43 = vpop.permute.xlu1 %2784  ;;  %v2835_v15 = vpop.permute.xlu2 %2834  ;;  %v17323_v27 = vld [vmem:[#allocation15_spill] sm:$0xff] }
 0x42a   : > { %v2866_v39 = vmul.f32 %v2785_v43, %v17318_v4  ;;  %v2876_v16 = vmul.f32 %v2835_v15, %v17116_v57  ;;  %v12933_v57 = vld [vmem:[%s16624_s1 + $0x8] sm:$0xff]  ;;  %v10340_v4 = vld [vmem:[%s16625_s2 + $0xc0] sm:$0xff] }
 0x42b   : > { %v2903_v21 = vpack.c.bf16 %v2871_v22, %v2871_v22  ;;  %v12946_v22 = vld [vmem:[%s16624_s1] sm:$0xff]  ;;  %v3076_v15 = vld [vmem:[%s16624_s1 + $0x28] sm:$0xff] }
 0x42c   : > { %v2898_v53 = vpack.c.bf16 %v2866_v39, %v2866_v39  ;;  %v2908_v37 = vpack.c.bf16 %v2876_v16, %v2876_v16  ;;  %v12959_v39 = vld [vmem:[%s16624_s1 + $0x10] sm:$0xff]  ;;  %v3088_v16 = vld [vmem:[%s16624_s1 + $0x88] sm:$0xff] }
 0x42d   : > { %2991 = vrot.lane.b32.xlu2 %v2903_v21, %s10749_s9  ;;  %v3074_v21 = vld [vmem:[%s16624_s1 + $0x18] sm:$0xff] }
 0x42e   : > { %2981 = vrot.lane.b32.xlu0 %v2898_v53, %s10749_s9  ;;  %2983 = vrot.lane.b32.xlu1 %v2899_v14, %s10749_s9  ;;  %v3075_v14 = vld [vmem:[%s16624_s1 + $0x20] sm:$0xff]  ;;  %v12968_v53 = vld [vmem:[%s16624_s1 + $0x30] sm:$0xff] }
 0x430   : > { %v2825_v7 = vpop.permute.xlu0 %2824 }
 0x431   : > { %v2874_v8 = vmul.f32 %v2825_v7, %v17320_v35  ;;  %v2800_v34 = vpop.permute.xlu1 %2799  ;;  %v12991_v35 = vld [vmem:[%s16624_s1 + $0x50] sm:$0xff] }
 0x432   : > { %v2869_v46 = vmul.f32 %v2800_v34, %v17321_v41  ;;  %v13000_v34 = vld [vmem:[%s16624_s1 + $0x60] sm:$0xff] }
 0x433   : > { %v2906_v25 = vpack.c.bf16 %v2874_v8, %v2874_v8  ;;  %v3079_v8 = vld [vmem:[%s16624_s1 + $0x40] sm:$0xff] }
 0x434   : > { %v2901_v52 = vpack.c.bf16 %v2869_v46, %v2869_v46  ;;  %v13008_v46 = vld [vmem:[%s16624_s1 + $0x68] sm:$0xff] }
 0x435   : > { %2997 = vrot.lane.b32.xlu2 %v2906_v25, %s10749_s9  ;;  %v3082_v25 = vld [vmem:[%s16624_s1 + $0x58] sm:$0xff] }
 0x436   : > { %2987 = vrot.lane.b32.xlu0 %v2901_v52, %s10749_s9  ;;  %2989 = vrot.lane.b32.xlu1 %v2902_v48, %s10749_s9 }
 0x438   : > { %v2840_v24 = vpop.permute.xlu0 %2839  ;;  %v2944_v59 = vpop.permute.xlu2 %2943 }
 0x439   : > { %v2877_v5 = vmul.f32 %v2840_v24, %v17322_v60  ;;  %v2815_v0 = vpop.permute.xlu1 %2814  ;;  %3039 = vst.msk [vmem:[#allocation2 + $0xc] sm:$0xf] %vm1085_vm2, %v2944_v59  ;;  %v13025_v60 = vld [vmem:[%s16624_s1 + $0x80] sm:$0xff] }
 0x43a   : > { %v2872_v56 = vmul.f32 %v2815_v0, %v11306_v51  ;;  %v10343_v51 = vld [vmem:[%s16625_s2 + $0xd8] sm:$0xff]  ;;  %v13034_v0 = vld [vmem:[%s16624_s1 + $0x90] sm:$0xff] }
 0x43b   : > { %v2909_v23 = vpack.c.bf16 %v2877_v5, %v2877_v5  ;;  %4467 = vmatpush.bf16.msrb.mxu3 %v10343_v51  ;;  %v3085_v5 = vld [vmem:[%s16624_s1 + $0x70] sm:$0xff]  ;;  %v13052_v51 = vld [vmem:[%s16624_s1 + $0xa8] sm:$0xff] }
 0x43c   : > { %v2904_v26 = vpack.c.bf16 %v2872_v56, %v2872_v56 }
 0x43d   : > { %3003 = vrot.lane.b32.xlu2 %v2909_v23, %s10749_s9 }
 0x43e   : > { %2993 = vrot.lane.b32.xlu0 %v2904_v26, %s10749_s9  ;;  %2995 = vrot.lane.b32.xlu1 %v2905_v62, %s10749_s9  ;;  %v13043_v26 = vld [vmem:[%s16624_s1 + $0x98] sm:$0xff] }
 0x43f   : > { %4468 = vmatpush.bf16.msrb.mxu3 %v10342_v58  ;;  %v13061_v58 = vld [vmem:[%s16624_s1 + $0xb0] sm:$0xff] }
 0x440   : > { %v2950_v11 = vpop.permute.xlu2 %2949  ;;  %v10237_v52 = vld [vmem:[#allocation2 + $0xc] sm:$0xf] }
 0x441   : > { %v2830_v18 = vpop.permute.xlu1 %2829  ;;  %3042 = vst.msk [vmem:[#allocation2 + $0x48] sm:$0xf] %vm1085_vm2, %v2950_v11 }
 0x442   : > { %v2875_v61 = vmul.f32 %v2830_v18, %v17130_v40  ;;  %v10341_v40 = vld [vmem:[%s16625_s2 + $0xc8] sm:$0xff] }
 0x443   : > { %4469 = vmatpush.bf16.msrb.mxu3 %v10341_v40  ;;  %v13070_v40 = vld [vmem:[%s16624_s1 + $0xc0] sm:$0xff] }
 0x444   : > { %v2907_v13 = vpack.c.bf16 %v2875_v61, %v2875_v61 }
 0x445   : > { %3110 = vperm.xlu2 %10560, %v12933_v57  }
 0x446   : > { %2999 = vrot.lane.b32.xlu0 %v2907_v13, %s10749_s9  ;;  %3001 = vrot.lane.b32.xlu1 %v2908_v37, %s10749_s9 }
 0x447   : > { %4470 = vmatpush.bf16.msrb.mxu3 %v10340_v4  ;;  %v13081_v4 = vld [vmem:[%s16624_s1 + $0xc8] sm:$0xff] }
 0x448   : > { %v9300_v11 = vld [vmem:[#allocation2 + $0x44] sm:$0xf0] }
 0x449   : > { %v2845_v12 = vpop.permute.xlu1 %2844 }
 0x44a   : > { %v2878_v9 = vmul.f32 %v2845_v12, %v17323_v27  ;;  %v3091_v12 = vld [vmem:[%s16624_s1 + $0xa0] sm:$0xff]  ;;  %v13072_v27 = vpop.f32.mrf.mxu3 }
 0x44c   : > { %v2910_v43 = vpack.c.bf16 %v2878_v9, %v2878_v9 }
 0x44d   : > { %3125 = vperm.xlu2 %10560, %v3075_v14  }
 0x44e   : > { %3005 = vrot.lane.b32.xlu0 %v2910_v43, %s10749_s9  ;;  %3105 = vperm.xlu1 %10559, %v12946_v22  }
 0x455   : > { %3135 = vperm.xlu2 %10560, %v12968_v53  }
 0x456   : > { %3115 = vperm.xlu0 %10561, %v12959_v39   ;;  %3120 = vperm.xlu1 %10559, %v3074_v21   ;;  %v13086_v21 = vld [vmem:[%s16624_s1 + $0xd8] sm:$0xff] }
 0x457   : > { %v2956_v38 = vpop.permute.xlu2 %2955 }
 0x458   : > { %3045 = vst.msk [vmem:[#allocation2 + $0x84] sm:$0xf] %vm1085_vm2, %v2956_v38 }
 0x45d   : > { %3150 = vperm.xlu2 %10560, %v12984_v19  }
 0x45e   : > { %3140 = vperm.xlu0 %10561, %v12975_v3   ;;  %3130 = vperm.xlu1 %10559, %v3076_v15  }
 0x45f   : > { %v2962_v7 = vpop.permute.xlu2 %2961 }
 0x460   : > { %3048 = vst.msk [vmem:[#allocation2 + $0xc0] sm:$0xf] %vm1085_vm2, %v2962_v7 }
 0x465   : > { %3165 = vperm.xlu2 %10560, %v13000_v34  }
 0x466   : > { %3155 = vperm.xlu0 %10561, %v12991_v35   ;;  %3145 = vperm.xlu1 %10559, %v3079_v8  }
 0x467   : > { %v2946_v48 = vpop.permute.xlu0 %2945  ;;  %v2968_v41 = vpop.permute.xlu2 %2967 }
 0x468   : > { %3040 = vst.msk [vmem:[#allocation2 + $0x20] sm:$0xf] %vm1085_vm2, %v2946_v48 }
 0x469   : > { %3051 = vst.msk [vmem:[#allocation2 + $0xfc] sm:$0xf] %vm1085_vm2, %v2968_v41 }
 0x46d   : > { %3180 = vperm.xlu2 %10560, %v13017_v55  }
 0x46e   : > { %3170 = vperm.xlu0 %10561, %v13008_v46   ;;  %3160 = vperm.xlu1 %10559, %v3082_v25   ;;  %v13092_v25 = vpop.f32.mrf.mxu3 }
 0x46f   : > { %v2974_v6 = vpop.permute.xlu2 %2973  ;;  %v9280_v24 = vld [vmem:[#allocation2 + $0x1c] sm:$0xf0] }
 0x470   : > { %v2948_v59 = vpop.permute.xlu1 %2947  ;;  %3054 = vst.msk [vmem:[#allocation2 + $0x138] sm:$0xf] %vm1085_vm2, %v2974_v6  ;;  %v9283_v31 = vor.u32 %v10237_v52, %v9280_v24  ;;  %v13099_v52 = vld [vmem:[%s16624_s1 + $0xf0] sm:$0xff] }
 0x471   : > { %3041 = vst.msk [vmem:[#allocation2 + $0x34] sm:$0xf] %vm1085_vm2, %v2948_v59 }
 0x472   : > { %4471 = vmatmul.bf16.vlgmr.msrb.gmra.mxu3 %v9283_v31 }
 0x475   : > { %3195 = vperm.xlu2 %10560, %v13034_v0  }
 0x476   : > { %3185 = vperm.xlu0 %10561, %v13025_v60   ;;  %3175 = vperm.xlu1 %10559, %v3085_v5   ;;  %v13107_v59 = vpop.f32.mrf.mxu3 }
 0x477   : > { %v2980_v62 = vpop.permute.xlu2 %2979  ;;  %17324 = vst [vmem:[#allocation58_spill] sm:$0xff] %v13107_v59 }
 0x478   : > { %v2952_v56 = vpop.permute.xlu0 %2951  ;;  %v2954_v23 = vpop.permute.xlu1 %2953  ;;  %3057 = vst.msk [vmem:[#allocation2 + $0x174] sm:$0xf] %vm1085_vm2, %v2980_v62  ;;  %v10242_v42 = vld [vmem:[#allocation2 + $0x34] sm:$0xf] }
 0x479   : > { %3043 = vst.msk [vmem:[#allocation2 + $0x5c] sm:$0xf] %vm1085_vm2, %v2952_v56  ;;  %v9303_v13 = vor.u32 %v10242_v42, %v9300_v11  ;;  %v17327_v42 = vld [vmem:[#allocation81_spill] sm:$0xff] }
 0x47a   : > { %3044 = vst.msk [vmem:[#allocation2 + $0x70] sm:$0xf] %vm1085_vm2, %v2954_v23 }
 0x47d   : > { %3210 = vperm.xlu2 %10560, %v13052_v51  }
 0x47e   : > { %3200 = vperm.xlu0 %10561, %v13043_v26   ;;  %3190 = vperm.xlu1 %10559, %v3088_v16   ;;  %v13114_v16 = vpop.f32.mrf.mxu3 }
 0x47f   : > { %v2986_v18 = vpop.permute.xlu2 %2985  ;;  %17326 = vst [vmem:[#allocation60_spill] sm:$0xff] %v13114_v16 }
 0x480   : > { %v2958_v37 = vpop.permute.xlu0 %2957  ;;  %v2960_v61 = vpop.permute.xlu1 %2959  ;;  %3060 = vst.msk [vmem:[#allocation2 + $0x1b0] sm:$0xf] %vm1085_vm2, %v2986_v18  ;;  %v10247_v38 = vld [vmem:[#allocation2 + $0x5c] sm:$0xf] }
 0x481   : > { %3046 = vst.msk [vmem:[#allocation2 + $0x98] sm:$0xf] %vm1085_vm2, %v2958_v37  ;;  %v9320_v15 = vld [vmem:[#allocation2 + $0x6c] sm:$0xf0] }
 0x482   : > { %3047 = vst.msk [vmem:[#allocation2 + $0xac] sm:$0xf] %vm1085_vm2, %v2960_v61  ;;  %4476 = vmatmul.bf16.gmra.mxu3 %v9303_v13  ;;  %v9323_v41 = vor.u32 %v10247_v38, %v9320_v15  ;;  %v17328_v13 = vld [vmem:[#allocation86_spill] sm:$0xff] }
 0x485   : > { %3225 = vperm.xlu2 %10560, %v13070_v40  }
 0x486   : > { %3215 = vperm.xlu0 %10561, %v13061_v58   ;;  %3205 = vperm.xlu1 %10559, %v3091_v12  }
 0x487   : > { %v2992_v9 = vpop.permute.xlu2 %2991 }
 0x488   : > { %v2964_v43 = vpop.permute.xlu0 %2963  ;;  %v2966_v14 = vpop.permute.xlu1 %2965  ;;  %3063 = vst.msk [vmem:[#allocation2 + $0x1ec] sm:$0xf] %vm1085_vm2, %v2992_v9  ;;  %v9340_v31 = vld [vmem:[#allocation2 + $0x94] sm:$0xf0] }
 0x489   : > { %3049 = vst.msk [vmem:[#allocation2 + $0xd4] sm:$0xf] %vm1085_vm2, %v2964_v43  ;;  %v10257_v61 = vld [vmem:[#allocation2 + $0xac] sm:$0xf]  ;;  %v13124_v9 = vpop.f32.mrf.mxu3  ;;  %v9360_v43 = vld [vmem:[#allocation2 + $0xbc] sm:$0xf0] }
 0x48a   : > { %3050 = vst.msk [vmem:[#allocation2 + $0xe8] sm:$0xf] %vm1085_vm2, %v2966_v14  ;;  %v9363_v38 = vor.u32 %v10257_v61, %v9360_v43  ;;  %v17336_v43 = vld [vmem:[#allocation14_spill] sm:$0xff] }
 0x48b   : > { %17329 = vst [vmem:[#allocation78_spill] sm:$0xff] %v13124_v9 }
 0x48d   : > { %3240 = vperm.xlu2 %10560, %v13086_v21  }
 0x48e   : > { %3230 = vperm.xlu0 %10561, %v13081_v4   ;;  %3220 = vperm.xlu1 %10559, %v12660_v1  }
 0x48f   : > { %v2998_v7 = vpop.permute.xlu2 %2997 }
 0x490   : > { %v2970_v8 = vpop.permute.xlu0 %2969  ;;  %v2972_v48 = vpop.permute.xlu1 %2971  ;;  %3066 = vst.msk [vmem:[#allocation2 + $0x228] sm:$0xf] %vm1085_vm2, %v2998_v7 }
 0x491   : > { %3052 = vst.msk [vmem:[#allocation2 + $0x110] sm:$0xf] %vm1085_vm2, %v2970_v8  ;;  %v17330_v8 = vld [vmem:[#allocation84_spill] sm:$0xff] }
 0x492   : > { %3053 = vst.msk [vmem:[#allocation2 + $0x124] sm:$0xf] %vm1085_vm2, %v2972_v48  ;;  %4481 = vmatmul.bf16.gmra.mxu3 %v9323_v41 }
 0x495   : > { %3255 = vperm.xlu2 %10560, %v13099_v52  }
 0x496   : > { %3245 = vperm.xlu0 %10561, %v12811_v47   ;;  %3235 = vperm.xlu1 %10559, %v12797_v2   ;;  %v10252_v47 = vld [vmem:[#allocation2 + $0x84] sm:$0xf]  ;;  %v17325_v2 = vmov 0  }
 0x497   : > { %v3004_v1 = vpop.permute.xlu2 %3003  ;;  %v9343_v56 = vor.u32 %v10252_v47, %v9340_v31  ;;  %v10262_v31 = vld [vmem:[#allocation2 + $0xd4] sm:$0xf]  ;;  %v9380_v47 = vld [vmem:[#allocation2 + $0xe4] sm:$0xf0] }
 0x498   : > { %v2976_v6 = vpop.permute.xlu0 %2975  ;;  %v2978_v24 = vpop.permute.xlu1 %2977  ;;  %3069 = vst.msk [vmem:[#allocation2 + $0x264] sm:$0xf] %vm1085_vm2, %v3004_v1 }
 0x499   : > { %3055 = vst.msk [vmem:[#allocation2 + $0x14c] sm:$0xf] %vm1085_vm2, %v2976_v6  ;;  %v13133_v6 = vpop.f32.mrf.mxu3 }
 0x49a   : > { %3056 = vst.msk [vmem:[#allocation2 + $0x160] sm:$0xf] %vm1085_vm2, %v2978_v24 }
 0x49b   : > { %17331 = vst [vmem:[#allocation25_spill] sm:$0xff] %v13133_v6 }
 0x49d   : > { %10564 = vset.pattern.permute.xlu2 %v17325_v2 }
 0x49e   : > { %3260 = vperm.xlu0 %10561, %v12829_v10   ;;  %3250 = vperm.xlu1 %10559, %v12816_v17  }
 0x49f   : > { %v3111_v23 = vpop.permute.xlu2 %3110 }
 0x4a0   : > { %v2982_v5 = vpop.permute.xlu0 %2981  ;;  %v2984_v62 = vpop.permute.xlu1 %2983  ;;  %v3264_v11 = vmul.f32 %v3111_v23, %v17327_v42  ;;  %v9383_v23 = vor.u32 %v10262_v31, %v9380_v47 }
 0x4a1   : > { %3058 = vst.msk [vmem:[#allocation2 + $0x188] sm:$0xf] %vm1085_vm2, %v2982_v5 }
 0x4a2   : > { %3059 = vst.msk [vmem:[#allocation2 + $0x19c] sm:$0xf] %vm1085_vm2, %v2984_v62  ;;  %4486 = vmatmul.bf16.gmra.mxu3 %v9343_v56  ;;  %v3296_v17 = vpack.c.bf16 %v3264_v11, %v3264_v11 }
 0x4a4   : > { %3328 = vst.msk [vmem:[#allocation2 + $0x24] sm:$0xf] %vm668_vm1, %v3296_v17 }
 0x4a6   : > { %10562 = vset.pattern.permute.xlu0 %v17325_v2  ;;  %10563 = vset.pattern.permute.xlu1 %v17325_v2  ;;  %v17332_v2 = vld [vmem:[#allocation88_spill] sm:$0xff] }
 0x4a7   : > { %446 = vperm.xlu0 %10562, %v12946_v22   ;;  %v3126_v37 = vpop.permute.xlu2 %3125 }
 0x4a8   : > { %v2988_v10 = vpop.permute.xlu0 %2987  ;;  %v2990_v18 = vpop.permute.xlu1 %2989  ;;  %v3267_v12 = vmul.f32 %v3126_v37, %v17328_v13 }
 0x4a9   : > { %3061 = vst.msk [vmem:[#allocation2 + $0x1c4] sm:$0xf] %vm1085_vm2, %v2988_v10  ;;  %v17334_v10 = vld [vmem:[#allocation91_spill] sm:$0xff]  ;;  %v13143_v37 = vpop.f32.mrf.mxu3 }
 0x4aa   : > { %3062 = vst.msk [vmem:[#allocation2 + $0x1d8] sm:$0xf] %vm1085_vm2, %v2990_v18  ;;  %v3299_v15 = vpack.c.bf16 %v3267_v12, %v3267_v12 }
 0x4ab   : > { %17335 = vst [vmem:[#allocation76_spill] sm:$0xff] %v13143_v37 }
 0x4ac   : > { %3331 = vst.msk [vmem:[#allocation2 + $0x60] sm:$0xf] %vm668_vm1, %v3299_v15 }
 0x4af   : > { %451 = vperm.xlu0 %10562, %v12933_v57   ;;  %v3136_v7 = vpop.permute.xlu2 %3135 }
 0x4b0   : > { %v2994_v14 = vpop.permute.xlu0 %2993  ;;  %v2996_v22 = vpop.permute.xlu1 %2995  ;;  %v3269_v48 = vmul.f32 %v3136_v7, %v17330_v8 }
 0x4b1   : > { %3064 = vst.msk [vmem:[#allocation2 + $0x200] sm:$0xf] %vm1085_vm2, %v2994_v14 }
 0x4b2   : > { %3065 = vst.msk [vmem:[#allocation2 + $0x214] sm:$0xf] %vm1085_vm2, %v2996_v22  ;;  %4491 = vmatmul.bf16.gmra.mxu3 %v9363_v38  ;;  %v3301_v41 = vpack.c.bf16 %v3269_v48, %v3269_v48  ;;  %v17337_v22 = vld [vmem:[#allocation79_spill] sm:$0xff]  ;;  %v13150_v48 = vpop.f32.mrf.mxu3 }
 0x4b3   : > { %17338 = vst [vmem:[#allocation10_spill] sm:$0xff] %v13150_v48 }
 0x4b4   : > { %3333 = vst.msk [vmem:[#allocation2 + $0x88] sm:$0xf] %vm668_vm1, %v3301_v41  ;;  %v9400_v41 = vld [vmem:[#allocation2 + $0x10c] sm:$0xf0] }
 0x4b7   : > { %476 = vperm.xlu0 %10562, %v12968_v53   ;;  %v3151_v24 = vpop.permute.xlu2 %3150  ;;  %v17333_v53 = vld [vmem:[#allocation11_spill] sm:$0xff] }
 0x4b8   : > { %v3000_v57 = vpop.permute.xlu0 %2999  ;;  %v3002_v1 = vpop.permute.xlu1 %3001  ;;  %v3272_v5 = vmul.f32 %v3151_v24, %v17332_v2 }
 0x4b9   : > { %3067 = vst.msk [vmem:[#allocation2 + $0x23c] sm:$0xf] %vm1085_vm2, %v3000_v57  ;;  %v17339_v57 = vld [vmem:[#allocation93_spill] sm:$0xff] }
 0x4ba   : > { %3068 = vst.msk [vmem:[#allocation2 + $0x250] sm:$0xf] %vm1085_vm2, %v3002_v1  ;;  %v3304_v42 = vpack.c.bf16 %v3272_v5, %v3272_v5  ;;  %v17340_v5 = vld [vmem:[#allocation90_spill] sm:$0xff] }
 0x4bc   : > { %3336 = vst.msk [vmem:[#allocation2 + $0xc4] sm:$0xf] %vm668_vm1, %v3304_v42 }
 0x4bf   : > { %491 = vperm.xlu0 %10562, %v12984_v19   ;;  %v3166_v17 = vpop.permute.xlu2 %3165 }
 0x4c0   : > { %v3006_v62 = vpop.permute.xlu0 %3005  ;;  %v3106_v56 = vpop.permute.xlu1 %3105  ;;  %v3275_v18 = vmul.f32 %v3166_v17, %v17334_v10 }
 0x4c1   : > { %3070 = vst.msk [vmem:[#allocation2 + $0x278] sm:$0xf] %vm1085_vm2, %v3006_v62  ;;  %v3263_v11 = vmul.f32 %v3106_v56, %v17333_v53  ;;  %v17341_v56 = vld [vmem:[#allocation8_spill] sm:$0xff] }
 0x4c2   : > { %4496 = vmatmul.bf16.gmra.mxu3 %v9383_v23  ;;  %v3307_v13 = vpack.c.bf16 %v3275_v18, %v3275_v18  ;;  %v17342_v53 = vld [vmem:[#allocation96_spill] sm:$0xff] }
 0x4c3   : > { %v3295_v61 = vpack.c.bf16 %v3263_v11, %v3263_v11 }
 0x4c4   : > { %3339 = vst.msk [vmem:[#allocation2 + $0x100] sm:$0xf] %vm668_vm1, %v3307_v13 }
 0x4c5   : > { %3327 = vst.msk [vmem:[#allocation2 + $0x10] sm:$0xf] %vm668_vm1, %v3295_v61 }
 0x4c7   : > { %506 = vperm.xlu0 %10562, %v13000_v34   ;;  %v3181_v15 = vpop.permute.xlu2 %3180  ;;  %v10267_v34 = vld [vmem:[#allocation2 + $0xfc] sm:$0xf] }
 0x4c8   : > { %v3116_v19 = vpop.permute.xlu0 %3115  ;;  %v3121_v12 = vpop.permute.xlu1 %3120  ;;  %v3278_v1 = vmul.f32 %v3181_v15, %v17339_v57  ;;  %v9403_v47 = vor.u32 %v10267_v34, %v9400_v41 }
 0x4c9   : > { %v3265_v14 = vmul.f32 %v3116_v19, %v17336_v43  ;;  %v3266_v38 = vmul.f32 %v3121_v12, %v17337_v22  ;;  %v17344_v19 = vld [vmem:[#allocation92_spill] sm:$0xff] }
 0x4ca   : > { %v3310_v2 = vpack.c.bf16 %v3278_v1, %v3278_v1  ;;  %v17345_v43 = vld [vmem:[#allocation12_spill] sm:$0xff] }
 0x4cb   : > { %v3297_v7 = vpack.c.bf16 %v3265_v14, %v3265_v14  ;;  %v3298_v8 = vpack.c.bf16 %v3266_v38, %v3266_v38 }
 0x4cc   : > { %3342 = vst.msk [vmem:[#allocation2 + $0x13c] sm:$0xf] %vm668_vm1, %v3310_v2 }
 0x4cd   : > { %3329 = vst.msk [vmem:[#allocation2 + $0x38] sm:$0xf] %vm668_vm1, %v3297_v7  ;;  %v10272_v7 = vld [vmem:[#allocation2 + $0x124] sm:$0xf] }
 0x4ce   : > { %3330 = vst.msk [vmem:[#allocation2 + $0x4c] sm:$0xf] %vm668_vm1, %v3298_v8  ;;  %v17346_v8 = vld [vmem:[#allocation98_spill] sm:$0xff] }
 0x4cf   : > { %521 = vperm.xlu0 %10562, %v13017_v55   ;;  %v3196_v42 = vpop.permute.xlu2 %3195  ;;  %v13162_v55 = vpop.f32.mrf.mxu3 }
 0x4d0   : > { %v3141_v24 = vpop.permute.xlu0 %3140  ;;  %v3131_v31 = vpop.permute.xlu1 %3130  ;;  %v3281_v11 = vmul.f32 %v3196_v42, %v17342_v53  ;;  %17343 = vst [vmem:[#allocation82_spill] sm:$0xff] %v13162_v55 }
 0x4d1   : > { %v3270_v62 = vmul.f32 %v3141_v24, %v17340_v5  ;;  %v3268_v23 = vmul.f32 %v3131_v31, %v17341_v56  ;;  %v17349_v5 = vld [vmem:[#allocation69_spill] sm:$0xff] }
 0x4d2   : > { %4501 = vmatmul.bf16.gmra.mxu3 %v9403_v47  ;;  %v3313_v18 = vpack.c.bf16 %v3281_v11, %v3281_v11  ;;  %v17348_v47 = vld [vmem:[#allocation94_spill] sm:$0xff] }
 0x4d3   : > { %v3302_v17 = vpack.c.bf16 %v3270_v62, %v3270_v62  ;;  %v3300_v10 = vpack.c.bf16 %v3268_v23, %v3268_v23  ;;  %v17350_v23 = vld [vmem:[#allocation100_spill] sm:$0xff] }
 0x4d4   : > { %3345 = vst.msk [vmem:[#allocation2 + $0x178] sm:$0xf] %vm668_vm1, %v3313_v18  ;;  %v17351_v18 = vld [vmem:[#allocation97_spill] sm:$0xff] }
 0x4d5   : > { %3334 = vst.msk [vmem:[#allocation2 + $0x9c] sm:$0xf] %vm668_vm1, %v3302_v17 }
 0x4d6   : > { %3332 = vst.msk [vmem:[#allocation2 + $0x74] sm:$0xf] %vm668_vm1, %v3300_v10 }
 0x4d7   : > { %536 = vperm.xlu0 %10562, %v13034_v0   ;;  %v3211_v22 = vpop.permute.xlu2 %3210  ;;  %v9420_v0 = vld [vmem:[#allocation2 + $0x134] sm:$0xf0]  ;;  %v13172_v31 = vpop.f32.mrf.mxu3 }
 0x4d8   : > { %v3156_v61 = vpop.permute.xlu0 %3155  ;;  %v3146_v13 = vpop.permute.xlu1 %3145  ;;  %v3284_v41 = vmul.f32 %v3211_v22, %v17346_v8  ;;  %v9423_v34 = vor.u32 %v10272_v7, %v9420_v0  ;;  %17347 = vst [vmem:[#allocation54_spill] sm:$0xff] %v13172_v31 }
 0x4d9   : > { %v3273_v12 = vmul.f32 %v3156_v61, %v17344_v19  ;;  %v3271_v14 = vmul.f32 %v3146_v13, %v17345_v43  ;;  %v17352_v13 = vld [vmem:[#allocation70_spill] sm:$0xff] }
 0x4da   : > { %v3316_v24 = vpack.c.bf16 %v3284_v41, %v3284_v41 }
 0x4db   : > { %v3305_v38 = vpack.c.bf16 %v3273_v12, %v3273_v12  ;;  %v3303_v15 = vpack.c.bf16 %v3271_v14, %v3271_v14 }
 0x4dc   : > { %3348 = vst.msk [vmem:[#allocation2 + $0x1b4] sm:$0xf] %vm668_vm1, %v3316_v24  ;;  %v17356_v24 = vld [vmem:[#allocation74_spill] sm:$0xff] }
 0x4dd   : > { %3337 = vst.msk [vmem:[#allocation2 + $0xd8] sm:$0xf] %vm668_vm1, %v3305_v38  ;;  %v10277_v38 = vld [vmem:[#allocation2 + $0x14c] sm:$0xf] }
 0x4de   : > { %3335 = vst.msk [vmem:[#allocation2 + $0xb0] sm:$0xf] %vm668_vm1, %v3303_v15  ;;  %v9440_v15 = vld [vmem:[#allocation2 + $0x15c] sm:$0xf0] }
 0x4df   : > { %551 = vperm.xlu0 %10562, %v13052_v51   ;;  %v3226_v56 = vpop.permute.xlu2 %3225  ;;  %v13184_v43 = vpop.f32.mrf.mxu3  ;;  %v9443_v0 = vor.u32 %v10277_v38, %v9440_v15  ;;  %v17362_v15 = vld [vmem:[#allocation103_spill] sm:$0xff] }
 0x4e0   : > { %v3171_v57 = vpop.permute.xlu0 %3170  ;;  %v3161_v1 = vpop.permute.xlu1 %3160  ;;  %v3287_v42 = vmul.f32 %v3226_v56, %v17350_v23  ;;  %17353 = vst [vmem:[#allocation87_spill] sm:$0xff] %v13184_v43 }
 0x4e1   : > { %v3276_v2 = vmul.f32 %v3171_v57, %v17348_v47  ;;  %v3274_v62 = vmul.f32 %v3161_v1, %v17349_v5  ;;  %v17355_v1 = vld [vmem:[#allocation99_spill] sm:$0xff]  ;;  %v17357_v5 = vld [vmem:[#allocation73_spill] sm:$0xff] }
 0x4e2   : > { %4506 = vmatmul.bf16.gmra.mxu3 %v9423_v34  ;;  %v3319_v51 = vpack.c.bf16 %v3287_v42, %v3287_v42 }
 0x4e3   : > { %v3308_v53 = vpack.c.bf16 %v3276_v2, %v3276_v2  ;;  %v3306_v11 = vpack.c.bf16 %v3274_v62, %v3274_v62 }
 0x4e4   : > { %3351 = vst.msk [vmem:[#allocation2 + $0x1f0] sm:$0xf] %vm668_vm1, %v3319_v51  ;;  %v17359_v51 = vld [vmem:[#allocation101_spill] sm:$0xff] }
 0x4e5   : > { %3340 = vst.msk [vmem:[#allocation2 + $0x114] sm:$0xf] %vm668_vm1, %v3308_v53  ;;  %v9386_v32 = vld [vmem:[#allocation2 + $0xd8] sm:$0xf] }
 0x4e6   : > { %3338 = vst.msk [vmem:[#allocation2 + $0xec] sm:$0xf] %vm668_vm1, %v3306_v11 }
 0x4e7   : > { %566 = vperm.xlu0 %10562, %v13070_v40   ;;  %v3241_v12 = vpop.permute.xlu2 %3240  ;;  %v17354_v40 = vld [vmem:[#allocation102_spill] sm:$0xff]  ;;  %v13194_v53 = vpop.f32.mrf.mxu3 }
 0x4e8   : > { %v3186_v17 = vpop.permute.xlu0 %3185  ;;  %v3176_v10 = vpop.permute.xlu1 %3175  ;;  %v3290_v7 = vmul.f32 %v3241_v12, %v17354_v40  ;;  %17358 = vst [vmem:[#allocation72_spill] sm:$0xff] %v13194_v53  ;;  %v5047_v53 = vld [vmem:[%s16624_s1 + $0xb0] sm:$0xff] }
 0x4e9   : > { %v3279_v61 = vmul.f32 %v3186_v17, %v17351_v18  ;;  %v3277_v19 = vmul.f32 %v3176_v10, %v17352_v13  ;;  %v17360_v10 = vld [vmem:[#allocation80_spill] sm:$0xff] }
 0x4ea   : > { %v3322_v57 = vpack.c.bf16 %v3290_v7, %v3290_v7  ;;  %v17363_v7 = vld [vmem:[#allocation85_spill] sm:$0xff] }
 0x4eb   : > { %v3311_v14 = vpack.c.bf16 %v3279_v61, %v3279_v61  ;;  %v3309_v22 = vpack.c.bf16 %v3277_v19, %v3277_v19  ;;  %v9460_v19 = vld [vmem:[#allocation2 + $0x184] sm:$0xf0] }
 0x4ec   : > { %3354 = vst.msk [vmem:[#allocation2 + $0x22c] sm:$0xf] %vm668_vm1, %v3322_v57 }
 0x4ed   : > { %3343 = vst.msk [vmem:[#allocation2 + $0x150] sm:$0xf] %vm668_vm1, %v3311_v14 }
 0x4ee   : > { %3341 = vst.msk [vmem:[#allocation2 + $0x128] sm:$0xf] %vm668_vm1, %v3309_v22 }
 0x4ef   : > { %581 = vperm.xlu0 %10562, %v13086_v21   ;;  %v3256_v2 = vpop.permute.xlu2 %3255  ;;  %v13204_v12 = vpop.f32.mrf.mxu3 }
 0x4f0   : > { %v3201_v8 = vpop.permute.xlu0 %3200  ;;  %v3191_v41 = vpop.permute.xlu1 %3190  ;;  %v3293_v62 = vmul.f32 %v3256_v2, %v17357_v5  ;;  %17361 = vst [vmem:[#allocation77_spill] sm:$0xff] %v13204_v12  ;;  %v10264_v12 = vld [vmem:[#allocation2 + $0xe0] sm:$0xf0] }
 0x4f1   : > { %v3282_v34 = vmul.f32 %v3201_v8, %v17355_v1  ;;  %v3280_v47 = vmul.f32 %v3191_v41, %v17356_v24  ;;  %v17365_v24 = vld [vmem:[#allocation89_spill] sm:$0xff] }
 0x4f2   : > { %4511 = vmatmul.bf16.gmra.mxu3 %v9443_v0  ;;  %v3325_v42 = vpack.c.bf16 %v3293_v62, %v3293_v62 }
 0x4f3   : > { %v3314_v56 = vpack.c.bf16 %v3282_v34, %v3282_v34  ;;  %v3312_v23 = vpack.c.bf16 %v3280_v47, %v3280_v47 }
 0x4f4   : > { %3357 = vst.msk [vmem:[#allocation2 + $0x268] sm:$0xf] %vm668_vm1, %v3325_v42 }
 0x4f5   : > { %3346 = vst.msk [vmem:[#allocation2 + $0x18c] sm:$0xf] %vm668_vm1, %v3314_v56  ;;  %v10287_v56 = vld [vmem:[#allocation2 + $0x19c] sm:$0xf] }
 0x4f6   : > { %3344 = vst.msk [vmem:[#allocation2 + $0x164] sm:$0xf] %vm668_vm1, %v3312_v23  ;;  %v9480_v23 = vld [vmem:[#allocation2 + $0x1ac] sm:$0xf0] }
 0x4f7   : > { %596 = vperm.xlu0 %10562, %v13099_v52   ;;  %v10282_v52 = vld [vmem:[#allocation2 + $0x174] sm:$0xf]  ;;  %v13214_v2 = vpop.f32.mrf.mxu3 }
 0x4f8   : > { %v3216_v21 = vpop.permute.xlu0 %3215  ;;  %v3206_v11 = vpop.permute.xlu1 %3205  ;;  %v9463_v38 = vor.u32 %v10282_v52, %v9460_v19  ;;  %17366 = vst [vmem:[#allocation83_spill] sm:$0xff] %v13214_v2 }
 0x4f9   : > { %v3285_v17 = vmul.f32 %v3216_v21, %v17359_v51  ;;  %v3283_v18 = vmul.f32 %v3206_v11, %v17360_v10  ;;  %v9483_v21 = vor.u32 %v10287_v56, %v9480_v23  ;;  %v17367_v11 = vld [vmem:[#allocation75_spill] sm:$0xff] }
 0x4fb   : > { %v3317_v61 = vpack.c.bf16 %v3285_v17, %v3285_v17  ;;  %v3315_v13 = vpack.c.bf16 %v3283_v18, %v3283_v18  ;;  %v17368_v17 = vld [vmem:[#allocation7_spill] sm:$0xff] }
 0x4fd   : > { %3349 = vst.msk [vmem:[#allocation2 + $0x1c8] sm:$0xf] %vm668_vm1, %v3317_v61 }
 0x4fe   : > { %3347 = vst.msk [vmem:[#allocation2 + $0x1a0] sm:$0xf] %vm668_vm1, %v3315_v13 }
 0x4ff   : > { %4781 = vperm.xlu0 %10562, %v12959_v39   ;;  %v17364_v39 = vld [vmem:[#allocation71_spill] sm:$0xff]  ;;  %v13221_v13 = vpop.f32.mrf.mxu3 }
 0x500   : > { %v3231_v14 = vpop.permute.xlu0 %3230  ;;  %v3221_v22 = vpop.permute.xlu1 %3220  ;;  %17369 = vst [vmem:[#allocation16_spill] sm:$0xff] %v13221_v13 }
 0x501   : > { %v3288_v40 = vmul.f32 %v3231_v14, %v17362_v15  ;;  %v3286_v8 = vmul.f32 %v3221_v22, %v17363_v7  ;;  %v10292_v22 = vld [vmem:[#allocation2 + $0x1c4] sm:$0xf]  ;;  %v17370_v15 = vld [vmem:[#allocation61_spill] sm:$0xff] }
 0x502   : > { %4516 = vmatmul.bf16.gmra.mxu3 %v9463_v38  ;;  %v9500_v38 = vld [vmem:[#allocation2 + $0x1d4] sm:$0xf0] }
 0x503   : > { %v3320_v41 = vpack.c.bf16 %v3288_v40, %v3288_v40  ;;  %v3318_v0 = vpack.c.bf16 %v3286_v8, %v3286_v8  ;;  %v9503_v40 = vor.u32 %v10292_v22, %v9500_v38 }
 0x505   : > { %3352 = vst.msk [vmem:[#allocation2 + $0x204] sm:$0xf] %vm668_vm1, %v3320_v41 }
 0x506   : > { %3350 = vst.msk [vmem:[#allocation2 + $0x1dc] sm:$0xf] %vm668_vm1, %v3318_v0  ;;  %v10339_v0 = vld [vmem:[%s16625_s2 + $0xb8] sm:$0xff] }
 0x507   : > { %4806 = vperm.xlu0 %10562, %v12975_v3   ;;  %v13227_v52 = vpop.f32.mrf.mxu3  ;;  %4374 = vmatpush.bf16.msrb.mxu2 %v10339_v0  ;;  %v9310_v0 = vld [vmem:[#allocation2 + $0x50] sm:$0xf] }
 0x508   : > { %v3246_v57 = vpop.permute.xlu0 %3245  ;;  %v3236_v1 = vpop.permute.xlu1 %3235 }
 0x509   : > { %v3291_v34 = vmul.f32 %v3246_v57, %v17364_v39  ;;  %v3289_v47 = vmul.f32 %v3236_v1, %v17365_v24  ;;  %v9520_v1 = vld [vmem:[#allocation2 + $0x1fc] sm:$0xf0] }
 0x50a   : > { %v17372_v24 = vld [vmem:[#allocation62_spill] sm:$0xff] }
 0x50b   : > { %v3323_v5 = vpack.c.bf16 %v3291_v34, %v3291_v34  ;;  %v3321_v62 = vpack.c.bf16 %v3289_v47, %v3289_v47  ;;  %v10297_v47 = vld [vmem:[#allocation2 + $0x1ec] sm:$0xf] }
 0x50d   : > { %3355 = vst.msk [vmem:[#allocation2 + $0x240] sm:$0xf] %vm668_vm1, %v3323_v5 }
 0x50e   : > { %3353 = vst.msk [vmem:[#allocation2 + $0x218] sm:$0xf] %vm668_vm1, %v3321_v62  ;;  %v9523_v62 = vor.u32 %v10297_v47, %v9520_v1 }
 0x50f   : > { %4821 = vperm.xlu0 %10562, %v12991_v35   ;;  %v13234_v41 = vpop.f32.mrf.mxu3 }
 0x510   : > { %v3261_v42 = vpop.permute.xlu0 %3260  ;;  %v3251_v3 = vpop.permute.xlu1 %3250 }
 0x511   : > { %v3294_v51 = vmul.f32 %v3261_v42, %v17367_v11  ;;  %v3292_v10 = vmul.f32 %v3251_v3, %v17368_v17  ;;  %v17373_v42 = vld [vmem:[#allocation63_spill] sm:$0xff] }
 0x512   : > { %4521 = vmatmul.bf16.gmra.mxu3 %v9483_v21  ;;  %v10338_v21 = vld [vmem:[%s16625_s2 + $0xb0] sm:$0xff]  ;;  %v9290_v17 = vld [vmem:[#allocation2 + $0x28] sm:$0xf] }
 0x513   : > { %v3326_v18 = vpack.c.bf16 %v3294_v51, %v3294_v51  ;;  %v3324_v61 = vpack.c.bf16 %v3292_v10, %v3292_v10  ;;  %4375 = vmatpush.bf16.msrb.mxu2 %v10338_v21  ;;  %v10302_v10 = vld [vmem:[#allocation2 + $0x214] sm:$0xf] }
 0x515   : > { %3358 = vst.msk [vmem:[#allocation2 + $0x27c] sm:$0xf] %vm668_vm1, %v3326_v18  ;;  %v10243_v18 = vld [vmem:[#allocation2 + $0x38] sm:$0xf0] }
 0x516   : > { %3356 = vst.msk [vmem:[#allocation2 + $0x254] sm:$0xf] %vm668_vm1, %v3324_v61  ;;  %v17374_v61 = vld [vmem:[#allocation64_spill] sm:$0xff] }
 0x517   : > { %4836 = vperm.xlu0 %10562, %v13008_v46   ;;  %v13248_v5 = vpop.f32.mrf.mxu3 }
 0x519   : > { %v447_v35 = vpop.permute.xlu0 %446 }
 0x51a   : > { %v604_v19 = vmul.f32 %v447_v35, %v12244_v63  ;;  %v17371_v63 = vld [vmem:[#allocation67_spill] sm:$0xff]  ;;  %v9291_v35 = vor.u32 %v10243_v18, %v9290_v17 }
 0x51b   : > { %v10253_v18 = vld [vmem:[#allocation2 + $0x88] sm:$0xf0] }
 0x51c   : > { %v636_v14 = vpack.c.bf16 %v604_v19, %v604_v19  ;;  %v9540_v19 = vld [vmem:[#allocation2 + $0x224] sm:$0xf0] }
 0x51e   : > { %669 = vst.msk [vmem:[#allocation2] sm:$0xf] %vm668_vm1, %v636_v14 }
 0x51f   : > { %1086 = vst.msk [vmem:[#allocation2] sm:$0xf] %vm1085_vm2, %v17370_v15  ;;  %4851 = vperm.xlu0 %10562, %v13025_v60  }
 0x521   : > { %v452_v7 = vpop.permute.xlu0 %451 }
 0x522   : > { %v605_v8 = vmul.f32 %v452_v7, %v12228_v36  ;;  %4526 = vmatmul.bf16.gmra.mxu3 %v9503_v40  ;;  %v13279_v40 = vld [vmem:[%s16624_s1 + $0xf8] sm:$0xff] }
 0x523   : > { %v17375_v7 = vld [vmem:[#allocation65_spill] sm:$0xff] }
 0x524   : > { %v637_v46 = vpack.c.bf16 %v605_v8, %v605_v8 }
 0x526   : > { %670 = vst.msk [vmem:[#allocation2 + $0x14] sm:$0xf] %vm668_vm1, %v637_v46  ;;  %v9270_v39 = vld [vmem:[#allocation2] sm:$0xf] }
 0x527   : > { %1087 = vst.msk [vmem:[#allocation2 + $0x14] sm:$0xf] %vm1085_vm2, %v17371_v63  ;;  %4866 = vperm.xlu0 %10562, %v13043_v26  }
 0x529   : > { %v477_v60 = vpop.permute.xlu0 %476 }
 0x52a   : > { %v610_v57 = vmul.f32 %v477_v60, %v17291_v45  ;;  %v10248_v60 = vld [vmem:[#allocation2 + $0x60] sm:$0xf0] }
 0x52c   : > { %v642_v36 = vpack.c.bf16 %v610_v57, %v610_v57  ;;  %v10307_v57 = vld [vmem:[#allocation2 + $0x23c] sm:$0xf] }
 0x52e   : > { %675 = vst.msk [vmem:[#allocation2 + $0x78] sm:$0xf] %vm668_vm1, %v642_v36  ;;  %v10238_v34 = vld [vmem:[#allocation2 + $0x10] sm:$0xf0]  ;;  %v9560_v36 = vld [vmem:[#allocation2 + $0x24c] sm:$0xf0] }
 0x52f   : > { %1092 = vst.msk [vmem:[#allocation2 + $0x78] sm:$0xf] %vm1085_vm2, %v17372_v24  ;;  %4881 = vperm.xlu0 %10562, %v13061_v58   ;;  %v9271_v26 = vor.u32 %v10238_v34, %v9270_v39  ;;  %v10351_v58 = vld [vmem:[%s16625_s2 + $0x118] sm:$0xff]  ;;  %v17376_v39 = vld [vmem:[#allocation66_spill] sm:$0xff]  ;;  %v9311_v34 = vor.u32 %v10248_v60, %v9310_v0  ;;  %v17377_v24 = vmov 1  }
 0x530   : > { %4556 = vmatpush.bf16.msrb.mxu0 %v10351_v58  ;;  %v10335_v0 = vld [vmem:[%s16625_s2 + $0x98] sm:$0xff] }
 0x531   : > { %4204 = vmatmul.bf16.vlgmr.msra.gmra.mxu0 %v9271_v26  ;;  %v492_v56 = vpop.permute.xlu0 %491  ;;  %v9563_v26 = vor.u32 %v10307_v57, %v9560_v36 }
 0x532   : > { %v613_v45 = vmul.f32 %v492_v56, %v17288_v54  ;;  %4531 = vmatmul.bf16.gmra.mxu3 %v9523_v62  ;;  %v13261_v54 = vpop.f32.mrf.mxu3 }
 0x534   : > { %v645_v23 = vpack.c.bf16 %v613_v45, %v613_v45 }
 0x536   : > { %678 = vst.msk [vmem:[#allocation2 + $0xb4] sm:$0xf] %vm668_vm1, %v645_v23  ;;  %v10283_v23 = vld [vmem:[#allocation2 + $0x178] sm:$0xf0]  ;;  %v9330_v17 = vld [vmem:[#allocation2 + $0x78] sm:$0xf] }
 0x537   : > { %1095 = vst.msk [vmem:[#allocation2 + $0xb4] sm:$0xf] %vm1085_vm2, %v17373_v42  ;;  %4896 = vperm.xlu0 %10562, %v13081_v4   ;;  %v13267_v4 = vld [vmem:[%s16624_s1 + $0xe0] sm:$0xff]  ;;  %v17378_v42 = vld [vmem:[#allocation68_spill] sm:$0xff] }
 0x539   : > { %v507_v3 = vpop.permute.xlu0 %506 }
 0x53a   : > { %v616_v11 = vmul.f32 %v507_v3, %v17289_v30  ;;  %v9543_v30 = vor.u32 %v10302_v10, %v9540_v19  ;;  %v13274_v38 = vpop.f32.mrf.mxu3  ;;  %v9580_v10 = vld [vmem:[#allocation2 + $0x274] sm:$0xf0]  ;;  %v10312_v19 = vld [vmem:[#allocation2 + $0x264] sm:$0xf] }
 0x53c   : > { %v648_v51 = vpack.c.bf16 %v616_v11, %v616_v11  ;;  %v10336_v11 = vld [vmem:[%s16625_s2 + $0xa0] sm:$0xff] }
 0x53e   : > { %681 = vst.msk [vmem:[#allocation2 + $0xf0] sm:$0xf] %vm668_vm1, %v648_v51  ;;  %v10258_v36 = vld [vmem:[#allocation2 + $0xb0] sm:$0xf0] }
 0x53f   : > { %1098 = vst.msk [vmem:[#allocation2 + $0xf0] sm:$0xf] %vm1085_vm2, %v17374_v61  ;;  %4911 = vperm.xlu0 %10562, %v13267_v4   ;;  %v17379_v61 = vld [vmem:[#allocation6_spill] sm:$0xff] }
 0x541   : > { %v522_v14 = vpop.permute.xlu0 %521  ;;  %4209 = vmatmul.bf16.gmra.mxu0 %v9291_v35  ;;  %v9331_v35 = vor.u32 %v10253_v18, %v9330_v17  ;;  %v13360_v18 = vld [vmem:[%s16624_s1 + $0x8] sm:$0xff] }
 0x542   : > { %v619_v22 = vmul.f32 %v522_v14, %v17292_v33  ;;  %4536 = vmatmul.bf16.gmra.mxu3 %v9543_v30  ;;  %v10337_v33 = vld [vmem:[%s16625_s2 + $0xa8] sm:$0xff]  ;;  %v13289_v1 = vpop.f32.mrf.mxu3  ;;  %v9583_v30 = vor.u32 %v10312_v19, %v9580_v10  ;;  %4776 = vperm.xlu2 %10564, %v13360_v18   ;;  %v10348_v19 = vld [vmem:[%s16625_s2 + $0x100] sm:$0xff] }
 0x543   : > { %4376 = vmatpush.bf16.msrb.mxu2 %v10337_v33  ;;  %v17380_v33 = vld [vmem:[#allocation9_spill] sm:$0xff]  ;;  %v10333_v10 = vld [vmem:[%s16625_s2 + $0x88] sm:$0xff] }
 0x544   : > { %v651_v15 = vpack.c.bf16 %v619_v22, %v619_v22 }
 0x546   : > { %684 = vst.msk [vmem:[#allocation2 + $0x12c] sm:$0xf] %vm668_vm1, %v651_v15 }
 0x547   : > { %1101 = vst.msk [vmem:[#allocation2 + $0x12c] sm:$0xf] %vm1085_vm2, %v17375_v7  ;;  %4926 = vperm.xlu0 %10562, %v13279_v40   ;;  %4377 = vmatpush.bf16.msrb.mxu2 %v10336_v11  ;;  %v13351_v11 = vld [vmem:[%s16624_s1 + $0x40] sm:$0xff] }
 0x549   : > { %v537_v8 = vpop.permute.xlu0 %536 }
 0x54a   : > { %v622_v46 = vmul.f32 %v537_v8, %v17295_v28  ;;  %v10350_v28 = vld [vmem:[%s16625_s2 + $0x110] sm:$0xff]  ;;  %v13302_v3 = vpop.f32.mrf.mxu3 }
 0x54b   : > { %4557 = vmatpush.bf16.msrb.mxu0 %v10350_v28  ;;  %v9470_v8 = vld [vmem:[#allocation2 + $0x190] sm:$0xf]  ;;  %4378 = vmatpush.bf16.msrb.mxu2 %v10335_v0  ;;  %v9490_v28 = vld [vmem:[#allocation2 + $0x1b8] sm:$0xf]  ;;  %v13395_v0 = vld [vmem:[%s16624_s1 + $0x88] sm:$0xff] }
 0x54c   : > { %v654_v63 = vpack.c.bf16 %v622_v46, %v622_v46 }
 0x54e   : > { %687 = vst.msk [vmem:[#allocation2 + $0x168] sm:$0xf] %vm668_vm1, %v654_v63 }
 0x54f   : > { %1104 = vst.msk [vmem:[#allocation2 + $0x168] sm:$0xf] %vm1085_vm2, %v17376_v39  ;;  %10567 = vset.pattern.permute.xlu0 %v17377_v24  ;;  %v9350_v39 = vld [vmem:[#allocation2 + $0xa0] sm:$0xf] }
 0x551   : > { %v552_v47 = vpop.permute.xlu0 %551  ;;  %4214 = vmatmul.bf16.gmra.mxu0 %v9311_v34  ;;  %v17381_v34 = vld [vmem:[#allocation13_spill] sm:$0xff] }
 0x552   : > { %v625_v62 = vmul.f32 %v552_v47, %v17298_v49  ;;  %4541 = vmatmul.bf16.gmra.mxu3 %v9563_v26  ;;  %v13311_v22 = vpop.f32.mrf.mxu3  ;;  %v9351_v26 = vor.u32 %v10258_v36, %v9350_v39  ;;  %v13333_v47 = vld [vmem:[%s16624_s1 + $0x18] sm:$0xff]  ;;  %v13402_v39 = vld [vmem:[%s16624_s1 + $0x48] sm:$0xff] }
 0x554   : > { %v657_v56 = vpack.c.bf16 %v625_v62, %v625_v62  ;;  %v10293_v62 = vld [vmem:[#allocation2 + $0x1c8] sm:$0xf0] }
 0x556   : > { %690 = vst.msk [vmem:[#allocation2 + $0x1a4] sm:$0xf] %vm668_vm1, %v657_v56  ;;  %v9450_v45 = vld [vmem:[#allocation2 + $0x168] sm:$0xf]  ;;  %v9491_v56 = vor.u32 %v10293_v62, %v9490_v28  ;;  %v13414_v62 = vld [vmem:[%s16624_s1 + $0x60] sm:$0xff] }
 0x557   : > { %1107 = vst.msk [vmem:[#allocation2 + $0x1a4] sm:$0xf] %vm1085_vm2, %v17378_v42  ;;  %v9451_v58 = vor.u32 %v10283_v23, %v9450_v45  ;;  %v10334_v45 = vld [vmem:[%s16625_s2 + $0x90] sm:$0xff]  ;;  %v13345_v23 = vld [vmem:[%s16624_s1 + $0x28] sm:$0xff] }
 0x558   : > { %4379 = vmatpush.bf16.msrb.mxu2 %v10334_v45  ;;  %v9370_v42 = vld [vmem:[#allocation2 + $0xc8] sm:$0xf]  ;;  %v9286_v45 = vld [vmem:[#allocation2 + $0x10] sm:$0xf] }
 0x559   : > { %4249 = vmatmul.bf16.gmra.mxu2 %v9451_v58  ;;  %v567_v21 = vpop.permute.xlu0 %566  ;;  %v10263_v58 = vld [vmem:[#allocation2 + $0xd8] sm:$0xf0] }
 0x55a   : > { %v628_v49 = vmul.f32 %v567_v21, %v12176_v20  ;;  %v9371_v21 = vor.u32 %v10263_v58, %v9370_v42  ;;  %v10240_v42 = vld [vmem:[#allocation2 + $0x20] sm:$0xf0] }
 0x55b   : > { %v9287_v58 = vor.u32 %v10240_v42, %v9286_v45  ;;  %v13471_v45 = vld [vmem:[%s16624_s1 + $0xc0] sm:$0xff] }
 0x55c   : > { %v660_v51 = vpack.c.bf16 %v628_v49, %v628_v49  ;;  %4380 = vmatpush.bf16.msrb.mxu2 %v10333_v10  ;;  %v9326_v42 = vld [vmem:[#allocation2 + $0x60] sm:$0xf] }
 0x55e   : > { %693 = vst.msk [vmem:[#allocation2 + $0x1e0] sm:$0xf] %vm668_vm1, %v660_v51  ;;  %v10288_v7 = vld [vmem:[#allocation2 + $0x1a0] sm:$0xf0]  ;;  %v10298_v51 = vld [vmem:[#allocation2 + $0x1f0] sm:$0xf0] }
 0x55f   : > { %1110 = vst.msk [vmem:[#allocation2 + $0x1e0] sm:$0xf] %vm1085_vm2, %v17379_v61  ;;  %v9471_v46 = vor.u32 %v10288_v7, %v9470_v8  ;;  %v13365_v61 = vld [vmem:[%s16624_s1 + $0x58] sm:$0xff]  ;;  %v9530_v8 = vld [vmem:[#allocation2 + $0x208] sm:$0xf] }
 0x561   : > { %v582_v14 = vpop.permute.xlu0 %581  ;;  %4219 = vmatmul.bf16.gmra.mxu0 %v9331_v35  ;;  %v9390_v35 = vld [vmem:[#allocation2 + $0xf0] sm:$0xf] }
 0x562   : > { %v631_v15 = vmul.f32 %v582_v14, %v12192_v29  ;;  %4546 = vmatmul.bf16.gmra.mxu3 %v9583_v30  ;;  %v13323_v29 = vld [vmem:[%s16624_s1] sm:$0xff] }
 0x563   : > { %4771 = vperm.xlu1 %10563, %v13323_v29   ;;  %v10268_v30 = vld [vmem:[#allocation2 + $0x100] sm:$0xf0] }
 0x564   : > { %v663_v20 = vpack.c.bf16 %v631_v15, %v631_v15  ;;  %v9391_v14 = vor.u32 %v10268_v30, %v9390_v35  ;;  %v13375_v15 = vld [vmem:[%s16624_s1 + $0x20] sm:$0xff]  ;;  %v10313_v35 = vld [vmem:[#allocation2 + $0x268] sm:$0xf0]  ;;  %v13443_v30 = vld [vmem:[%s16624_s1 + $0x90] sm:$0xff] }
 0x565   : > { %4791 = vperm.xlu2 %10564, %v13375_v15  }
 0x566   : > { %696 = vst.msk [vmem:[#allocation2 + $0x21c] sm:$0xf] %vm668_vm1, %v663_v20  ;;  %v9510_v49 = vld [vmem:[#allocation2 + $0x1e0] sm:$0xf]  ;;  %v13380_v20 = vld [vmem:[%s16624_s1 + $0x70] sm:$0xff] }
 0x567   : > { %1113 = vst.msk [vmem:[#allocation2 + $0x21c] sm:$0xf] %vm1085_vm2, %v17380_v33  ;;  %v9511_v17 = vor.u32 %v10298_v51, %v9510_v49  ;;  %v13428_v49 = vld [vmem:[%s16624_s1 + $0x78] sm:$0xff]  ;;  %v13433_v51 = vld [vmem:[%s16624_s1 + $0xd0] sm:$0xff] }
 0x569   : > { %4254 = vmatmul.bf16.gmra.mxu2 %v9471_v46  ;;  %v597_v63 = vpop.permute.xlu0 %596  ;;  %v10332_v46 = vld [vmem:[%s16625_s2 + $0x80] sm:$0xff] }
 0x56a   : > { %v634_v60 = vmul.f32 %v597_v63, %v17305_v50  ;;  %v10349_v50 = vld [vmem:[%s16625_s2 + $0x108] sm:$0xff]  ;;  %v13390_v63 = vld [vmem:[%s16624_s1 + $0x30] sm:$0xff]  ;;  %4381 = vmatpush.bf16.msrb.mxu2 %v10332_v46 }
 0x56b   : > { %4786 = vperm.xlu1 %10563, %v13333_v47   ;;  %4558 = vmatpush.bf16.msrb.mxu0 %v10349_v50  ;;  %v10308_v50 = vld [vmem:[#allocation2 + $0x240] sm:$0xf0] }
 0x56c   : > { %v666_v57 = vpack.c.bf16 %v634_v60, %v634_v60  ;;  %v10273_v60 = vld [vmem:[#allocation2 + $0x128] sm:$0xf0] }
 0x56d   : > { %4801 = vperm.xlu2 %10564, %v13390_v63  }
 0x56e   : > { %699 = vst.msk [vmem:[#allocation2 + $0x258] sm:$0xf] %vm668_vm1, %v666_v57  ;;  %v10303_v7 = vld [vmem:[#allocation2 + $0x218] sm:$0xf0]  ;;  %v9410_v57 = vld [vmem:[#allocation2 + $0x118] sm:$0xf] }
 0x56f   : > { %1116 = vst.msk [vmem:[#allocation2 + $0x258] sm:$0xf] %vm1085_vm2, %v17381_v34  ;;  %4559 = vmatpush.bf16.msrb.mxu0 %v10348_v19  ;;  %v9531_v33 = vor.u32 %v10303_v7, %v9530_v8  ;;  %v9411_v36 = vor.u32 %v10273_v60, %v9410_v57  ;;  %v13407_v34 = vld [vmem:[%s16624_s1 + $0xa0] sm:$0xff]  ;;  %v9306_v7 = vld [vmem:[#allocation2 + $0x38] sm:$0xf]  ;;  %v13457_v60 = vld [vmem:[%s16624_s1 + $0xa8] sm:$0xff] }
 0x570   : > { %v10245_v8 = vld [vmem:[#allocation2 + $0x48] sm:$0xf0]  ;;  %v5027_v57 = vld [vmem:[%s16624_s1 + $0x10] sm:$0xff] }
 0x571   : > { %4224 = vmatmul.bf16.gmra.mxu0 %v9351_v26  ;;  %v9550_v26 = vld [vmem:[#allocation2 + $0x230] sm:$0xf]  ;;  %v9307_v46 = vor.u32 %v10245_v8, %v9306_v7  ;;  %5069 = vperm.xlu0 %10567, %v5027_v57   ;;  %v10244_v7 = vld [vmem:[#allocation2 + $0x40] sm:$0xf0] }
 0x572   : > { %v9551_v28 = vor.u32 %v10308_v50, %v9550_v26  ;;  %v10239_v26 = vld [vmem:[#allocation2 + $0x18] sm:$0xf0]  ;;  %v13492_v57 = vld [vmem:[%s16624_s1 + $0xf0] sm:$0xff] }
 0x573   : > { %4796 = vperm.xlu1 %10563, %v13345_v23  }
 0x575   : > { %4816 = vperm.xlu2 %10564, %v13402_v39  }
 0x579   : > { %4259 = vmatmul.bf16.gmra.mxu2 %v9491_v56  ;;  %v13419_v56 = vld [vmem:[%s16624_s1 + $0xb8] sm:$0xff] }
 0x57b   : > { %4811 = vperm.xlu1 %10563, %v13351_v11  }
 0x57d   : > { %4831 = vperm.xlu2 %10564, %v13414_v62  }
 0x581   : > { %4229 = vmatmul.bf16.gmra.mxu0 %v9371_v21 }
 0x583   : > { %4826 = vperm.xlu1 %10563, %v13365_v61  }
 0x585   : > { %4846 = vperm.xlu2 %10564, %v13428_v49  }
 0x589   : > { %4264 = vmatmul.bf16.gmra.mxu2 %v9511_v17  ;;  %v9570_v17 = vld [vmem:[#allocation2 + $0x258] sm:$0xf] }
 0x58a   : > { %v9571_v19 = vor.u32 %v10313_v35, %v9570_v17 }
 0x58b   : > { %4841 = vperm.xlu1 %10563, %v13380_v20  }
 0x58d   : > { %4861 = vperm.xlu2 %10564, %v13443_v30  }
 0x591   : > { %4234 = vmatmul.bf16.gmra.mxu0 %v9391_v14  ;;  %v13448_v14 = vld [vmem:[%s16624_s1 + $0xe8] sm:$0xff] }
 0x593   : > { %4856 = vperm.xlu1 %10563, %v13395_v0  }
 0x595   : > { %4876 = vperm.xlu2 %10564, %v13457_v60  }
 0x599   : > { %4269 = vmatmul.bf16.gmra.mxu2 %v9531_v33 }
 0x59b   : > { %4871 = vperm.xlu1 %10563, %v13407_v34  }
 0x59d   : > { %4891 = vperm.xlu2 %10564, %v13471_v45  }
 0x5a1   : > { %4239 = vmatmul.bf16.gmra.mxu0 %v9411_v36  ;;  %v9278_v36 = vld [vmem:[#allocation2 + $0x8] sm:$0xf] }
 0x5a3   : > { %4886 = vperm.xlu1 %10563, %v13419_v56  }
 0x5a9   : > { %4274 = vmatmul.bf16.gmra.mxu2 %v9551_v28  ;;  %v9279_v28 = vor.u32 %v10239_v26, %v9278_v36  ;;  %v10255_v26 = vld [vmem:[#allocation2 + $0x98] sm:$0xf0] }
 0x5ab   : > { %4901 = vperm.xlu1 %10563, %v13433_v51  }
 0x5ae   : > { %v13423_v21 = vpop.f32.mrf.mxu0 }
 0x5b1   : > { %9732 = vmatmul.msk.bf16.vlgmr.msrb.gmra.mxu0 %vm4147_vm4, %v9287_v58  ;;  %v10250_v58 = vld [vmem:[#allocation2 + $0x70] sm:$0xf0] }
 0x5b2   : > { %v9327_v17 = vor.u32 %v10250_v58, %v9326_v42 }
 0x5b3   : > { %4916 = vperm.xlu1 %10563, %v13448_v14  }
 0x5b6   : > { %v13438_v10 = vpop.f32.mrf.mxu0 }
 0x5b9   : > { %4279 = vmatmul.bf16.gmra.mxu2 %v9571_v19  ;;  %v13485_v19 = vpop.f32.mrf.mxu2 }
 0x5bb   : > { %10565 = vset.pattern.permute.xlu1 %v17377_v24 }
 0x5bc   : > { %5059 = vperm.xlu1 %10565, %v13323_v29   ;;  %v13480_v29 = vld [vmem:[%s16624_s1 + $0xd8] sm:$0xff] }
 0x5bd   : > { %4906 = vperm.xlu2 %10564, %v13480_v29  }
 0x5be   : > { %v13452_v33 = vpop.f32.mrf.mxu0 }
 0x5c1   : > { %9733 = vmatmul.msk.bf16.gmra.mxu0 %vm4147_vm4, %v9307_v46 }
 0x5c4   : > { %5074 = vperm.xlu1 %10565, %v13333_v47   ;;  %v9298_v47 = vld [vmem:[#allocation2 + $0x30] sm:$0xf] }
 0x5c5   : > { %v9299_v46 = vor.u32 %v10244_v7, %v9298_v47  ;;  %4921 = vperm.xlu2 %10564, %v13492_v57  }
 0x5c6   : > { %v13466_v50 = vpop.f32.mrf.mxu0 }
 0x5c9   : > { %4382 = vmatmul.bf16.vlgmr.msrb.gmra.mxu2 %v9279_v28 }
 0x5cc   : > { %5084 = vperm.xlu1 %10565, %v13345_v23   ;;  %v9346_v23 = vld [vmem:[#allocation2 + $0x88] sm:$0xf] }
 0x5cd   : > { %v9347_v42 = vor.u32 %v10255_v26, %v9346_v23  ;;  %10566 = vset.pattern.permute.xlu2 %v17377_v24 }
 0x5ce   : > { %v13475_v35 = vpop.f32.mrf.mxu0  ;;  %5064 = vperm.xlu2 %10566, %v13360_v18   ;;  %v9366_v18 = vld [vmem:[#allocation2 + $0xb0] sm:$0xf] }
 0x5d1   : > { %9734 = vmatmul.msk.bf16.gmra.mxu0 %vm4147_vm4, %v9327_v17  ;;  %v9318_v17 = vld [vmem:[#allocation2 + $0x58] sm:$0xf] }
 0x5d4   : > { %5099 = vperm.xlu1 %10565, %v13351_v11   ;;  %v10249_v11 = vld [vmem:[#allocation2 + $0x68] sm:$0xf0] }
 0x5d5   : > { %v9319_v47 = vor.u32 %v10249_v11, %v9318_v17  ;;  %v13511_v23 = vpop.permute.xlu1 %4771  ;;  %v13519_v17 = vpop.permute.xlu0 %4781 }
 0x5d6   : > { %v13487_v8 = vpop.f32.mrf.mxu0  ;;  %17382 = vst [vmem:[#allocation21_spill] sm:$0xff] %v13511_v23  ;;  %5079 = vperm.xlu2 %10566, %v13375_v15   ;;  %v9338_v15 = vld [vmem:[#allocation2 + $0x80] sm:$0xf]  ;;  %v9358_v23 = vld [vmem:[#allocation2 + $0xa8] sm:$0xf] }
 0x5d7   : > { %17384 = vst [vmem:[#allocation26_spill] sm:$0xff] %v13519_v17 }
 0x5d9   : > { %4387 = vmatmul.bf16.gmra.mxu2 %v9299_v46  ;;  %v5032_v46 = vld [vmem:[%s16624_s1 + $0x38] sm:$0xff] }
 0x5da   : > { %5094 = vperm.xlu0 %10567, %v5032_v46  }
 0x5dc   : > { %v13496_v36 = vpop.f32.mrf.mxu2  ;;  %5114 = vperm.xlu1 %10565, %v13365_v61   ;;  %v10260_v61 = vld [vmem:[#allocation2 + $0xc0] sm:$0xf0] }
 0x5de   : > { %v13498_v28 = vpop.f32.mrf.mxu0  ;;  %5089 = vperm.xlu2 %10566, %v13390_v63  }
 0x5e1   : > { %9735 = vmatmul.msk.bf16.gmra.mxu0 %vm4147_vm4, %v9347_v42  ;;  %v9367_v42 = vor.u32 %v10260_v61, %v9366_v18  ;;  %v5035_v18 = vld [vmem:[%s16624_s1 + $0x50] sm:$0xff]  ;;  %v13533_v61 = vpop.permute.xlu0 %4806 }
 0x5e2   : > { %5109 = vperm.xlu0 %10567, %v5035_v18  }
 0x5e4   : > { %v13504_v58 = vpop.f32.mrf.mxu2  ;;  %5129 = vperm.xlu1 %10565, %v13380_v20   ;;  %v13526_v20 = vpop.permute.xlu1 %4786 }
 0x5e6   : > { %v13506_v7 = vpop.f32.mrf.mxu0  ;;  %5104 = vperm.xlu2 %10566, %v13402_v39  }
 0x5e9   : > { %4392 = vmatmul.bf16.gmra.mxu2 %v9319_v47  ;;  %v10254_v47 = vld [vmem:[#allocation2 + $0x90] sm:$0xf0] }
 0x5ea   : > { %v9339_v44 = vor.u32 %v10254_v47, %v9338_v15  ;;  %v5038_v47 = vld [vmem:[%s16624_s1 + $0x68] sm:$0xff] }
 0x5eb   : > { %5124 = vperm.xlu0 %10567, %v5038_v47  }
 0x5ec   : > { %v13515_v24 = vpop.f32.mrf.mxu2  ;;  %5144 = vperm.xlu1 %10565, %v13395_v0   ;;  %v10265_v0 = vld [vmem:[#allocation2 + $0xe8] sm:$0xf0]  ;;  %v13541_v17 = vpop.permute.xlu1 %4796 }
 0x5ed   : > { %17383 = vst [vmem:[#allocation22_spill] sm:$0xff] %v13515_v24  ;;  %v9387_v15 = vor.u32 %v10265_v0, %v9386_v32  ;;  %v5041_v0 = vld [vmem:[%s16624_s1 + $0x80] sm:$0xff] }
 0x5ee   : > { %v13517_v26 = vpop.f32.mrf.mxu0  ;;  %5119 = vperm.xlu2 %10566, %v13414_v62  }
 0x5f1   : > { %9736 = vmatmul.msk.bf16.gmra.mxu0 %vm4147_vm4, %v9367_v42 }
 0x5f3   : > { %5139 = vperm.xlu0 %10567, %v5041_v0  }
 0x5f4   : > { %v13524_v11 = vpop.f32.mrf.mxu2  ;;  %5159 = vperm.xlu1 %10565, %v13407_v34   ;;  %v10259_v34 = vld [vmem:[#allocation2 + $0xb8] sm:$0xf0]  ;;  %v13558_v47 = vpop.permute.xlu1 %4811 }
 0x5f5   : > { %17385 = vst [vmem:[#allocation19_spill] sm:$0xff] %v13524_v11  ;;  %v9359_v32 = vor.u32 %v10259_v34, %v9358_v23  ;;  %v5044_v23 = vld [vmem:[%s16624_s1 + $0x98] sm:$0xff] }
 0x5f6   : > { %v13528_v46 = vpop.f32.mrf.mxu0  ;;  %5134 = vperm.xlu2 %10566, %v13428_v49  }
 0x5f9   : > { %4397 = vmatmul.bf16.gmra.mxu2 %v9339_v44  ;;  %v13549_v44 = vpop.permute.xlu0 %4821 }
 0x5fb   : > { %5154 = vperm.xlu0 %10567, %v5044_v23   ;;  %v9426_v23 = vld [vmem:[#allocation2 + $0x128] sm:$0xf] }
 0x5fc   : > { %v13537_v63 = vpop.f32.mrf.mxu2  ;;  %5174 = vperm.xlu1 %10565, %v13419_v56   ;;  %v9406_v56 = vld [vmem:[#allocation2 + $0x100] sm:$0xf] }
 0x5fd   : > { %17386 = vst [vmem:[#allocation33_spill] sm:$0xff] %v13537_v63  ;;  %v10290_v63 = vld [vmem:[#allocation2 + $0x1b0] sm:$0xf0] }
 0x5fe   : > { %v13539_v42 = vpop.f32.mrf.mxu0  ;;  %5149 = vperm.xlu2 %10566, %v13443_v30   ;;  %v17390_v30 = vmov 2  }
 0x601   : > { %9737 = vmatmul.msk.bf16.gmra.mxu0 %vm4147_vm4, %v9387_v15  ;;  %v10270_v15 = vld [vmem:[#allocation2 + $0x110] sm:$0xf0]  ;;  %v13564_v13 = vpop.permute.xlu0 %4836 }
 0x602   : > { %v9407_v34 = vor.u32 %v10270_v15, %v9406_v56 }
 0x603   : > { %5169 = vperm.xlu0 %10567, %v5047_v53  }
 0x604   : > { %v13551_v39 = vpop.f32.mrf.mxu2  ;;  %5189 = vperm.xlu1 %10565, %v13433_v51   ;;  %v9378_v51 = vld [vmem:[#allocation2 + $0xd0] sm:$0xf] }
 0x605   : > { %17387 = vst [vmem:[#allocation31_spill] sm:$0xff] %v13551_v39  ;;  %v9379_v56 = vor.u32 %v10264_v12, %v9378_v51  ;;  %v5050_v12 = vld [vmem:[%s16624_s1 + $0xc8] sm:$0xff] }
 0x606   : > { %v13553_v18 = vpop.f32.mrf.mxu0  ;;  %5164 = vperm.xlu2 %10566, %v13457_v60  }
 0x609   : > { %4402 = vmatmul.bf16.gmra.mxu2 %v9359_v32  ;;  %v13572_v32 = vpop.permute.xlu1 %4826  ;;  %v13583_v15 = vpop.permute.xlu0 %4851 }
 0x60b   : > { %5184 = vperm.xlu0 %10567, %v5050_v12  }
 0x60c   : > { %v13562_v62 = vpop.f32.mrf.mxu2  ;;  %5204 = vperm.xlu1 %10565, %v13448_v14  }
 0x60d   : > { %17388 = vst [vmem:[#allocation38_spill] sm:$0xff] %v13562_v62 }
 0x60e   : > { %v13566_v2 = vpop.f32.mrf.mxu0  ;;  %5179 = vperm.xlu2 %10566, %v13471_v45   ;;  %v10280_v45 = vld [vmem:[#allocation2 + $0x160] sm:$0xf0] }
 0x611   : > { %9738 = vmatmul.msk.bf16.gmra.mxu0 %vm4147_vm4, %v9407_v34  ;;  %v10275_v34 = vld [vmem:[#allocation2 + $0x138] sm:$0xf0]  ;;  %v13589_v43 = vpop.permute.xlu1 %4841  ;;  %v13597_v53 = vpop.permute.xlu0 %4866 }
 0x612   : > { %v9427_v51 = vor.u32 %v10275_v34, %v9426_v23  ;;  %17392 = vst [vmem:[#allocation37_spill] sm:$0xff] %v13597_v53  ;;  %v4294_v23 = vpop.f32.mrf.mxu1 }
 0x613   : > { %5199 = vperm.xlu0 %10567, %v13267_v4   ;;  %v10274_v4 = vld [vmem:[#allocation2 + $0x130] sm:$0xf0] }
 0x614   : > { %v13576_v49 = vpop.f32.mrf.mxu2  ;;  %10569 = vset.pattern.permute.xlu1 %v17390_v30 }
 0x615   : > { %17389 = vst [vmem:[#allocation34_spill] sm:$0xff] %v13576_v49 }
 0x616   : > { %v13578_v0 = vpop.f32.mrf.mxu0  ;;  %5194 = vperm.xlu2 %10566, %v13480_v29  }
 0x619   : > { %4407 = vmatmul.bf16.gmra.mxu2 %v9379_v56  ;;  %v9398_v56 = vld [vmem:[#allocation2 + $0xf8] sm:$0xf]  ;;  %v13604_v49 = vpop.permute.xlu1 %4856  ;;  %v13608_v34 = vpop.permute.xlu0 %4881 }
 0x61a   : > { %17394 = vst [vmem:[#allocation105_spill] sm:$0xff] %v13608_v34  ;;  %v4296_v29 = vpop.f32.mrf.mxu1 }
 0x61b   : > { %5214 = vperm.xlu0 %10567, %v13279_v40  }
 0x61c   : > { %v13587_v14 = vpop.f32.mrf.mxu2 }
 0x61d   : > { %17391 = vst [vmem:[#allocation18_spill] sm:$0xff] %v13587_v14  ;;  %v10269_v14 = vld [vmem:[#allocation2 + $0x108] sm:$0xf0] }
 0x61e   : > { %v13591_v31 = vpop.f32.mrf.mxu0  ;;  %v9399_v48 = vor.u32 %v10269_v14, %v9398_v56  ;;  %5209 = vperm.xlu2 %10566, %v13492_v57   ;;  %v10285_v57 = vld [vmem:[#allocation2 + $0x188] sm:$0xf0] }
 0x621   : > { %9739 = vmatmul.msk.bf16.gmra.mxu0 %vm4147_vm4, %v9427_v51  ;;  %v13612_v37 = vpop.permute.xlu1 %4871  ;;  %v13619_v14 = vpop.permute.xlu0 %4896 }
 0x622   : > { %17396 = vst [vmem:[#allocation95_spill] sm:$0xff] %v13612_v37  ;;  %v4299_v6 = vpop.f32.mrf.mxu1 }
 0x623   : > { %17398 = vst [vmem:[#allocation40_spill] sm:$0xff] %v13619_v14  ;;  %10568 = vset.pattern.permute.xlu0 %v17390_v30 }
 0x624   : > { %v13600_v60 = vpop.f32.mrf.mxu2 }
 0x625   : > { %17393 = vst [vmem:[#allocation104_spill] sm:$0xff] %v13600_v60  ;;  %v9446_v60 = vld [vmem:[#allocation2 + $0x150] sm:$0xf] }
 0x626   : > { %v13602_v55 = vpop.f32.mrf.mxu0  ;;  %v9447_v62 = vor.u32 %v10280_v45, %v9446_v60  ;;  %10570 = vset.pattern.permute.xlu2 %v17390_v30  ;;  %v10279_v30 = vld [vmem:[#allocation2 + $0x158] sm:$0xf0] }
 0x629   : > { %4412 = vmatmul.bf16.gmra.mxu2 %v9399_v48  ;;  %v13622_v60 = vpop.permute.xlu1 %4886  ;;  %v13629_v34 = vpop.permute.xlu0 %4911 }
 0x62a   : > { %17399 = vst [vmem:[#allocation23_spill] sm:$0xff] %v13622_v60 }
 0x62b   : > { %17401 = vst [vmem:[#allocation46_spill] sm:$0xff] %v13629_v34  ;;  %v4301_v34 = vpop.f32.mrf.mxu1 }
 0x62c   : > { %v13610_v12 = vpop.f32.mrf.mxu2 }
 0x62d   : > { %17395 = vst [vmem:[#allocation20_spill] sm:$0xff] %v13610_v12  ;;  %v9418_v12 = vld [vmem:[#allocation2 + $0x120] sm:$0xf] }
 0x62e   : > { %v4561_v51 = vpop.f32.mrf.mxu0  ;;  %v9419_v39 = vor.u32 %v10274_v4, %v9418_v12 }
 0x631   : > { %9740 = vmatmul.msk.bf16.gmra.mxu0 %vm4147_vm4, %v9447_v62  ;;  %v9466_v62 = vld [vmem:[#allocation2 + $0x178] sm:$0xf]  ;;  %v13634_v4 = vpop.permute.xlu1 %4901 }
 0x632   : > { %17403 = vst [vmem:[#allocation108_spill] sm:$0xff] %v13634_v4  ;;  %v9486_v4 = vld [vmem:[#allocation2 + $0x1a0] sm:$0xf] }
 0x634   : > { %v13617_v48 = vpop.f32.mrf.mxu2 }
 0x635   : > { %17397 = vst [vmem:[#allocation106_spill] sm:$0xff] %v13617_v48  ;;  %v9467_v48 = vor.u32 %v10285_v57, %v9466_v62 }
 0x636   : > { %v4563_v56 = vpop.f32.mrf.mxu0 }
 0x639   : > { %4417 = vmatmul.bf16.gmra.mxu2 %v9419_v39  ;;  %v9438_v39 = vld [vmem:[#allocation2 + $0x148] sm:$0xf]  ;;  %v13647_v11 = vpop.permute.xlu1 %4916 }
 0x63a   : > { %v9439_v57 = vor.u32 %v10279_v30, %v9438_v39  ;;  %17405 = vst [vmem:[#allocation29_spill] sm:$0xff] %v13647_v11 }
 0x63c   : > { %v13625_v40 = vpop.f32.mrf.mxu2 }
 0x63d   : > { %17400 = vst [vmem:[#allocation107_spill] sm:$0xff] %v13625_v40  ;;  %v13641_v40 = vld [vmem:[%s16626_s3] ss:$0 sm:$0xff] }
 0x63e   : > { %v13627_v45 = vpop.f32.mrf.mxu0  ;;  %v4206_v62 = vadd.f32 %v13641_v40, %v13423_v21  ;;  %v4208_v37 = vadd.f32 %v13641_v40, %v13438_v10  ;;  %v9487_v21 = vor.u32 %v10290_v63, %v9486_v4 }
 0x641   : > { %9741 = vmatmul.msk.bf16.gmra.mxu0 %vm4147_vm4, %v9467_v48  ;;  %v13645_v48 = vpop.permute.xlu0 %4926  ;;  %v13667_v63 = vpop.permute.xlu1 %5059 }
 0x642   : > { %17404 = vst [vmem:[#allocation48_spill] sm:$0xff] %v13645_v48  ;;  %v10284_v48 = vld [vmem:[#allocation2 + $0x180] sm:$0xf0] }
 0x644   : > { %v13632_v12 = vpop.f32.mrf.mxu2 }
 0x645   : > { %17402 = vst [vmem:[#allocation27_spill] sm:$0xff] %v13632_v12  ;;  %v4295_v12 = vadd.f32 %v4294_v23, %v4206_v62  ;;  %v4297_v23 = vadd.f32 %v4296_v29, %v4208_v37  ;;  %v13657_v62 = vpop.f32.mrf.mxu1 }
 0x646   : > { %v13636_v14 = vpop.f32.mrf.mxu0 }
 0x649   : > { %4422 = vmatmul.bf16.gmra.mxu2 %v9439_v57  ;;  %v5070_v30 = vpop.permute.xlu0 %5069 }
 0x64c   : > { %v4383_v60 = vpop.f32.mrf.mxu2 }
 0x64d   : > { %v4384_v9 = vadd.f32 %v4383_v60, %v4295_v12  ;;  %v9458_v12 = vld [vmem:[#allocation2 + $0x170] sm:$0xf] }
 0x64e   : > { %v13649_v16 = vpop.f32.mrf.mxu0  ;;  %v9459_v37 = vor.u32 %v10284_v48, %v9458_v12 }
 0x64f   : > { %v4473_v24 = vadd.f32 %v13227_v52, %v4384_v9  ;;  %v4211_v52 = vadd.f32 %v13641_v40, %v13452_v33 }
 0x651   : > { %v4562_v39 = vadd.f32 %v4561_v51, %v4473_v24  ;;  %9742 = vmatmul.msk.bf16.gmra.mxu0 %vm4147_vm4, %v9487_v21  ;;  %v4300_v4 = vadd.f32 %v4299_v6, %v4211_v52 }
 0x653   : > { %v13655_v57 = vmax.f32 %v4562_v39, 0.0  ;;  %v10295_v39 = vld [vmem:[#allocation2 + $0x1d8] sm:$0xf0] }
 0x654   : > { %v4385_v60 = vpop.f32.mrf.mxu2 }
 0x655   : > { %17406 = vst [vmem:[#allocation51_spill] sm:$0xff] %v13655_v57  ;;  %v4386_v11 = vadd.f32 %v4385_v60, %v4297_v23  ;;  %v5219_v59 = vmul.f32 %v5070_v30, %v13655_v57  ;;  %v6209_v9 = vpack.c.bf16 %v13655_v57, %v13655_v57  ;;  %v13673_v30 = vpop.permute.xlu2 %4776  ;;  %v16872_v33 = vrot.slane %v13655_v57, 7  ;;  %v9506_v23 = vld [vmem:[#allocation2 + $0x1c8] sm:$0xf] }
 0x656   : > { %v13660_v53 = vpop.f32.mrf.mxu0  ;;  %v4213_v60 = vadd.f32 %v13641_v40, %v13466_v50  ;;  %v9507_v12 = vor.u32 %v10295_v39, %v9506_v23  ;;  %v13697_v50 = vpop.permute.xlu1 %5074  ;;  %v10289_v39 = vld [vmem:[#allocation2 + $0x1a8] sm:$0xf0] }
 0x657   : > { %v4475_v10 = vadd.f32 %v13234_v41, %v4386_v11  ;;  %v5251_v24 = vpack.c.bf16 %v5219_v59, %v5219_v59  ;;  %6241 = vst.msk [vmem:[#allocation2 + $0x8] sm:$0xf] %vm668_vm1, %v6209_v9  ;;  %v4306_v11 = vpop.f32.mrf.mxu1 }
 0x659   : > { %v4564_v51 = vadd.f32 %v4563_v56, %v4475_v10  ;;  %4427 = vmatmul.bf16.gmra.mxu2 %v9459_v37  ;;  %5317 = vrot.lane.b32.xlu0 %v5251_v24, %s10749_s9  ;;  %v13690_v10 = vpop.f32.mrf.mxu3 }
 0x65b   : > { %v13671_v29 = vmax.f32 %v4564_v51, 0.0 }
 0x65c   : > { %v4388_v21 = vpop.f32.mrf.mxu2 }
 0x65d   : > { %17407 = vst [vmem:[#allocation36_spill] sm:$0xff] %v13671_v29  ;;  %v4674_v59 = vrot.slane %v13671_v29, 7  ;;  %v4389_v41 = vadd.f32 %v4388_v21, %v4300_v4  ;;  %v6210_v56 = vpack.c.bf16 %v13671_v29, %v13671_v29  ;;  %v4302_v4 = vadd.f32 %v4301_v34, %v4213_v60 }
 0x65e   : > { %v13677_v48 = vpop.f32.mrf.mxu0 }
 0x65f   : > { %v4478_v6 = vadd.f32 %v13248_v5, %v4389_v41  ;;  %v13688_v52 = vsel %vm379_vm0, %v16872_v33, %v4674_v59  ;;  %6242 = vst.msk [vmem:[#allocation2 + $0x1c] sm:$0xf] %vm668_vm1, %v6210_v56  ;;  %v9478_v56 = vld [vmem:[#allocation2 + $0x198] sm:$0xf]  ;;  %v5085_v33 = vpop.permute.xlu1 %5084 }
 0x660   : > { %17409 = vst [vmem:[#allocation53_spill] sm:$0xff] %v13688_v52  ;;  %v4932_v24 = vmul.f32 %v13526_v20, %v13688_v52  ;;  %v9479_v34 = vor.u32 %v10289_v39, %v9478_v56  ;;  %v9526_v39 = vld [vmem:[#allocation2 + $0x1f0] sm:$0xf] }
 0x661   : > { %v4567_v37 = vadd.f32 %v13627_v45, %v4478_v6  ;;  %9743 = vmatmul.msk.bf16.gmra.mxu0 %vm4147_vm4, %v9507_v12  ;;  %v4216_v6 = vadd.f32 %v13641_v40, %v13475_v35  ;;  %v4792_v12 = vpop.permute.xlu2 %4791 }
 0x662   : > { %v4964_v5 = vpack.c.bf16 %v4932_v24, %v4932_v24 }
 0x663   : > { %v13699_v51 = vmax.f32 %v4567_v37, 0.0  ;;  %v4309_v37 = vpop.f32.mrf.mxu1 }
 0x664   : > { %v4390_v21 = vpop.f32.mrf.mxu2  ;;  %4996 = vst.msk [vmem:[#allocation2 + $0x3c] sm:$0xf] %vm668_vm1, %v4964_v5 }
 0x665   : > { %17410 = vst [vmem:[#allocation39_spill] sm:$0xff] %v13699_v51  ;;  %v4675_v41 = vrot.slane %v13699_v51, 7  ;;  %v4391_v23 = vadd.f32 %v4390_v21, %v4302_v4  ;;  %v6211_v45 = vpack.c.bf16 %v13699_v51, %v13699_v51  ;;  %v13717_v21 = vpop.f32.mrf.mxu3 }
 0x666   : > { %v13703_v20 = vpop.f32.mrf.mxu0 }
 0x667   : > { %v4480_v24 = vadd.f32 %v13261_v54, %v4391_v23  ;;  %v13712_v60 = vsel %vm379_vm0, %v4674_v59, %v4675_v41  ;;  %6243 = vst.msk [vmem:[#allocation2 + $0x30] sm:$0xf] %vm668_vm1, %v6211_v45  ;;  %v4305_v54 = vadd.f32 %v13657_v62, %v4216_v6  ;;  %v10300_v23 = vld [vmem:[#allocation2 + $0x200] sm:$0xf0] }
 0x668   : > { %17411 = vst [vmem:[#allocation109_spill] sm:$0xff] %v13712_v60  ;;  %v4933_v5 = vmul.f32 %v4792_v12, %v13712_v60  ;;  %v9546_v60 = vld [vmem:[#allocation2 + $0x218] sm:$0xf] }
 0x669   : > { %v4569_v4 = vadd.f32 %v13636_v14, %v4480_v24  ;;  %4432 = vmatmul.bf16.gmra.mxu2 %v9479_v34  ;;  %v9527_v24 = vor.u32 %v10300_v23, %v9526_v39 }
 0x66a   : > { %v4965_v35 = vpack.c.bf16 %v4933_v5, %v4933_v5  ;;  %v4218_v5 = vadd.f32 %v13641_v40, %v13487_v8 }
 0x66b   : > { %v13719_v52 = vmax.f32 %v4569_v4, 0.0 }
 0x66c   : > { %v4393_v59 = vpop.f32.mrf.mxu2  ;;  %4997 = vst.msk [vmem:[#allocation2 + $0x50] sm:$0xf] %vm668_vm1, %v4965_v35 }
 0x66d   : > { %17412 = vst [vmem:[#allocation56_spill] sm:$0xff] %v13719_v52  ;;  %v4676_v56 = vrot.slane %v13719_v52, 7  ;;  %v4394_v12 = vadd.f32 %v4393_v59, %v4305_v54  ;;  %v5222_v45 = vmul.f32 %v5085_v33, %v13719_v52  ;;  %v6212_v34 = vpack.c.bf16 %v13719_v52, %v13719_v52  ;;  %v4311_v54 = vpop.f32.mrf.mxu1  ;;  %v13744_v23 = vpop.f32.mrf.mxu3  ;;  %v9498_v59 = vld [vmem:[#allocation2 + $0x1c0] sm:$0xf] }
 0x66e   : > { %v13725_v14 = vpop.f32.mrf.mxu0 }
 0x66f   : > { %v4483_v62 = vadd.f32 %v13274_v38, %v4394_v12  ;;  %v5254_v6 = vpack.c.bf16 %v5222_v45, %v5222_v45  ;;  %v13734_v4 = vsel %vm379_vm0, %v4675_v41, %v4676_v56  ;;  %6244 = vst.msk [vmem:[#allocation2 + $0x44] sm:$0xf] %vm668_vm1, %v6212_v34  ;;  %v4307_v38 = vadd.f32 %v4306_v11, %v4218_v5 }
 0x670   : > { %17413 = vst [vmem:[#allocation45_spill] sm:$0xff] %v13734_v4  ;;  %v4934_v35 = vmul.f32 %v13541_v17, %v13734_v4  ;;  %v4221_v34 = vadd.f32 %v13641_v40, %v13498_v28 }
 0x671   : > { %v4572_v33 = vadd.f32 %v13649_v16, %v4483_v62  ;;  %9744 = vmatmul.msk.bf16.gmra.mxu0 %vm4147_vm4, %v9527_v24  ;;  %5323 = vrot.lane.b32.xlu0 %v5254_v6, %s10749_s9  ;;  %v10294_v16 = vld [vmem:[#allocation2 + $0x1d0] sm:$0xf0]  ;;  %v4802_v62 = vpop.permute.xlu2 %4801 }
 0x672   : > { %v4966_v8 = vpack.c.bf16 %v4934_v35, %v4934_v35  ;;  %v9499_v5 = vor.u32 %v10294_v16, %v9498_v59 }
 0x673   : > { %v13742_v39 = vmax.f32 %v4572_v33, 0.0 }
 0x674   : > { %v4395_v41 = vpop.f32.mrf.mxu2  ;;  %4998 = vst.msk [vmem:[#allocation2 + $0x64] sm:$0xf] %vm668_vm1, %v4966_v8 }
 0x675   : > { %17414 = vst [vmem:[#allocation47_spill] sm:$0xff] %v13742_v39  ;;  %v4677_v17 = vrot.slane %v13742_v39, 7  ;;  %v4396_v12 = vadd.f32 %v4395_v41, %v4307_v38  ;;  %v6213_v24 = vpack.c.bf16 %v13742_v39, %v13742_v39  ;;  %v4310_v41 = vadd.f32 %v4309_v37, %v4221_v34  ;;  %v4314_v28 = vpop.f32.mrf.mxu1 }
 0x676   : > { %v13748_v45 = vpop.f32.mrf.mxu0 }
 0x677   : > { %v4485_v11 = vadd.f32 %v13289_v1, %v4396_v12  ;;  %v13757_v6 = vsel %vm379_vm0, %v4676_v56, %v4677_v17  ;;  %6245 = vst.msk [vmem:[#allocation2 + $0x58] sm:$0xf] %vm668_vm1, %v6213_v24  ;;  %v10305_v1 = vld [vmem:[#allocation2 + $0x228] sm:$0xf0]  ;;  %v13766_v12 = vpop.f32.mrf.mxu3  ;;  %v4223_v24 = vadd.f32 %v13641_v40, %v13506_v7 }
 0x678   : > { %17415 = vst [vmem:[#allocation28_spill] sm:$0xff] %v13757_v6  ;;  %v4935_v35 = vmul.f32 %v4802_v62, %v13757_v6  ;;  %v9547_v34 = vor.u32 %v10305_v1, %v9546_v60  ;;  %v9518_v60 = vld [vmem:[#allocation2 + $0x1e8] sm:$0xf]  ;;  %v17487_v6 = vld [vmem:[#allocation72_spill] sm:$0xff] }
 0x679   : > { %v4574_v33 = vadd.f32 %v13660_v53, %v4485_v11  ;;  %4437 = vmatmul.bf16.gmra.mxu2 %v9499_v5  ;;  %v5100_v5 = vpop.permute.xlu1 %5099 }
 0x67a   : > { %v4967_v8 = vpack.c.bf16 %v4935_v35, %v4935_v35 }
 0x67b   : > { %v13762_v38 = vmax.f32 %v4574_v33, 0.0  ;;  %v13784_v33 = vpop.permute.xlu0 %5094 }
 0x67c   : > { %v4398_v4 = vpop.f32.mrf.mxu2  ;;  %4999 = vst.msk [vmem:[#allocation2 + $0x78] sm:$0xf] %vm668_vm1, %v4967_v8  ;;  %v10299_v8 = vld [vmem:[#allocation2 + $0x1f8] sm:$0xf0] }
 0x67d   : > { %17416 = vst [vmem:[#allocation30_spill] sm:$0xff] %v13762_v38  ;;  %v4678_v56 = vrot.slane %v13762_v38, 7  ;;  %v4399_v59 = vadd.f32 %v4398_v4, %v4310_v41  ;;  %v6214_v53 = vpack.c.bf16 %v13762_v38, %v13762_v38 }
 0x67e   : > { %v13768_v16 = vpop.f32.mrf.mxu0 }
 0x67f   : > { %v4488_v37 = vadd.f32 %v13302_v3, %v4399_v59  ;;  %v13777_v62 = vsel %vm379_vm0, %v4677_v17, %v4678_v56  ;;  %6246 = vst.msk [vmem:[#allocation2 + $0x6c] sm:$0xf] %vm668_vm1, %v6214_v53  ;;  %v4312_v3 = vadd.f32 %v4311_v54, %v4223_v24  ;;  %v9519_v53 = vor.u32 %v10299_v8, %v9518_v60  ;;  %v10310_v8 = vld [vmem:[#allocation2 + $0x250] sm:$0xf0] }
 0x680   : > { %17417 = vst [vmem:[#allocation41_spill] sm:$0xff] %v13777_v62  ;;  %v4936_v4 = vmul.f32 %v13533_v61, %v13777_v62  ;;  %v4226_v54 = vadd.f32 %v13641_v40, %v13517_v26 }
 0x681   : > { %v4577_v11 = vadd.f32 %v13677_v48, %v4488_v37  ;;  %9745 = vmatmul.msk.bf16.gmra.mxu0 %vm4147_vm4, %v9547_v34  ;;  %v4316_v48 = vpop.f32.mrf.mxu1 }
 0x682   : > { %v4968_v35 = vpack.c.bf16 %v4936_v4, %v4936_v4  ;;  %v4315_v60 = vadd.f32 %v4314_v28, %v4226_v54 }
 0x683   : > { %v13786_v7 = vmax.f32 %v4577_v11, 0.0  ;;  %v13802_v11 = vpop.f32.mrf.mxu3 }
 0x684   : > { %v4400_v17 = vpop.f32.mrf.mxu2  ;;  %5000 = vst.msk [vmem:[#allocation2 + $0x8c] sm:$0xf] %vm668_vm1, %v4968_v35 }
 0x685   : > { %17418 = vst [vmem:[#allocation32_spill] sm:$0xff] %v13786_v7  ;;  %v4679_v61 = vrot.slane %v13786_v7, 7  ;;  %v4401_v41 = vadd.f32 %v4400_v17, %v4312_v3  ;;  %v5225_v1 = vmul.f32 %v5100_v5, %v13786_v7  ;;  %v6215_v37 = vpack.c.bf16 %v13786_v7, %v13786_v7 }
 0x686   : > { %v13791_v59 = vpop.f32.mrf.mxu0 }
 0x687   : > { %v4490_v24 = vadd.f32 %v13311_v22, %v4401_v41  ;;  %v5257_v34 = vpack.c.bf16 %v5225_v1, %v5225_v1  ;;  %v13800_v4 = vsel %vm379_vm0, %v4678_v56, %v4679_v61  ;;  %6247 = vst.msk [vmem:[#allocation2 + $0x80] sm:$0xf] %vm668_vm1, %v6215_v37  ;;  %v13811_v22 = vpop.permute.xlu0 %5109  ;;  %v9566_v1 = vld [vmem:[#allocation2 + $0x240] sm:$0xf]  ;;  %v4817_v37 = vpop.permute.xlu2 %4816 }
 0x688   : > { %17419 = vst [vmem:[#allocation52_spill] sm:$0xff] %v13800_v4  ;;  %v4937_v5 = vmul.f32 %v13558_v47, %v13800_v4  ;;  %v9567_v28 = vor.u32 %v10310_v8, %v9566_v1  ;;  %v10304_v8 = vld [vmem:[#allocation2 + $0x220] sm:$0xf0] }
 0x689   : > { %v4579_v35 = vadd.f32 %v13703_v20, %v4490_v24  ;;  %4442 = vmatmul.bf16.gmra.mxu2 %v9519_v53  ;;  %5329 = vrot.lane.b32.xlu0 %v5257_v34, %s10749_s9  ;;  %v4228_v53 = vadd.f32 %v13641_v40, %v13528_v46  ;;  %v4319_v34 = vpop.f32.mrf.mxu1 }
 0x68a   : > { %v4969_v26 = vpack.c.bf16 %v4937_v5, %v4937_v5 }
 0x68b   : > { %v13809_v3 = vmax.f32 %v4579_v35, 0.0 }
 0x68c   : > { %v4403_v56 = vpop.f32.mrf.mxu2  ;;  %5001 = vst.msk [vmem:[#allocation2 + $0xa0] sm:$0xf] %vm668_vm1, %v4969_v26  ;;  %v13830_v26 = vpop.f32.mrf.mxu3 }
 0x68d   : > { %17420 = vst [vmem:[#allocation43_spill] sm:$0xff] %v13809_v3  ;;  %v4680_v17 = vrot.slane %v13809_v3, 7  ;;  %v4404_v47 = vadd.f32 %v4403_v56, %v4315_v60  ;;  %v6216_v20 = vpack.c.bf16 %v13809_v3, %v13809_v3 }
 0x68e   : > { %v13815_v41 = vpop.f32.mrf.mxu0 }
 0x68f   : > { %v4493_v24 = vadd.f32 %v13690_v10, %v4404_v47  ;;  %v13824_v54 = vsel %vm379_vm0, %v4679_v61, %v4680_v17  ;;  %6248 = vst.msk [vmem:[#allocation2 + $0x94] sm:$0xf] %vm668_vm1, %v6216_v20  ;;  %v4317_v10 = vadd.f32 %v4316_v48, %v4228_v53  ;;  %v13836_v47 = vpop.permute.xlu0 %5124 }
 0x690   : > { %17421 = vst [vmem:[#allocation35_spill] sm:$0xff] %v13824_v54  ;;  %v4938_v5 = vmul.f32 %v4817_v37, %v13824_v54 }
 0x691   : > { %v4582_v35 = vadd.f32 %v13725_v14, %v4493_v24  ;;  %9746 = vmatmul.msk.bf16.gmra.mxu0 %vm4147_vm4, %v9567_v28  ;;  %v9538_v14 = vld [vmem:[#allocation2 + $0x210] sm:$0xf]  ;;  %v4231_v24 = vadd.f32 %v13641_v40, %v13539_v42 }
 0x692   : > { %v4970_v46 = vpack.c.bf16 %v4938_v5, %v4938_v5  ;;  %v9539_v53 = vor.u32 %v10304_v8, %v9538_v14  ;;  %v10315_v8 = vld [vmem:[#allocation2 + $0x278] sm:$0xf0] }
 0x693   : > { %v13832_v60 = vmax.f32 %v4582_v35, 0.0  ;;  %v4320_v42 = vadd.f32 %v4319_v34, %v4231_v24  ;;  %v4233_v34 = vadd.f32 %v13641_v40, %v13553_v18 }
 0x694   : > { %v4405_v56 = vpop.f32.mrf.mxu2  ;;  %5002 = vst.msk [vmem:[#allocation2 + $0xb4] sm:$0xf] %vm668_vm1, %v4970_v46  ;;  %v4321_v46 = vpop.f32.mrf.mxu1 }
 0x695   : > { %17422 = vst [vmem:[#allocation55_spill] sm:$0xff] %v13832_v60  ;;  %v4681_v61 = vrot.slane %v13832_v60, 7  ;;  %v4406_v1 = vadd.f32 %v4405_v56, %v4317_v10  ;;  %v6217_v37 = vpack.c.bf16 %v13832_v60, %v13832_v60  ;;  %v5115_v10 = vpop.permute.xlu1 %5114 }
 0x696   : > { %v13838_v20 = vpop.f32.mrf.mxu0 }
 0x697   : > { %v4495_v48 = vadd.f32 %v13717_v21, %v4406_v1  ;;  %v13847_v28 = vsel %vm379_vm0, %v4680_v17, %v4681_v61  ;;  %6249 = vst.msk [vmem:[#allocation2 + $0xa8] sm:$0xf] %vm668_vm1, %v6217_v37  ;;  %v9586_v21 = vld [vmem:[#allocation2 + $0x268] sm:$0xf]  ;;  %v13855_v1 = vpop.f32.mrf.mxu3  ;;  %v13866_v24 = vpop.permute.xlu0 %5139 }
 0x698   : > { %17423 = vst [vmem:[#allocation49_spill] sm:$0xff] %v13847_v28  ;;  %v4939_v5 = vmul.f32 %v13549_v44, %v13847_v28 }
 0x699   : > { %v4584_v35 = vadd.f32 %v13748_v45, %v4495_v48  ;;  %4447 = vmatmul.bf16.gmra.mxu2 %v9539_v53  ;;  %v9587_v48 = vor.u32 %v10315_v8, %v9586_v21 }
 0x69a   : > { %v4971_v56 = vpack.c.bf16 %v4939_v5, %v4939_v5 }
 0x69b   : > { %v13853_v4 = vmax.f32 %v4584_v35, 0.0 }
 0x69c   : > { %v4408_v17 = vpop.f32.mrf.mxu2  ;;  %5003 = vst.msk [vmem:[#allocation2 + $0xc8] sm:$0xf] %vm668_vm1, %v4971_v56  ;;  %v4324_v8 = vpop.f32.mrf.mxu1 }
 0x69d   : > { %17424 = vst [vmem:[#allocation42_spill] sm:$0xff] %v13853_v4  ;;  %v4682_v44 = vrot.slane %v13853_v4, 7  ;;  %v4409_v14 = vadd.f32 %v4408_v17, %v4320_v42  ;;  %v5228_v37 = vmul.f32 %v5115_v10, %v13853_v4  ;;  %v6218_v53 = vpack.c.bf16 %v13853_v4, %v13853_v4 }
 0x69e   : > { %v13860_v45 = vpop.f32.mrf.mxu0 }
 0x69f   : > { %v4498_v5 = vadd.f32 %v13744_v23, %v4409_v14  ;;  %v5260_v35 = vpack.c.bf16 %v5228_v37, %v5228_v37  ;;  %v13871_v56 = vsel %vm379_vm0, %v4681_v61, %v4682_v44  ;;  %6250 = vst.msk [vmem:[#allocation2 + $0xbc] sm:$0xf] %vm668_vm1, %v6218_v53  ;;  %v4322_v23 = vadd.f32 %v4321_v46, %v4233_v34  ;;  %v9558_v14 = vld [vmem:[#allocation2 + $0x238] sm:$0xf]  ;;  %v13883_v37 = vpop.f32.mrf.mxu3  ;;  %v10309_v53 = vld [vmem:[#allocation2 + $0x248] sm:$0xf0] }
 0x6a0   : > { %17425 = vst [vmem:[#allocation57_spill] sm:$0xff] %v13871_v56  ;;  %v4940_v10 = vmul.f32 %v13572_v32, %v13871_v56  ;;  %v9559_v34 = vor.u32 %v10309_v53, %v9558_v14 }
 0x6a1   : > { %v4587_v42 = vadd.f32 %v13768_v16, %v4498_v5  ;;  %9747 = vmatmul.msk.bf16.gmra.mxu0 %vm4147_vm4, %v9587_v48  ;;  %5335 = vrot.lane.b32.xlu0 %v5260_v35, %s10749_s9  ;;  %v4236_v48 = vadd.f32 %v13641_v40, %v13566_v2  ;;  %v4832_v5 = vpop.permute.xlu2 %4831 }
 0x6a2   : > { %v4972_v18 = vpack.c.bf16 %v4940_v10, %v4940_v10 }
 0x6a3   : > { %v13879_v21 = vmax.f32 %v4587_v42, 0.0 }
 0x6a4   : > { %v4410_v17 = vpop.f32.mrf.mxu2  ;;  %5004 = vst.msk [vmem:[#allocation2 + $0xdc] sm:$0xf] %vm668_vm1, %v4972_v18  ;;  %v13898_v18 = vpop.permute.xlu0 %5154 }
 0x6a5   : > { %17426 = vst [vmem:[#allocation59_spill] sm:$0xff] %v13879_v21  ;;  %v4683_v61 = vrot.slane %v13879_v21, 7  ;;  %v4411_v32 = vadd.f32 %v4410_v17, %v4322_v23  ;;  %v6219_v16 = vpack.c.bf16 %v13879_v21, %v13879_v21  ;;  %v4326_v53 = vpop.f32.mrf.mxu1 }
 0x6a6   : > { %v13894_v10 = vpop.f32.mrf.mxu0 }
 0x6a7   : > { %v4500_v46 = vadd.f32 %v13766_v12, %v4411_v32  ;;  %v13892_v35 = vsel %vm379_vm0, %v4682_v44, %v4683_v61  ;;  %6251 = vst.msk [vmem:[#allocation2 + $0xd0] sm:$0xf] %vm668_vm1, %v6219_v16  ;;  %v4325_v12 = vadd.f32 %v4324_v8, %v4236_v48  ;;  %v4238_v16 = vadd.f32 %v13641_v40, %v13578_v0  ;;  %v13914_v8 = vpop.f32.mrf.mxu3 }
 0x6a8   : > { %17427 = vst [vmem:[#allocation44_spill] sm:$0xff] %v13892_v35  ;;  %v4941_v42 = vmul.f32 %v4832_v5, %v13892_v35  ;;  %v17455_v35 = vld [vmem:[#allocation33_spill] sm:$0xff] }
 0x6a9   : > { %v4589_v23 = vadd.f32 %v13791_v59, %v4500_v46  ;;  %4452 = vmatmul.bf16.gmra.mxu2 %v9559_v34 }
 0x6aa   : > { %v4973_v2 = vpack.c.bf16 %v4941_v42, %v4941_v42 }
 0x6ab   : > { %v13901_v17 = vmax.f32 %v4589_v23, 0.0  ;;  %v5130_v23 = vpop.permute.xlu1 %5129 }
 0x6ac   : > { %v4413_v14 = vpop.f32.mrf.mxu2  ;;  %5005 = vst.msk [vmem:[#allocation2 + $0xf0] sm:$0xf] %vm668_vm1, %v4973_v2  ;;  %v13922_v0 = vpop.permute.xlu0 %5169 }
 0x6ad   : > { %17428 = vst [vmem:[#allocation24_spill] sm:$0xff] %v13901_v17  ;;  %v4684_v44 = vrot.slane %v13901_v17, 7  ;;  %v4414_v32 = vadd.f32 %v4413_v14, %v4325_v12  ;;  %v6220_v5 = vpack.c.bf16 %v13901_v17, %v13901_v17  ;;  %v4327_v12 = vadd.f32 %v4326_v53, %v4238_v16  ;;  %v10314_v14 = vld [vmem:[#allocation2 + $0x270] sm:$0xf0] }
 0x6ae   : > { %v13920_v42 = vpop.f32.mrf.mxu0 }
 0x6af   : > { %v4503_v59 = vadd.f32 %v13802_v11, %v4414_v32  ;;  %v13912_v46 = vsel %vm379_vm0, %v4683_v61, %v4684_v44  ;;  %6252 = vst.msk [vmem:[#allocation2 + $0xe4] sm:$0xf] %vm668_vm1, %v6220_v5  ;;  %v9578_v61 = vld [vmem:[#allocation2 + $0x260] sm:$0xf] }
 0x6b0   : > { %17429 = vst [vmem:[#allocation15_spill] sm:$0xff] %v13912_v46  ;;  %v4942_v48 = vmul.f32 %v13564_v13, %v13912_v46 }
 0x6b1   : > { %v4592_v34 = vadd.f32 %v13815_v41, %v4503_v59  ;;  %v9579_v41 = vor.u32 %v10314_v14, %v9578_v61  ;;  %v13943_v61 = vpop.f32.mrf.mxu3 }
 0x6b2   : > { %v4974_v2 = vpack.c.bf16 %v4942_v48, %v4942_v48  ;;  %v4241_v48 = vadd.f32 %v13641_v40, %v13591_v31 }
 0x6b3   : > { %v13924_v11 = vmax.f32 %v4592_v34, 0.0 }
 0x6b4   : > { %v4415_v32 = vpop.f32.mrf.mxu2  ;;  %5006 = vst.msk [vmem:[#allocation2 + $0x104] sm:$0xf] %vm668_vm1, %v4974_v2  ;;  %v4329_v2 = vpop.f32.mrf.mxu1 }
 0x6b5   : > { %17430 = vst [vmem:[#allocation81_spill] sm:$0xff] %v13924_v11  ;;  %v4685_v13 = vrot.slane %v13924_v11, 7  ;;  %v4416_v56 = vadd.f32 %v4415_v32, %v4327_v12  ;;  %v5231_v5 = vmul.f32 %v5130_v23, %v13924_v11  ;;  %v6221_v59 = vpack.c.bf16 %v13924_v11, %v13924_v11  ;;  %v13950_v32 = vpop.permute.xlu0 %5184 }
 0x6b6   : > { %v13947_v14 = vpop.f32.mrf.mxu0 }
 0x6b7   : > { %v4505_v34 = vadd.f32 %v13830_v26, %v4416_v56  ;;  %v5263_v53 = vpack.c.bf16 %v5231_v5, %v5231_v5  ;;  %v13936_v16 = vsel %vm379_vm0, %v4684_v44, %v4685_v13  ;;  %6253 = vst.msk [vmem:[#allocation2 + $0xf8] sm:$0xf] %vm668_vm1, %v6221_v59  ;;  %v4330_v56 = vadd.f32 %v4329_v2, %v4241_v48  ;;  %v4847_v59 = vpop.permute.xlu2 %4846 }
 0x6b8   : > { %17431 = vst [vmem:[#allocation86_spill] sm:$0xff] %v13936_v16  ;;  %v4943_v12 = vmul.f32 %v13589_v43, %v13936_v16 }
 0x6b9   : > { %v4594_v23 = vadd.f32 %v13838_v20, %v4505_v34  ;;  %4457 = vmatmul.bf16.gmra.mxu2 %v9579_v41  ;;  %5341 = vrot.lane.b32.xlu0 %v5263_v53, %s10749_s9  ;;  %v4243_v41 = vadd.f32 %v13641_v40, %v13602_v55 }
 0x6ba   : > { %v4975_v31 = vpack.c.bf16 %v4943_v12, %v4943_v12 }
 0x6bb   : > { %v13945_v26 = vmax.f32 %v4594_v23, 0.0 }
 0x6bc   : > { %v4418_v44 = vpop.f32.mrf.mxu2  ;;  %5007 = vst.msk [vmem:[#allocation2 + $0x118] sm:$0xf] %vm668_vm1, %v4975_v31  ;;  %v4331_v12 = vpop.f32.mrf.mxu1 }
 0x6bd   : > { %17432 = vst [vmem:[#allocation84_spill] sm:$0xff] %v13945_v26  ;;  %v4686_v43 = vrot.slane %v13945_v26, 7  ;;  %v4419_v5 = vadd.f32 %v4418_v44, %v4330_v56  ;;  %v6222_v20 = vpack.c.bf16 %v13945_v26, %v13945_v26  ;;  %v4332_v56 = vadd.f32 %v4331_v12, %v4243_v41  ;;  %v4517_v44 = vpop.f32.mrf.mxu3  ;;  %v13971_v16 = vpop.permute.xlu0 %5199 }
 0x6bf   : > { %v4508_v34 = vadd.f32 %v13855_v1, %v4419_v5  ;;  %v13960_v48 = vsel %vm379_vm0, %v4685_v13, %v4686_v43  ;;  %6254 = vst.msk [vmem:[#allocation2 + $0x10c] sm:$0xf] %vm668_vm1, %v6222_v20  ;;  %v4606_v13 = vpop.f32.mrf.mxu0 }
 0x6c0   : > { %17433 = vst [vmem:[#allocation88_spill] sm:$0xff] %v13960_v48  ;;  %v4944_v53 = vmul.f32 %v4847_v59, %v13960_v48 }
 0x6c1   : > { %v4597_v2 = vadd.f32 %v13860_v45, %v4508_v34 }
 0x6c2   : > { %v4976_v23 = vpack.c.bf16 %v4944_v53, %v4944_v53  ;;  %v5145_v53 = vpop.permute.xlu1 %5144 }
 0x6c3   : > { %v13965_v31 = vmax.f32 %v4597_v2, 0.0 }
 0x6c4   : > { %v4420_v55 = vpop.f32.mrf.mxu2  ;;  %5008 = vst.msk [vmem:[#allocation2 + $0x12c] sm:$0xf] %vm668_vm1, %v4976_v23 }
 0x6c5   : > { %17434 = vst [vmem:[#allocation11_spill] sm:$0xff] %v13965_v31  ;;  %v4687_v1 = vrot.slane %v13965_v31, 7  ;;  %v4421_v5 = vadd.f32 %v4420_v55, %v4332_v56  ;;  %v6223_v59 = vpack.c.bf16 %v13965_v31, %v13965_v31  ;;  %v17437_v56 = vld [vmem:[#allocation50_spill] sm:$0xff] }
 0x6c7   : > { %v4510_v45 = vadd.f32 %v13883_v37, %v4421_v5  ;;  %v13976_v20 = vsel %vm379_vm0, %v4686_v43, %v4687_v1  ;;  %6255 = vst.msk [vmem:[#allocation2 + $0x120] sm:$0xf] %vm668_vm1, %v6223_v59  ;;  %v4519_v5 = vpop.f32.mrf.mxu3 }
 0x6c8   : > { %17435 = vst [vmem:[#allocation91_spill] sm:$0xff] %v13976_v20  ;;  %v4945_v41 = vmul.f32 %v13583_v15, %v13976_v20 }
 0x6c9   : > { %v4599_v34 = vadd.f32 %v13894_v10, %v4510_v45 }
 0x6ca   : > { %v4977_v2 = vpack.c.bf16 %v4945_v41, %v4945_v41  ;;  %v4608_v41 = vpop.f32.mrf.mxu0 }
 0x6cb   : > { %v13982_v12 = vmax.f32 %v4599_v34, 0.0 }
 0x6cc   : > { %v4423_v23 = vpop.f32.mrf.mxu2  ;;  %5009 = vst.msk [vmem:[#allocation2 + $0x140] sm:$0xf] %vm668_vm1, %v4977_v2  ;;  %v14000_v2 = vpop.permute.xlu0 %5214 }
 0x6cd   : > { %17436 = vst [vmem:[#allocation14_spill] sm:$0xff] %v13982_v12  ;;  %v4688_v37 = vrot.slane %v13982_v12, 7  ;;  %v4424_v55 = vadd.f32 %v4423_v23, %v17437_v56  ;;  %v5234_v43 = vmul.f32 %v5145_v53, %v13982_v12  ;;  %v6224_v15 = vpack.c.bf16 %v13982_v12, %v13982_v12 }
 0x6ce   : > { %v4248_v53 = vadd.f32 %v13641_v40, %v13485_v19 }
 0x6cf   : > { %v4513_v59 = vadd.f32 %v13914_v8, %v4424_v55  ;;  %v5266_v10 = vpack.c.bf16 %v5234_v43, %v5234_v43  ;;  %v13993_v45 = vsel %vm379_vm0, %v4687_v1, %v4688_v37  ;;  %6256 = vst.msk [vmem:[#allocation2 + $0x134] sm:$0xf] %vm668_vm1, %v6224_v15  ;;  %v4251_v15 = vadd.f32 %v13641_v40, %v13496_v36 }
 0x6d0   : > { %17438 = vst [vmem:[#allocation79_spill] sm:$0xff] %v13993_v45  ;;  %v4946_v34 = vmul.f32 %v13604_v49, %v13993_v45  ;;  %v4337_v56 = vadd.f32 %v13072_v27, %v4248_v53 }
 0x6d1   : > { %v4602_v23 = vadd.f32 %v13920_v42, %v4513_v59  ;;  %5347 = vrot.lane.b32.xlu0 %v5266_v10, %s10749_s9  ;;  %v4862_v42 = vpop.permute.xlu2 %4861  ;;  %v4522_v10 = vpop.f32.mrf.mxu3  ;;  %v4340_v36 = vadd.f32 %v13092_v25, %v4251_v15 }
 0x6d2   : > { %v4978_v8 = vpack.c.bf16 %v4946_v34, %v4946_v34 }
 0x6d3   : > { %v14005_v1 = vmax.f32 %v4602_v23, 0.0  ;;  %v4611_v23 = vpop.f32.mrf.mxu0 }
 0x6d4   : > { %v4425_v55 = vpop.f32.mrf.mxu2  ;;  %5010 = vst.msk [vmem:[#allocation2 + $0x154] sm:$0xf] %vm668_vm1, %v4978_v8 }
 0x6d5   : > { %17439 = vst [vmem:[#allocation93_spill] sm:$0xff] %v14005_v1  ;;  %v4689_v49 = vrot.slane %v14005_v1, 7  ;;  %v4426_v43 = vadd.f32 %v4425_v55, %v4337_v56  ;;  %v6225_v19 = vpack.c.bf16 %v14005_v1, %v14005_v1  ;;  %v14021_v56 = vpop.permute.xlu0 %5317 }
 0x6d7   : > { %v4515_v59 = vadd.f32 %v13943_v61, %v4426_v43  ;;  %v14016_v27 = vsel %vm379_vm0, %v4688_v37, %v4689_v49  ;;  %6257 = vst.msk [vmem:[#allocation2 + $0x148] sm:$0xf] %vm668_vm1, %v6225_v19 }
 0x6d8   : > { %17440 = vst [vmem:[#allocation90_spill] sm:$0xff] %v14016_v27  ;;  %v4947_v34 = vmul.f32 %v4862_v42, %v14016_v27  ;;  %v17445_v27 = vld [vmem:[#allocation58_spill] sm:$0xff] }
 0x6d9   : > { %v4604_v53 = vadd.f32 %v13947_v14, %v4515_v59  ;;  %v4253_v14 = vadd.f32 %v13641_v40, %v13504_v58 }
 0x6da   : > { %v4979_v8 = vpack.c.bf16 %v4947_v34, %v4947_v34  ;;  %v17443_v34 = vld [vmem:[#allocation37_spill] sm:$0xff] }
 0x6db   : > { %v14023_v55 = vmax.f32 %v4604_v53, 0.0  ;;  %v4524_v53 = vpop.f32.mrf.mxu3  ;;  %v4342_v48 = vadd.f32 %v17445_v27, %v4253_v14  ;;  %v4613_v58 = vpop.f32.mrf.mxu0 }
 0x6dc   : > { %v4428_v61 = vpop.f32.mrf.mxu2  ;;  %5011 = vst.msk [vmem:[#allocation2 + $0x168] sm:$0xf] %vm668_vm1, %v4979_v8  ;;  %v5160_v8 = vpop.permute.xlu1 %5159 }
 0x6dd   : > { %17441 = vst [vmem:[#allocation8_spill] sm:$0xff] %v14023_v55  ;;  %v4690_v37 = vrot.slane %v14023_v55, 7  ;;  %v4429_v43 = vadd.f32 %v4428_v61, %v4340_v36  ;;  %v6226_v42 = vpack.c.bf16 %v14023_v55, %v14023_v55 }
 0x6df   : > { %v4518_v19 = vadd.f32 %v4517_v44, %v4429_v43  ;;  %v14034_v59 = vsel %vm379_vm0, %v4689_v49, %v4690_v37  ;;  %6258 = vst.msk [vmem:[#allocation2 + $0x15c] sm:$0xf] %vm668_vm1, %v6226_v42  ;;  %v17446_v42 = vld [vmem:[#allocation22_spill] sm:$0xff] }
 0x6e0   : > { %17442 = vst [vmem:[#allocation96_spill] sm:$0xff] %v14034_v59  ;;  %v4948_v25 = vmul.f32 %v17443_v34, %v14034_v59 }
 0x6e1   : > { %v4607_v15 = vadd.f32 %v4606_v13, %v4518_v19  ;;  %v4256_v19 = vadd.f32 %v13641_v40, %v17446_v42 }
 0x6e2   : > { %v4980_v36 = vpack.c.bf16 %v4948_v25, %v4948_v25 }
 0x6e3   : > { %v14039_v61 = vmax.f32 %v4607_v15, 0.0  ;;  %v5324_v45 = vpop.permute.xlu0 %5323  ;;  %v4527_v42 = vpop.f32.mrf.mxu3 }
 0x6e4   : > { %5414 = vst.msk [vmem:[#allocation2 + $0x64] sm:$0xf] %vm1085_vm2, %v5324_v45  ;;  %v4430_v44 = vpop.f32.mrf.mxu2  ;;  %v17448_v45 = vld [vmem:[#allocation95_spill] sm:$0xff] }
 0x6e5   : > { %17444 = vst [vmem:[#allocation92_spill] sm:$0xff] %v14039_v61  ;;  %v4691_v49 = vrot.slane %v14039_v61, 7  ;;  %v4431_v43 = vadd.f32 %v4430_v44, %v4342_v48  ;;  %v5237_v34 = vmul.f32 %v5160_v8, %v14039_v61  ;;  %v6227_v13 = vpack.c.bf16 %v14039_v61, %v14039_v61  ;;  %v17450_v44 = vld [vmem:[#allocation60_spill] sm:$0xff] }
 0x6e6   : > { %5012 = vst.msk [vmem:[#allocation2 + $0x17c] sm:$0xf] %vm668_vm1, %v4980_v36  ;;  %v4345_v59 = vadd.f32 %v17450_v44, %v4256_v19  ;;  %v17454_v44 = vld [vmem:[#allocation78_spill] sm:$0xff] }
 0x6e7   : > { %v4520_v25 = vadd.f32 %v4519_v5, %v4431_v43  ;;  %v5269_v15 = vpack.c.bf16 %v5237_v34, %v5237_v34  ;;  %v14052_v27 = vsel %vm379_vm0, %v4690_v37, %v4691_v49  ;;  %6259 = vst.msk [vmem:[#allocation2 + $0x170] sm:$0xf] %vm668_vm1, %v6227_v13  ;;  %v4616_v34 = vpop.f32.mrf.mxu0  ;;  %v17451_v13 = vld [vmem:[#allocation19_spill] sm:$0xff] }
 0x6e8   : > { %17447 = vst [vmem:[#allocation12_spill] sm:$0xff] %v14052_v27  ;;  %v4949_v14 = vmul.f32 %v17448_v45, %v14052_v27 }
 0x6e9   : > { %v4609_v48 = vadd.f32 %v4608_v41, %v4520_v25  ;;  %5353 = vrot.lane.b32.xlu0 %v5269_v15, %s10749_s9  ;;  %v4258_v41 = vadd.f32 %v13641_v40, %v17451_v13  ;;  %v4877_v25 = vpop.permute.xlu2 %4876 }
 0x6ea   : > { %v4981_v8 = vpack.c.bf16 %v4949_v14, %v4949_v14 }
 0x6eb   : > { %v14058_v36 = vmax.f32 %v4609_v48, 0.0 }
 0x6ec   : > { %v4433_v5 = vpop.f32.mrf.mxu2  ;;  %5013 = vst.msk [vmem:[#allocation2 + $0x190] sm:$0xf] %vm668_vm1, %v4981_v8 }
 0x6ed   : > { %17449 = vst [vmem:[#allocation98_spill] sm:$0xff] %v14058_v36  ;;  %v4692_v37 = vrot.slane %v14058_v36, 7  ;;  %v4434_v43 = vadd.f32 %v4433_v5, %v4345_v59  ;;  %v6228_v45 = vpack.c.bf16 %v14058_v36, %v14058_v36  ;;  %v4347_v5 = vadd.f32 %v17454_v44, %v4258_v41  ;;  %v17457_v41 = vld [vmem:[#allocation105_spill] sm:$0xff] }
 0x6ef   : > { %v4523_v15 = vadd.f32 %v4522_v10, %v4434_v43  ;;  %v14069_v14 = vsel %vm379_vm0, %v4691_v49, %v4692_v37  ;;  %6260 = vst.msk [vmem:[#allocation2 + $0x184] sm:$0xf] %vm668_vm1, %v6228_v45  ;;  %v4529_v43 = vpop.f32.mrf.mxu3 }
 0x6f0   : > { %17452 = vst [vmem:[#allocation94_spill] sm:$0xff] %v14069_v14  ;;  %v4950_v19 = vmul.f32 %v4877_v25, %v14069_v14  ;;  %v4261_v25 = vadd.f32 %v13641_v40, %v17455_v35  ;;  %v17459_v14 = vld [vmem:[#allocation25_spill] sm:$0xff] }
 0x6f1   : > { %v4612_v48 = vadd.f32 %v4611_v23, %v4523_v15  ;;  %v4618_v15 = vpop.f32.mrf.mxu0 }
 0x6f2   : > { %v4982_v8 = vpack.c.bf16 %v4950_v19, %v4950_v19  ;;  %v4350_v20 = vadd.f32 %v17459_v14, %v4261_v25 }
 0x6f3   : > { %v14073_v59 = vmax.f32 %v4612_v48, 0.0 }
 0x6f4   : > { %v4435_v27 = vpop.f32.mrf.mxu2  ;;  %5014 = vst.msk [vmem:[#allocation2 + $0x1a4] sm:$0xf] %vm668_vm1, %v4982_v8 }
 0x6f5   : > { %17453 = vst [vmem:[#allocation69_spill] sm:$0xff] %v14073_v59  ;;  %v4693_v13 = vrot.slane %v14073_v59, 7  ;;  %v4436_v10 = vadd.f32 %v4435_v27, %v4347_v5  ;;  %v6229_v49 = vpack.c.bf16 %v14073_v59, %v14073_v59  ;;  %v5175_v27 = vpop.permute.xlu1 %5174 }
 0x6f7   : > { %v4525_v45 = vadd.f32 %v4524_v53, %v4436_v10  ;;  %v14084_v23 = vsel %vm379_vm0, %v4692_v37, %v4693_v13  ;;  %6261 = vst.msk [vmem:[#allocation2 + $0x198] sm:$0xf] %vm668_vm1, %v6229_v49  ;;  %v17460_v49 = vld [vmem:[#allocation31_spill] sm:$0xff]  ;;  %v4532_v25 = vpop.f32.mrf.mxu3 }
 0x6f8   : > { %17456 = vst [vmem:[#allocation100_spill] sm:$0xff] %v14084_v23  ;;  %v4951_v19 = vmul.f32 %v17457_v41, %v14084_v23 }
 0x6f9   : > { %v4614_v48 = vadd.f32 %v4613_v58, %v4525_v45  ;;  %v4263_v45 = vadd.f32 %v13641_v40, %v17460_v49  ;;  %v17464_v49 = vld [vmem:[#allocation76_spill] sm:$0xff] }
 0x6fa   : > { %v4983_v8 = vpack.c.bf16 %v4951_v19, %v4951_v19 }
 0x6fb   : > { %v14089_v44 = vmax.f32 %v4614_v48, 0.0  ;;  %v5330_v5 = vpop.permute.xlu0 %5329  ;;  %v17462_v48 = vld [vmem:[#allocation23_spill] sm:$0xff] }
 0x6fc   : > { %5417 = vst.msk [vmem:[#allocation2 + $0xa0] sm:$0xf] %vm1085_vm2, %v5330_v5  ;;  %v4438_v35 = vpop.f32.mrf.mxu2 }
 0x6fd   : > { %17458 = vst [vmem:[#allocation97_spill] sm:$0xff] %v14089_v44  ;;  %v4694_v53 = vrot.slane %v14089_v44, 7  ;;  %v4439_v37 = vadd.f32 %v4438_v35, %v4350_v20  ;;  %v5240_v10 = vmul.f32 %v5175_v27, %v14089_v44  ;;  %v6230_v58 = vpack.c.bf16 %v14089_v44, %v14089_v44 }
 0x6fe   : > { %5015 = vst.msk [vmem:[#allocation2 + $0x1b8] sm:$0xf] %vm668_vm1, %v4983_v8  ;;  %v4621_v8 = vpop.f32.mrf.mxu0 }
 0x6ff   : > { %v4528_v41 = vadd.f32 %v4527_v42, %v4439_v37  ;;  %v5272_v19 = vpack.c.bf16 %v5240_v10, %v5240_v10  ;;  %v14102_v14 = vsel %vm379_vm0, %v4693_v13, %v4694_v53  ;;  %6262 = vst.msk [vmem:[#allocation2 + $0x1ac] sm:$0xf] %vm668_vm1, %v6230_v58  ;;  %v4352_v42 = vadd.f32 %v17464_v49, %v4263_v45  ;;  %v4892_v58 = vpop.permute.xlu2 %4891 }
 0x700   : > { %17461 = vst [vmem:[#allocation70_spill] sm:$0xff] %v14102_v14  ;;  %v4952_v20 = vmul.f32 %v17462_v48, %v14102_v14  ;;  %v17465_v14 = vld [vmem:[#allocation38_spill] sm:$0xff] }
 0x701   : > { %v4617_v27 = vadd.f32 %v4616_v34, %v4528_v41  ;;  %5359 = vrot.lane.b32.xlu0 %v5272_v19, %s10749_s9  ;;  %v4266_v34 = vadd.f32 %v13641_v40, %v17465_v14 }
 0x702   : > { %v4984_v5 = vpack.c.bf16 %v4952_v20, %v4952_v20 }
 0x703   : > { %v14108_v35 = vmax.f32 %v4617_v27, 0.0  ;;  %v4534_v27 = vpop.f32.mrf.mxu3 }
 0x704   : > { %v4440_v37 = vpop.f32.mrf.mxu2  ;;  %5016 = vst.msk [vmem:[#allocation2 + $0x1cc] sm:$0xf] %vm668_vm1, %v4984_v5 }
 0x705   : > { %17463 = vst [vmem:[#allocation102_spill] sm:$0xff] %v14108_v35  ;;  %v4695_v13 = vrot.slane %v14108_v35, 7  ;;  %v4441_v10 = vadd.f32 %v4440_v37, %v4352_v42  ;;  %v6231_v48 = vpack.c.bf16 %v14108_v35, %v14108_v35  ;;  %v17468_v42 = vld [vmem:[#allocation10_spill] sm:$0xff] }
 0x706   : > { %v4355_v37 = vadd.f32 %v17468_v42, %v4266_v34  ;;  %v4623_v23 = vpop.f32.mrf.mxu0  ;;  %v17471_v34 = vld [vmem:[#allocation40_spill] sm:$0xff] }
 0x707   : > { %v4530_v41 = vadd.f32 %v4529_v43, %v4441_v10  ;;  %v14119_v19 = vsel %vm379_vm0, %v4694_v53, %v4695_v13  ;;  %6263 = vst.msk [vmem:[#allocation2 + $0x1c0] sm:$0xf] %vm668_vm1, %v6231_v48  ;;  %v17469_v10 = vld [vmem:[#allocation34_spill] sm:$0xff] }
 0x708   : > { %17466 = vst [vmem:[#allocation99_spill] sm:$0xff] %v14119_v19  ;;  %v4953_v45 = vmul.f32 %v4892_v58, %v14119_v19  ;;  %v4268_v48 = vadd.f32 %v13641_v40, %v17469_v10  ;;  %v14151_v10 = vld [vmem:[%s16626_s3] ss:$0 sm:$0xff] }
 0x709   : > { %v4619_v20 = vadd.f32 %v4618_v15, %v4530_v41 }
 0x70a   : > { %v4985_v5 = vpack.c.bf16 %v4953_v45, %v4953_v45 }
 0x70b   : > { %v14123_v49 = vmax.f32 %v4619_v20, 0.0  ;;  %v5190_v20 = vpop.permute.xlu1 %5189  ;;  %v4537_v46 = vpop.f32.mrf.mxu3 }
 0x70c   : > { %v4443_v54 = vpop.f32.mrf.mxu2  ;;  %5017 = vst.msk [vmem:[#allocation2 + $0x1e0] sm:$0xf] %vm668_vm1, %v4985_v5 }
 0x70d   : > { %17467 = vst [vmem:[#allocation74_spill] sm:$0xff] %v14123_v49  ;;  %v4696_v43 = vrot.slane %v14123_v49, 7  ;;  %v4444_v14 = vadd.f32 %v4443_v54, %v4355_v37  ;;  %v6232_v53 = vpack.c.bf16 %v14123_v49, %v14123_v49  ;;  %v17473_v37 = vld [vmem:[#allocation82_spill] sm:$0xff] }
 0x70e   : > { %v4357_v19 = vadd.f32 %v17473_v37, %v4268_v48  ;;  %v17474_v48 = vld [vmem:[#allocation18_spill] sm:$0xff] }
 0x70f   : > { %v4533_v15 = vadd.f32 %v4532_v25, %v4444_v14  ;;  %v14134_v58 = vsel %vm379_vm0, %v4695_v13, %v4696_v43  ;;  %6264 = vst.msk [vmem:[#allocation2 + $0x1d4] sm:$0xf] %vm668_vm1, %v6232_v53  ;;  %v4626_v53 = vpop.f32.mrf.mxu0 }
 0x710   : > { %17470 = vst [vmem:[#allocation73_spill] sm:$0xff] %v14134_v58  ;;  %v4954_v41 = vmul.f32 %v17471_v34, %v14134_v58 }
 0x711   : > { %v4622_v45 = vadd.f32 %v4621_v8, %v4533_v15  ;;  %v4271_v15 = vadd.f32 %v14151_v10, %v17474_v48 }
 0x712   : > { %v4986_v5 = vpack.c.bf16 %v4954_v41, %v4954_v41 }
 0x713   : > { %v14139_v54 = vmax.f32 %v4622_v45, 0.0  ;;  %v5336_v42 = vpop.permute.xlu0 %5335  ;;  %v17476_v45 = vld [vmem:[#allocation108_spill] sm:$0xff] }
 0x714   : > { %5420 = vst.msk [vmem:[#allocation2 + $0xdc] sm:$0xf] %vm1085_vm2, %v5336_v42  ;;  %v4445_v40 = vpop.f32.mrf.mxu2 }
 0x715   : > { %17472 = vst [vmem:[#allocation101_spill] sm:$0xff] %v14139_v54  ;;  %v4697_v25 = vrot.slane %v14139_v54, 7  ;;  %v4446_v13 = vadd.f32 %v4445_v40, %v4357_v19  ;;  %v5243_v14 = vmul.f32 %v5190_v20, %v14139_v54  ;;  %v6233_v8 = vpack.c.bf16 %v14139_v54, %v14139_v54  ;;  %v17478_v40 = vld [vmem:[#allocation54_spill] sm:$0xff] }
 0x716   : > { %5018 = vst.msk [vmem:[#allocation2 + $0x1f4] sm:$0xf] %vm668_vm1, %v4986_v5  ;;  %v4360_v58 = vadd.f32 %v17478_v40, %v4271_v15  ;;  %v17482_v40 = vld [vmem:[#allocation87_spill] sm:$0xff] }
 0x717   : > { %v4535_v34 = vadd.f32 %v4534_v27, %v4446_v13  ;;  %v5275_v41 = vpack.c.bf16 %v5243_v14, %v5243_v14  ;;  %v14157_v19 = vsel %vm379_vm0, %v4696_v43, %v4697_v25  ;;  %6265 = vst.msk [vmem:[#allocation2 + $0x1e8] sm:$0xf] %vm668_vm1, %v6233_v8  ;;  %v4539_v13 = vpop.f32.mrf.mxu3  ;;  %v4907_v8 = vpop.permute.xlu2 %4906 }
 0x718   : > { %17475 = vst [vmem:[#allocation80_spill] sm:$0xff] %v14157_v19  ;;  %v4955_v20 = vmul.f32 %v17476_v45, %v14157_v19  ;;  %v17479_v45 = vld [vmem:[#allocation104_spill] sm:$0xff]  ;;  %v4628_v15 = vpop.f32.mrf.mxu0 }
 0x719   : > { %v4624_v5 = vadd.f32 %v4623_v23, %v4535_v34  ;;  %5365 = vrot.lane.b32.xlu0 %v5275_v41, %s10749_s9  ;;  %v4273_v23 = vadd.f32 %v14151_v10, %v17479_v45  ;;  %v17483_v45 = vld [vmem:[#allocation20_spill] sm:$0xff] }
 0x71a   : > { %v4987_v42 = vpack.c.bf16 %v4955_v20, %v4955_v20 }
 0x71b   : > { %v14163_v37 = vmax.f32 %v4624_v5, 0.0 }
 0x71c   : > { %v4448_v48 = vpop.f32.mrf.mxu2  ;;  %5019 = vst.msk [vmem:[#allocation2 + $0x208] sm:$0xf] %vm668_vm1, %v4987_v42 }
 0x71d   : > { %17477 = vst [vmem:[#allocation103_spill] sm:$0xff] %v14163_v37  ;;  %v4698_v27 = vrot.slane %v14163_v37, 7  ;;  %v4449_v43 = vadd.f32 %v4448_v48, %v4360_v58  ;;  %v6234_v14 = vpack.c.bf16 %v14163_v37, %v14163_v37  ;;  %v4362_v48 = vadd.f32 %v17482_v40, %v4273_v23  ;;  %v17485_v23 = vld [vmem:[#allocation46_spill] sm:$0xff] }
 0x71f   : > { %v4538_v34 = vadd.f32 %v4537_v46, %v4449_v43  ;;  %v14174_v41 = vsel %vm379_vm0, %v4697_v25, %v4698_v27  ;;  %6266 = vst.msk [vmem:[#allocation2 + $0x1fc] sm:$0xf] %vm668_vm1, %v6234_v14  ;;  %v4542_v14 = vpop.f32.mrf.mxu3 }
 0x720   : > { %17480 = vst [vmem:[#allocation85_spill] sm:$0xff] %v14174_v41  ;;  %v4956_v20 = vmul.f32 %v4907_v8, %v14174_v41  ;;  %v4276_v8 = vadd.f32 %v14151_v10, %v17483_v45 }
 0x721   : > { %v4627_v5 = vadd.f32 %v4626_v53, %v4538_v34 }
 0x722   : > { %v4988_v58 = vpack.c.bf16 %v4956_v20, %v4956_v20  ;;  %v4365_v45 = vadd.f32 %v17487_v6, %v4276_v8  ;;  %v17490_v8 = vld [vmem:[#allocation29_spill] sm:$0xff] }
 0x723   : > { %v14178_v42 = vmax.f32 %v4627_v5, 0.0  ;;  %v4631_v5 = vpop.f32.mrf.mxu0 }
 0x724   : > { %v4450_v19 = vpop.f32.mrf.mxu2  ;;  %5020 = vst.msk [vmem:[#allocation2 + $0x21c] sm:$0xf] %vm668_vm1, %v4988_v58 }
 0x725   : > { %17481 = vst [vmem:[#allocation71_spill] sm:$0xff] %v14178_v42  ;;  %v4699_v46 = vrot.slane %v14178_v42, 7  ;;  %v4451_v43 = vadd.f32 %v4450_v19, %v4362_v48  ;;  %v6235_v25 = vpack.c.bf16 %v14178_v42, %v14178_v42  ;;  %v5205_v19 = vpop.permute.xlu1 %5204 }
 0x727   : > { %v4540_v41 = vadd.f32 %v4539_v13, %v4451_v43  ;;  %v14189_v53 = vsel %vm379_vm0, %v4698_v27, %v4699_v46  ;;  %6267 = vst.msk [vmem:[#allocation2 + $0x210] sm:$0xf] %vm668_vm1, %v6235_v25 }
 0x728   : > { %17484 = vst [vmem:[#allocation89_spill] sm:$0xff] %v14189_v53  ;;  %v4957_v34 = vmul.f32 %v17485_v23, %v14189_v53 }
 0x729   : > { %v4629_v20 = vadd.f32 %v4628_v15, %v4540_v41  ;;  %v17488_v15 = vld [vmem:[#allocation106_spill] sm:$0xff] }
 0x72a   : > { %v4989_v58 = vpack.c.bf16 %v4957_v34, %v4957_v34  ;;  %v4278_v25 = vadd.f32 %v14151_v10, %v17488_v15  ;;  %v17492_v15 = vld [vmem:[#allocation77_spill] sm:$0xff] }
 0x72b   : > { %v14194_v40 = vmax.f32 %v4629_v20, 0.0  ;;  %v5342_v48 = vpop.permute.xlu0 %5341 }
 0x72c   : > { %5423 = vst.msk [vmem:[#allocation2 + $0x118] sm:$0xf] %vm1085_vm2, %v5342_v48  ;;  %v4453_v13 = vpop.f32.mrf.mxu2 }
 0x72d   : > { %17486 = vst [vmem:[#allocation75_spill] sm:$0xff] %v14194_v40  ;;  %v4700_v27 = vrot.slane %v14194_v40, 7  ;;  %v4454_v43 = vadd.f32 %v4453_v13, %v4365_v45  ;;  %v5246_v28 = vmul.f32 %v5205_v19, %v14194_v40  ;;  %v6236_v41 = vpack.c.bf16 %v14194_v40, %v14194_v40  ;;  %v4922_v45 = vpop.permute.xlu2 %4921  ;;  %v17501_v40 = vld [vmem:[#allocation16_spill] sm:$0xff] }
 0x72e   : > { %5021 = vst.msk [vmem:[#allocation2 + $0x230] sm:$0xf] %vm668_vm1, %v4989_v58  ;;  %v4544_v58 = vpop.f32.mrf.mxu3 }
 0x72f   : > { %v4543_v23 = vadd.f32 %v4542_v14, %v4454_v43  ;;  %v5278_v34 = vpack.c.bf16 %v5246_v28, %v5246_v28  ;;  %v14207_v6 = vsel %vm379_vm0, %v4699_v46, %v4700_v27  ;;  %6268 = vst.msk [vmem:[#allocation2 + $0x224] sm:$0xf] %vm668_vm1, %v6236_v41  ;;  %v4367_v14 = vadd.f32 %v17492_v15, %v4278_v25  ;;  %v4633_v28 = vpop.f32.mrf.mxu0 }
 0x730   : > { %17489 = vst [vmem:[#allocation7_spill] sm:$0xff] %v14207_v6  ;;  %v4958_v20 = vmul.f32 %v17490_v8, %v14207_v6 }
 0x731   : > { %v4632_v19 = vadd.f32 %v4631_v5, %v4543_v23  ;;  %5371 = vrot.lane.b32.xlu0 %v5278_v34, %s10749_s9  ;;  %v14221_v5 = vld [vmem:[%s16624_s1] sm:$0xff]  ;;  %v17493_v23 = vld [vmem:[#allocation107_spill] sm:$0xff] }
 0x732   : > { %v4990_v48 = vpack.c.bf16 %v4958_v20, %v4958_v20  ;;  %v4281_v34 = vadd.f32 %v14151_v10, %v17493_v23 }
 0x733   : > { %v14213_v13 = vmax.f32 %v4632_v19, 0.0 }
 0x734   : > { %v4455_v43 = vpop.f32.mrf.mxu2  ;;  %5022 = vst.msk [vmem:[#allocation2 + $0x244] sm:$0xf] %vm668_vm1, %v4990_v48 }
 0x735   : > { %17491 = vst [vmem:[#allocation61_spill] sm:$0xff] %v14213_v13  ;;  %v4701_v46 = vrot.slane %v14213_v13, 7  ;;  %v4456_v53 = vadd.f32 %v4455_v43, %v4367_v14  ;;  %v6237_v41 = vpack.c.bf16 %v14213_v13, %v14213_v13  ;;  %v17496_v14 = vld [vmem:[#allocation83_spill] sm:$0xff] }
 0x736   : > { %v4370_v43 = vadd.f32 %v17496_v14, %v4281_v34  ;;  %v4547_v6 = vpop.f32.mrf.mxu3 }
 0x737   : > { %v4545_v8 = vadd.f32 %v4544_v58, %v4456_v53  ;;  %v14229_v25 = vsel %vm379_vm0, %v4700_v27, %v4701_v46  ;;  %6269 = vst.msk [vmem:[#allocation2 + $0x238] sm:$0xf] %vm668_vm1, %v6237_v41  ;;  %v5065_v58 = vpop.permute.xlu2 %5064  ;;  %v4636_v23 = vpop.f32.mrf.mxu0  ;;  %v17497_v41 = vld [vmem:[#allocation27_spill] sm:$0xff] }
 0x738   : > { %17494 = vst [vmem:[#allocation67_spill] sm:$0xff] %v14229_v25  ;;  %v4959_v20 = vmul.f32 %v4922_v45, %v14229_v25  ;;  %v14242_v45 = vld [vmem:[%s16624_s1 + $0x28] sm:$0xff]  ;;  %v4283_v34 = vadd.f32 %v14151_v10, %v17497_v41 }
 0x739   : > { %v4634_v19 = vadd.f32 %v4633_v28, %v4545_v8  ;;  %5539 = vperm.xlu0 %10568, %v14221_v5  }
 0x73a   : > { %v4991_v48 = vpack.c.bf16 %v4959_v20, %v4959_v20  ;;  %v4372_v54 = vadd.f32 %v17501_v40, %v4283_v34 }
 0x73b   : > { %v14234_v15 = vmax.f32 %v4634_v19, 0.0 }
 0x73c   : > { %v4458_v62 = vpop.f32.mrf.mxu2  ;;  %5023 = vst.msk [vmem:[#allocation2 + $0x258] sm:$0xf] %vm668_vm1, %v4991_v48 }
 0x73d   : > { %17495 = vst [vmem:[#allocation62_spill] sm:$0xff] %v14234_v15  ;;  %v4702_v53 = vrot.slane %v14234_v15, 7  ;;  %v4459_v27 = vadd.f32 %v4458_v62, %v4370_v43  ;;  %v6238_v28 = vpack.c.bf16 %v14234_v15, %v14234_v15  ;;  %v17499_v62 = vld [vmem:[#allocation48_spill] sm:$0xff] }
 0x73f   : > { %v4548_v8 = vadd.f32 %v4547_v6, %v4459_v27  ;;  %v14250_v20 = vsel %vm379_vm0, %v4701_v46, %v4702_v53  ;;  %6270 = vst.msk [vmem:[#allocation2 + $0x24c] sm:$0xf] %vm668_vm1, %v6238_v28  ;;  %v14267_v28 = vld [vmem:[%s16624_s1 + $0x40] sm:$0xff] }
 0x740   : > { %17498 = vst [vmem:[#allocation63_spill] sm:$0xff] %v14250_v20  ;;  %v4960_v19 = vmul.f32 %v17499_v62, %v14250_v20 }
 0x741   : > { %v4637_v48 = vadd.f32 %v4636_v23, %v4548_v8  ;;  %5564 = vperm.xlu0 %10568, %v14242_v45   ;;  %v4549_v23 = vpop.f32.mrf.mxu3  ;;  %v4638_v8 = vpop.f32.mrf.mxu0 }
 0x742   : > { %v4992_v14 = vpack.c.bf16 %v4960_v19, %v4960_v19 }
 0x743   : > { %v14256_v43 = vmax.f32 %v4637_v48, 0.0  ;;  %v5348_v25 = vpop.permute.xlu0 %5347 }
 0x744   : > { %5426 = vst.msk [vmem:[#allocation2 + $0x154] sm:$0xf] %vm1085_vm2, %v5348_v25  ;;  %v4460_v10 = vpop.f32.mrf.mxu2 }
 0x745   : > { %17500 = vst [vmem:[#allocation64_spill] sm:$0xff] %v14256_v43  ;;  %v4703_v6 = vrot.slane %v14256_v43, 7  ;;  %v4461_v46 = vadd.f32 %v4460_v10, %v4372_v54  ;;  %v5217_v27 = vmul.f32 %v13667_v63, %v14256_v43  ;;  %v6239_v40 = vpack.c.bf16 %v14256_v43, %v14256_v43  ;;  %v5080_v54 = vpop.permute.xlu2 %5079  ;;  %v17503_v63 = vld [vmem:[#allocation21_spill] sm:$0xff] }
 0x746   : > { %5024 = vst.msk [vmem:[#allocation2 + $0x26c] sm:$0xf] %vm668_vm1, %v4992_v14  ;;  %v5220_v14 = vmul.f32 %v13697_v50, %v13671_v29  ;;  %v14298_v50 = vld [vmem:[%s16624_s1 + $0x58] sm:$0xff] }
 0x747   : > { %v4550_v41 = vadd.f32 %v4549_v23, %v4461_v46  ;;  %v5249_v25 = vpack.c.bf16 %v5217_v27, %v5217_v27  ;;  %v14273_v34 = vsel %vm379_vm0, %v4702_v53, %v4703_v6  ;;  %6271 = vst.msk [vmem:[#allocation2 + $0x260] sm:$0xf] %vm668_vm1, %v6239_v40  ;;  %v17505_v40 = vrot.slane %v13655_v57, 7 }
 0x748   : > { %17502 = vst [vmem:[#allocation65_spill] sm:$0xff] %v14273_v34  ;;  %v4929_v62 = vmul.f32 %v17503_v63, %v14273_v34  ;;  %v5252_v23 = vpack.c.bf16 %v5220_v14, %v5220_v14  ;;  %v17508_v63 = vld [vmem:[#allocation26_spill] sm:$0xff]  ;;  %v14658_v34 = vld [vmem:[%s16624_s1 + $0xc8] sm:$0xff] }
 0x749   : > { %v4639_v19 = vadd.f32 %v4638_v8, %v4550_v41  ;;  %5313 = vrot.lane.b32.xlu1 %v5249_v25, %s10749_s9  ;;  %5579 = vperm.xlu0 %10568, %v14267_v28  }
 0x74a   : > { %v4961_v48 = vpack.c.bf16 %v4929_v62, %v4929_v62 }
 0x74b   : > { %v14282_v10 = vmax.f32 %v4639_v19, 0.0 }
 0x74c   : > { %4993 = vst.msk [vmem:[#allocation2] sm:$0xf] %vm668_vm1, %v4961_v48 }
 0x74d   : > { %17504 = vst [vmem:[#allocation66_spill] sm:$0xff] %v14282_v10  ;;  %v4704_v53 = vrot.slane %v14282_v10, 7  ;;  %v5218_v46 = vmul.f32 %v5065_v58, %v14282_v10  ;;  %v6240_v27 = vpack.c.bf16 %v14282_v10, %v14282_v10  ;;  %v5090_v58 = vpop.permute.xlu2 %5089 }
 0x74f   : > { %v14293_v41 = vsel %vm379_vm0, %v4704_v53, %v17505_v40  ;;  %v5250_v25 = vpack.c.bf16 %v5218_v46, %v5218_v46  ;;  %v14302_v8 = vsel %vm379_vm0, %v4703_v6, %v4704_v53  ;;  %6272 = vst.msk [vmem:[#allocation2 + $0x274] sm:$0xf] %vm668_vm1, %v6240_v27  ;;  %v5221_v6 = vmul.f32 %v5080_v54, %v13699_v51  ;;  %v14321_v27 = vld [vmem:[%s16624_s1 + $0x70] sm:$0xff] }
 0x750   : > { %17506 = vst [vmem:[#allocation68_spill] sm:$0xff] %v14293_v41  ;;  %v4931_v62 = vmul.f32 %v17508_v63, %v14293_v41  ;;  %v4930_v19 = vmul.f32 %v13673_v30, %v14302_v8  ;;  %v5223_v53 = vmul.f32 %v5090_v58, %v13742_v39  ;;  %v5224_v54 = vmul.f32 %v13784_v33, %v13762_v38  ;;  %v14333_v63 = vld [vmem:[%s16624_s1 + $0x88] sm:$0xff] }
 0x751   : > { %17507 = vst [vmem:[#allocation6_spill] sm:$0xff] %v14302_v8  ;;  %5315 = vrot.lane.b32.xlu2 %v5250_v25, %s10749_s9  ;;  %5319 = vrot.lane.b32.xlu1 %v5252_v23, %s10749_s9  ;;  %v5253_v30 = vpack.c.bf16 %v5221_v6, %v5221_v6 }
 0x752   : > { %v4963_v48 = vpack.c.bf16 %v4931_v62, %v4931_v62  ;;  %5594 = vperm.xlu0 %10568, %v14298_v50   ;;  %v4962_v14 = vpack.c.bf16 %v4930_v19, %v4930_v19  ;;  %v5255_v46 = vpack.c.bf16 %v5223_v53, %v5223_v53  ;;  %v5256_v25 = vpack.c.bf16 %v5224_v54, %v5224_v54 }
 0x753   : > { %v5227_v19 = vmul.f32 %v13811_v22, %v13832_v60 }
 0x754   : > { %4995 = vst.msk [vmem:[#allocation2 + $0x28] sm:$0xf] %vm668_vm1, %v4963_v48 }
 0x755   : > { %5411 = vst.msk [vmem:[#allocation2 + $0x28] sm:$0xf] %vm1085_vm2, %v14021_v56  ;;  %v5105_v23 = vpop.permute.xlu2 %5104  ;;  %v5259_v6 = vpack.c.bf16 %v5227_v19, %v5227_v19 }
 0x756   : > { %4994 = vst.msk [vmem:[#allocation2 + $0x14] sm:$0xf] %vm668_vm1, %v4962_v14  ;;  %v5226_v56 = vmul.f32 %v5105_v23, %v13809_v3  ;;  %v14344_v14 = vld [vmem:[%s16624_s1 + $0xa0] sm:$0xff]  ;;  %v14355_v23 = vld [vmem:[%s16624_s1 + $0xb8] sm:$0xff] }
 0x758   : > { %v5258_v58 = vpack.c.bf16 %v5226_v56, %v5226_v56 }
 0x759   : > { %5325 = vrot.lane.b32.xlu1 %v5255_v46, %s10749_s9  ;;  %5321 = vrot.lane.b32.xlu2 %v5253_v30, %s10749_s9  ;;  %v5230_v46 = vmul.f32 %v13836_v47, %v13901_v17  ;;  %v5233_v47 = vmul.f32 %v13866_v24, %v13965_v31  ;;  %v5236_v24 = vmul.f32 %v13898_v18, %v14023_v55  ;;  %v10439_v18 = vld [vmem:[%s16627_s4 + $0x38] sm:$0xff] }
 0x75a   : > { %5609 = vperm.xlu0 %10568, %v14321_v27   ;;  %8517 = vmatpush.bf16.msrb.mxu1 %v10439_v18  ;;  %v10435_v18 = vld [vmem:[%s16627_s4 + $0x18] sm:$0xff] }
 0x75b   : > { %v5354_v40 = vpop.permute.xlu0 %5353  ;;  %v5262_v54 = vpack.c.bf16 %v5230_v46, %v5230_v46 }
 0x75c   : > { %5429 = vst.msk [vmem:[#allocation2 + $0x190] sm:$0xf] %vm1085_vm2, %v5354_v40 }
 0x75d   : > { %v5120_v62 = vpop.permute.xlu2 %5119 }
 0x75e   : > { %v5229_v33 = vmul.f32 %v5120_v62, %v13879_v21  ;;  %v14367_v62 = vld [vmem:[%s16624_s1 + $0xd0] sm:$0xff] }
 0x760   : > { %v5261_v48 = vpack.c.bf16 %v5229_v33, %v5229_v33  ;;  %v5265_v33 = vpack.c.bf16 %v5233_v47, %v5233_v47  ;;  %v17509_v47 = vmov 3  }
 0x761   : > { %5331 = vrot.lane.b32.xlu1 %v5258_v58, %s10749_s9  ;;  %5327 = vrot.lane.b32.xlu2 %v5256_v25, %s10749_s9 }
 0x762   : > { %5624 = vperm.xlu0 %10568, %v14333_v63  }
 0x765   : > { %v5135_v53 = vpop.permute.xlu2 %5134 }
 0x766   : > { %v5232_v30 = vmul.f32 %v5135_v53, %v13945_v26  ;;  %v14378_v53 = vld [vmem:[%s16624_s1 + $0xe8] sm:$0xff] }
 0x768   : > { %v5264_v22 = vpack.c.bf16 %v5232_v30, %v5232_v30  ;;  %v5268_v30 = vpack.c.bf16 %v5236_v24, %v5236_v24 }
 0x769   : > { %5337 = vrot.lane.b32.xlu1 %v5261_v48, %s10749_s9  ;;  %5333 = vrot.lane.b32.xlu2 %v5259_v6, %s10749_s9 }
 0x76a   : > { %5639 = vperm.xlu0 %10568, %v14344_v14  }
 0x76d   : > { %v5150_v56 = vpop.permute.xlu2 %5149 }
 0x76e   : > { %v5235_v40 = vmul.f32 %v5150_v56, %v14005_v1 }
 0x770   : > { %v5267_v58 = vpack.c.bf16 %v5235_v40, %v5235_v40 }
 0x771   : > { %5343 = vrot.lane.b32.xlu1 %v5264_v22, %s10749_s9  ;;  %5339 = vrot.lane.b32.xlu2 %v5262_v54, %s10749_s9  ;;  %v5239_v54 = vmul.f32 %v13922_v0, %v14073_v59 }
 0x772   : > { %5654 = vperm.xlu0 %10568, %v14355_v23  }
 0x773   : > { %v5360_v25 = vpop.permute.xlu0 %5359  ;;  %v5271_v40 = vpack.c.bf16 %v5239_v54, %v5239_v54 }
 0x774   : > { %5432 = vst.msk [vmem:[#allocation2 + $0x1cc] sm:$0xf] %vm1085_vm2, %v5360_v25 }
 0x775   : > { %v5165_v19 = vpop.permute.xlu2 %5164 }
 0x776   : > { %v5238_v48 = vmul.f32 %v5165_v19, %v14058_v36  ;;  %v5242_v19 = vmul.f32 %v13950_v32, %v14123_v49  ;;  %v5245_v32 = vmul.f32 %v13971_v16, %v14178_v42  ;;  %v5248_v16 = vmul.f32 %v14000_v2, %v14234_v15 }
 0x778   : > { %v5270_v6 = vpack.c.bf16 %v5238_v48, %v5238_v48  ;;  %v5274_v24 = vpack.c.bf16 %v5242_v19, %v5242_v19  ;;  %v5277_v54 = vpack.c.bf16 %v5245_v32, %v5245_v32  ;;  %v16935_v32 = vrot.slane %v13742_v39, 1 }
 0x779   : > { %5349 = vrot.lane.b32.xlu1 %v5267_v58, %s10749_s9  ;;  %5345 = vrot.lane.b32.xlu2 %v5265_v33, %s10749_s9  ;;  %v10438_v58 = vld [vmem:[%s16627_s4 + $0x30] sm:$0xff] }
 0x77a   : > { %5669 = vperm.xlu0 %10568, %v14367_v62   ;;  %8518 = vmatpush.bf16.msrb.mxu1 %v10438_v58  ;;  %v14441_v58 = vld [vmem:[%s16624_s1 + $0x18] sm:$0xff] }
 0x77d   : > { %v5180_v46 = vpop.permute.xlu2 %5179 }
 0x77e   : > { %v5241_v22 = vmul.f32 %v5180_v46, %v14108_v35  ;;  %v10436_v46 = vld [vmem:[%s16627_s4 + $0x20] sm:$0xff] }
 0x780   : > { %v5273_v56 = vpack.c.bf16 %v5241_v22, %v5241_v22 }
 0x781   : > { %5355 = vrot.lane.b32.xlu1 %v5270_v6, %s10749_s9  ;;  %5351 = vrot.lane.b32.xlu2 %v5268_v30, %s10749_s9  ;;  %v10437_v6 = vld [vmem:[%s16627_s4 + $0x28] sm:$0xff] }
 0x782   : > { %5684 = vperm.xlu0 %10568, %v14378_v53   ;;  %8519 = vmatpush.bf16.msrb.mxu1 %v10437_v6 }
 0x785   : > { %v5195_v25 = vpop.permute.xlu2 %5194 }
 0x786   : > { %v5244_v0 = vmul.f32 %v5195_v25, %v14163_v37  ;;  %8520 = vmatpush.bf16.msrb.mxu1 %v10436_v46  ;;  %v10433_v25 = vld [vmem:[%s16627_s4 + $0x8] sm:$0xff]  ;;  %v16942_v46 = vrot.slane %v13719_v52, 1 }
 0x788   : > { %v5276_v48 = vpack.c.bf16 %v5244_v0, %v5244_v0  ;;  %v14446_v0 = vld [vmem:[%s16624_s1 + $0x10] sm:$0xff] }
 0x789   : > { %5361 = vrot.lane.b32.xlu1 %v5273_v56, %s10749_s9  ;;  %5357 = vrot.lane.b32.xlu2 %v5271_v40, %s10749_s9  ;;  %v14426_v56 = vld [vmem:[%s16624_s1 + $0x8] sm:$0xff]  ;;  %v5280_v40 = vpack.c.bf16 %v5248_v16, %v5248_v16 }
 0x78a   : > { %10571 = vset.pattern.permute.xlu0 %v17509_v47  ;;  %8521 = vmatpush.bf16.msrb.mxu1 %v10435_v18 }
 0x78b   : > { %5827 = vperm.xlu0 %10571, %v14221_v5   ;;  %v5366_v33 = vpop.permute.xlu0 %5365 }
 0x78c   : > { %5435 = vst.msk [vmem:[#allocation2 + $0x208] sm:$0xf] %vm1085_vm2, %v5366_v33  ;;  %v16933_v33 = vrot.slane %v14256_v43, 1 }
 0x78d   : > { %v5210_v30 = vpop.permute.xlu2 %5209 }
 0x78e   : > { %v5247_v5 = vmul.f32 %v5210_v30, %v14213_v13 }
 0x790   : > { %v5279_v22 = vpack.c.bf16 %v5247_v5, %v5247_v5  ;;  %v14466_v5 = vld [vmem:[%s16624_s1 + $0x30] sm:$0xff] }
 0x791   : > { %5367 = vrot.lane.b32.xlu1 %v5276_v48, %s10749_s9  ;;  %5363 = vrot.lane.b32.xlu2 %v5274_v24, %s10749_s9 }
 0x793   : > { %5852 = vperm.xlu0 %10571, %v14242_v45   ;;  %v10434_v45 = vld [vmem:[%s16627_s4 + $0x10] sm:$0xff] }
 0x794   : > { %8522 = vmatpush.bf16.msrb.mxu1 %v10434_v45 }
 0x798   : > { %8523 = vmatpush.bf16.msrb.mxu1 %v10433_v25  ;;  %v16934_v25 = vrot.slane %v13809_v3, 1 }
 0x799   : > { %5373 = vrot.lane.b32.xlu1 %v5279_v22, %s10749_s9  ;;  %5369 = vrot.lane.b32.xlu2 %v5277_v54, %s10749_s9  ;;  %v14485_v22 = vsel %vm1150_vm3, %v16942_v46, %v16935_v32 }
 0x79a   : > { %17511 = vst [vmem:[#allocation13_spill] sm:$0xff] %v14485_v22 }
 0x79b   : > { %5867 = vperm.xlu0 %10571, %v14267_v28   ;;  %v10432_v28 = vld [vmem:[%s16627_s4] sm:$0xff] }
 0x79c   : > { %8524 = vmatpush.bf16.msrb.mxu1 %v10432_v28 }
 0x7a1   : > { %5544 = vperm.xlu1 %10569, %v14426_v56   ;;  %5375 = vrot.lane.b32.xlu2 %v5280_v40, %s10749_s9  ;;  %v14492_v40 = vld [vmem:[%s16624_s1 + $0x48] sm:$0xff] }
 0x7a3   : > { %5882 = vperm.xlu0 %10571, %v14298_v50   ;;  %v5372_v2 = vpop.permute.xlu0 %5371  ;;  %v16941_v50 = vrot.slane %v14282_v10, 1 }
 0x7a4   : > { %5438 = vst.msk [vmem:[#allocation2 + $0x244] sm:$0xf] %vm1085_vm2, %v5372_v2  ;;  %v16940_v2 = vrot.slane %v13786_v7, 1 }
 0x7a5   : > { %v14459_v48 = vsel %vm1150_vm3, %v16933_v33, %v16941_v50 }
 0x7a6   : > { %17510 = vst [vmem:[#allocation9_spill] sm:$0xff] %v14459_v48 }
 0x7a9   : > { %5554 = vperm.xlu1 %10569, %v14441_v58   ;;  %5549 = vperm.xlu2 %10570, %v14446_v0  }
 0x7ab   : > { %5897 = vperm.xlu0 %10571, %v14321_v27   ;;  %v5316_v19 = vpop.permute.xlu2 %5315  ;;  %v5540_v24 = vpop.permute.xlu0 %5539  ;;  %v14471_v27 = vld [vmem:[%s16624_s1 + $0x20] sm:$0xff] }
 0x7ac   : > { %5410 = vst.msk [vmem:[#allocation2 + $0x14] sm:$0xf] %vm1085_vm2, %v5316_v19  ;;  %v5697_v6 = vmul.f32 %v5540_v24, %v14459_v48  ;;  %v14511_v19 = vsel %vm1150_vm3, %v16940_v2, %v16934_v25  ;;  %v9770_v2 = vld [vmem:[#allocation2 + $0x28] sm:$0xf] }
 0x7ad   : > { %17512 = vst [vmem:[#allocation17_spill] sm:$0xff] %v14511_v19 }
 0x7ae   : > { %v5729_v30 = vpack.c.bf16 %v5697_v6, %v5697_v6 }
 0x7b0   : > { %5761 = vst.msk [vmem:[#allocation2 + $0x4] sm:$0xf] %vm668_vm1, %v5729_v30 }
 0x7b1   : > { %5569 = vperm.xlu1 %10569, %v14466_v5   ;;  %5559 = vperm.xlu2 %10570, %v14471_v27  }
 0x7b3   : > { %5912 = vperm.xlu0 %10571, %v14333_v63   ;;  %v5565_v54 = vpop.permute.xlu0 %5564  ;;  %v5322_v18 = vpop.permute.xlu2 %5321  ;;  %v14497_v63 = vld [vmem:[%s16624_s1 + $0x38] sm:$0xff] }
 0x7b4   : > { %v5702_v16 = vmul.f32 %v5565_v54, %v14485_v22  ;;  %5413 = vst.msk [vmem:[#allocation2 + $0x50] sm:$0xf] %vm1085_vm2, %v5322_v18  ;;  %v14524_v18 = vld [vmem:[%s16624_s1 + $0x50] sm:$0xff] }
 0x7b6   : > { %v5734_v45 = vpack.c.bf16 %v5702_v16, %v5702_v16  ;;  %v16936_v16 = vrot.slane %v13879_v21, 1 }
 0x7b8   : > { %5766 = vst.msk [vmem:[#allocation2 + $0x68] sm:$0xf] %vm668_vm1, %v5734_v45  ;;  %v16937_v45 = vrot.slane %v13853_v4, 1 }
 0x7b9   : > { %5584 = vperm.xlu1 %10569, %v14492_v40   ;;  %5574 = vperm.xlu2 %10570, %v14497_v63  }
 0x7bb   : > { %5927 = vperm.xlu0 %10571, %v14344_v14   ;;  %v5314_v28 = vpop.permute.xlu1 %5313  ;;  %v5580_v24 = vpop.permute.xlu0 %5579  ;;  %v14519_v14 = vld [vmem:[%s16624_s1 + $0x60] sm:$0xff] }
 0x7bc   : > { %5409 = vst.msk [vmem:[#allocation2] sm:$0xf] %vm1085_vm2, %v5314_v28  ;;  %v5705_v6 = vmul.f32 %v5580_v24, %v14511_v19  ;;  %v5328_v30 = vpop.permute.xlu2 %5327 }
 0x7bd   : > { %5416 = vst.msk [vmem:[#allocation2 + $0x8c] sm:$0xf] %vm1085_vm2, %v5328_v30  ;;  %v14539_v30 = vsel %vm1150_vm3, %v16937_v45, %v16936_v16  ;;  %v16938_v45 = vrot.slane %v13945_v26, 1 }
 0x7be   : > { %v5737_v54 = vpack.c.bf16 %v5705_v6, %v5705_v6  ;;  %v10354_v6 = vld [vmem:[#allocation2 + $0x10] sm:$0xf0]  ;;  %17513 = vst [vmem:[#allocation50_spill] sm:$0xff] %v14539_v30 }
 0x7c0   : > { %5769 = vst.msk [vmem:[#allocation2 + $0xa4] sm:$0xf] %vm668_vm1, %v5737_v54 }
 0x7c1   : > { %5599 = vperm.xlu1 %10569, %v14519_v14   ;;  %5589 = vperm.xlu2 %10570, %v14524_v18  }
 0x7c3   : > { %5942 = vperm.xlu0 %10571, %v14355_v23   ;;  %v5320_v28 = vpop.permute.xlu1 %5319  ;;  %v9750_v24 = vld [vmem:[#allocation2] sm:$0xf]  ;;  %v14546_v23 = vld [vmem:[%s16624_s1 + $0x78] sm:$0xff] }
 0x7c4   : > { %5412 = vst.msk [vmem:[#allocation2 + $0x3c] sm:$0xf] %vm1085_vm2, %v5320_v28  ;;  %v5595_v54 = vpop.permute.xlu0 %5594  ;;  %v5334_v33 = vpop.permute.xlu2 %5333  ;;  %v9751_v25 = vor.u32 %v10354_v6, %v9750_v24  ;;  %v14551_v28 = vld [vmem:[%s16624_s1 + $0x68] sm:$0xff] }
 0x7c5   : > { %v5708_v32 = vmul.f32 %v5595_v54, %v14539_v30  ;;  %5419 = vst.msk [vmem:[#allocation2 + $0xc8] sm:$0xf] %vm1085_vm2, %v5334_v33  ;;  %v16939_v33 = vrot.slane %v13924_v11, 1  ;;  %v14578_v54 = vld [vmem:[%s16624_s1 + $0x80] sm:$0xff]  ;;  %v10369_v20 = vld [vmem:[#allocation2 + $0x88] sm:$0xf0] }
 0x7c6   : > { %8525 = vmatmul.bf16.vlgmr.msrb.gmra.mxu1 %v9751_v25 }
 0x7c7   : > { %v5740_v16 = vpack.c.bf16 %v5708_v32, %v5708_v32  ;;  %v14566_v32 = vsel %vm1150_vm3, %v16939_v33, %v16938_v45  ;;  %v16945_v45 = vrot.slane %v14005_v1, 1 }
 0x7c8   : > { %17514 = vst [vmem:[#allocation37_spill] sm:$0xff] %v14566_v32 }
 0x7c9   : > { %5772 = vst.msk [vmem:[#allocation2 + $0xe0] sm:$0xf] %vm668_vm1, %v5740_v16  ;;  %5614 = vperm.xlu1 %10569, %v14546_v23   ;;  %5604 = vperm.xlu2 %10570, %v14551_v28  }
 0x7cb   : > { %5957 = vperm.xlu0 %10571, %v14367_v62   ;;  %v5326_v25 = vpop.permute.xlu1 %5325  ;;  %v14573_v62 = vld [vmem:[%s16624_s1 + $0x90] sm:$0xff] }
 0x7cc   : > { %5415 = vst.msk [vmem:[#allocation2 + $0x78] sm:$0xf] %vm1085_vm2, %v5326_v25  ;;  %v5610_v16 = vpop.permute.xlu0 %5609  ;;  %v5340_v24 = vpop.permute.xlu2 %5339 }
 0x7cd   : > { %v5711_v6 = vmul.f32 %v5610_v16, %v14566_v32  ;;  %5422 = vst.msk [vmem:[#allocation2 + $0x104] sm:$0xf] %vm1085_vm2, %v5340_v24  ;;  %v10359_v16 = vld [vmem:[#allocation2 + $0x38] sm:$0xf0]  ;;  %v16946_v24 = vrot.slane %v13982_v12, 1 }
 0x7ce   : > { %v9771_v46 = vor.u32 %v10359_v16, %v9770_v2  ;;  %v17516_v2 = vmov 5  }
 0x7cf   : > { %v5743_v25 = vpack.c.bf16 %v5711_v6, %v5711_v6  ;;  %v14593_v6 = vsel %vm1150_vm3, %v16946_v24, %v16945_v45  ;;  %v16951_v24 = vrot.slane %v14058_v36, 1 }
 0x7d0   : > { %17515 = vst [vmem:[#allocation58_spill] sm:$0xff] %v14593_v6 }
 0x7d1   : > { %5775 = vst.msk [vmem:[#allocation2 + $0x11c] sm:$0xf] %vm668_vm1, %v5743_v25  ;;  %5629 = vperm.xlu1 %10569, %v14573_v62   ;;  %5619 = vperm.xlu2 %10570, %v14578_v54  }
 0x7d3   : > { %5972 = vperm.xlu0 %10571, %v14378_v53   ;;  %v5332_v33 = vpop.permute.xlu1 %5331  ;;  %v14600_v53 = vld [vmem:[%s16624_s1 + $0xa8] sm:$0xff] }
 0x7d4   : > { %5418 = vst.msk [vmem:[#allocation2 + $0xb4] sm:$0xf] %vm1085_vm2, %v5332_v33  ;;  %v5625_v25 = vpop.permute.xlu0 %5624  ;;  %v5346_v50 = vpop.permute.xlu2 %5345  ;;  %v14605_v33 = vld [vmem:[%s16624_s1 + $0x98] sm:$0xff] }
 0x7d5   : > { %v5714_v48 = vmul.f32 %v5625_v25, %v14593_v6  ;;  %5425 = vst.msk [vmem:[#allocation2 + $0x140] sm:$0xf] %vm1085_vm2, %v5346_v50  ;;  %v16952_v50 = vrot.slane %v14039_v61, 1  ;;  %v14627_v6 = vld [vmem:[%s16624_s1 + $0xc0] sm:$0xff] }
 0x7d6   : > { %8530 = vmatmul.bf16.gmra.mxu1 %v9771_v46 }
 0x7d7   : > { %v5746_v45 = vpack.c.bf16 %v5714_v48, %v5714_v48  ;;  %v14620_v48 = vsel %vm1150_vm3, %v16952_v50, %v16951_v24  ;;  %v16963_v24 = vrot.slane %v14108_v35, 1 }
 0x7d8   : > { %17517 = vst [vmem:[#allocation22_spill] sm:$0xff] %v14620_v48 }
 0x7d9   : > { %5778 = vst.msk [vmem:[#allocation2 + $0x158] sm:$0xf] %vm668_vm1, %v5746_v45  ;;  %5644 = vperm.xlu1 %10569, %v14600_v53   ;;  %5634 = vperm.xlu2 %10570, %v14605_v33  }
 0x7db   : > { %v5338_v46 = vpop.permute.xlu1 %5337  ;;  %10575 = vset.pattern.permute.xlu0 %v17516_v2 }
 0x7dc   : > { %5421 = vst.msk [vmem:[#allocation2 + $0xf0] sm:$0xf] %vm1085_vm2, %v5338_v46  ;;  %v5640_v45 = vpop.permute.xlu0 %5639  ;;  %v5352_v16 = vpop.permute.xlu2 %5351  ;;  %v14632_v46 = vld [vmem:[%s16624_s1 + $0xb0] sm:$0xff] }
 0x7dd   : > { %v5717_v25 = vmul.f32 %v5640_v45, %v14620_v48  ;;  %5428 = vst.msk [vmem:[#allocation2 + $0x17c] sm:$0xf] %vm1085_vm2, %v5352_v16  ;;  %v9790_v45 = vld [vmem:[#allocation2 + $0x50] sm:$0xf]  ;;  %v16964_v16 = vrot.slane %v14089_v44, 1 }
 0x7de   : > { %v10364_v48 = vld [vmem:[#allocation2 + $0x60] sm:$0xf0] }
 0x7df   : > { %v5749_v32 = vpack.c.bf16 %v5717_v25, %v5717_v25  ;;  %v14646_v25 = vsel %vm1150_vm3, %v16964_v16, %v16963_v24  ;;  %v9791_v19 = vor.u32 %v10364_v48, %v9790_v45  ;;  %v16969_v16 = vrot.slane %v14163_v37, 1 }
 0x7e0   : > { %17518 = vst [vmem:[#allocation95_spill] sm:$0xff] %v14646_v25 }
 0x7e1   : > { %5781 = vst.msk [vmem:[#allocation2 + $0x194] sm:$0xf] %vm668_vm1, %v5749_v32  ;;  %5659 = vperm.xlu1 %10569, %v14627_v6   ;;  %5649 = vperm.xlu2 %10570, %v14632_v46  }
 0x7e3   : > { %v5344_v50 = vpop.permute.xlu1 %5343 }
 0x7e4   : > { %5424 = vst.msk [vmem:[#allocation2 + $0x12c] sm:$0xf] %vm1085_vm2, %v5344_v50  ;;  %v5655_v32 = vpop.permute.xlu0 %5654  ;;  %v5358_v30 = vpop.permute.xlu2 %5357  ;;  %v14653_v50 = vld [vmem:[%s16624_s1 + $0xd8] sm:$0xff] }
 0x7e5   : > { %v5720_v22 = vmul.f32 %v5655_v32, %v14646_v25  ;;  %5431 = vst.msk [vmem:[#allocation2 + $0x1b8] sm:$0xf] %vm1085_vm2, %v5358_v30  ;;  %v14679_v25 = vld [vmem:[%s16624_s1 + $0xf0] sm:$0xff] }
 0x7e6   : > { %8535 = vmatmul.bf16.gmra.mxu1 %v9791_v19  ;;  %v17519_v19 = vld [vmem:[#allocation101_spill] sm:$0xff] }
 0x7e7   : > { %v5752_v24 = vpack.c.bf16 %v5720_v22, %v5720_v22  ;;  %v16970_v30 = vrot.slane %v17519_v19, 1 }
 0x7e9   : > { %5784 = vst.msk [vmem:[#allocation2 + $0x1d0] sm:$0xf] %vm668_vm1, %v5752_v24  ;;  %5674 = vperm.xlu1 %10569, %v14653_v50   ;;  %5664 = vperm.xlu2 %10570, %v14658_v34   ;;  %v14672_v22 = vsel %vm1150_vm3, %v16970_v30, %v16969_v16  ;;  %v16983_v16 = vrot.slane %v14213_v13, 1 }
 0x7ea   : > { %17520 = vst [vmem:[#allocation60_spill] sm:$0xff] %v14672_v22 }
 0x7eb   : > { %v5350_v48 = vpop.permute.xlu1 %5349 }
 0x7ec   : > { %5427 = vst.msk [vmem:[#allocation2 + $0x168] sm:$0xf] %vm1085_vm2, %v5350_v48  ;;  %v5670_v45 = vpop.permute.xlu0 %5669  ;;  %v5364_v32 = vpop.permute.xlu2 %5363  ;;  %v14684_v48 = vld [vmem:[%s16624_s1 + $0xe0] sm:$0xff] }
 0x7ed   : > { %v5723_v24 = vmul.f32 %v5670_v45, %v14672_v22  ;;  %5434 = vst.msk [vmem:[#allocation2 + $0x1f4] sm:$0xf] %vm1085_vm2, %v5364_v32  ;;  %v9810_v45 = vld [vmem:[#allocation2 + $0x78] sm:$0xf]  ;;  %v17521_v32 = vld [vmem:[#allocation75_spill] sm:$0xff] }
 0x7ee   : > { %v16984_v30 = vrot.slane %v17521_v32, 1  ;;  %v9811_v43 = vor.u32 %v10369_v20, %v9810_v45 }
 0x7ef   : > { %v5755_v8 = vpack.c.bf16 %v5723_v24, %v5723_v24 }
 0x7f0   : > { %v14698_v24 = vsel %vm1150_vm3, %v16984_v30, %v16983_v16  ;;  %v9830_v16 = vld [vmem:[#allocation2 + $0xa0] sm:$0xf] }
 0x7f1   : > { %5787 = vst.msk [vmem:[#allocation2 + $0x20c] sm:$0xf] %vm668_vm1, %v5755_v8  ;;  %5689 = vperm.xlu1 %10569, %v14679_v25   ;;  %5679 = vperm.xlu2 %10570, %v14684_v48  }
 0x7f2   : > { %17522 = vst [vmem:[#allocation19_spill] sm:$0xff] %v14698_v24 }
 0x7f3   : > { %v5356_v22 = vpop.permute.xlu1 %5355 }
 0x7f4   : > { %5430 = vst.msk [vmem:[#allocation2 + $0x1a4] sm:$0xf] %vm1085_vm2, %v5356_v22  ;;  %v5685_v8 = vpop.permute.xlu0 %5684  ;;  %v5370_v37 = vpop.permute.xlu2 %5369  ;;  %v14705_v22 = vld [vmem:[%s16624_s1 + $0xf8] sm:$0xff] }
 0x7f5   : > { %v5726_v35 = vmul.f32 %v5685_v8, %v14698_v24  ;;  %5437 = vst.msk [vmem:[#allocation2 + $0x230] sm:$0xf] %vm1085_vm2, %v5370_v37 }
 0x7f6   : > { %8540 = vmatmul.bf16.gmra.mxu1 %v9811_v43 }
 0x7f7   : > { %v5758_v13 = vpack.c.bf16 %v5726_v35, %v5726_v35  ;;  %v5442_v35 = vrot.slane %v13671_v29, 1 }
 0x7f9   : > { %5790 = vst.msk [vmem:[#allocation2 + $0x248] sm:$0xf] %vm668_vm1, %v5758_v13  ;;  %10572 = vset.pattern.permute.xlu1 %v17509_v47  ;;  %5694 = vperm.xlu2 %10570, %v14705_v22   ;;  %v10374_v13 = vld [vmem:[#allocation2 + $0xb0] sm:$0xf0] }
 0x7fa   : > { %5832 = vperm.xlu1 %10572, %v14426_v56   ;;  %v5441_v56 = vrot.slane %v13655_v57, 1 }
 0x7fb   : > { %v5362_v20 = vpop.permute.xlu1 %5361 }
 0x7fc   : > { %5433 = vst.msk [vmem:[#allocation2 + $0x1e0] sm:$0xf] %vm1085_vm2, %v5362_v20  ;;  %v5376_v45 = vpop.permute.xlu2 %5375 }
 0x7fd   : > { %5440 = vst.msk [vmem:[#allocation2 + $0x26c] sm:$0xf] %vm1085_vm2, %v5376_v45  ;;  %v5828_v37 = vpop.permute.xlu0 %5827  ;;  %v14723_v45 = vsel %vm1150_vm3, %v5441_v56, %v5442_v35 }
 0x7fe   : > { %v5985_v43 = vmul.f32 %v5828_v37, %v14293_v41  ;;  %17523 = vst [vmem:[#allocation78_spill] sm:$0xff] %v14723_v45 }
 0x800   : > { %v6017_v8 = vpack.c.bf16 %v5985_v43, %v5985_v43  ;;  %v9831_v43 = vor.u32 %v10374_v13, %v9830_v16 }
 0x801   : > { %10573 = vset.pattern.permute.xlu2 %v17509_v47 }
 0x802   : > { %6081 = vrot.lane.b32.xlu0 %v6017_v8, %s10749_s9  ;;  %5842 = vperm.xlu1 %10572, %v14441_v58   ;;  %v5443_v58 = vrot.slane %v13699_v51, 1  ;;  %v6293_v51 = vld [vmem:[%s16624_s1 + $0xa0] sm:$0xff] }
 0x803   : > { %5837 = vperm.xlu2 %10573, %v14446_v0   ;;  %v5368_v20 = vpop.permute.xlu1 %5367 }
 0x804   : > { %5436 = vst.msk [vmem:[#allocation2 + $0x21c] sm:$0xf] %vm1085_vm2, %v5368_v20  ;;  %v5550_v37 = vpop.permute.xlu2 %5549  ;;  %v17524_v20 = vrot.slane %v13719_v52, 1  ;;  %v6288_v52 = vld [vmem:[%s16624_s1 + $0x78] sm:$0xff] }
 0x805   : > { %v5699_v47 = vmul.f32 %v5550_v37, %v14723_v45 }
 0x806   : > { %8545 = vmatmul.bf16.gmra.mxu1 %v9831_v43  ;;  %v14735_v16 = vsel %vm1150_vm3, %v5443_v58, %v17524_v20  ;;  %v10379_v20 = vld [vmem:[#allocation2 + $0xd8] sm:$0xf0] }
 0x807   : > { %v5731_v8 = vpack.c.bf16 %v5699_v47, %v5699_v47  ;;  %17525 = vst [vmem:[#allocation33_spill] sm:$0xff] %v14735_v16  ;;  %v17526_v47 = vrot.slane %v14282_v10, 1 }
 0x809   : > { %5763 = vst.msk [vmem:[#allocation2 + $0x2c] sm:$0xf] %vm668_vm1, %v5731_v8  ;;  %v14746_v8 = vsel %vm1150_vm3, %v17526_v47, %v5441_v56  ;;  %v5449_v56 = vrot.slane %v13832_v60, 1 }
 0x80a   : > { %5857 = vperm.xlu1 %10572, %v14466_v5   ;;  %v9850_v5 = vld [vmem:[#allocation2 + $0xc8] sm:$0xf]  ;;  %17527 = vst [vmem:[#allocation105_spill] sm:$0xff] %v14746_v8 }
 0x80b   : > { %5847 = vperm.xlu2 %10573, %v14471_v27   ;;  %v5374_v0 = vpop.permute.xlu1 %5373  ;;  %v5446_v27 = vrot.slane %v13762_v38, 1  ;;  %v9851_v30 = vor.u32 %v10379_v20, %v9850_v5  ;;  %v14765_v5 = vpop.permute.xlu0 %5852  ;;  %v17530_v20 = vrot.slane %v13853_v4, 1 }
 0x80c   : > { %5439 = vst.msk [vmem:[#allocation2 + $0x258] sm:$0xf] %vm1085_vm2, %v5374_v0  ;;  %v5560_v13 = vpop.permute.xlu2 %5559 }
 0x80d   : > { %v5701_v37 = vmul.f32 %v5560_v13, %v14735_v16 }
 0x80f   : > { %v5733_v43 = vpack.c.bf16 %v5701_v37, %v5701_v37  ;;  %v17528_v37 = vrot.slane %v13786_v7, 1 }
 0x811   : > { %5765 = vst.msk [vmem:[#allocation2 + $0x54] sm:$0xf] %vm668_vm1, %v5733_v43  ;;  %v14753_v43 = vsel %vm1150_vm3, %v5446_v27, %v17528_v37  ;;  %v17531_v37 = vrot.slane %v13742_v39, 1 }
 0x812   : > { %5872 = vperm.xlu1 %10572, %v14492_v40  }
 0x813   : > { %5862 = vperm.xlu2 %10573, %v14497_v63   ;;  %v5545_v0 = vpop.permute.xlu1 %5544 }
 0x814   : > { %v5698_v13 = vmul.f32 %v5545_v0, %v14746_v8  ;;  %v5575_v40 = vpop.permute.xlu2 %5574  ;;  %v14763_v0 = vsel %vm1150_vm3, %v5442_v35, %v5443_v58  ;;  %v9870_v35 = vld [vmem:[#allocation2 + $0xf0] sm:$0xf]  ;;  %v5452_v58 = vrot.slane %v13901_v17, 1 }
 0x815   : > { %v5704_v63 = vmul.f32 %v5575_v40, %v14753_v43  ;;  %17529 = vst [vmem:[#allocation25_spill] sm:$0xff] %v14763_v0  ;;  %v14784_v40 = vsel %vm1150_vm3, %v17531_v37, %v5446_v27  ;;  %v5455_v37 = vrot.slane %v13965_v31, 1 }
 0x816   : > { %v5730_v41 = vpack.c.bf16 %v5698_v13, %v5698_v13  ;;  %8550 = vmatmul.bf16.gmra.mxu1 %v9851_v30 }
 0x817   : > { %v5736_v57 = vpack.c.bf16 %v5704_v63, %v5704_v63 }
 0x818   : > { %5762 = vst.msk [vmem:[#allocation2 + $0x18] sm:$0xf] %vm668_vm1, %v5730_v41 }
 0x819   : > { %5768 = vst.msk [vmem:[#allocation2 + $0x90] sm:$0xf] %vm668_vm1, %v5736_v57  ;;  %v14772_v57 = vsel %vm1150_vm3, %v5449_v56, %v17530_v20  ;;  %v17532_v20 = vrot.slane %v13924_v11, 1 }
 0x81a   : > { %5887 = vperm.xlu1 %10572, %v14519_v14  }
 0x81b   : > { %5877 = vperm.xlu2 %10573, %v14524_v18   ;;  %v5555_v47 = vpop.permute.xlu1 %5554 }
 0x81c   : > { %v5700_v30 = vmul.f32 %v5555_v47, %v14763_v0  ;;  %v5590_v41 = vpop.permute.xlu2 %5589  ;;  %v10384_v47 = vld [vmem:[#allocation2 + $0x100] sm:$0xf0] }
 0x81d   : > { %v5707_v14 = vmul.f32 %v5590_v41, %v14772_v57  ;;  %v14791_v41 = vsel %vm1150_vm3, %v5452_v58, %v17532_v20  ;;  %v17534_v20 = vrot.slane %v13982_v12, 1 }
 0x81e   : > { %v5732_v13 = vpack.c.bf16 %v5700_v30, %v5700_v30 }
 0x81f   : > { %v5739_v18 = vpack.c.bf16 %v5707_v14, %v5707_v14  ;;  %v9871_v14 = vor.u32 %v10384_v47, %v9870_v35 }
 0x820   : > { %5764 = vst.msk [vmem:[#allocation2 + $0x40] sm:$0xf] %vm668_vm1, %v5732_v13  ;;  %v14794_v13 = vpop.permute.xlu0 %5867 }
 0x821   : > { %5771 = vst.msk [vmem:[#allocation2 + $0xcc] sm:$0xf] %vm668_vm1, %v5739_v18 }
 0x822   : > { %5902 = vperm.xlu1 %10572, %v14546_v23  }
 0x823   : > { %5892 = vperm.xlu2 %10573, %v14551_v28   ;;  %v5570_v63 = vpop.permute.xlu1 %5569 }
 0x824   : > { %v5703_v30 = vmul.f32 %v5570_v63, %v14784_v40  ;;  %v5605_v23 = vpop.permute.xlu2 %5604  ;;  %v17533_v63 = vrot.slane %v13809_v3, 1  ;;  %v17577_v3 = vld [vmem:[#allocation79_spill] sm:$0xff] }
 0x825   : > { %v5710_v28 = vmul.f32 %v5605_v23, %v14791_v41  ;;  %v14812_v23 = vsel %vm1150_vm3, %v5455_v37, %v17534_v20  ;;  %v9890_v20 = vld [vmem:[#allocation2 + $0x118] sm:$0xf] }
 0x826   : > { %v5735_v18 = vpack.c.bf16 %v5703_v30, %v5703_v30  ;;  %8555 = vmatmul.bf16.gmra.mxu1 %v9871_v14  ;;  %v14805_v35 = vsel %vm1150_vm3, %v17533_v63, %v5449_v56  ;;  %v10389_v56 = vld [vmem:[#allocation2 + $0x128] sm:$0xf0]  ;;  %v17535_v63 = vrot.slane %v13879_v21, 1  ;;  %v17570_v21 = vld [vmem:[#allocation96_spill] sm:$0xff] }
 0x827   : > { %v5742_v27 = vpack.c.bf16 %v5710_v28, %v5710_v28 }
 0x828   : > { %5767 = vst.msk [vmem:[#allocation2 + $0x7c] sm:$0xf] %vm668_vm1, %v5735_v18  ;;  %v14815_v18 = vpop.permute.xlu0 %5882 }
 0x829   : > { %5774 = vst.msk [vmem:[#allocation2 + $0x108] sm:$0xf] %vm668_vm1, %v5742_v27  ;;  %v5458_v27 = vrot.slane %v14023_v55, 1 }
 0x82a   : > { %5917 = vperm.xlu1 %10572, %v14573_v62  }
 0x82b   : > { %5907 = vperm.xlu2 %10573, %v14578_v54   ;;  %v5585_v47 = vpop.permute.xlu1 %5584 }
 0x82c   : > { %v5706_v30 = vmul.f32 %v5585_v47, %v14805_v35  ;;  %v5620_v62 = vpop.permute.xlu2 %5619  ;;  %v14826_v47 = vsel %vm1150_vm3, %v17535_v63, %v5452_v58  ;;  %v5461_v63 = vrot.slane %v14073_v59, 1 }
 0x82d   : > { %v5713_v14 = vmul.f32 %v5620_v62, %v14812_v23 }
 0x82e   : > { %v5738_v28 = vpack.c.bf16 %v5706_v30, %v5706_v30 }
 0x82f   : > { %v5745_v54 = vpack.c.bf16 %v5713_v14, %v5713_v14  ;;  %v17536_v14 = vrot.slane %v14039_v61, 1 }
 0x830   : > { %5770 = vst.msk [vmem:[#allocation2 + $0xb8] sm:$0xf] %vm668_vm1, %v5738_v28  ;;  %v14838_v58 = vpop.permute.xlu0 %5897 }
 0x831   : > { %5777 = vst.msk [vmem:[#allocation2 + $0x144] sm:$0xf] %vm668_vm1, %v5745_v54  ;;  %v14833_v28 = vsel %vm1150_vm3, %v5458_v27, %v17536_v14  ;;  %v9891_v54 = vor.u32 %v10389_v56, %v9890_v20 }
 0x832   : > { %5932 = vperm.xlu1 %10572, %v14600_v53  }
 0x833   : > { %5922 = vperm.xlu2 %10573, %v14605_v33   ;;  %v5600_v30 = vpop.permute.xlu1 %5599 }
 0x834   : > { %v5709_v62 = vmul.f32 %v5600_v30, %v14826_v47  ;;  %v5635_v53 = vpop.permute.xlu2 %5634  ;;  %v17537_v30 = vrot.slane %v13945_v26, 1 }
 0x835   : > { %v5716_v33 = vmul.f32 %v5635_v53, %v14833_v28 }
 0x836   : > { %v5741_v29 = vpack.c.bf16 %v5709_v62, %v5709_v62  ;;  %8560 = vmatmul.bf16.gmra.mxu1 %v9891_v54  ;;  %v14847_v56 = vsel %vm1150_vm3, %v17537_v30, %v5455_v37  ;;  %v9910_v37 = vld [vmem:[#allocation2 + $0x140] sm:$0xf]  ;;  %v5464_v54 = vrot.slane %v14123_v49, 1 }
 0x837   : > { %v5748_v10 = vpack.c.bf16 %v5716_v33, %v5716_v33  ;;  %v17540_v33 = vrot.slane %v14005_v1, 1 }
 0x838   : > { %5773 = vst.msk [vmem:[#allocation2 + $0xf4] sm:$0xf] %vm668_vm1, %v5741_v29  ;;  %v17538_v29 = vrot.slane %v14089_v44, 1 }
 0x839   : > { %5780 = vst.msk [vmem:[#allocation2 + $0x180] sm:$0xf] %vm668_vm1, %v5748_v10  ;;  %v14866_v30 = vsel %vm1150_vm3, %v17540_v33, %v5458_v27  ;;  %v5467_v33 = vrot.slane %v14178_v42, 1 }
 0x83a   : > { %5947 = vperm.xlu1 %10572, %v14627_v6   ;;  %v14854_v10 = vsel %vm1150_vm3, %v5461_v63, %v17538_v29  ;;  %v14868_v29 = vpop.permute.xlu0 %5912 }
 0x83b   : > { %5937 = vperm.xlu2 %10573, %v14632_v46   ;;  %v5615_v20 = vpop.permute.xlu1 %5614  ;;  %17539 = vst [vmem:[#allocation31_spill] sm:$0xff] %v14854_v10 }
 0x83c   : > { %v5712_v62 = vmul.f32 %v5615_v20, %v14847_v56  ;;  %v5650_v6 = vpop.permute.xlu2 %5649 }
 0x83d   : > { %v5719_v14 = vmul.f32 %v5650_v6, %v14854_v10 }
 0x83e   : > { %v5744_v53 = vpack.c.bf16 %v5712_v62, %v5712_v62  ;;  %v10394_v62 = vld [vmem:[#allocation2 + $0x150] sm:$0xf0] }
 0x83f   : > { %v5751_v46 = vpack.c.bf16 %v5719_v14, %v5719_v14  ;;  %v17541_v14 = vrot.slane %v17519_v19, 1 }
 0x840   : > { %5776 = vst.msk [vmem:[#allocation2 + $0x130] sm:$0xf] %vm668_vm1, %v5744_v53 }
 0x841   : > { %5783 = vst.msk [vmem:[#allocation2 + $0x1bc] sm:$0xf] %vm668_vm1, %v5751_v46 }
 0x842   : > { %5962 = vperm.xlu1 %10572, %v14653_v50   ;;  %v14875_v50 = vsel %vm1150_vm3, %v5464_v54, %v17541_v14  ;;  %v17545_v14 = vrot.slane %v17521_v32, 1 }
 0x843   : > { %5952 = vperm.xlu2 %10573, %v14658_v34   ;;  %v5630_v20 = vpop.permute.xlu1 %5629  ;;  %17542 = vst [vmem:[#allocation23_spill] sm:$0xff] %v14875_v50  ;;  %v9911_v34 = vor.u32 %v10394_v62, %v9910_v37 }
 0x844   : > { %v5715_v6 = vmul.f32 %v5630_v20, %v14866_v30  ;;  %v5665_v53 = vpop.permute.xlu2 %5664  ;;  %v17543_v20 = vrot.slane %v14058_v36, 1 }
 0x845   : > { %v5722_v46 = vmul.f32 %v5665_v53, %v14875_v50 }
 0x846   : > { %v5747_v49 = vpack.c.bf16 %v5715_v6, %v5715_v6  ;;  %8565 = vmatmul.bf16.gmra.mxu1 %v9911_v34  ;;  %v14887_v37 = vsel %vm1150_vm3, %v17543_v20, %v5461_v63  ;;  %v14897_v34 = vpop.permute.xlu0 %5927  ;;  %v9930_v63 = vld [vmem:[#allocation2 + $0x168] sm:$0xf]  ;;  %v17547_v20 = vld [vmem:[#allocation102_spill] sm:$0xff] }
 0x847   : > { %v5754_v27 = vpack.c.bf16 %v5722_v46, %v5722_v46  ;;  %17544 = vst [vmem:[#allocation76_spill] sm:$0xff] %v14887_v37 }
 0x848   : > { %5779 = vst.msk [vmem:[#allocation2 + $0x16c] sm:$0xf] %vm668_vm1, %v5747_v49  ;;  %v14894_v49 = vsel %vm1150_vm3, %v5467_v33, %v17545_v14 }
 0x849   : > { %5786 = vst.msk [vmem:[#allocation2 + $0x1f8] sm:$0xf] %vm668_vm1, %v5754_v27  ;;  %v5470_v27 = vrot.slane %v14234_v15, 1 }
 0x84a   : > { %5977 = vperm.xlu1 %10572, %v14679_v25   ;;  %17546 = vst [vmem:[#allocation38_spill] sm:$0xff] %v14894_v49 }
 0x84b   : > { %5967 = vperm.xlu2 %10573, %v14684_v48   ;;  %v5645_v62 = vpop.permute.xlu1 %5644 }
 0x84c   : > { %v5718_v6 = vmul.f32 %v5645_v62, %v14887_v37  ;;  %v5680_v25 = vpop.permute.xlu2 %5679  ;;  %v17548_v62 = vrot.slane %v17547_v20, 1 }
 0x84d   : > { %v5725_v53 = vmul.f32 %v5680_v25, %v14894_v49 }
 0x84e   : > { %v5750_v48 = vpack.c.bf16 %v5718_v6, %v5718_v6  ;;  %v14908_v14 = vsel %vm1150_vm3, %v17548_v62, %v5464_v54  ;;  %v10399_v6 = vld [vmem:[#allocation2 + $0x178] sm:$0xf0]  ;;  %v14918_v44 = vpop.permute.xlu0 %5942  ;;  %v17553_v54 = vld [vmem:[#allocation103_spill] sm:$0xff] }
 0x84f   : > { %v5757_v46 = vpack.c.bf16 %v5725_v53, %v5725_v53  ;;  %17549 = vst [vmem:[#allocation10_spill] sm:$0xff] %v14908_v14  ;;  %v9931_v42 = vor.u32 %v10399_v6, %v9930_v63  ;;  %v17554_v62 = vrot.slane %v17553_v54, 1  ;;  %v17556_v6 = vld [vmem:[#allocation109_spill] sm:$0xff] }
 0x850   : > { %5782 = vst.msk [vmem:[#allocation2 + $0x1a8] sm:$0xf] %vm668_vm1, %v5750_v48  ;;  %v17550_v48 = vld [vmem:[#allocation64_spill] sm:$0xff]  ;;  %v17560_v54 = vld [vmem:[#allocation41_spill] sm:$0xff] }
 0x851   : > { %5789 = vst.msk [vmem:[#allocation2 + $0x234] sm:$0xf] %vm668_vm1, %v5757_v46  ;;  %v17551_v32 = vrot.slane %v17550_v48, 1  ;;  %v17557_v48 = vld [vmem:[#allocation61_spill] sm:$0xff] }
 0x852   : > { %10576 = vset.pattern.permute.xlu1 %v17516_v2 }
 0x853   : > { %5982 = vperm.xlu2 %10573, %v14705_v22   ;;  %v5660_v25 = vpop.permute.xlu1 %5659  ;;  %v14915_v46 = vsel %vm1150_vm3, %v5470_v27, %v17551_v32 }
 0x854   : > { %v5721_v53 = vmul.f32 %v5660_v25, %v14908_v14  ;;  %17552 = vst [vmem:[#allocation34_spill] sm:$0xff] %v14915_v46  ;;  %v5695_v15 = vpop.permute.xlu2 %5694  ;;  %v14926_v25 = vsel %vm1150_vm3, %v17554_v62, %v5467_v33  ;;  %v17558_v33 = vrot.slane %v17557_v48, 1  ;;  %v17562_v48 = vld [vmem:[#allocation53_spill] sm:$0xff] }
 0x855   : > { %v5728_v22 = vmul.f32 %v5695_v15, %v14915_v46  ;;  %17555 = vst [vmem:[#allocation40_spill] sm:$0xff] %v14926_v25 }
 0x856   : > { %v5753_v19 = vpack.c.bf16 %v5721_v53, %v5721_v53  ;;  %8570 = vmatmul.bf16.gmra.mxu1 %v9931_v42  ;;  %v14939_v62 = vsel %vm1150_vm3, %v17558_v33, %v5470_v27 }
 0x857   : > { %v5760_v59 = vpack.c.bf16 %v5728_v22, %v5728_v22  ;;  %v10404_v22 = vld [vmem:[#allocation2 + $0x1a0] sm:$0xf0]  ;;  %17559 = vst [vmem:[#allocation82_spill] sm:$0xff] %v14939_v62 }
 0x858   : > { %5785 = vst.msk [vmem:[#allocation2 + $0x1e4] sm:$0xf] %vm668_vm1, %v5753_v19 }
 0x859   : > { %5792 = vst.msk [vmem:[#allocation2 + $0x270] sm:$0xf] %vm668_vm1, %v5760_v59  ;;  %v14932_v59 = vpop.permute.xlu0 %5957 }
 0x85b   : > { %v5675_v32 = vpop.permute.xlu1 %5674  ;;  %10574 = vset.pattern.permute.xlu2 %v17516_v2 }
 0x85c   : > { %v5724_v15 = vmul.f32 %v5675_v32, %v14926_v25  ;;  %v9950_v32 = vld [vmem:[#allocation2 + $0x190] sm:$0xf] }
 0x85d   : > { %v5838_v63 = vpop.permute.xlu2 %5837 }
 0x85e   : > { %v5756_v42 = vpack.c.bf16 %v5724_v15, %v5724_v15  ;;  %v5987_v53 = vmul.f32 %v5838_v63, %v17556_v6  ;;  %v5990_v15 = vmul.f32 %v14765_v5, %v17560_v54 }
 0x860   : > { %5788 = vst.msk [vmem:[#allocation2 + $0x220] sm:$0xf] %vm668_vm1, %v5756_v42  ;;  %v6019_v19 = vpack.c.bf16 %v5987_v53, %v5987_v53  ;;  %v9951_v42 = vor.u32 %v10404_v22, %v9950_v32  ;;  %v6022_v36 = vpack.c.bf16 %v5990_v15, %v5990_v15  ;;  %v14951_v22 = vpop.f32.mrf.mxu1  ;;  %v9970_v32 = vld [vmem:[#allocation2 + $0x1b8] sm:$0xf]  ;;  %v10409_v15 = vld [vmem:[#allocation2 + $0x1c8] sm:$0xf0] }
 0x861   : > { %v14948_v27 = vpop.permute.xlu0 %5972  ;;  %v9971_v1 = vor.u32 %v10409_v15, %v9970_v32  ;;  %v17567_v32 = vld [vmem:[#allocation91_spill] sm:$0xff] }
 0x862   : > { %6085 = vrot.lane.b32.xlu2 %v6019_v19, %s10749_s9  ;;  %v17561_v19 = vld [vmem:[#allocation49_spill] sm:$0xff]  ;;  %v5999_v15 = vmul.f32 %v14838_v58, %v17567_v32  ;;  %v6002_v58 = vmul.f32 %v14868_v29, %v17570_v21  ;;  %v17573_v29 = vld [vmem:[#allocation100_spill] sm:$0xff] }
 0x863   : > { %v5690_v2 = vpop.permute.xlu1 %5689  ;;  %v5993_v9 = vmul.f32 %v14794_v13, %v17561_v19  ;;  %v6005_v21 = vmul.f32 %v14897_v34, %v17573_v29  ;;  %v17576_v34 = vld [vmem:[#allocation73_spill] sm:$0xff] }
 0x864   : > { %v5727_v63 = vmul.f32 %v5690_v2, %v14939_v62 }
 0x865   : > { %v5848_v53 = vpop.permute.xlu2 %5847  ;;  %v6025_v2 = vpack.c.bf16 %v5993_v9, %v5993_v9 }
 0x866   : > { %v5759_v20 = vpack.c.bf16 %v5727_v63, %v5727_v63  ;;  %8575 = vmatmul.bf16.gmra.mxu1 %v9951_v42  ;;  %v17564_v63 = vld [vmem:[#allocation15_spill] sm:$0xff] }
 0x867   : > { %v5996_v13 = vmul.f32 %v14815_v18, %v17564_v63  ;;  %v17566_v18 = vld [vmem:[#allocation35_spill] sm:$0xff] }
 0x868   : > { %5791 = vst.msk [vmem:[#allocation2 + $0x25c] sm:$0xf] %vm668_vm1, %v5759_v20  ;;  %v17563_v20 = vld [vmem:[#allocation28_spill] sm:$0xff] }
 0x869   : > { %v6028_v31 = vpack.c.bf16 %v5996_v13, %v5996_v13  ;;  %v6031_v13 = vpack.c.bf16 %v5999_v15, %v5999_v15 }
 0x86a   : > { %6091 = vrot.lane.b32.xlu2 %v6022_v36, %s10749_s9  ;;  %v5989_v36 = vmul.f32 %v5848_v53, %v17563_v20  ;;  %v14962_v53 = vpop.f32.mrf.mxu1 }
 0x86c   : > { %v5833_v33 = vpop.permute.xlu1 %5832 }
 0x86d   : > { %v5986_v55 = vmul.f32 %v5833_v33, %v17562_v48  ;;  %v5863_v5 = vpop.permute.xlu2 %5862  ;;  %v6021_v48 = vpack.c.bf16 %v5989_v36, %v5989_v36 }
 0x86f   : > { %v6018_v12 = vpack.c.bf16 %v5986_v55, %v5986_v55  ;;  %v17565_v55 = vld [vmem:[#allocation45_spill] sm:$0xff] }
 0x871   : > { %6083 = vrot.lane.b32.xlu1 %v6018_v12, %s10749_s9 }
 0x872   : > { %6097 = vrot.lane.b32.xlu2 %v6025_v2, %s10749_s9  ;;  %v5992_v2 = vmul.f32 %v5863_v5, %v17566_v18  ;;  %v10414_v5 = vld [vmem:[#allocation2 + $0x1f0] sm:$0xf0]  ;;  %v14975_v26 = vpop.f32.mrf.mxu1 }
 0x873   : > { %v6303_v18 = vld [vmem:[%s16624_s1 + $0xf0] sm:$0xff] }
 0x874   : > { %v6082_v42 = vpop.permute.xlu0 %6081  ;;  %v5843_v61 = vpop.permute.xlu1 %5842  ;;  %v6024_v36 = vpack.c.bf16 %v5992_v2, %v5992_v2  ;;  %v17571_v2 = vld [vmem:[#allocation57_spill] sm:$0xff] }
 0x875   : > { %6177 = vst.msk [vmem:[#allocation2 + $0x4] sm:$0xf] %vm1085_vm2, %v6082_v42  ;;  %v5988_v9 = vmul.f32 %v5843_v61, %v17565_v55  ;;  %v5878_v33 = vpop.permute.xlu2 %5877  ;;  %v17568_v61 = vld [vmem:[#allocation52_spill] sm:$0xff] }
 0x876   : > { %8580 = vmatmul.bf16.gmra.mxu1 %v9971_v1 }
 0x877   : > { %v6020_v12 = vpack.c.bf16 %v5988_v9, %v5988_v9 }
 0x879   : > { %6089 = vrot.lane.b32.xlu1 %v6021_v48, %s10749_s9  ;;  %6087 = vrot.lane.b32.xlu0 %v6020_v12, %s10749_s9  ;;  %v9990_v48 = vld [vmem:[#allocation2 + $0x1e0] sm:$0xf] }
 0x87a   : > { %6103 = vrot.lane.b32.xlu2 %v6028_v31, %s10749_s9  ;;  %v17569_v31 = vld [vmem:[#allocation44_spill] sm:$0xff]  ;;  %v9991_v60 = vor.u32 %v10414_v5, %v9990_v48  ;;  %v17574_v48 = vld [vmem:[#allocation86_spill] sm:$0xff]  ;;  %v14985_v7 = vpop.f32.mrf.mxu1 }
 0x87b   : > { %v5995_v12 = vmul.f32 %v5878_v33, %v17569_v31  ;;  %v17572_v33 = vld [vmem:[#allocation88_spill] sm:$0xff]  ;;  %v6289_v31 = vld [vmem:[%s16624_s1 + $0x80] sm:$0xff] }
 0x87c   : > { %v5858_v42 = vpop.permute.xlu1 %5857 }
 0x87d   : > { %v5991_v11 = vmul.f32 %v5858_v42, %v17568_v61  ;;  %v5893_v1 = vpop.permute.xlu2 %5892 }
 0x87f   : > { %v6023_v9 = vpack.c.bf16 %v5991_v11, %v5991_v11 }
 0x881   : > { %6095 = vrot.lane.b32.xlu1 %v6024_v36, %s10749_s9  ;;  %6093 = vrot.lane.b32.xlu0 %v6023_v9, %s10749_s9  ;;  %v6027_v36 = vpack.c.bf16 %v5995_v12, %v5995_v12  ;;  %v6034_v9 = vpack.c.bf16 %v6002_v58, %v6002_v58  ;;  %v6037_v58 = vpack.c.bf16 %v6005_v21, %v6005_v21 }
 0x882   : > { %6109 = vrot.lane.b32.xlu2 %v6031_v13, %s10749_s9  ;;  %v5998_v13 = vmul.f32 %v5893_v1, %v17572_v33  ;;  %v17575_v1 = vld [vmem:[#allocation90_spill] sm:$0xff]  ;;  %v14994_v38 = vpop.f32.mrf.mxu1 }
 0x884   : > { %v5873_v42 = vpop.permute.xlu1 %5872 }
 0x885   : > { %v5994_v11 = vmul.f32 %v5873_v42, %v17571_v2  ;;  %v5908_v15 = vpop.permute.xlu2 %5907  ;;  %v6295_v2 = vld [vmem:[%s16624_s1 + $0xb0] sm:$0xff] }
 0x886   : > { %8585 = vmatmul.bf16.gmra.mxu1 %v9991_v60  ;;  %v6030_v60 = vpack.c.bf16 %v5998_v13, %v5998_v13 }
 0x887   : > { %v6026_v17 = vpack.c.bf16 %v5994_v11, %v5994_v11  ;;  %v6001_v11 = vmul.f32 %v5908_v15, %v17575_v1  ;;  %v17578_v15 = vld [vmem:[#allocation94_spill] sm:$0xff] }
 0x888   : > { %v10424_v1 = vld [vmem:[#allocation2 + $0x240] sm:$0xf0] }
 0x889   : > { %6101 = vrot.lane.b32.xlu1 %v6027_v36, %s10749_s9  ;;  %6099 = vrot.lane.b32.xlu0 %v6026_v17, %s10749_s9  ;;  %v10419_v17 = vld [vmem:[#allocation2 + $0x218] sm:$0xf0]  ;;  %v10010_v36 = vld [vmem:[#allocation2 + $0x208] sm:$0xf]  ;;  %v6033_v21 = vpack.c.bf16 %v6001_v11, %v6001_v11 }
 0x88a   : > { %6115 = vrot.lane.b32.xlu2 %v6034_v9, %s10749_s9  ;;  %v6008_v9 = vmul.f32 %v14918_v44, %v17576_v34  ;;  %v10011_v29 = vor.u32 %v10419_v17, %v10010_v36  ;;  %v17579_v44 = vld [vmem:[#allocation89_spill] sm:$0xff]  ;;  %v17580_v36 = vld [vmem:[#allocation12_spill] sm:$0xff] }
 0x88c   : > { %v5888_v4 = vpop.permute.xlu1 %5887 }
 0x88d   : > { %v5997_v5 = vmul.f32 %v5888_v4, %v17574_v48  ;;  %v5923_v42 = vpop.permute.xlu2 %5922 }
 0x88f   : > { %v6029_v12 = vpack.c.bf16 %v5997_v5, %v5997_v5 }
 0x891   : > { %6107 = vrot.lane.b32.xlu1 %v6030_v60, %s10749_s9  ;;  %6105 = vrot.lane.b32.xlu0 %v6029_v12, %s10749_s9  ;;  %v6040_v60 = vpack.c.bf16 %v6008_v9, %v6008_v9  ;;  %v6004_v12 = vmul.f32 %v5923_v42, %v17578_v15  ;;  %v17581_v42 = vld [vmem:[#allocation99_spill] sm:$0xff] }
 0x892   : > { %6121 = vrot.lane.b32.xlu2 %v6037_v58, %s10749_s9  ;;  %v6011_v58 = vmul.f32 %v14932_v59, %v17579_v44  ;;  %v17582_v59 = vld [vmem:[#allocation63_spill] sm:$0xff] }
 0x893   : > { %v6014_v44 = vmul.f32 %v14948_v27, %v17582_v59  ;;  %v17585_v59 = vld [vmem:[#allocation80_spill] sm:$0xff]  ;;  %v15149_v15 = vld [vmem:[%s16624_s1 + $0x68] sm:$0xff] }
 0x894   : > { %v5903_v4 = vpop.permute.xlu1 %5902  ;;  %17590 = vst [vmem:[#allocation18_spill] sm:$0xff] %v15149_v15 }
 0x895   : > { %v6000_v39 = vmul.f32 %v5903_v4, %v17577_v3  ;;  %v5938_v13 = vpop.permute.xlu2 %5937  ;;  %v6046_v34 = vpack.c.bf16 %v6014_v44, %v6014_v44 }
 0x896   : > { %8590 = vmatmul.bf16.gmra.mxu1 %v10011_v29  ;;  %v6036_v29 = vpack.c.bf16 %v6004_v12, %v6004_v12 }
 0x897   : > { %v6032_v5 = vpack.c.bf16 %v6000_v39, %v6000_v39  ;;  %v6043_v39 = vpack.c.bf16 %v6011_v58, %v6011_v58 }
 0x899   : > { %6113 = vrot.lane.b32.xlu1 %v6033_v21, %s10749_s9  ;;  %6111 = vrot.lane.b32.xlu0 %v6032_v5, %s10749_s9  ;;  %v10030_v21 = vld [vmem:[#allocation2 + $0x230] sm:$0xf]  ;;  %v15005_v5 = vpop.f32.mrf.mxu1 }
 0x89a   : > { %6127 = vrot.lane.b32.xlu2 %v6040_v60, %s10749_s9  ;;  %v6007_v60 = vmul.f32 %v5938_v13, %v17581_v42  ;;  %v10031_v12 = vor.u32 %v10424_v1, %v10030_v21  ;;  %v17584_v13 = vld [vmem:[#allocation85_spill] sm:$0xff] }
 0x89b   : > { %v10447_v21 = vld [vmem:[%s16627_s4 + $0x78] sm:$0xff] }
 0x89c   : > { %v5918_v17 = vpop.permute.xlu1 %5917  ;;  %8606 = vmatpush.bf16.msra.mxu2 %v10447_v21 }
 0x89d   : > { %v6003_v4 = vmul.f32 %v5918_v17, %v17580_v36  ;;  %v5953_v9 = vpop.permute.xlu2 %5952  ;;  %v6039_v36 = vpack.c.bf16 %v6007_v60, %v6007_v60 }
 0x89f   : > { %v6035_v11 = vpack.c.bf16 %v6003_v4, %v6003_v4  ;;  %v17583_v4 = vld [vmem:[#allocation70_spill] sm:$0xff] }
 0x8a1   : > { %6119 = vrot.lane.b32.xlu1 %v6036_v29, %s10749_s9  ;;  %6117 = vrot.lane.b32.xlu0 %v6035_v11, %s10749_s9  ;;  %v15016_v42 = vpop.f32.mrf.mxu1 }
 0x8a2   : > { %6133 = vrot.lane.b32.xlu2 %v6043_v39, %s10749_s9  ;;  %v6010_v39 = vmul.f32 %v5953_v9, %v17584_v13  ;;  %v10446_v9 = vld [vmem:[%s16627_s4 + $0x70] sm:$0xff] }
 0x8a3   : > { %8607 = vmatpush.bf16.msra.mxu2 %v10446_v9  ;;  %v17588_v9 = vld [vmem:[#allocation6_spill] sm:$0xff] }
 0x8a4   : > { %v5933_v17 = vpop.permute.xlu1 %5932  ;;  %v6042_v60 = vpack.c.bf16 %v6010_v39, %v6010_v39 }
 0x8a5   : > { %v6006_v58 = vmul.f32 %v5933_v17, %v17583_v4  ;;  %v5968_v11 = vpop.permute.xlu2 %5967  ;;  %v17586_v17 = vld [vmem:[#allocation67_spill] sm:$0xff] }
 0x8a6   : > { %8595 = vmatmul.bf16.gmra.mxu1 %v10031_v12  ;;  %v6013_v12 = vmul.f32 %v5968_v11, %v17586_v17  ;;  %v15043_v11 = vld [vmem:[%s16624_s1 + $0x18] sm:$0xff]  ;;  %v15060_v17 = vld [vmem:[%s16624_s1 + $0x28] sm:$0xff] }
 0x8a7   : > { %v6038_v29 = vpack.c.bf16 %v6006_v58, %v6006_v58  ;;  %v10429_v58 = vld [vmem:[#allocation2 + $0x268] sm:$0xf0] }
 0x8a8   : > { %v6290_v4 = vld [vmem:[%s16624_s1 + $0x88] sm:$0xff] }
 0x8a9   : > { %6125 = vrot.lane.b32.xlu1 %v6039_v36, %s10749_s9  ;;  %6123 = vrot.lane.b32.xlu0 %v6038_v29, %s10749_s9  ;;  %v15025_v36 = vld [vmem:[%s16624_s1] sm:$0xff] }
 0x8aa   : > { %6139 = vrot.lane.b32.xlu2 %v6046_v34, %s10749_s9  ;;  %v10050_v34 = vld [vmem:[#allocation2 + $0x258] sm:$0xf] }
 0x8ac   : > { %v5948_v27 = vpop.permute.xlu1 %5947 }
 0x8ad   : > { %v6009_v1 = vmul.f32 %v5948_v27, %v17585_v59  ;;  %v5983_v29 = vpop.permute.xlu2 %5982  ;;  %v10051_v27 = vor.u32 %v10429_v58, %v10050_v34  ;;  %v6045_v59 = vpack.c.bf16 %v6013_v12, %v6013_v12  ;;  %v10444_v34 = vld [vmem:[%s16627_s4 + $0x60] sm:$0xff] }
 0x8ae   : > { %v6016_v58 = vmul.f32 %v5983_v29, %v17588_v9  ;;  %v10442_v29 = vld [vmem:[%s16627_s4 + $0x50] sm:$0xff] }
 0x8af   : > { %v6041_v44 = vpack.c.bf16 %v6009_v1, %v6009_v1  ;;  %v17587_v1 = vld [vmem:[#allocation7_spill] sm:$0xff]  ;;  %v15132_v9 = vld [vmem:[%s16624_s1 + $0x50] sm:$0xff] }
 0x8b1   : > { %6131 = vrot.lane.b32.xlu1 %v6042_v60, %s10749_s9  ;;  %6129 = vrot.lane.b32.xlu0 %v6041_v44, %s10749_s9  ;;  %v10445_v60 = vld [vmem:[%s16627_s4 + $0x68] sm:$0xff]  ;;  %v15038_v44 = vpop.f32.mrf.mxu1 }
 0x8b2   : > { %6307 = vperm.xlu2 %10574, %v15025_v36   ;;  %8608 = vmatpush.bf16.msra.mxu2 %v10445_v60 }
 0x8b4   : > { %v5963_v39 = vpop.permute.xlu1 %5962 }
 0x8b5   : > { %v6012_v21 = vmul.f32 %v5963_v39, %v17587_v1  ;;  %v15137_v1 = vld [vmem:[%s16624_s1 + $0x60] sm:$0xff] }
 0x8b6   : > { %8600 = vmatmul.bf16.gmra.mxu1 %v10051_v27  ;;  %8609 = vmatpush.bf16.msra.mxu2 %v10444_v34  ;;  %v17589_v27 = vld [vmem:[#allocation65_spill] sm:$0xff] }
 0x8b7   : > { %v6044_v13 = vpack.c.bf16 %v6012_v21, %v6012_v21 }
 0x8b9   : > { %6137 = vrot.lane.b32.xlu1 %v6045_v59, %s10749_s9  ;;  %6135 = vrot.lane.b32.xlu0 %v6044_v13, %s10749_s9  ;;  %v10443_v59 = vld [vmem:[%s16627_s4 + $0x58] sm:$0xff]  ;;  %v6048_v13 = vpack.c.bf16 %v6016_v58, %v6016_v58  ;;  %v10441_v58 = vld [vmem:[%s16627_s4 + $0x48] sm:$0xff] }
 0x8ba   : > { %6322 = vperm.xlu2 %10574, %v15043_v11   ;;  %8610 = vmatpush.bf16.msra.mxu2 %v10443_v59  ;;  %v10440_v59 = vld [vmem:[%s16627_s4 + $0x40] sm:$0xff] }
 0x8bc   : > { %v6086_v12 = vpop.permute.xlu2 %6085  ;;  %v5978_v39 = vpop.permute.xlu1 %5977 }
 0x8bd   : > { %6179 = vst.msk [vmem:[#allocation2 + $0x2c] sm:$0xf] %vm1085_vm2, %v6086_v12  ;;  %v6015_v21 = vmul.f32 %v5978_v39, %v17589_v27  ;;  %v15075_v12 = vld [vmem:[%s16624_s1 + $0x10] sm:$0xff]  ;;  %v15080_v39 = vld [vmem:[%s16624_s1 + $0x8] sm:$0xff] }
 0x8be   : > { %8611 = vmatpush.bf16.msra.mxu2 %v10442_v29  ;;  %v15102_v29 = vld [vmem:[%s16624_s1 + $0x30] sm:$0xff] }
 0x8bf   : > { %v6047_v60 = vpack.c.bf16 %v6015_v21, %v6015_v21  ;;  %v15085_v21 = vld [vmem:[%s16624_s1 + $0x40] sm:$0xff]  ;;  %v6287_v27 = vld [vmem:[%s16624_s1 + $0x70] sm:$0xff] }
 0x8c1   : > { %6143 = vrot.lane.b32.xlu1 %v6048_v13, %s10749_s9  ;;  %6141 = vrot.lane.b32.xlu0 %v6047_v60, %s10749_s9  ;;  %v15097_v60 = vld [vmem:[%s16624_s1 + $0x20] sm:$0xff] }
 0x8c2   : > { %6332 = vperm.xlu2 %10574, %v15060_v17   ;;  %8612 = vmatpush.bf16.msra.mxu2 %v10441_v58 }
 0x8c4   : > { %v6092_v34 = vpop.permute.xlu2 %6091 }
 0x8c5   : > { %6182 = vst.msk [vmem:[#allocation2 + $0x68] sm:$0xf] %vm1085_vm2, %v6092_v34  ;;  %v15107_v34 = vld [vmem:[%s16624_s1 + $0x58] sm:$0xff] }
 0x8c6   : > { %8613 = vmatpush.bf16.msra.mxu2 %v10440_v59  ;;  %v15116_v59 = vld [vmem:[%s16624_s1 + $0x38] sm:$0xff] }
 0x8c9   : > { %6317 = vperm.xlu1 %10576, %v15075_v12   ;;  %6312 = vperm.xlu0 %10575, %v15080_v39  }
 0x8ca   : > { %6347 = vperm.xlu2 %10574, %v15085_v21  }
 0x8cc   : > { %v6098_v13 = vpop.permute.xlu2 %6097 }
 0x8cd   : > { %6185 = vst.msk [vmem:[#allocation2 + $0xa4] sm:$0xf] %vm1085_vm2, %v6098_v13  ;;  %v15121_v13 = vld [vmem:[%s16624_s1 + $0x48] sm:$0xff] }
 0x8d1   : > { %6327 = vperm.xlu1 %10576, %v15097_v60   ;;  %6337 = vperm.xlu0 %10575, %v15102_v29  }
 0x8d2   : > { %6362 = vperm.xlu2 %10574, %v15107_v34  }
 0x8d4   : > { %v6104_v58 = vpop.permute.xlu2 %6103  ;;  %v10372_v20 = vld [vmem:[#allocation2 + $0xa4] sm:$0xf] }
 0x8d5   : > { %6188 = vst.msk [vmem:[#allocation2 + $0xe0] sm:$0xf] %vm1085_vm2, %v6104_v58 }
 0x8d9   : > { %6342 = vperm.xlu1 %10576, %v15116_v59   ;;  %6352 = vperm.xlu0 %10575, %v15121_v13  }
 0x8da   : > { %6377 = vperm.xlu2 %10574, %v6287_v27  }
 0x8dc   : > { %v6110_v58 = vpop.permute.xlu2 %6109  ;;  %v9852_v63 = vld [vmem:[#allocation2 + $0xdc] sm:$0xf0] }
 0x8dd   : > { %6191 = vst.msk [vmem:[#allocation2 + $0x11c] sm:$0xf] %vm1085_vm2, %v6110_v58 }
 0x8e1   : > { %6357 = vperm.xlu1 %10576, %v15132_v9   ;;  %6367 = vperm.xlu0 %10575, %v15137_v1  }
 0x8e2   : > { %6392 = vperm.xlu2 %10574, %v6290_v4  }
 0x8e3   : > { %v6084_v27 = vpop.permute.xlu1 %6083 }
 0x8e4   : > { %6178 = vst.msk [vmem:[#allocation2 + $0x18] sm:$0xf] %vm1085_vm2, %v6084_v27  ;;  %v6116_v58 = vpop.permute.xlu2 %6115 }
 0x8e5   : > { %6194 = vst.msk [vmem:[#allocation2 + $0x158] sm:$0xf] %vm1085_vm2, %v6116_v58  ;;  %v10352_v58 = vld [vmem:[#allocation2 + $0x4] sm:$0xf] }
 0x8e9   : > { %6372 = vperm.xlu1 %10576, %v15149_v15   ;;  %6382 = vperm.xlu0 %10575, %v6288_v52   ;;  %v6291_v52 = vld [vmem:[%s16624_s1 + $0x90] sm:$0xff] }
 0x8ea   : > { %6407 = vperm.xlu2 %10574, %v6293_v51   ;;  %v6296_v51 = vld [vmem:[%s16624_s1 + $0xb8] sm:$0xff] }
 0x8eb   : > { %v6090_v4 = vpop.permute.xlu1 %6089  ;;  %v6088_v27 = vpop.permute.xlu0 %6087  ;;  %v9752_v33 = vld [vmem:[#allocation2 + $0x14] sm:$0xf0] }
 0x8ec   : > { %6181 = vst.msk [vmem:[#allocation2 + $0x54] sm:$0xf] %vm1085_vm2, %v6090_v4  ;;  %v6122_v3 = vpop.permute.xlu2 %6121  ;;  %v9755_v48 = vor.u32 %v10352_v58, %v9752_v33  ;;  %v6292_v4 = vld [vmem:[%s16624_s1 + $0x98] sm:$0xff] }
 0x8ed   : > { %6197 = vst.msk [vmem:[#allocation2 + $0x194] sm:$0xf] %vm1085_vm2, %v6122_v3 }
 0x8ee   : > { %6180 = vst.msk [vmem:[#allocation2 + $0x40] sm:$0xf] %vm1085_vm2, %v6088_v27  ;;  %8614 = vmatmul.bf16.vlgmr.msra.gmra.mxu2 %v9755_v48  ;;  %v6294_v27 = vld [vmem:[%s16624_s1 + $0xa8] sm:$0xff] }
 0x8f1   : > { %6387 = vperm.xlu1 %10576, %v6289_v31   ;;  %6397 = vperm.xlu0 %10575, %v6291_v52   ;;  %v6299_v31 = vld [vmem:[%s16624_s1 + $0xd0] sm:$0xff] }
 0x8f2   : > { %6422 = vperm.xlu2 %10574, %v6296_v51  }
 0x8f3   : > { %v6096_v33 = vpop.permute.xlu1 %6095  ;;  %v6094_v3 = vpop.permute.xlu0 %6093 }
 0x8f4   : > { %6184 = vst.msk [vmem:[#allocation2 + $0x90] sm:$0xf] %vm1085_vm2, %v6096_v33  ;;  %v6128_v48 = vpop.permute.xlu2 %6127  ;;  %v10357_v33 = vld [vmem:[#allocation2 + $0x2c] sm:$0xf] }
 0x8f5   : > { %6200 = vst.msk [vmem:[#allocation2 + $0x1d0] sm:$0xf] %vm1085_vm2, %v6128_v48  ;;  %v9772_v58 = vld [vmem:[#allocation2 + $0x3c] sm:$0xf0] }
 0x8f6   : > { %6183 = vst.msk [vmem:[#allocation2 + $0x7c] sm:$0xf] %vm1085_vm2, %v6094_v3  ;;  %v9775_v48 = vor.u32 %v10357_v33, %v9772_v58  ;;  %v6300_v33 = vld [vmem:[%s16624_s1 + $0xd8] sm:$0xff] }
 0x8f9   : > { %6402 = vperm.xlu1 %10576, %v6292_v4   ;;  %6412 = vperm.xlu0 %10575, %v6294_v27   ;;  %v6297_v4 = vld [vmem:[%s16624_s1 + $0xc0] sm:$0xff]  ;;  %v6302_v27 = vld [vmem:[%s16624_s1 + $0xe8] sm:$0xff] }
 0x8fa   : > { %6437 = vperm.xlu2 %10574, %v6299_v31  }
 0x8fb   : > { %v6102_v52 = vpop.permute.xlu1 %6101  ;;  %v6100_v51 = vpop.permute.xlu0 %6099 }
 0x8fc   : > { %6187 = vst.msk [vmem:[#allocation2 + $0xcc] sm:$0xf] %vm1085_vm2, %v6102_v52  ;;  %v6134_v3 = vpop.permute.xlu2 %6133 }
 0x8fd   : > { %6203 = vst.msk [vmem:[#allocation2 + $0x20c] sm:$0xf] %vm1085_vm2, %v6134_v3  ;;  %v17591_v3 = vmov 6  }
 0x8fe   : > { %6186 = vst.msk [vmem:[#allocation2 + $0xb8] sm:$0xf] %vm1085_vm2, %v6100_v51  ;;  %8619 = vmatmul.bf16.gmra.mxu2 %v9775_v48  ;;  %v6298_v51 = vld [vmem:[%s16624_s1 + $0xc8] sm:$0xff] }
 0x901   : > { %6417 = vperm.xlu1 %10576, %v6295_v2   ;;  %6427 = vperm.xlu0 %10575, %v6297_v4   ;;  %v10362_v2 = vld [vmem:[#allocation2 + $0x54] sm:$0xf] }
 0x902   : > { %6452 = vperm.xlu2 %10574, %v6302_v27   ;;  %v9792_v27 = vld [vmem:[#allocation2 + $0x64] sm:$0xf0] }
 0x903   : > { %v6108_v31 = vpop.permute.xlu1 %6107  ;;  %v6106_v58 = vpop.permute.xlu0 %6105 }
 0x904   : > { %6190 = vst.msk [vmem:[#allocation2 + $0x108] sm:$0xf] %vm1085_vm2, %v6108_v31  ;;  %v6140_v52 = vpop.permute.xlu2 %6139 }
 0x905   : > { %6206 = vst.msk [vmem:[#allocation2 + $0x248] sm:$0xf] %vm1085_vm2, %v6140_v52 }
 0x906   : > { %6189 = vst.msk [vmem:[#allocation2 + $0xf4] sm:$0xf] %vm1085_vm2, %v6106_v58  ;;  %v9795_v58 = vor.u32 %v10362_v2, %v9792_v27 }
 0x909   : > { %6432 = vperm.xlu1 %10576, %v6298_v51   ;;  %6442 = vperm.xlu0 %10575, %v6300_v33   ;;  %v6301_v51 = vld [vmem:[%s16624_s1 + $0xe0] sm:$0xff] }
 0x90a   : > { %10578 = vset.pattern.permute.xlu2 %v17591_v3 }
 0x90b   : > { %v6114_v48 = vpop.permute.xlu1 %6113  ;;  %v6112_v4 = vpop.permute.xlu0 %6111 }
 0x90c   : > { %6193 = vst.msk [vmem:[#allocation2 + $0x144] sm:$0xf] %vm1085_vm2, %v6114_v48  ;;  %v6308_v31 = vpop.permute.xlu2 %6307 }
 0x90d   : > { %v6465_v52 = vmul.f32 %v6308_v31, %v14723_v45  ;;  %6192 = vst.msk [vmem:[#allocation2 + $0x130] sm:$0xf] %vm1085_vm2, %v6112_v4  ;;  %v17592_v4 = vld [vmem:[#allocation13_spill] sm:$0xff] }
 0x90e   : > { %8624 = vmatmul.bf16.gmra.mxu2 %v9795_v58  ;;  %v6304_v58 = vld [vmem:[%s16624_s1 + $0xf8] sm:$0xff] }
 0x90f   : > { %v6497_v33 = vpack.c.bf16 %v6465_v52, %v6465_v52 }
 0x911   : > { %6561 = vrot.lane.b32.xlu2 %v6497_v33, %s10749_s9  ;;  %6447 = vperm.xlu1 %10576, %v6301_v51   ;;  %v10367_v33 = vld [vmem:[#allocation2 + $0x7c] sm:$0xf]  ;;  %v9812_v51 = vld [vmem:[#allocation2 + $0x8c] sm:$0xf0] }
 0x912   : > { %6457 = vperm.xlu0 %10575, %v6303_v18  }
 0x913   : > { %v6120_v48 = vpop.permute.xlu1 %6119  ;;  %v6118_v2 = vpop.permute.xlu0 %6117 }
 0x914   : > { %6196 = vst.msk [vmem:[#allocation2 + $0x180] sm:$0xf] %vm1085_vm2, %v6120_v48  ;;  %v6323_v27 = vpop.permute.xlu2 %6322 }
 0x915   : > { %v6468_v31 = vmul.f32 %v6323_v27, %v17592_v4  ;;  %6195 = vst.msk [vmem:[#allocation2 + $0x16c] sm:$0xf] %vm1085_vm2, %v6118_v2  ;;  %v9815_v27 = vor.u32 %v10367_v33, %v9812_v51 }
 0x917   : > { %v6500_v52 = vpack.c.bf16 %v6468_v31, %v6468_v31 }
 0x919   : > { %6567 = vrot.lane.b32.xlu2 %v6500_v52, %s10749_s9  ;;  %6462 = vperm.xlu1 %10576, %v6304_v58   ;;  %v9832_v52 = vld [vmem:[#allocation2 + $0xb4] sm:$0xf0] }
 0x91a   : > { %10579 = vset.pattern.permute.xlu0 %v17591_v3  ;;  %v9835_v33 = vor.u32 %v10372_v20, %v9832_v52 }
 0x91b   : > { %v6126_v18 = vpop.permute.xlu1 %6125  ;;  %v6124_v45 = vpop.permute.xlu0 %6123 }
 0x91c   : > { %6199 = vst.msk [vmem:[#allocation2 + $0x1bc] sm:$0xf] %vm1085_vm2, %v6126_v18  ;;  %v6333_v48 = vpop.permute.xlu2 %6332 }
 0x91d   : > { %6198 = vst.msk [vmem:[#allocation2 + $0x1a8] sm:$0xf] %vm1085_vm2, %v6124_v45 }
 0x91e   : > { %8629 = vmatmul.bf16.gmra.mxu2 %v9815_v27 }
 0x921   : > { %10577 = vset.pattern.permute.xlu1 %v17591_v3 }
 0x923   : > { %v6132_v2 = vpop.permute.xlu1 %6131  ;;  %v6130_v31 = vpop.permute.xlu0 %6129 }
 0x924   : > { %6202 = vst.msk [vmem:[#allocation2 + $0x1f8] sm:$0xf] %vm1085_vm2, %v6132_v2  ;;  %v6348_v58 = vpop.permute.xlu2 %6347  ;;  %v10377_v2 = vld [vmem:[#allocation2 + $0xcc] sm:$0xf] }
 0x925   : > { %6201 = vst.msk [vmem:[#allocation2 + $0x1e4] sm:$0xf] %vm1085_vm2, %v6130_v31 }
 0x92b   : > { %v6138_v4 = vpop.permute.xlu1 %6137  ;;  %v6136_v32 = vpop.permute.xlu0 %6135 }
 0x92c   : > { %6205 = vst.msk [vmem:[#allocation2 + $0x234] sm:$0xf] %vm1085_vm2, %v6138_v4  ;;  %v6363_v18 = vpop.permute.xlu2 %6362  ;;  %v9855_v4 = vor.u32 %v10377_v2, %v9852_v63  ;;  %v9872_v2 = vld [vmem:[#allocation2 + $0x104] sm:$0xf0] }
 0x92d   : > { %6204 = vst.msk [vmem:[#allocation2 + $0x220] sm:$0xf] %vm1085_vm2, %v6136_v32 }
 0x92e   : > { %8634 = vmatmul.bf16.gmra.mxu2 %v9835_v33  ;;  %v6470_v33 = vmul.f32 %v6333_v48, %v14753_v43  ;;  %v6473_v48 = vmul.f32 %v6348_v58, %v14772_v57  ;;  %v6476_v58 = vmul.f32 %v6363_v18, %v14791_v41 }
 0x930   : > { %v6502_v15 = vpack.c.bf16 %v6470_v33, %v6470_v33  ;;  %v6505_v33 = vpack.c.bf16 %v6473_v48, %v6473_v48 }
 0x933   : > { %v6144_v45 = vpop.permute.xlu1 %6143  ;;  %v6142_v51 = vpop.permute.xlu0 %6141 }
 0x934   : > { %6208 = vst.msk [vmem:[#allocation2 + $0x270] sm:$0xf] %vm1085_vm2, %v6144_v45  ;;  %v6378_v27 = vpop.permute.xlu2 %6377 }
 0x935   : > { %6207 = vst.msk [vmem:[#allocation2 + $0x25c] sm:$0xf] %vm1085_vm2, %v6142_v51  ;;  %v6479_v18 = vmul.f32 %v6378_v27, %v14812_v23 }
 0x93b   : > { %v6318_v31 = vpop.permute.xlu1 %6317  ;;  %v6313_v54 = vpop.permute.xlu0 %6312 }
 0x93c   : > { %v6467_v6 = vmul.f32 %v6318_v31, %v14735_v16  ;;  %v15232_v19 = vpop.permute.xlu2 %6392  ;;  %v6466_v20 = vmul.f32 %v6313_v54, %v14763_v0  ;;  %v17593_v31 = vld [vmem:[#allocation17_spill] sm:$0xff] }
 0x93d   : > { %v6482_v27 = vmul.f32 %v15232_v19, %v14833_v28 }
 0x93e   : > { %v6499_v32 = vpack.c.bf16 %v6467_v6, %v6467_v6  ;;  %v6498_v52 = vpack.c.bf16 %v6466_v20, %v6466_v20  ;;  %8639 = vmatmul.bf16.gmra.mxu2 %v9855_v4  ;;  %v10382_v6 = vld [vmem:[#allocation2 + $0xf4] sm:$0xf] }
 0x940   : > { %6565 = vrot.lane.b32.xlu1 %v6499_v32, %s10749_s9  ;;  %6563 = vrot.lane.b32.xlu0 %v6498_v52, %s10749_s9  ;;  %v17594_v52 = vld [vmem:[#allocation50_spill] sm:$0xff] }
 0x943   : > { %v6328_v45 = vpop.permute.xlu1 %6327  ;;  %v6338_v51 = vpop.permute.xlu0 %6337 }
 0x944   : > { %v6469_v61 = vmul.f32 %v6328_v45, %v14784_v40  ;;  %v15239_v55 = vpop.permute.xlu2 %6407  ;;  %v6471_v16 = vmul.f32 %v6338_v51, %v17593_v31  ;;  %v9875_v51 = vor.u32 %v10382_v6, %v9872_v2  ;;  %v6508_v2 = vpack.c.bf16 %v6476_v58, %v6476_v58 }
 0x945   : > { %v6485_v19 = vmul.f32 %v15239_v55, %v14854_v10 }
 0x946   : > { %v6501_v54 = vpack.c.bf16 %v6469_v61, %v6469_v61  ;;  %v6503_v63 = vpack.c.bf16 %v6471_v16, %v6471_v16 }
 0x948   : > { %6571 = vrot.lane.b32.xlu1 %v6502_v15, %s10749_s9  ;;  %6569 = vrot.lane.b32.xlu0 %v6501_v54, %s10749_s9 }
 0x949   : > { %6573 = vrot.lane.b32.xlu2 %v6503_v63, %s10749_s9 }
 0x94b   : > { %v6343_v20 = vpop.permute.xlu1 %6342  ;;  %v6353_v4 = vpop.permute.xlu0 %6352 }
 0x94c   : > { %v6472_v32 = vmul.f32 %v6343_v20, %v14805_v35  ;;  %v6474_v45 = vmul.f32 %v6353_v4, %v17594_v52  ;;  %v15248_v16 = vpop.permute.xlu2 %6422  ;;  %v17595_v4 = vld [vmem:[#allocation37_spill] sm:$0xff] }
 0x94e   : > { %v6504_v61 = vpack.c.bf16 %v6472_v32, %v6472_v32  ;;  %v6506_v15 = vpack.c.bf16 %v6474_v45, %v6474_v45  ;;  %8644 = vmatmul.bf16.gmra.mxu2 %v9875_v51  ;;  %v9892_v45 = vld [vmem:[#allocation2 + $0x12c] sm:$0xf0] }
 0x950   : > { %6577 = vrot.lane.b32.xlu1 %v6505_v33, %s10749_s9  ;;  %6575 = vrot.lane.b32.xlu0 %v6504_v61, %s10749_s9  ;;  %v10387_v61 = vld [vmem:[#allocation2 + $0x11c] sm:$0xf] }
 0x951   : > { %6579 = vrot.lane.b32.xlu2 %v6506_v15, %s10749_s9 }
 0x953   : > { %v6358_v54 = vpop.permute.xlu1 %6357  ;;  %v6368_v63 = vpop.permute.xlu0 %6367 }
 0x954   : > { %v6475_v20 = vmul.f32 %v6358_v54, %v14826_v47  ;;  %v6477_v6 = vmul.f32 %v6368_v63, %v17595_v4  ;;  %v15256_v0 = vpop.permute.xlu2 %6437  ;;  %v17596_v54 = vld [vmem:[#allocation58_spill] sm:$0xff]  ;;  %v9895_v63 = vor.u32 %v10387_v61, %v9892_v45 }
 0x955   : > { %v17597_v45 = vld [vmem:[#allocation22_spill] sm:$0xff] }
 0x956   : > { %v6507_v48 = vpack.c.bf16 %v6475_v20, %v6475_v20  ;;  %v6509_v32 = vpack.c.bf16 %v6477_v6, %v6477_v6  ;;  %v6511_v20 = vpack.c.bf16 %v6479_v18, %v6479_v18 }
 0x958   : > { %6583 = vrot.lane.b32.xlu1 %v6508_v2, %s10749_s9  ;;  %6581 = vrot.lane.b32.xlu0 %v6507_v48, %s10749_s9 }
 0x959   : > { %6585 = vrot.lane.b32.xlu2 %v6509_v32, %s10749_s9 }
 0x95b   : > { %v6373_v51 = vpop.permute.xlu1 %6372  ;;  %v6383_v33 = vpop.permute.xlu0 %6382 }
 0x95c   : > { %v6478_v15 = vmul.f32 %v6373_v51, %v14847_v56  ;;  %v6480_v58 = vmul.f32 %v6383_v33, %v17596_v54  ;;  %v15269_v2 = vpop.permute.xlu2 %6452  ;;  %v6514_v33 = vpack.c.bf16 %v6482_v27, %v6482_v27 }
 0x95e   : > { %v6510_v6 = vpack.c.bf16 %v6478_v15, %v6478_v15  ;;  %v6512_v4 = vpack.c.bf16 %v6480_v58, %v6480_v58  ;;  %8649 = vmatmul.bf16.gmra.mxu2 %v9895_v63 }
 0x960   : > { %6589 = vrot.lane.b32.xlu1 %v6511_v20, %s10749_s9  ;;  %6587 = vrot.lane.b32.xlu0 %v6510_v6, %s10749_s9  ;;  %v9912_v20 = vld [vmem:[#allocation2 + $0x154] sm:$0xf0]  ;;  %v15281_v6 = vld [vmem:[%s16628_s5] ss:$0 sm:$0xff] }
 0x961   : > { %6591 = vrot.lane.b32.xlu2 %v6512_v4, %s10749_s9  ;;  %v10392_v4 = vld [vmem:[#allocation2 + $0x144] sm:$0xf] }
 0x963   : > { %v6388_v48 = vpop.permute.xlu1 %6387  ;;  %v6398_v32 = vpop.permute.xlu0 %6397 }
 0x964   : > { %v6481_v51 = vmul.f32 %v6388_v48, %v14866_v30  ;;  %v6483_v18 = vmul.f32 %v6398_v32, %v17597_v45  ;;  %v9915_v32 = vor.u32 %v10392_v4, %v9912_v20 }
 0x966   : > { %v6513_v61 = vpack.c.bf16 %v6481_v51, %v6481_v51  ;;  %v6515_v15 = vpack.c.bf16 %v6483_v18, %v6483_v18  ;;  %v17598_v51 = vld [vmem:[#allocation95_spill] sm:$0xff] }
 0x968   : > { %6595 = vrot.lane.b32.xlu1 %v6514_v33, %s10749_s9  ;;  %6593 = vrot.lane.b32.xlu0 %v6513_v61, %s10749_s9  ;;  %v6517_v33 = vpack.c.bf16 %v6485_v19, %v6485_v19 }
 0x969   : > { %6597 = vrot.lane.b32.xlu2 %v6515_v15, %s10749_s9  ;;  %v8527_v15 = vadd.f32 %v15281_v6, %v14951_v22  ;;  %v17599_v22 = vld [vmem:[#allocation60_spill] sm:$0xff] }
 0x96b   : > { %v6562_v58 = vpop.permute.xlu2 %6561  ;;  %v6403_v63 = vpop.permute.xlu1 %6402 }
 0x96c   : > { %6657 = vst.msk [vmem:[#allocation2 + $0x8] sm:$0xf] %vm1085_vm2, %v6562_v58  ;;  %v6484_v27 = vmul.f32 %v6403_v63, %v14887_v37  ;;  %v6413_v48 = vpop.permute.xlu0 %6412  ;;  %v6488_v63 = vmul.f32 %v15248_v16, %v14875_v50 }
 0x96d   : > { %v6486_v18 = vmul.f32 %v6413_v48, %v17598_v51 }
 0x96e   : > { %v6516_v61 = vpack.c.bf16 %v6484_v27, %v6484_v27  ;;  %8654 = vmatmul.bf16.gmra.mxu2 %v9915_v32 }
 0x96f   : > { %v6518_v55 = vpack.c.bf16 %v6486_v18, %v6486_v18  ;;  %v6520_v18 = vpack.c.bf16 %v6488_v63, %v6488_v63 }
 0x970   : > { %6601 = vrot.lane.b32.xlu1 %v6517_v33, %s10749_s9  ;;  %6599 = vrot.lane.b32.xlu0 %v6516_v61, %s10749_s9 }
 0x971   : > { %6603 = vrot.lane.b32.xlu2 %v6518_v55, %s10749_s9  ;;  %v8615_v58 = vpop.f32.mrf.mxu2  ;;  %v8529_v55 = vadd.f32 %v15281_v6, %v14962_v53 }
 0x972   : > { %v15293_v4 = vadd.f32 %v8615_v58, %v8527_v15  ;;  %v10397_v15 = vld [vmem:[#allocation2 + $0x16c] sm:$0xf]  ;;  %v9932_v58 = vld [vmem:[#allocation2 + $0x17c] sm:$0xf0] }
 0x973   : > { %v6568_v20 = vpop.permute.xlu2 %6567  ;;  %v6418_v19 = vpop.permute.xlu1 %6417 }
 0x974   : > { %6660 = vst.msk [vmem:[#allocation2 + $0x44] sm:$0xf] %vm1085_vm2, %v6568_v20  ;;  %v6487_v27 = vmul.f32 %v6418_v19, %v14908_v14  ;;  %v6428_v48 = vpop.permute.xlu0 %6427  ;;  %v6491_v20 = vmul.f32 %v15256_v0, %v14894_v49  ;;  %v8532_v0 = vadd.f32 %v15281_v6, %v14975_v26 }
 0x975   : > { %v6489_v32 = vmul.f32 %v6428_v48, %v17599_v22 }
 0x976   : > { %v6519_v33 = vpack.c.bf16 %v6487_v27, %v6487_v27 }
 0x977   : > { %v6521_v61 = vpack.c.bf16 %v6489_v32, %v6489_v32  ;;  %v9935_v32 = vor.u32 %v10397_v15, %v9932_v58  ;;  %v10454_v58 = vld [vmem:[%s16627_s4 + $0xb0] sm:$0xff] }
 0x978   : > { %6607 = vrot.lane.b32.xlu1 %v6520_v18, %s10749_s9  ;;  %6605 = vrot.lane.b32.xlu0 %v6519_v33, %s10749_s9  ;;  %v6523_v18 = vpack.c.bf16 %v6491_v20, %v6491_v20  ;;  %v10455_v33 = vld [vmem:[%s16627_s4 + $0xb8] sm:$0xff] }
 0x979   : > { %6609 = vrot.lane.b32.xlu2 %v6521_v61, %s10749_s9  ;;  %v8617_v16 = vpop.f32.mrf.mxu2  ;;  %8695 = vmatpush.bf16.msra.mxu3 %v10455_v33 }
 0x97a   : > { %v15305_v19 = vadd.f32 %v8617_v16, %v8529_v55  ;;  %v6494_v16 = vmul.f32 %v15269_v2, %v14915_v46 }
 0x97b   : > { %v6433_v63 = vpop.permute.xlu1 %6432 }
 0x97c   : > { %v6490_v27 = vmul.f32 %v6433_v63, %v14926_v25  ;;  %v6443_v48 = vpop.permute.xlu0 %6442 }
 0x97d   : > { %v6492_v53 = vmul.f32 %v6443_v48, %v14698_v24  ;;  %8696 = vmatpush.bf16.msra.mxu3 %v10454_v58  ;;  %v10402_v58 = vld [vmem:[#allocation2 + $0x194] sm:$0xf] }
 0x97e   : > { %v6522_v50 = vpack.c.bf16 %v6490_v27, %v6490_v27  ;;  %8659 = vmatmul.bf16.gmra.mxu2 %v9935_v32  ;;  %v17600_v27 = vld [vmem:[#allocation9_spill] sm:$0xff]  ;;  %v6526_v32 = vpack.c.bf16 %v6494_v16, %v6494_v16 }
 0x97f   : > { %v6524_v61 = vpack.c.bf16 %v6492_v53, %v6492_v53 }
 0x980   : > { %6613 = vrot.lane.b32.xlu1 %v6523_v18, %s10749_s9  ;;  %6611 = vrot.lane.b32.xlu0 %v6522_v50, %s10749_s9  ;;  %v10453_v50 = vld [vmem:[%s16627_s4 + $0xa8] sm:$0xff]  ;;  %v8534_v18 = vadd.f32 %v15281_v6, %v14985_v7 }
 0x981   : > { %6615 = vrot.lane.b32.xlu2 %v6524_v61, %s10749_s9  ;;  %v8620_v55 = vpop.f32.mrf.mxu2  ;;  %v9952_v61 = vld [vmem:[#allocation2 + $0x1a4] sm:$0xf0]  ;;  %8697 = vmatpush.bf16.msra.mxu3 %v10453_v50 }
 0x982   : > { %v15319_v15 = vadd.f32 %v8620_v55, %v8532_v0  ;;  %v10452_v55 = vld [vmem:[%s16627_s4 + $0xa0] sm:$0xff]  ;;  %v9955_v7 = vor.u32 %v10402_v58, %v9952_v61  ;;  %v10407_v61 = vld [vmem:[#allocation2 + $0x1bc] sm:$0xf]  ;;  %v9972_v58 = vld [vmem:[#allocation2 + $0x1cc] sm:$0xf0] }
 0x983   : > { %v6448_v20 = vpop.permute.xlu1 %6447 }
 0x984   : > { %v6493_v26 = vmul.f32 %v6448_v20, %v14939_v62  ;;  %v6458_v63 = vpop.permute.xlu0 %6457 }
 0x985   : > { %v6495_v48 = vmul.f32 %v6458_v63, %v17600_v27  ;;  %8698 = vmatpush.bf16.msra.mxu3 %v10452_v55  ;;  %v10451_v63 = vld [vmem:[%s16627_s4 + $0x98] sm:$0xff] }
 0x986   : > { %v6525_v53 = vpack.c.bf16 %v6493_v26, %v6493_v26 }
 0x987   : > { %v6527_v2 = vpack.c.bf16 %v6495_v48, %v6495_v48  ;;  %v8537_v48 = vadd.f32 %v15281_v6, %v14994_v38  ;;  %v10449_v38 = vld [vmem:[%s16627_s4 + $0x88] sm:$0xff] }
 0x988   : > { %6619 = vrot.lane.b32.xlu1 %v6526_v32, %s10749_s9  ;;  %6617 = vrot.lane.b32.xlu0 %v6525_v53, %s10749_s9  ;;  %v10450_v53 = vld [vmem:[%s16627_s4 + $0x90] sm:$0xff] }
 0x989   : > { %6621 = vrot.lane.b32.xlu2 %v6527_v2, %s10749_s9  ;;  %v8622_v33 = vpop.f32.mrf.mxu2  ;;  %8699 = vmatpush.bf16.msra.mxu3 %v10451_v63  ;;  %v8546_v2 = vpop.f32.mrf.mxu1 }
 0x98a   : > { %v15334_v0 = vadd.f32 %v8622_v33, %v8534_v18  ;;  %v8539_v18 = vadd.f32 %v15281_v6, %v15005_v5 }
 0x98b   : > { %v6463_v16 = vpop.permute.xlu1 %6462 }
 0x98c   : > { %v6496_v20 = vmul.f32 %v6463_v16, %v14746_v8  ;;  %v10448_v16 = vld [vmem:[%s16627_s4 + $0x80] sm:$0xff] }
 0x98d   : > { %8700 = vmatpush.bf16.msra.mxu3 %v10450_v53 }
 0x98e   : > { %v6528_v26 = vpack.c.bf16 %v6496_v20, %v6496_v20  ;;  %8664 = vmatmul.bf16.gmra.mxu2 %v9955_v7  ;;  %v9975_v20 = vor.u32 %v10407_v61, %v9972_v58 }
 0x990   : > { %6723 = vperm.xlu1 %10577, %v15025_v36   ;;  %6623 = vrot.lane.b32.xlu0 %v6528_v26, %s10749_s9 }
 0x991   : > { %6728 = vperm.xlu2 %10578, %v15080_v39   ;;  %v8625_v50 = vpop.f32.mrf.mxu2  ;;  %8701 = vmatpush.bf16.msra.mxu3 %v10449_v38  ;;  %v15366_v5 = vpop.f32.mrf.mxu1 }
 0x992   : > { %v15348_v32 = vadd.f32 %v8625_v50, %v8537_v48  ;;  %v8544_v48 = vadd.f32 %v15281_v6, %v15038_v44  ;;  %v9992_v50 = vld [vmem:[#allocation2 + $0x1f4] sm:$0xf0]  ;;  %v17601_v44 = vmov 7  }
 0x995   : > { %8702 = vmatpush.bf16.msra.mxu3 %v10448_v16 }
 0x998   : > { %6738 = vperm.xlu1 %10577, %v15043_v11   ;;  %6733 = vperm.xlu0 %10579, %v15075_v12   ;;  %v8542_v11 = vadd.f32 %v15281_v6, %v15016_v42 }
 0x999   : > { %6743 = vperm.xlu2 %10578, %v15097_v60   ;;  %v8627_v33 = vpop.f32.mrf.mxu2  ;;  %v8551_v42 = vpop.f32.mrf.mxu1 }
 0x99a   : > { %v15361_v55 = vadd.f32 %v8627_v33, %v8539_v18  ;;  %v8547_v18 = vadd.f32 %v15281_v6, %v8546_v2 }
 0x99e   : > { %8669 = vmatmul.bf16.gmra.mxu2 %v9975_v20  ;;  %v10417_v20 = vld [vmem:[#allocation2 + $0x20c] sm:$0xf] }
 0x9a0   : > { %6748 = vperm.xlu1 %10577, %v15060_v17   ;;  %6758 = vperm.xlu0 %10579, %v15116_v59   ;;  %v10412_v59 = vld [vmem:[#allocation2 + $0x1e4] sm:$0xf] }
 0x9a1   : > { %6753 = vperm.xlu2 %10578, %v15102_v29   ;;  %v8630_v7 = vpop.f32.mrf.mxu2  ;;  %v9995_v38 = vor.u32 %v10412_v59, %v9992_v50  ;;  %v15391_v61 = vpop.f32.mrf.mxu1 }
 0x9a2   : > { %v15373_v26 = vadd.f32 %v8630_v7, %v8542_v11  ;;  %v9758_v11 = vld [vmem:[#allocation2 + $0x8] sm:$0xf] }
 0x9a3   : > { %v6574_v63 = vpop.permute.xlu2 %6573 }
 0x9a4   : > { %6663 = vst.msk [vmem:[#allocation2 + $0x80] sm:$0xf] %vm1085_vm2, %v6574_v63 }
 0x9a8   : > { %6763 = vperm.xlu1 %10577, %v15085_v21   ;;  %6773 = vperm.xlu0 %10579, %v15132_v9  }
 0x9a9   : > { %6768 = vperm.xlu2 %10578, %v15121_v13   ;;  %v8632_v17 = vpop.f32.mrf.mxu2 }
 0x9aa   : > { %v15381_v29 = vadd.f32 %v8632_v17, %v8544_v48  ;;  %v8556_v48 = vpop.f32.mrf.mxu1 }
 0x9ab   : > { %v6580_v53 = vpop.permute.xlu2 %6579 }
 0x9ac   : > { %6666 = vst.msk [vmem:[#allocation2 + $0xbc] sm:$0xf] %vm1085_vm2, %v6580_v53  ;;  %v17602_v53 = vmov 8  }
 0x9ae   : > { %8674 = vmatmul.bf16.gmra.mxu2 %v9995_v38 }
 0x9b0   : > { %6778 = vperm.xlu1 %10577, %v15107_v34   ;;  %10580 = vset.pattern.permute.xlu0 %v17601_v44 }
 0x9b1   : > { %6783 = vperm.xlu2 %10578, %v15137_v1   ;;  %v8635_v9 = vpop.f32.mrf.mxu2  ;;  %7011 = vperm.xlu0 %10580, %v15025_v36   ;;  %v10012_v1 = vld [vmem:[#allocation2 + $0x21c] sm:$0xf0] }
 0x9b2   : > { %v15389_v21 = vadd.f32 %v8635_v9, %v8547_v18  ;;  %v6566_v13 = vpop.permute.xlu1 %6565  ;;  %v6564_v33 = vpop.permute.xlu0 %6563  ;;  %v10015_v63 = vor.u32 %v10417_v20, %v10012_v1  ;;  %v7393_v1 = vld [vmem:[%s16624_s1] sm:$0xff] }
 0x9b3   : > { %6659 = vst.msk [vmem:[#allocation2 + $0x30] sm:$0xf] %vm1085_vm2, %v6566_v13  ;;  %v6586_v16 = vpop.permute.xlu2 %6585  ;;  %v17603_v13 = vld [vmem:[#allocation18_spill] sm:$0xff] }
 0x9b4   : > { %6669 = vst.msk [vmem:[#allocation2 + $0xf8] sm:$0xf] %vm1085_vm2, %v6586_v16  ;;  %v7395_v16 = vld [vmem:[%s16624_s1 + $0x10] sm:$0xff] }
 0x9b5   : > { %6658 = vst.msk [vmem:[#allocation2 + $0x1c] sm:$0xf] %vm1085_vm2, %v6564_v33  ;;  %v15427_v33 = vpop.f32.mrf.mxu1 }
 0x9b8   : > { %10581 = vset.pattern.permute.xlu1 %v17601_v44 }
 0x9b9   : > { %10582 = vset.pattern.permute.xlu2 %v17601_v44  ;;  %7016 = vperm.xlu1 %10581, %v15080_v39   ;;  %v15399_v36 = vpop.f32.mrf.mxu2 }
 0x9ba   : > { %7031 = vperm.xlu0 %10580, %v15097_v60   ;;  %7021 = vperm.xlu2 %10582, %v15075_v12   ;;  %v6572_v34 = vpop.permute.xlu1 %6571  ;;  %v6570_v2 = vpop.permute.xlu0 %6569  ;;  %v15409_v12 = vld [vmem:[%s16624_s1 + $0x18] sm:$0xff]  ;;  %v8552_v60 = vadd.f32 %v15281_v6, %v8551_v42  ;;  %v15425_v42 = vld [vmem:[%s16624_s1 + $0x28] sm:$0xff]  ;;  %v9778_v20 = vld [vmem:[#allocation2 + $0x30] sm:$0xf] }
 0x9bb   : > { %6662 = vst.msk [vmem:[#allocation2 + $0x6c] sm:$0xf] %vm1085_vm2, %v6572_v34  ;;  %v6592_v58 = vpop.permute.xlu2 %6591  ;;  %v10422_v34 = vld [vmem:[#allocation2 + $0x234] sm:$0xf] }
 0x9bc   : > { %6672 = vst.msk [vmem:[#allocation2 + $0x134] sm:$0xf] %vm1085_vm2, %v6592_v58  ;;  %v10355_v7 = vld [vmem:[#allocation2 + $0x18] sm:$0xf0] }
 0x9bd   : > { %6661 = vst.msk [vmem:[#allocation2 + $0x58] sm:$0xf] %vm1085_vm2, %v6570_v2  ;;  %v9759_v17 = vor.u32 %v10355_v7, %v9758_v11  ;;  %v10032_v7 = vld [vmem:[#allocation2 + $0x244] sm:$0xf0] }
 0x9be   : > { %8679 = vmatmul.bf16.gmra.mxu2 %v10015_v63  ;;  %v10360_v63 = vld [vmem:[#allocation2 + $0x40] sm:$0xf0] }
 0x9bf   : > { %8703 = vmatmul.bf16.vlgmr.msra.gmra.mxu3 %v9759_v17  ;;  %v10035_v17 = vor.u32 %v10422_v34, %v10032_v7  ;;  %v10427_v34 = vld [vmem:[#allocation2 + $0x25c] sm:$0xf] }
 0x9c1   : > { %7026 = vperm.xlu1 %10581, %v15409_v12   ;;  %v8640_v59 = vpop.f32.mrf.mxu2 }
 0x9c2   : > { %v15413_v50 = vadd.f32 %v8640_v59, %v8552_v60  ;;  %10585 = vset.pattern.permute.xlu0 %v17602_v53  ;;  %10583 = vset.pattern.permute.xlu2 %v17591_v3  ;;  %v6578_v38 = vpop.permute.xlu1 %6577  ;;  %v6576_v18 = vpop.permute.xlu0 %6575  ;;  %v9779_v60 = vor.u32 %v10360_v63, %v9778_v20  ;;  %v8557_v59 = vadd.f32 %v15281_v6, %v8556_v48  ;;  %v10365_v7 = vld [vmem:[#allocation2 + $0x68] sm:$0xf0] }
 0x9c3   : > { %6665 = vst.msk [vmem:[#allocation2 + $0xa8] sm:$0xf] %vm1085_vm2, %v6578_v38  ;;  %7432 = vperm.xlu0 %10585, %v15080_v39   ;;  %v6598_v9 = vpop.permute.xlu2 %6597  ;;  %6788 = vperm.xlu2 %10583, %v17603_v13   ;;  %v8561_v38 = vpop.f32.mrf.mxu1 }
 0x9c4   : > { %6675 = vst.msk [vmem:[#allocation2 + $0x170] sm:$0xf] %vm1085_vm2, %v6598_v9 }
 0x9c5   : > { %6664 = vst.msk [vmem:[#allocation2 + $0x94] sm:$0xf] %vm1085_vm2, %v6576_v18 }
 0x9c9   : > { %7036 = vperm.xlu1 %10581, %v15425_v42   ;;  %v15433_v39 = vpop.f32.mrf.mxu2 }
 0x9ca   : > { %v6584_v2 = vpop.permute.xlu1 %6583  ;;  %v6582_v58 = vpop.permute.xlu0 %6581 }
 0x9cb   : > { %6668 = vst.msk [vmem:[#allocation2 + $0xe4] sm:$0xf] %vm1085_vm2, %v6584_v2  ;;  %7437 = vperm.xlu0 %10585, %v7395_v16   ;;  %v6604_v11 = vpop.permute.xlu2 %6603  ;;  %10584 = vset.pattern.permute.xlu2 %v17602_v53  ;;  %v15451_v63 = vpop.f32.mrf.mxu1 }
 0x9cc   : > { %6678 = vst.msk [vmem:[#allocation2 + $0x1ac] sm:$0xf] %vm1085_vm2, %v6604_v11  ;;  %7427 = vperm.xlu2 %10584, %v7393_v1   ;;  %v9798_v11 = vld [vmem:[#allocation2 + $0x58] sm:$0xf] }
 0x9cd   : > { %6667 = vst.msk [vmem:[#allocation2 + $0xd0] sm:$0xf] %vm1085_vm2, %v6582_v58  ;;  %v10052_v58 = vld [vmem:[#allocation2 + $0x26c] sm:$0xf0] }
 0x9ce   : > { %8684 = vmatmul.bf16.gmra.mxu2 %v10035_v17 }
 0x9cf   : > { %8708 = vmatmul.bf16.gmra.mxu3 %v9779_v60  ;;  %v10055_v60 = vor.u32 %v10427_v34, %v10052_v58 }
 0x9d1   : > { %v8645_v18 = vpop.f32.mrf.mxu2 }
 0x9d2   : > { %v15443_v9 = vadd.f32 %v8645_v18, %v8557_v59  ;;  %v6590_v13 = vpop.permute.xlu1 %6589  ;;  %v6588_v16 = vpop.permute.xlu0 %6587  ;;  %v9799_v59 = vor.u32 %v10365_v7, %v9798_v11  ;;  %v8562_v18 = vadd.f32 %v15281_v6, %v8561_v38  ;;  %v10370_v11 = vld [vmem:[#allocation2 + $0x90] sm:$0xf0]  ;;  %v17604_v7 = vld [vmem:[#allocation45_spill] sm:$0xff] }
 0x9d3   : > { %6671 = vst.msk [vmem:[#allocation2 + $0x120] sm:$0xf] %vm1085_vm2, %v6590_v13  ;;  %v6610_v2 = vpop.permute.xlu2 %6609 }
 0x9d4   : > { %6681 = vst.msk [vmem:[#allocation2 + $0x1e8] sm:$0xf] %vm1085_vm2, %v6610_v2  ;;  %10586 = vset.pattern.permute.xlu2 %v17601_v44 }
 0x9d5   : > { %6670 = vst.msk [vmem:[#allocation2 + $0x10c] sm:$0xf] %vm1085_vm2, %v6588_v16 }
 0x9d9   : > { %v15449_v1 = vpop.f32.mrf.mxu2 }
 0x9da   : > { %v6596_v48 = vpop.permute.xlu1 %6595  ;;  %v6594_v20 = vpop.permute.xlu0 %6593 }
 0x9db   : > { %6674 = vst.msk [vmem:[#allocation2 + $0x15c] sm:$0xf] %vm1085_vm2, %v6596_v48  ;;  %v6616_v17 = vpop.permute.xlu2 %6615  ;;  %v8566_v48 = vpop.f32.mrf.mxu1 }
 0x9dc   : > { %6684 = vst.msk [vmem:[#allocation2 + $0x224] sm:$0xf] %vm1085_vm2, %v6616_v17 }
 0x9dd   : > { %6673 = vst.msk [vmem:[#allocation2 + $0x148] sm:$0xf] %vm1085_vm2, %v6594_v20 }
 0x9de   : > { %8689 = vmatmul.bf16.gmra.mxu2 %v10055_v60  ;;  %v9818_v60 = vld [vmem:[#allocation2 + $0x80] sm:$0xf] }
 0x9df   : > { %8713 = vmatmul.bf16.gmra.mxu3 %v9799_v59  ;;  %v9819_v59 = vor.u32 %v10370_v11, %v9818_v60 }
 0x9e1   : > { %v8650_v13 = vpop.f32.mrf.mxu2 }
 0x9e2   : > { %v15457_v16 = vadd.f32 %v8650_v13, %v8562_v18  ;;  %v6602_v2 = vpop.permute.xlu1 %6601  ;;  %v6600_v27 = vpop.permute.xlu0 %6599 }
 0x9e3   : > { %6677 = vst.msk [vmem:[#allocation2 + $0x198] sm:$0xf] %vm1085_vm2, %v6602_v2  ;;  %v6622_v8 = vpop.permute.xlu2 %6621  ;;  %v15467_v13 = vpop.f32.mrf.mxu1 }
 0x9e4   : > { %6687 = vst.msk [vmem:[#allocation2 + $0x260] sm:$0xf] %vm1085_vm2, %v6622_v8  ;;  %v8567_v8 = vadd.f32 %v15281_v6, %v8566_v48 }
 0x9e5   : > { %6676 = vst.msk [vmem:[#allocation2 + $0x184] sm:$0xf] %vm1085_vm2, %v6600_v27 }
 0x9e9   : > { %v15462_v34 = vpop.f32.mrf.mxu2 }
 0x9ea   : > { %v6608_v58 = vpop.permute.xlu1 %6607  ;;  %v6606_v20 = vpop.permute.xlu0 %6605 }
 0x9eb   : > { %6680 = vst.msk [vmem:[#allocation2 + $0x1d4] sm:$0xf] %vm1085_vm2, %v6608_v58  ;;  %v6729_v38 = vpop.permute.xlu2 %6728 }
 0x9ec   : > { %v6882_v17 = vmul.f32 %v6729_v38, %v17604_v7  ;;  %6679 = vst.msk [vmem:[#allocation2 + $0x1c0] sm:$0xf] %vm1085_vm2, %v6606_v20  ;;  %v17605_v7 = vld [vmem:[#allocation52_spill] sm:$0xff] }
 0x9ee   : > { %v6914_v18 = vpack.c.bf16 %v6882_v17, %v6882_v17  ;;  %v8571_v17 = vpop.f32.mrf.mxu1 }
 0x9ef   : > { %8718 = vmatmul.bf16.gmra.mxu3 %v9819_v59 }
 0x9f0   : > { %6946 = vst.msk [vmem:[#allocation2 + $0x20] sm:$0xf] %vm668_vm1, %v6914_v18  ;;  %v9838_v18 = vld [vmem:[#allocation2 + $0xa8] sm:$0xf] }
 0x9f1   : > { %v8655_v27 = vpop.f32.mrf.mxu2 }
 0x9f2   : > { %v15471_v2 = vadd.f32 %v8655_v27, %v8567_v8  ;;  %v6614_v46 = vpop.permute.xlu1 %6613  ;;  %v6612_v58 = vpop.permute.xlu0 %6611  ;;  %v17606_v27 = vld [vmem:[#allocation49_spill] sm:$0xff] }
 0x9f3   : > { %6683 = vst.msk [vmem:[#allocation2 + $0x210] sm:$0xf] %vm1085_vm2, %v6614_v46  ;;  %v6744_v38 = vpop.permute.xlu2 %6743  ;;  %v10375_v46 = vld [vmem:[#allocation2 + $0xb8] sm:$0xf0] }
 0x9f4   : > { %v6885_v20 = vmul.f32 %v6744_v38, %v17605_v7  ;;  %6682 = vst.msk [vmem:[#allocation2 + $0x1fc] sm:$0xf] %vm1085_vm2, %v6612_v58  ;;  %v9839_v38 = vor.u32 %v10375_v46, %v9838_v18  ;;  %v8572_v58 = vadd.f32 %v15281_v6, %v8571_v17 }
 0x9f6   : > { %v6917_v11 = vpack.c.bf16 %v6885_v20, %v6885_v20  ;;  %v15486_v22 = vpop.f32.mrf.mxu1 }
 0x9f8   : > { %6949 = vst.msk [vmem:[#allocation2 + $0x5c] sm:$0xf] %vm668_vm1, %v6917_v11 }
 0x9f9   : > { %v15477_v60 = vpop.f32.mrf.mxu2 }
 0x9fa   : > { %v6620_v48 = vpop.permute.xlu1 %6619  ;;  %v6618_v59 = vpop.permute.xlu0 %6617 }
 0x9fb   : > { %6686 = vst.msk [vmem:[#allocation2 + $0x24c] sm:$0xf] %vm1085_vm2, %v6620_v48  ;;  %v6754_v8 = vpop.permute.xlu2 %6753  ;;  %v17607_v48 = vld [vmem:[#allocation109_spill] sm:$0xff] }
 0x9fc   : > { %v6887_v62 = vmul.f32 %v6754_v8, %v17606_v27  ;;  %6685 = vst.msk [vmem:[#allocation2 + $0x238] sm:$0xf] %vm1085_vm2, %v6618_v59  ;;  %v17608_v59 = vld [vmem:[#allocation15_spill] sm:$0xff] }
 0x9fe   : > { %v6919_v7 = vpack.c.bf16 %v6887_v62, %v6887_v62 }
 0x9ff   : > { %8723 = vmatmul.bf16.gmra.mxu3 %v9839_v38 }
 0xa00   : > { %6951 = vst.msk [vmem:[#allocation2 + $0x84] sm:$0xf] %vm668_vm1, %v6919_v7  ;;  %v9858_v7 = vld [vmem:[#allocation2 + $0xd0] sm:$0xf] }
 0xa01   : > { %v8660_v20 = vpop.f32.mrf.mxu2 }
 0xa02   : > { %v15484_v11 = vadd.f32 %v8660_v20, %v8572_v58  ;;  %v6724_v24 = vpop.permute.xlu1 %6723  ;;  %v6624_v49 = vpop.permute.xlu0 %6623  ;;  %v10380_v58 = vld [vmem:[#allocation2 + $0xe0] sm:$0xf0]  ;;  %v17609_v20 = vld [vmem:[#allocation41_spill] sm:$0xff] }
 0xa03   : > { %v6881_v25 = vmul.f32 %v6724_v24, %v17607_v48  ;;  %v6769_v8 = vpop.permute.xlu2 %6768  ;;  %6688 = vst.msk [vmem:[#allocation2 + $0x274] sm:$0xf] %vm1085_vm2, %v6624_v49  ;;  %v17610_v48 = vld [vmem:[#allocation28_spill] sm:$0xff]  ;;  %v17611_v49 = vld [vmem:[#allocation91_spill] sm:$0xff] }
 0xa04   : > { %v6890_v18 = vmul.f32 %v6769_v8, %v17608_v59  ;;  %v8576_v8 = vpop.f32.mrf.mxu1 }
 0xa05   : > { %v6913_v62 = vpack.c.bf16 %v6881_v25, %v6881_v25 }
 0xa06   : > { %v6922_v27 = vpack.c.bf16 %v6890_v18, %v6890_v18  ;;  %v9859_v18 = vor.u32 %v10380_v58, %v9858_v7 }
 0xa07   : > { %6945 = vst.msk [vmem:[#allocation2 + $0xc] sm:$0xf] %vm668_vm1, %v6913_v62 }
 0xa08   : > { %6954 = vst.msk [vmem:[#allocation2 + $0xc0] sm:$0xf] %vm668_vm1, %v6922_v27  ;;  %v8577_v27 = vadd.f32 %v15281_v6, %v8576_v8 }
 0xa09   : > { %v15493_v17 = vpop.f32.mrf.mxu2 }
 0xa0a   : > { %v6739_v46 = vpop.permute.xlu1 %6738  ;;  %v6734_v38 = vpop.permute.xlu0 %6733 }
 0xa0b   : > { %v6884_v14 = vmul.f32 %v6739_v46, %v17609_v20  ;;  %v6784_v24 = vpop.permute.xlu2 %6783  ;;  %v6883_v10 = vmul.f32 %v6734_v38, %v17610_v48 }
 0xa0c   : > { %v6893_v37 = vmul.f32 %v6784_v24, %v17611_v49  ;;  %v17612_v24 = vld [vmem:[#allocation35_spill] sm:$0xff] }
 0xa0d   : > { %v6916_v25 = vpack.c.bf16 %v6884_v14, %v6884_v14  ;;  %v6915_v59 = vpack.c.bf16 %v6883_v10, %v6883_v10  ;;  %v17613_v14 = vld [vmem:[#allocation57_spill] sm:$0xff] }
 0xa0e   : > { %v6925_v62 = vpack.c.bf16 %v6893_v37, %v6893_v37  ;;  %v10467_v37 = vld [vmem:[%s16627_s4 + $0x118] sm:$0xff] }
 0xa0f   : > { %6948 = vst.msk [vmem:[#allocation2 + $0x48] sm:$0xf] %vm668_vm1, %v6916_v25  ;;  %8728 = vmatmul.bf16.gmra.mxu3 %v9859_v18  ;;  %8877 = vmatpush.bf16.msra.mxu1 %v10467_v37  ;;  %v10466_v25 = vld [vmem:[%s16627_s4 + $0x110] sm:$0xff] }
 0xa10   : > { %6957 = vst.msk [vmem:[#allocation2 + $0xfc] sm:$0xf] %vm668_vm1, %v6925_v62  ;;  %v10385_v62 = vld [vmem:[#allocation2 + $0x108] sm:$0xf0] }
 0xa11   : > { %6947 = vst.msk [vmem:[#allocation2 + $0x34] sm:$0xf] %vm668_vm1, %v6915_v59  ;;  %v8665_v46 = vpop.f32.mrf.mxu2 }
 0xa12   : > { %v15502_v20 = vadd.f32 %v8665_v46, %v8577_v27  ;;  %v6749_v38 = vpop.permute.xlu1 %6748  ;;  %v6759_v48 = vpop.permute.xlu0 %6758  ;;  %v17614_v27 = vld [vmem:[#allocation44_spill] sm:$0xff] }
 0xa13   : > { %v6886_v49 = vmul.f32 %v6749_v38, %v17612_v24  ;;  %v6888_v10 = vmul.f32 %v6759_v48, %v17613_v14  ;;  %8878 = vmatpush.bf16.msra.mxu1 %v10466_v25  ;;  %v17615_v38 = vld [vmem:[#allocation86_spill] sm:$0xff]  ;;  %v9878_v24 = vld [vmem:[#allocation2 + $0xf8] sm:$0xf] }
 0xa14   : > { %v7022_v7 = vpop.permute.xlu2 %7021 }
 0xa15   : > { %v6918_v58 = vpack.c.bf16 %v6886_v49, %v6886_v49  ;;  %v6920_v8 = vpack.c.bf16 %v6888_v10, %v6888_v10  ;;  %v10465_v49 = vld [vmem:[%s16627_s4 + $0x108] sm:$0xff] }
 0xa17   : > { %6950 = vst.msk [vmem:[#allocation2 + $0x70] sm:$0xf] %vm668_vm1, %v6918_v58  ;;  %v9879_v58 = vor.u32 %v10385_v62, %v9878_v24  ;;  %8879 = vmatpush.bf16.msra.mxu1 %v10465_v49 }
 0xa18   : > { %6952 = vst.msk [vmem:[#allocation2 + $0x98] sm:$0xf] %vm668_vm1, %v6920_v8  ;;  %v17616_v8 = vld [vmem:[#allocation79_spill] sm:$0xff] }
 0xa1a   : > { %v6764_v59 = vpop.permute.xlu1 %6763  ;;  %v6774_v18 = vpop.permute.xlu0 %6773 }
 0xa1b   : > { %v6889_v46 = vmul.f32 %v6764_v59, %v17614_v27  ;;  %v6891_v48 = vmul.f32 %v6774_v18, %v17615_v38  ;;  %v10464_v59 = vld [vmem:[%s16627_s4 + $0x100] sm:$0xff]  ;;  %v17617_v27 = vld [vmem:[#allocation88_spill] sm:$0xff]  ;;  %v17618_v38 = vld [vmem:[#allocation39_spill] sm:$0xff] }
 0xa1c   : > { %8880 = vmatpush.bf16.msra.mxu1 %v10464_v59 }
 0xa1d   : > { %v6921_v14 = vpack.c.bf16 %v6889_v46, %v6889_v46  ;;  %v6923_v10 = vpack.c.bf16 %v6891_v48, %v6891_v48  ;;  %v6789_v37 = vpop.permute.xlu2 %6788 }
 0xa1e   : > { %v6894_v51 = vmul.f32 %v6789_v37, %v17616_v8 }
 0xa1f   : > { %6953 = vst.msk [vmem:[#allocation2 + $0xac] sm:$0xf] %vm668_vm1, %v6921_v14  ;;  %8733 = vmatmul.bf16.gmra.mxu3 %v9879_v58  ;;  %v9898_v58 = vld [vmem:[#allocation2 + $0x120] sm:$0xf] }
 0xa20   : > { %6955 = vst.msk [vmem:[#allocation2 + $0xd4] sm:$0xf] %vm668_vm1, %v6923_v10  ;;  %v6926_v25 = vpack.c.bf16 %v6894_v51, %v6894_v51  ;;  %v17619_v10 = vld [vmem:[#allocation33_spill] sm:$0xff] }
 0xa22   : > { %6958 = vst.msk [vmem:[#allocation2 + $0x110] sm:$0xf] %vm668_vm1, %v6926_v25  ;;  %v6779_v18 = vpop.permute.xlu1 %6778  ;;  %v17620_v25 = vld [vmem:[#allocation56_spill] sm:$0xff] }
 0xa23   : > { %v6892_v46 = vmul.f32 %v6779_v18, %v17617_v27  ;;  %v7012_v62 = vpop.permute.xlu0 %7011  ;;  %v10390_v27 = vld [vmem:[#allocation2 + $0x130] sm:$0xf0] }
 0xa24   : > { %v7169_v48 = vmul.f32 %v7012_v62, %v17618_v38  ;;  %v9899_v45 = vor.u32 %v10390_v27, %v9898_v58 }
 0xa25   : > { %v6924_v24 = vpack.c.bf16 %v6892_v46, %v6892_v46  ;;  %v6983_v46 = vld [vmem:[%s16624_s1 + $0x30] sm:$0xff] }
 0xa26   : > { %v7201_v49 = vpack.c.bf16 %v7169_v48, %v7169_v48  ;;  %v7428_v14 = vpop.permute.xlu2 %7427  ;;  %v17621_v48 = vld [vmem:[#allocation30_spill] sm:$0xff] }
 0xa27   : > { %6956 = vst.msk [vmem:[#allocation2 + $0xe8] sm:$0xf] %vm668_vm1, %v6924_v24  ;;  %v7585_v51 = vmul.f32 %v7428_v14, %v17619_v10  ;;  %v6984_v14 = vld [vmem:[%s16624_s1 + $0x38] sm:$0xff] }
 0xa28   : > { %7265 = vrot.lane.b32.xlu1 %v7201_v49, %s10749_s9 }
 0xa29   : > { %v7617_v37 = vpack.c.bf16 %v7585_v51, %v7585_v51  ;;  %v17622_v51 = vld [vmem:[#allocation13_spill] sm:$0xff] }
 0xa2b   : > { %7649 = vst.msk [vmem:[#allocation2 + $0x10] sm:$0xf] %vm668_vm1, %v7617_v37  ;;  %v7017_v8 = vpop.permute.xlu1 %7016 }
 0xa2c   : > { %v7170_v59 = vmul.f32 %v7017_v8, %v17620_v25  ;;  %v7032_v18 = vpop.permute.xlu0 %7031  ;;  %v9918_v25 = vld [vmem:[#allocation2 + $0x148] sm:$0xf] }
 0xa2e   : > { %v7202_v62 = vpack.c.bf16 %v7170_v59, %v7170_v59  ;;  %v10395_v59 = vld [vmem:[#allocation2 + $0x158] sm:$0xf0] }
 0xa2f   : > { %8738 = vmatmul.bf16.gmra.mxu3 %v9899_v45  ;;  %v17623_v45 = vld [vmem:[#allocation47_spill] sm:$0xff] }
 0xa30   : > { %7267 = vrot.lane.b32.xlu2 %v7202_v62, %s10749_s9  ;;  %7041 = vperm.xlu1 %10581, %v6983_v46   ;;  %v7171_v8 = vmul.f32 %v7022_v7, %v17623_v45  ;;  %v9919_v62 = vor.u32 %v10395_v59, %v9918_v25  ;;  %v6986_v25 = vld [vmem:[%s16624_s1 + $0x48] sm:$0xff] }
 0xa32   : > { %v9766_v7 = vld [vmem:[#allocation2 + $0x10] sm:$0xf] }
 0xa33   : > { %v7027_v38 = vpop.permute.xlu1 %7026 }
 0xa34   : > { %v7172_v24 = vmul.f32 %v7027_v38, %v17621_v48  ;;  %v7397_v38 = vld [vmem:[%s16624_s1 + $0x20] sm:$0xff]  ;;  %v7203_v48 = vpack.c.bf16 %v7171_v8, %v7171_v8 }
 0xa35   : > { %v7433_v49 = vpop.permute.xlu0 %7432 }
 0xa36   : > { %v7204_v10 = vpack.c.bf16 %v7172_v24, %v7172_v24  ;;  %v7586_v37 = vmul.f32 %v7433_v49, %v17622_v51 }
 0xa38   : > { %v7618_v58 = vpack.c.bf16 %v7586_v37, %v7586_v37  ;;  %7271 = vrot.lane.b32.xlu0 %v7204_v10, %s10749_s9  ;;  %7046 = vperm.xlu2 %10586, %v6984_v14   ;;  %v17624_v37 = vld [vmem:[#allocation43_spill] sm:$0xff] }
 0xa39   : > { %10587 = vset.pattern.permute.xlu1 %v17602_v53 }
 0xa3a   : > { %7650 = vst.msk [vmem:[#allocation2 + $0x24] sm:$0xf] %vm668_vm1, %v7618_v58  ;;  %7442 = vperm.xlu1 %10587, %v15409_v12   ;;  %v15555_v12 = vld [vmem:[%s16624_s1 + $0x40] sm:$0xff] }
 0xa3b   : > { %v7037_v49 = vpop.permute.xlu1 %7036 }
 0xa3c   : > { %v7174_v58 = vmul.f32 %v7037_v49, %v17624_v37 }
 0xa3d   : > { %v7438_v27 = vpop.permute.xlu0 %7437 }
 0xa3e   : > { %v7587_v24 = vmul.f32 %v7438_v27, %v14784_v40  ;;  %v7206_v59 = vpack.c.bf16 %v7174_v58, %v7174_v58  ;;  %v17625_v27 = vld [vmem:[#allocation32_spill] sm:$0xff]  ;;  %v10405_v58 = vld [vmem:[#allocation2 + $0x1a8] sm:$0xf0] }
 0xa3f   : > { %8743 = vmatmul.bf16.gmra.mxu3 %v9919_v62  ;;  %v7173_v62 = vmul.f32 %v7032_v18, %v17625_v27  ;;  %v15579_v18 = vld [vmem:[%s16624_s1 + $0x50] sm:$0xff]  ;;  %v15602_v27 = vld [vmem:[%s16624_s1 + $0x60] sm:$0xff] }
 0xa40   : > { %v7619_v10 = vpack.c.bf16 %v7587_v24, %v7587_v24  ;;  %7447 = vperm.xlu0 %10585, %v7397_v38   ;;  %7269 = vrot.lane.b32.xlu2 %v7203_v48, %s10749_s9  ;;  %v10400_v48 = vld [vmem:[#allocation2 + $0x180] sm:$0xf0] }
 0xa41   : > { %v10356_v51 = vld [vmem:[#allocation2 + $0x20] sm:$0xf0] }
 0xa42   : > { %7651 = vst.msk [vmem:[#allocation2 + $0x38] sm:$0xf] %vm668_vm1, %v7619_v10  ;;  %v8704_v45 = vpop.f32.mrf.mxu3  ;;  %10588 = vset.pattern.permute.xlu1 %v17601_v44  ;;  %v9767_v40 = vor.u32 %v10356_v51, %v9766_v7  ;;  %v7205_v10 = vpack.c.bf16 %v7173_v62, %v7173_v62  ;;  %v9958_v51 = vld [vmem:[#allocation2 + $0x198] sm:$0xf]  ;;  %v10410_v62 = vld [vmem:[#allocation2 + $0x1d0] sm:$0xf0] }
 0xa43   : > { %v15561_v8 = vadd.f32 %v8704_v45, %v15293_v4  ;;  %7051 = vperm.xlu1 %10588, %v15555_v12   ;;  %v9938_v4 = vld [vmem:[#allocation2 + $0x170] sm:$0xf]  ;;  %v9959_v45 = vor.u32 %v10405_v58, %v9958_v51  ;;  %v10415_v51 = vld [vmem:[#allocation2 + $0x1f8] sm:$0xf0] }
 0xa44   : > { %10212 = vmatmul.msk.bf16.vlgmr.msra.gmra.mxu1 %vm4147_vm4, %v9767_v40  ;;  %v9939_v49 = vor.u32 %v10400_v48, %v9938_v4  ;;  %v10461_v4 = vld [vmem:[%s16627_s4 + $0xe8] sm:$0xff] }
 0xa48   : > { %7275 = vrot.lane.b32.xlu0 %v7206_v59, %s10749_s9  ;;  %7056 = vperm.xlu2 %10586, %v6986_v25   ;;  %v10463_v59 = vld [vmem:[%s16627_s4 + $0xf8] sm:$0xff] }
 0xa49   : > { %8784 = vmatpush.bf16.msra.mxu0 %v10463_v59  ;;  %v10457_v59 = vld [vmem:[%s16627_s4 + $0xc8] sm:$0xff] }
 0xa4a   : > { %v8706_v38 = vpop.f32.mrf.mxu3 }
 0xa4b   : > { %v15571_v24 = vadd.f32 %v8706_v38, %v15305_v19  ;;  %10589 = vset.pattern.permute.xlu1 %v17602_v53 }
 0xa4c   : > { %7452 = vperm.xlu1 %10589, %v15425_v42   ;;  %v6988_v42 = vld [vmem:[%s16624_s1 + $0x58] sm:$0xff] }
 0xa4f   : > { %8748 = vmatmul.bf16.gmra.mxu3 %v9939_v49 }
 0xa50   : > { %7457 = vperm.xlu0 %10585, %v6983_v46   ;;  %7273 = vrot.lane.b32.xlu2 %v7205_v10, %s10749_s9  ;;  %v10460_v10 = vld [vmem:[%s16627_s4 + $0xe0] sm:$0xff] }
 0xa52   : > { %v8709_v7 = vpop.f32.mrf.mxu3 }
 0xa53   : > { %v15582_v19 = vadd.f32 %v8709_v7, %v15319_v15 }
 0xa54   : > { %10590 = vset.pattern.permute.xlu1 %v17601_v44 }
 0xa55   : > { %7061 = vperm.xlu1 %10590, %v15579_v18  }
 0xa58   : > { %7066 = vperm.xlu2 %10586, %v6988_v42  }
 0xa5a   : > { %v8711_v46 = vpop.f32.mrf.mxu3 }
 0xa5b   : > { %v15590_v37 = vadd.f32 %v8711_v46, %v15334_v0  ;;  %v15628_v46 = vld [vmem:[%s16624_s1 + $0x70] sm:$0xff] }
 0xa5d   : > { %10591 = vset.pattern.permute.xlu1 %v17602_v53 }
 0xa5e   : > { %7462 = vperm.xlu1 %10591, %v6984_v14   ;;  %v9978_v14 = vld [vmem:[#allocation2 + $0x1c0] sm:$0xf] }
 0xa5f   : > { %8753 = vmatmul.bf16.gmra.mxu3 %v9959_v45  ;;  %v9979_v48 = vor.u32 %v10410_v62, %v9978_v14  ;;  %v9998_v45 = vld [vmem:[#allocation2 + $0x1e8] sm:$0xf]  ;;  %v10456_v14 = vld [vmem:[%s16627_s4 + $0xc0] sm:$0xff]  ;;  %v8549_v62 = vadd.f32 %v15281_v6, %v15366_v5 }
 0xa62   : > { %v8714_v15 = vpop.f32.mrf.mxu3 }
 0xa63   : > { %v15594_v40 = vadd.f32 %v8714_v15, %v15348_v32  ;;  %v10462_v32 = vld [vmem:[%s16627_s4 + $0xf0] sm:$0xff]  ;;  %v9999_v15 = vor.u32 %v10415_v51, %v9998_v45 }
 0xa64   : > { %8785 = vmatpush.bf16.msra.mxu0 %v10462_v32  ;;  %v15653_v32 = vld [vmem:[%s16624_s1 + $0x80] sm:$0xff] }
 0xa66   : > { %10592 = vset.pattern.permute.xlu1 %v17601_v44 }
 0xa67   : > { %7071 = vperm.xlu1 %10592, %v15602_v27  }
 0xa68   : > { %8786 = vmatpush.bf16.msra.mxu0 %v10461_v4 }
 0xa6a   : > { %v8716_v0 = vpop.f32.mrf.mxu3 }
 0xa6b   : > { %v15610_v38 = vadd.f32 %v8716_v0, %v15361_v55  ;;  %v10459_v55 = vld [vmem:[%s16627_s4 + $0xd8] sm:$0xff] }
 0xa6c   : > { %8787 = vmatpush.bf16.msra.mxu0 %v10460_v10 }
 0xa6f   : > { %8758 = vmatmul.bf16.gmra.mxu3 %v9979_v48  ;;  %10593 = vset.pattern.permute.xlu1 %v17602_v53  ;;  %v8638_v48 = vadd.f32 %v15399_v36, %v8549_v62 }
 0xa70   : > { %7472 = vperm.xlu1 %10593, %v6986_v25   ;;  %8788 = vmatpush.bf16.msra.mxu0 %v10459_v55  ;;  %v7406_v55 = vld [vmem:[%s16624_s1 + $0x68] sm:$0xff] }
 0xa72   : > { %v8719_v49 = vpop.f32.mrf.mxu3 }
 0xa73   : > { %v15620_v7 = vadd.f32 %v8719_v49, %v15373_v26  ;;  %v10458_v26 = vld [vmem:[%s16627_s4 + $0xd0] sm:$0xff] }
 0xa74   : > { %8789 = vmatpush.bf16.msra.mxu0 %v10458_v26  ;;  %v10018_v49 = vld [vmem:[#allocation2 + $0x210] sm:$0xf]  ;;  %v17626_v26 = vld [vmem:[#allocation42_spill] sm:$0xff] }
 0xa78   : > { %10594 = vset.pattern.permute.xlu1 %v17601_v44  ;;  %8790 = vmatpush.bf16.msra.mxu0 %v10457_v59  ;;  %v8554_v59 = vadd.f32 %v15281_v6, %v15391_v61 }
 0xa79   : > { %7081 = vperm.xlu1 %10594, %v15628_v46  }
 0xa7a   : > { %v8721_v25 = vpop.f32.mrf.mxu3 }
 0xa7b   : > { %v15636_v58 = vadd.f32 %v8721_v25, %v15381_v29 }
 0xa7c   : > { %8791 = vmatpush.bf16.msra.mxu0 %v10456_v14 }
 0xa7f   : > { %8763 = vmatmul.bf16.gmra.mxu3 %v9999_v15 }
 0xa81   : > { %10595 = vset.pattern.permute.xlu1 %v17602_v53 }
 0xa82   : > { %v8724_v0 = vpop.f32.mrf.mxu3  ;;  %7482 = vperm.xlu1 %10595, %v6988_v42  }
 0xa83   : > { %v15646_v29 = vadd.f32 %v8724_v0, %v15389_v21  ;;  %v10420_v21 = vld [vmem:[#allocation2 + $0x220] sm:$0xf0]  ;;  %v8643_v0 = vadd.f32 %v15433_v39, %v8554_v59  ;;  %v17628_v59 = vld [vmem:[#allocation55_spill] sm:$0xff] }
 0xa84   : > { %v10019_v5 = vor.u32 %v10420_v21, %v10018_v49 }
 0xa8a   : > { %v8726_v4 = vpop.f32.mrf.mxu3  ;;  %10596 = vset.pattern.permute.xlu1 %v17601_v44  ;;  %v7268_v42 = vpop.permute.xlu2 %7267 }
 0xa8b   : > { %v15657_v10 = vadd.f32 %v8726_v4, %v8638_v48  ;;  %7362 = vst.msk [vmem:[#allocation2 + $0x20] sm:$0xf] %vm1085_vm2, %v7268_v42  ;;  %7091 = vperm.xlu1 %10596, %v15653_v32   ;;  %v10038_v48 = vld [vmem:[#allocation2 + $0x238] sm:$0xf]  ;;  %v10425_v4 = vld [vmem:[#allocation2 + $0x248] sm:$0xf0] }
 0xa8c   : > { %v10039_v6 = vor.u32 %v10425_v4, %v10038_v48 }
 0xa8f   : > { %8768 = vmatmul.bf16.gmra.mxu3 %v10019_v5  ;;  %v17627_v5 = vld [vmem:[#allocation24_spill] sm:$0xff] }
 0xa92   : > { %v8729_v25 = vpop.f32.mrf.mxu3  ;;  %v7047_v36 = vpop.permute.xlu2 %7046 }
 0xa93   : > { %v15665_v51 = vadd.f32 %v8729_v25, %v15413_v50  ;;  %v7176_v45 = vmul.f32 %v7047_v36, %v17626_v26  ;;  %10597 = vset.pattern.permute.xlu1 %v17602_v53  ;;  %v15676_v50 = vld [vmem:[%s16624_s1 + $0x90] sm:$0xff]  ;;  %v15692_v26 = vld [vmem:[%s16624_s1 + $0x78] sm:$0xff] }
 0xa94   : > { %7492 = vperm.xlu1 %10597, %v7406_v55  }
 0xa95   : > { %v7208_v15 = vpack.c.bf16 %v7176_v45, %v7176_v45 }
 0xa97   : > { %7279 = vrot.lane.b32.xlu0 %v7208_v15, %s10749_s9  ;;  %v9760_v15 = vld [vmem:[#allocation2 + $0x1c] sm:$0xf0] }
 0xa9a   : > { %v8731_v14 = vpop.f32.mrf.mxu3  ;;  %v7270_v62 = vpop.permute.xlu2 %7269 }
 0xa9b   : > { %v15678_v42 = vadd.f32 %v8731_v14, %v8643_v0  ;;  %7363 = vst.msk [vmem:[#allocation2 + $0x34] sm:$0xf] %vm1085_vm2, %v7270_v62  ;;  %v7266_v49 = vpop.permute.xlu1 %7265 }
 0xa9c   : > { %7361 = vst.msk [vmem:[#allocation2 + $0xc] sm:$0xf] %vm1085_vm2, %v7266_v49  ;;  %10598 = vset.pattern.permute.xlu1 %v17601_v44 }
 0xa9d   : > { %7101 = vperm.xlu1 %10598, %v15676_v50  }
 0xa9f   : > { %8773 = vmatmul.bf16.gmra.mxu3 %v10039_v6  ;;  %7467 = vperm.xlu0 %10585, %v15555_v12  }
 0xaa2   : > { %v8734_v61 = vpop.f32.mrf.mxu3  ;;  %v7057_v39 = vpop.permute.xlu2 %7056 }
 0xaa3   : > { %v15686_v21 = vadd.f32 %v8734_v61, %v15443_v9  ;;  %v7178_v25 = vmul.f32 %v7057_v39, %v17627_v5  ;;  %v7042_v36 = vpop.permute.xlu1 %7041  ;;  %v10353_v45 = vld [vmem:[#allocation2 + $0xc] sm:$0xf]  ;;  %v15700_v9 = vld [vmem:[%s16628_s5] ss:$0 sm:$0xff]  ;;  %v10430_v61 = vld [vmem:[#allocation2 + $0x270] sm:$0xf0] }
 0xaa4   : > { %v7175_v0 = vmul.f32 %v7042_v36, %v17628_v59  ;;  %v9763_v14 = vor.u32 %v10353_v45, %v9760_v15  ;;  %v8559_v48 = vadd.f32 %v15700_v9, %v15427_v33  ;;  %v10058_v36 = vld [vmem:[#allocation2 + $0x260] sm:$0xf] }
 0xaa5   : > { %v7210_v62 = vpack.c.bf16 %v7178_v25, %v7178_v25  ;;  %10599 = vset.pattern.permute.xlu1 %v17591_v3  ;;  %v10059_v45 = vor.u32 %v10430_v61, %v10058_v36  ;;  %v9786_v36 = vld [vmem:[#allocation2 + $0x38] sm:$0xf] }
 0xaa6   : > { %v7207_v12 = vpack.c.bf16 %v7175_v0, %v7175_v0  ;;  %6798 = vperm.xlu1 %10599, %v15692_v26   ;;  %8792 = vmatmul.bf16.vlgmr.msra.gmra.mxu0 %v9763_v14  ;;  %v8648_v4 = vadd.f32 %v15449_v1, %v8559_v48  ;;  %v17629_v14 = vld [vmem:[#allocation84_spill] sm:$0xff] }
 0xaa7   : > { %7283 = vrot.lane.b32.xlu0 %v7210_v62, %s10749_s9 }
 0xaa8   : > { %7277 = vrot.lane.b32.xlu2 %v7207_v12, %s10749_s9  ;;  %v10358_v12 = vld [vmem:[#allocation2 + $0x34] sm:$0xf] }
 0xaaa   : > { %v8736_v49 = vpop.f32.mrf.mxu3  ;;  %v7274_v6 = vpop.permute.xlu2 %7273 }
 0xaab   : > { %v15707_v39 = vadd.f32 %v8736_v49, %v8648_v4  ;;  %7365 = vst.msk [vmem:[#allocation2 + $0x5c] sm:$0xf] %vm1085_vm2, %v7274_v6  ;;  %v7272_v5 = vpop.permute.xlu0 %7271 }
 0xaac   : > { %7364 = vst.msk [vmem:[#allocation2 + $0x48] sm:$0xf] %vm1085_vm2, %v7272_v5  ;;  %v7443_v25 = vpop.permute.xlu1 %7442  ;;  %v17630_v5 = vld [vmem:[#allocation59_spill] sm:$0xff] }
 0xaad   : > { %v7588_v33 = vmul.f32 %v7443_v25, %v14753_v43 }
 0xaae   : > { %10601 = vset.pattern.permute.xlu1 %v17602_v53 }
 0xaaf   : > { %v7620_v15 = vpack.c.bf16 %v7588_v33, %v7588_v33  ;;  %8778 = vmatmul.bf16.gmra.mxu3 %v10059_v45  ;;  %7502 = vperm.xlu1 %10601, %v15692_v26   ;;  %v15733_v45 = vpop.f32.mrf.mxu1 }
 0xab0   : > { %7477 = vperm.xlu0 %10585, %v15579_v18   ;;  %7076 = vperm.xlu2 %10586, %v7406_v55   ;;  %v15724_v18 = vld [vmem:[%s16624_s1 + $0xa0] sm:$0xff] }
 0xab1   : > { %7652 = vst.msk [vmem:[#allocation2 + $0x4c] sm:$0xf] %vm668_vm1, %v7620_v15 }
 0xab2   : > { %v8739_v1 = vpop.f32.mrf.mxu3  ;;  %v7067_v59 = vpop.permute.xlu2 %7066 }
 0xab3   : > { %v15717_v0 = vadd.f32 %v8739_v1, %v15457_v16  ;;  %v7180_v62 = vmul.f32 %v7067_v59, %v17629_v14  ;;  %v7448_v43 = vpop.permute.xlu0 %7447  ;;  %v9780_v48 = vld [vmem:[#allocation2 + $0x44] sm:$0xf0]  ;;  %v8564_v16 = vadd.f32 %v15700_v9, %v15451_v63 }
 0xab4   : > { %v7589_v4 = vmul.f32 %v7448_v43, %v17593_v31  ;;  %v9783_v49 = vor.u32 %v10358_v12, %v9780_v48  ;;  %v15744_v43 = vld [vmem:[%s16624_s1 + $0x88] sm:$0xff] }
 0xab5   : > { %v7212_v6 = vpack.c.bf16 %v7180_v62, %v7180_v62  ;;  %v7052_v61 = vpop.permute.xlu1 %7051  ;;  %v8653_v15 = vadd.f32 %v15462_v34, %v8564_v16 }
 0xab6   : > { %v7621_v55 = vpack.c.bf16 %v7589_v4, %v7589_v4  ;;  %v7177_v25 = vmul.f32 %v7052_v61, %v17630_v5  ;;  %8797 = vmatmul.bf16.gmra.mxu0 %v9783_v49  ;;  %v10363_v61 = vld [vmem:[#allocation2 + $0x5c] sm:$0xf] }
 0xab7   : > { %10602 = vset.pattern.permute.xlu1 %v17601_v44  ;;  %v15751_v4 = vpop.f32.mrf.mxu1 }
 0xab8   : > { %7653 = vst.msk [vmem:[#allocation2 + $0x60] sm:$0xf] %vm668_vm1, %v7621_v55  ;;  %v7209_v31 = vpack.c.bf16 %v7177_v25, %v7177_v25  ;;  %7111 = vperm.xlu1 %10602, %v15724_v18   ;;  %7287 = vrot.lane.b32.xlu0 %v7212_v6, %s10749_s9  ;;  %v10361_v33 = vld [vmem:[#allocation2 + $0x48] sm:$0xf0]  ;;  %v8569_v25 = vadd.f32 %v15700_v9, %v15467_v13 }
 0xab9   : > { %v9787_v1 = vor.u32 %v10361_v33, %v9786_v36 }
 0xaba   : > { %v8741_v59 = vpop.f32.mrf.mxu3  ;;  %7281 = vrot.lane.b32.xlu2 %v7209_v31, %s10749_s9  ;;  %v8658_v36 = vadd.f32 %v15477_v60, %v8569_v25 }
 0xabb   : > { %v15737_v63 = vadd.f32 %v8741_v59, %v8653_v15  ;;  %v7276_v14 = vpop.permute.xlu0 %7275  ;;  %10213 = vmatmul.msk.bf16.gmra.mxu1 %vm4147_vm4, %v9787_v1 }
 0xabc   : > { %7366 = vst.msk [vmem:[#allocation2 + $0x70] sm:$0xf] %vm1085_vm2, %v7276_v14 }
 0xabe   : > { %v7453_v62 = vpop.permute.xlu1 %7452 }
 0xabf   : > { %v7590_v12 = vmul.f32 %v7453_v62, %v14805_v35  ;;  %v9806_v15 = vld [vmem:[#allocation2 + $0x60] sm:$0xf]  ;;  %v15767_v14 = vpop.f32.mrf.mxu1 }
 0xac0   : > { %10604 = vset.pattern.permute.xlu1 %v17591_v3  ;;  %7487 = vperm.xlu0 %10585, %v15602_v27  }
 0xac1   : > { %v7622_v34 = vpack.c.bf16 %v7590_v12, %v7590_v12  ;;  %6808 = vperm.xlu1 %10604, %v15744_v43  }
 0xac2   : > { %v8744_v48 = vpop.f32.mrf.mxu3  ;;  %7086 = vperm.xlu2 %10586, %v15692_v26   ;;  %v17631_v26 = vld [vmem:[#allocation81_spill] sm:$0xff] }
 0xac3   : > { %7654 = vst.msk [vmem:[#allocation2 + $0x74] sm:$0xf] %vm668_vm1, %v7622_v34  ;;  %v15755_v49 = vadd.f32 %v8744_v48, %v15471_v2  ;;  %v7458_v6 = vpop.permute.xlu0 %7457  ;;  %v9800_v35 = vld [vmem:[#allocation2 + $0x6c] sm:$0xf0]  ;;  %v8574_v48 = vadd.f32 %v15700_v9, %v15486_v22 }
 0xac4   : > { %v7591_v55 = vmul.f32 %v7458_v6, %v14772_v57  ;;  %v9803_v5 = vor.u32 %v10363_v61, %v9800_v35 }
 0xac5   : > { %v8663_v61 = vadd.f32 %v15493_v17, %v8574_v48  ;;  %v15810_v48 = vld [vmem:[%s16624_s1 + $0xa8] sm:$0xff] }
 0xac6   : > { %v7623_v27 = vpack.c.bf16 %v7591_v55, %v7591_v55  ;;  %8802 = vmatmul.bf16.gmra.mxu0 %v9803_v5  ;;  %v17632_v5 = vld [vmem:[#allocation11_spill] sm:$0xff] }
 0xac7   : > { %v7062_v16 = vpop.permute.xlu1 %7061  ;;  %v15778_v6 = vpop.f32.mrf.mxu1 }
 0xac8   : > { %7655 = vst.msk [vmem:[#allocation2 + $0x88] sm:$0xf] %vm668_vm1, %v7623_v27  ;;  %v7179_v31 = vmul.f32 %v7062_v16, %v17631_v26 }
 0xac9   : > { %10607 = vset.pattern.permute.xlu1 %v17601_v44 }
 0xaca   : > { %v7211_v2 = vpack.c.bf16 %v7179_v31, %v7179_v31  ;;  %v8746_v33 = vpop.f32.mrf.mxu3  ;;  %v10366_v1 = vld [vmem:[#allocation2 + $0x70] sm:$0xf0] }
 0xacb   : > { %v15764_v57 = vadd.f32 %v8746_v33, %v8658_v36  ;;  %v9807_v59 = vor.u32 %v10366_v1, %v9806_v15 }
 0xacc   : > { %7285 = vrot.lane.b32.xlu2 %v7211_v2, %s10749_s9  ;;  %v6996_v2 = vld [vmem:[%s16624_s1 + $0x98] sm:$0xff] }
 0xacd   : > { %10214 = vmatmul.msk.bf16.gmra.mxu1 %vm4147_vm4, %v9807_v59  ;;  %v17633_v59 = vld [vmem:[#allocation93_spill] sm:$0xff] }
 0xacf   : > { %v15786_v31 = vpop.f32.mrf.mxu1 }
 0xad0   : > { %v7463_v13 = vpop.permute.xlu1 %7462 }
 0xad1   : > { %v7592_v62 = vmul.f32 %v7463_v13, %v17594_v52 }
 0xad2   : > { %v8749_v12 = vpop.f32.mrf.mxu3 }
 0xad3   : > { %v7624_v60 = vpack.c.bf16 %v7592_v62, %v7592_v62  ;;  %v15772_v34 = vadd.f32 %v8749_v12, %v15484_v11  ;;  %v9826_v11 = vld [vmem:[#allocation2 + $0x88] sm:$0xf] }
 0xad4   : > { %7096 = vperm.xlu2 %10586, %v15744_v43  }
 0xad5   : > { %7656 = vst.msk [vmem:[#allocation2 + $0x9c] sm:$0xf] %vm668_vm1, %v7624_v60 }
 0xad7   : > { %v15796_v1 = vpop.f32.mrf.mxu1 }
 0xad9   : > { %v7072_v35 = vpop.permute.xlu1 %7071 }
 0xada   : > { %v8751_v55 = vpop.f32.mrf.mxu3  ;;  %v7181_v52 = vmul.f32 %v7072_v35, %v17632_v5  ;;  %v17634_v35 = vld [vmem:[#allocation92_spill] sm:$0xff] }
 0xadb   : > { %v15782_v27 = vadd.f32 %v8751_v55, %v8663_v61 }
 0xadc   : > { %v7213_v25 = vpack.c.bf16 %v7181_v52, %v7181_v52  ;;  %v10371_v16 = vld [vmem:[#allocation2 + $0x98] sm:$0xf0] }
 0xadd   : > { %v9827_v26 = vor.u32 %v10371_v16, %v9826_v11  ;;  %v15823_v16 = vld [vmem:[%s16624_s1 + $0xb0] sm:$0xff] }
 0xade   : > { %7289 = vrot.lane.b32.xlu2 %v7213_v25, %s10749_s9 }
 0xadf   : > { %10215 = vmatmul.msk.bf16.gmra.mxu1 %vm4147_vm4, %v9827_v26  ;;  %v15802_v12 = vpop.f32.mrf.mxu1 }
 0xae2   : > { %v8754_v22 = vpop.f32.mrf.mxu3  ;;  %v7473_v9 = vpop.permute.xlu1 %7472 }
 0xae3   : > { %v15789_v17 = vadd.f32 %v8754_v22, %v15502_v20  ;;  %v7594_v36 = vmul.f32 %v7473_v9, %v14791_v41 }
 0xae5   : > { %v7626_v33 = vpack.c.bf16 %v7594_v36, %v7594_v36 }
 0xae6   : > { %7106 = vperm.xlu2 %10586, %v6996_v2  }
 0xae7   : > { %7658 = vst.msk [vmem:[#allocation2 + $0xc4] sm:$0xf] %vm668_vm1, %v7626_v33 }
 0xaeb   : > { %v7082_v15 = vpop.permute.xlu1 %7081 }
 0xaec   : > { %v7183_v20 = vmul.f32 %v7082_v15, %v17633_v59 }
 0xaee   : > { %10600 = vset.pattern.permute.xlu2 %v17602_v53  ;;  %v7215_v62 = vpack.c.bf16 %v7183_v20, %v7183_v20 }
 0xaef   : > { %7497 = vperm.xlu2 %10600, %v15628_v46  }
 0xaf4   : > { %v7483_v13 = vpop.permute.xlu1 %7482 }
 0xaf5   : > { %v7596_v41 = vmul.f32 %v7483_v13, %v14847_v56  ;;  %v15814_v56 = vpop.f32.mrf.mxu1 }
 0xaf7   : > { %v7628_v60 = vpack.c.bf16 %v7596_v41, %v7596_v41  ;;  %7293 = vrot.lane.b32.xlu2 %v7215_v62, %s10749_s9 }
 0xaf8   : > { %10603 = vset.pattern.permute.xlu2 %v17601_v44 }
 0xaf9   : > { %7660 = vst.msk [vmem:[#allocation2 + $0xec] sm:$0xf] %vm668_vm1, %v7628_v60 }
 0xafd   : > { %v7092_v61 = vpop.permute.xlu1 %7091  ;;  %v15826_v9 = vpop.f32.mrf.mxu1 }
 0xafe   : > { %v7185_v55 = vmul.f32 %v7092_v61, %v17634_v35  ;;  %17635 = vst [vmem:[#allocation108_spill] sm:$0xff] %v15826_v9 }
 0xaff   : > { %7116 = vperm.xlu2 %10603, %v15810_v48  }
 0xb00   : > { %v7217_v5 = vpack.c.bf16 %v7185_v55, %v7185_v55 }
 0xb02   : > { %7297 = vrot.lane.b32.xlu1 %v7217_v5, %s10749_s9  ;;  %v7278_v52 = vpop.permute.xlu2 %7277 }
 0xb03   : > { %7367 = vst.msk [vmem:[#allocation2 + $0x84] sm:$0xf] %vm1085_vm2, %v7278_v52  ;;  %v17638_v52 = vld [vmem:[#allocation96_spill] sm:$0xff] }
 0xb05   : > { %v15838_v61 = vpop.f32.mrf.mxu1 }
 0xb06   : > { %v7493_v25 = vpop.permute.xlu1 %7492  ;;  %17637 = vst [vmem:[#allocation54_spill] sm:$0xff] %v15838_v61 }
 0xb07   : > { %v7598_v11 = vmul.f32 %v7493_v25, %v17596_v54  ;;  %10605 = vset.pattern.permute.xlu2 %v17602_v53  ;;  %v17636_v54 = vld [vmem:[#allocation14_spill] sm:$0xff] }
 0xb08   : > { %7507 = vperm.xlu2 %10605, %v15653_v32  }
 0xb09   : > { %v7630_v26 = vpack.c.bf16 %v7598_v11, %v7598_v11  ;;  %v7280_v22 = vpop.permute.xlu0 %7279 }
 0xb0a   : > { %7121 = vperm.xlu1 %10607, %v15823_v16   ;;  %v7077_v36 = vpop.permute.xlu2 %7076  ;;  %7368 = vst.msk [vmem:[#allocation2 + $0x98] sm:$0xf] %vm1085_vm2, %v7280_v22  ;;  %v10368_v13 = vld [vmem:[#allocation2 + $0x84] sm:$0xf]  ;;  %v17639_v22 = vld [vmem:[#allocation8_spill] sm:$0xff] }
 0xb0b   : > { %7662 = vst.msk [vmem:[#allocation2 + $0x114] sm:$0xf] %vm668_vm1, %v7630_v26  ;;  %v7182_v33 = vmul.f32 %v7077_v36, %v17636_v54 }
 0xb0d   : > { %v7214_v15 = vpack.c.bf16 %v7182_v33, %v7182_v33  ;;  %v10376_v33 = vld [vmem:[#allocation2 + $0xc0] sm:$0xf0] }
 0xb0f   : > { %v15832_v59 = vpop.permute.xlu1 %7101  ;;  %7291 = vrot.lane.b32.xlu0 %v7214_v15, %s10749_s9  ;;  %v15847_v15 = vpop.f32.mrf.mxu1 }
 0xb10   : > { %10608 = vset.pattern.permute.xlu2 %v17601_v44  ;;  %17640 = vst [vmem:[#allocation104_spill] sm:$0xff] %v15847_v15 }
 0xb11   : > { %v7468_v20 = vpop.permute.xlu0 %7467  ;;  %v9820_v62 = vld [vmem:[#allocation2 + $0x94] sm:$0xf0] }
 0xb12   : > { %10609 = vset.pattern.permute.xlu1 %v17591_v3  ;;  %v7593_v41 = vmul.f32 %v7468_v20, %v14826_v47  ;;  %v9823_v60 = vor.u32 %v10368_v13, %v9820_v62 }
 0xb13   : > { %6818 = vperm.xlu1 %10609, %v6996_v2  }
 0xb14   : > { %v7625_v35 = vpack.c.bf16 %v7593_v41, %v7593_v41  ;;  %v7282_v55 = vpop.permute.xlu2 %7281  ;;  %8807 = vmatmul.bf16.gmra.mxu0 %v9823_v60 }
 0xb15   : > { %7369 = vst.msk [vmem:[#allocation2 + $0xac] sm:$0xf] %vm1085_vm2, %v7282_v55  ;;  %v15855_v55 = vld [vmem:[%s16624_s1 + $0xc0] sm:$0xff] }
 0xb16   : > { %7657 = vst.msk [vmem:[#allocation2 + $0xb0] sm:$0xf] %vm668_vm1, %v7625_v35 }
 0xb18   : > { %v6799_v5 = vpop.permute.xlu1 %6798 }
 0xb19   : > { %v6896_v25 = vmul.f32 %v6799_v5, %v17638_v52  ;;  %v7284_v11 = vpop.permute.xlu0 %7283  ;;  %v17641_v52 = vld [vmem:[#allocation37_spill] sm:$0xff] }
 0xb1a   : > { %7370 = vst.msk [vmem:[#allocation2 + $0xc0] sm:$0xf] %vm1085_vm2, %v7284_v11 }
 0xb1b   : > { %v6928_v26 = vpack.c.bf16 %v6896_v25, %v6896_v25  ;;  %10611 = vset.pattern.permute.xlu1 %v17602_v53 }
 0xb1c   : > { %7522 = vperm.xlu1 %10611, %v6996_v2   ;;  %v7087_v47 = vpop.permute.xlu2 %7086  ;;  %v10373_v41 = vld [vmem:[#allocation2 + $0xac] sm:$0xf] }
 0xb1d   : > { %6960 = vst.msk [vmem:[#allocation2 + $0x138] sm:$0xf] %vm668_vm1, %v6928_v26  ;;  %v7184_v36 = vmul.f32 %v7087_v47, %v17639_v22  ;;  %v9846_v54 = vld [vmem:[#allocation2 + $0xb0] sm:$0xf] }
 0xb1e   : > { %v9847_v20 = vor.u32 %v10376_v33, %v9846_v54 }
 0xb1f   : > { %v7216_v13 = vpack.c.bf16 %v7184_v36, %v7184_v36 }
 0xb20   : > { %10216 = vmatmul.msk.bf16.gmra.mxu1 %vm4147_vm4, %v9847_v20 }
 0xb21   : > { %v7503_v62 = vpop.permute.xlu1 %7502  ;;  %7295 = vrot.lane.b32.xlu0 %v7216_v13, %s10749_s9  ;;  %v9840_v60 = vld [vmem:[#allocation2 + $0xbc] sm:$0xf0] }
 0xb22   : > { %v7600_v2 = vmul.f32 %v7503_v62, %v14833_v28  ;;  %v7478_v35 = vpop.permute.xlu0 %7477  ;;  %v9843_v5 = vor.u32 %v10373_v41, %v9840_v60  ;;  %v15863_v28 = vpop.f32.mrf.mxu1  ;;  %v10381_v62 = vld [vmem:[#allocation2 + $0xe8] sm:$0xf0]  ;;  %v17642_v41 = vld [vmem:[#allocation98_spill] sm:$0xff] }
 0xb23   : > { %v7595_v25 = vmul.f32 %v7478_v35, %v17641_v52  ;;  %v8793_v11 = vpop.f32.mrf.mxu0 }
 0xb24   : > { %v7632_v26 = vpack.c.bf16 %v7600_v2, %v7600_v2  ;;  %v15859_v47 = vadd.f32 %v8793_v11, %v15561_v8  ;;  %10612 = vset.pattern.permute.xlu1 %v17601_v44  ;;  %8812 = vmatmul.bf16.gmra.mxu0 %v9843_v5  ;;  %v17643_v5 = vld [vmem:[#allocation102_spill] sm:$0xff] }
 0xb25   : > { %v7627_v22 = vpack.c.bf16 %v7595_v25, %v7595_v25  ;;  %7131 = vperm.xlu1 %10612, %v15855_v55  }
 0xb26   : > { %7664 = vst.msk [vmem:[#allocation2 + $0x13c] sm:$0xf] %vm668_vm1, %v7632_v26  ;;  %v7286_v36 = vpop.permute.xlu2 %7285 }
 0xb27   : > { %7659 = vst.msk [vmem:[#allocation2 + $0xd8] sm:$0xf] %vm668_vm1, %v7627_v22 }
 0xb28   : > { %7371 = vst.msk [vmem:[#allocation2 + $0xd4] sm:$0xf] %vm1085_vm2, %v7286_v36 }
 0xb29   : > { %7512 = vperm.xlu0 %10585, %v15744_v43  }
 0xb2a   : > { %v7112_v54 = vpop.permute.xlu1 %7111  ;;  %v7288_v8 = vpop.permute.xlu0 %7287 }
 0xb2b   : > { %v15869_v33 = vpop.f32.mrf.mxu0  ;;  %7372 = vst.msk [vmem:[#allocation2 + $0xe8] sm:$0xf] %vm1085_vm2, %v7288_v8  ;;  %v15875_v35 = vpop.f32.mrf.mxu1  ;;  %v7189_v43 = vmul.f32 %v7112_v54, %v17643_v5 }
 0xb2d   : > { %10614 = vset.pattern.permute.xlu1 %v17591_v3  ;;  %v7221_v36 = vpack.c.bf16 %v7189_v43, %v7189_v43 }
 0xb2e   : > { %6828 = vperm.xlu1 %10614, %v15810_v48   ;;  %v7097_v20 = vpop.permute.xlu2 %7096  ;;  %v9866_v13 = vld [vmem:[#allocation2 + $0xd8] sm:$0xf] }
 0xb2f   : > { %v7186_v60 = vmul.f32 %v7097_v20, %v17642_v41  ;;  %v9867_v2 = vor.u32 %v10381_v62, %v9866_v13  ;;  %v10378_v26 = vld [vmem:[#allocation2 + $0xd4] sm:$0xf]  ;;  %v17644_v20 = vld [vmem:[#allocation94_spill] sm:$0xff] }
 0xb31   : > { %v7218_v52 = vpack.c.bf16 %v7186_v60, %v7186_v60  ;;  %10606 = vset.pattern.permute.xlu0 %v17591_v3  ;;  %10217 = vmatmul.msk.bf16.gmra.mxu1 %vm4147_vm4, %v9867_v2 }
 0xb32   : > { %6793 = vperm.xlu0 %10606, %v15628_v46   ;;  %v7488_v25 = vpop.permute.xlu0 %7487  ;;  %v9860_v22 = vld [vmem:[#allocation2 + $0xe4] sm:$0xf0] }
 0xb33   : > { %v6809_v11 = vpop.permute.xlu1 %6808  ;;  %7299 = vrot.lane.b32.xlu2 %v7218_v52, %s10749_s9  ;;  %v7597_v8 = vmul.f32 %v7488_v25, %v14812_v23  ;;  %v8798_v62 = vpop.f32.mrf.mxu0  ;;  %v9863_v54 = vor.u32 %v10378_v26, %v9860_v22  ;;  %v7000_v23 = vld [vmem:[%s16624_s1 + $0xb8] sm:$0xff] }
 0xb34   : > { %v6898_v13 = vmul.f32 %v6809_v11, %v17644_v20  ;;  %v8799_v41 = vadd.f32 %v8798_v62, %v15582_v19  ;;  %v15899_v19 = vld [vmem:[%s16624_s1 + $0xd0] sm:$0xff]  ;;  %v17647_v62 = vld [vmem:[#allocation69_spill] sm:$0xff] }
 0xb35   : > { %v7629_v60 = vpack.c.bf16 %v7597_v8, %v7597_v8  ;;  %8817 = vmatmul.bf16.gmra.mxu0 %v9863_v54  ;;  %v10386_v11 = vld [vmem:[#allocation2 + $0x110] sm:$0xf0]  ;;  %v7187_v54 = vmul.f32 %v15832_v59, %v17647_v62  ;;  %v10391_v59 = vld [vmem:[#allocation2 + $0x138] sm:$0xf0]  ;;  %v17649_v62 = vld [vmem:[#allocation22_spill] sm:$0xff] }
 0xb36   : > { %v6930_v5 = vpack.c.bf16 %v6898_v13, %v6898_v13  ;;  %7305 = vrot.lane.b32.xlu1 %v7221_v36, %s10749_s9 }
 0xb37   : > { %10616 = vset.pattern.permute.xlu1 %v17601_v44  ;;  %7661 = vst.msk [vmem:[#allocation2 + $0x100] sm:$0xf] %vm668_vm1, %v7629_v60 }
 0xb38   : > { %v7290_v46 = vpop.permute.xlu2 %7289  ;;  %v8887_v2 = vpop.f32.mrf.mxu1  ;;  %6962 = vst.msk [vmem:[#allocation2 + $0x160] sm:$0xf] %vm668_vm1, %v6930_v5  ;;  %v7219_v5 = vpack.c.bf16 %v7187_v54, %v7187_v54 }
 0xb39   : > { %v15892_v43 = vadd.f32 %v8887_v2, %v8799_v41  ;;  %7373 = vst.msk [vmem:[#allocation2 + $0xfc] sm:$0xf] %vm1085_vm2, %v7290_v46 }
 0xb3a   : > { %6803 = vperm.xlu0 %10606, %v15653_v32   ;;  %v17646_v32 = vld [vmem:[#allocation97_spill] sm:$0xff] }
 0xb3b   : > { %17645 = vst [vmem:[#allocation87_spill] sm:$0xff] %v15892_v43  ;;  %7126 = vperm.xlu2 %10608, %v7000_v23   ;;  %v15901_v52 = vpop.f32.mrf.mxu0 }
 0xb3e   : > { %7141 = vperm.xlu1 %10616, %v15899_v19   ;;  %v9886_v25 = vld [vmem:[#allocation2 + $0x100] sm:$0xf] }
 0xb3f   : > { %v9887_v22 = vor.u32 %v10386_v11, %v9886_v25 }
 0xb40   : > { %v7107_v26 = vpop.permute.xlu2 %7106  ;;  %v15904_v36 = vpop.f32.mrf.mxu1 }
 0xb41   : > { %10218 = vmatmul.msk.bf16.gmra.mxu1 %vm4147_vm4, %v9887_v22  ;;  %v7188_v8 = vmul.f32 %v7107_v26, %v17646_v32  ;;  %v15935_v22 = vld [vmem:[%s16624_s1 + $0xe0] sm:$0xff] }
 0xb42   : > { %6813 = vperm.xlu0 %10606, %v15676_v50   ;;  %v17648_v32 = vld [vmem:[#allocation74_spill] sm:$0xff] }
 0xb43   : > { %10610 = vset.pattern.permute.xlu2 %v17602_v53  ;;  %v8803_v20 = vpop.f32.mrf.mxu0  ;;  %v7220_v41 = vpack.c.bf16 %v7188_v8, %v7188_v8 }
 0xb44   : > { %7517 = vperm.xlu2 %10610, %v15676_v50   ;;  %v8804_v13 = vadd.f32 %v8803_v20, %v15594_v40 }
 0xb46   : > { %10619 = vset.pattern.permute.xlu1 %v17591_v3 }
 0xb47   : > { %6838 = vperm.xlu1 %10619, %v7000_v23  }
 0xb49   : > { %v7498_v60 = vpop.permute.xlu2 %7497 }
 0xb4a   : > { %v7599_v46 = vmul.f32 %v7498_v60, %v14866_v30  ;;  %7303 = vrot.lane.b32.xlu0 %v7220_v41, %s10749_s9  ;;  %v8892_v2 = vpop.f32.mrf.mxu1  ;;  %v15928_v30 = vld [vmem:[%s16624_s1 + $0xc8] sm:$0xff] }
 0xb4b   : > { %v15917_v25 = vadd.f32 %v8892_v2, %v8804_v13 }
 0xb4c   : > { %v7631_v11 = vpack.c.bf16 %v7599_v46, %v7599_v46  ;;  %7301 = vrot.lane.b32.xlu2 %v7219_v5, %s10749_s9  ;;  %v17650_v5 = vld [vmem:[#allocation101_spill] sm:$0xff] }
 0xb4d   : > { %10613 = vset.pattern.permute.xlu2 %v17601_v44 }
 0xb4e   : > { %7663 = vst.msk [vmem:[#allocation2 + $0x128] sm:$0xf] %vm668_vm1, %v7631_v11 }
 0xb4f   : > { %10621 = vset.pattern.permute.xlu1 %v17602_v53 }
 0xb50   : > { %7542 = vperm.xlu1 %10621, %v7000_v23  }
 0xb51   : > { %v15923_v40 = vpop.permute.xlu2 %7293 }
 0xb52   : > { %6823 = vperm.xlu0 %10606, %v15724_v18  }
 0xb54   : > { %7136 = vperm.xlu2 %10613, %v15928_v30  }
 0xb55   : > { %v9906_v50 = vld [vmem:[#allocation2 + $0x128] sm:$0xf] }
 0xb56   : > { %v9907_v26 = vor.u32 %v10391_v59, %v9906_v50  ;;  %v15967_v50 = vpop.f32.mrf.mxu1 }
 0xb58   : > { %10622 = vset.pattern.permute.xlu1 %v17601_v44  ;;  %10219 = vmatmul.msk.bf16.gmra.mxu1 %vm4147_vm4, %v9907_v26  ;;  %v17651_v26 = vld [vmem:[#allocation70_spill] sm:$0xff] }
 0xb59   : > { %7151 = vperm.xlu1 %10622, %v15935_v22   ;;  %v7117_v23 = vpop.permute.xlu2 %7116 }
 0xb5a   : > { %6833 = vperm.xlu0 %10606, %v15823_v16   ;;  %v7190_v8 = vmul.f32 %v7117_v23, %v17648_v32 }
 0xb5c   : > { %10615 = vset.pattern.permute.xlu2 %v17602_v53  ;;  %v7222_v13 = vpack.c.bf16 %v7190_v8, %v7190_v8  ;;  %v15975_v8 = vpop.f32.mrf.mxu0 }
 0xb5d   : > { %7527 = vperm.xlu2 %10615, %v15724_v18   ;;  %v15955_v18 = vld [vmem:[%s16624_s1 + $0xd8] sm:$0xff] }
 0xb61   : > { %10624 = vset.pattern.permute.xlu1 %v17591_v3 }
 0xb62   : > { %6848 = vperm.xlu1 %10624, %v15928_v30   ;;  %10618 = vset.pattern.permute.xlu0 %v17602_v53  ;;  %v7508_v20 = vpop.permute.xlu2 %7507 }
 0xb63   : > { %v7601_v54 = vmul.f32 %v7508_v20, %v17649_v62  ;;  %7532 = vperm.xlu0 %10618, %v15810_v48   ;;  %v10383_v20 = vld [vmem:[#allocation2 + $0xfc] sm:$0xf] }
 0xb65   : > { %v7633_v41 = vpack.c.bf16 %v7601_v54, %v7601_v54  ;;  %7307 = vrot.lane.b32.xlu2 %v7222_v13, %s10749_s9  ;;  %v8897_v54 = vpop.f32.mrf.mxu1 }
 0xb66   : > { %10617 = vset.pattern.permute.xlu2 %v17601_v44 }
 0xb67   : > { %7665 = vst.msk [vmem:[#allocation2 + $0x150] sm:$0xf] %vm668_vm1, %v7633_v41 }
 0xb6a   : > { %10627 = vset.pattern.permute.xlu1 %v17601_v44 }
 0xb6d   : > { %7146 = vperm.xlu2 %10617, %v15955_v18  }
 0xb74   : > { %v15959_v60 = vpop.permute.xlu1 %7297 }
 0xb75   : > { %10620 = vset.pattern.permute.xlu2 %v17602_v53 }
 0xb76   : > { %7537 = vperm.xlu2 %10620, %v15823_v16   ;;  %v15973_v16 = vld [vmem:[%s16624_s1 + $0xe8] sm:$0xff] }
 0xb7c   : > { %v7122_v48 = vpop.permute.xlu1 %7121 }
 0xb7d   : > { %v7191_v46 = vmul.f32 %v7122_v48, %v17650_v5  ;;  %v17652_v5 = vld [vmem:[#allocation95_spill] sm:$0xff] }
 0xb7e   : > { %10623 = vset.pattern.permute.xlu2 %v17601_v44 }
 0xb7f   : > { %v7223_v2 = vpack.c.bf16 %v7191_v46, %v7191_v46 }
 0xb81   : > { %7309 = vrot.lane.b32.xlu2 %v7223_v2, %s10749_s9  ;;  %v7292_v11 = vpop.permute.xlu0 %7291 }
 0xb82   : > { %7374 = vst.msk [vmem:[#allocation2 + $0x110] sm:$0xf] %vm1085_vm2, %v7292_v11 }
 0xb85   : > { %v6819_v59 = vpop.permute.xlu1 %6818 }
 0xb86   : > { %v6900_v23 = vmul.f32 %v6819_v59, %v17651_v26 }
 0xb88   : > { %v6932_v32 = vpack.c.bf16 %v6900_v23, %v6900_v23 }
 0xb89   : > { %7156 = vperm.xlu2 %10623, %v15973_v16   ;;  %v9880_v13 = vld [vmem:[#allocation2 + $0x10c] sm:$0xf0] }
 0xb8a   : > { %6964 = vst.msk [vmem:[#allocation2 + $0x188] sm:$0xf] %vm668_vm1, %v6932_v32  ;;  %v9883_v62 = vor.u32 %v10383_v20, %v9880_v13  ;;  %v17654_v20 = vld [vmem:[#allocation103_spill] sm:$0xff] }
 0xb8c   : > { %8822 = vmatmul.bf16.gmra.mxu0 %v9883_v62  ;;  %v15989_v62 = vpop.f32.mrf.mxu1 }
 0xb8d   : > { %v7300_v41 = vpop.permute.xlu2 %7299 }
 0xb8e   : > { %7378 = vst.msk [vmem:[#allocation2 + $0x160] sm:$0xf] %vm1085_vm2, %v7300_v41  ;;  %v7523_v48 = vpop.permute.xlu1 %7522 }
 0xb8f   : > { %v7604_v46 = vmul.f32 %v7523_v48, %v17652_v5  ;;  %v17655_v5 = vld [vmem:[#allocation71_spill] sm:$0xff] }
 0xb91   : > { %v7636_v2 = vpack.c.bf16 %v7604_v46, %v7604_v46  ;;  %10625 = vset.pattern.permute.xlu2 %v17602_v53  ;;  %v8808_v11 = vpop.f32.mrf.mxu0 }
 0xb92   : > { %7547 = vperm.xlu2 %10625, %v15855_v55   ;;  %v8809_v59 = vadd.f32 %v8808_v11, %v15620_v7 }
 0xb93   : > { %7668 = vst.msk [vmem:[#allocation2 + $0x18c] sm:$0xf] %vm668_vm1, %v7636_v2  ;;  %v7296_v26 = vpop.permute.xlu0 %7295 }
 0xb94   : > { %v15985_v23 = vadd.f32 %v8897_v54, %v8809_v59  ;;  %7376 = vst.msk [vmem:[#allocation2 + $0x138] sm:$0xf] %vm1085_vm2, %v7296_v26  ;;  %v17656_v54 = vld [vmem:[#allocation76_spill] sm:$0xff]  ;;  %v17657_v26 = vld [vmem:[#allocation31_spill] sm:$0xff] }
 0xb95   : > { %v7127_v32 = vpop.permute.xlu2 %7126 }
 0xb96   : > { %17653 = vst [vmem:[#allocation20_spill] sm:$0xff] %v15985_v23  ;;  %v7192_v13 = vmul.f32 %v7127_v32, %v17654_v20 }
 0xb97   : > { %v7132_v41 = vpop.permute.xlu1 %7131 }
 0xb98   : > { %v7224_v48 = vpack.c.bf16 %v7192_v13, %v7192_v13  ;;  %v7193_v46 = vmul.f32 %v7132_v41, %v17655_v5  ;;  %v17658_v5 = vld [vmem:[#allocation73_spill] sm:$0xff] }
 0xb99   : > { %v15992_v15 = vpop.f32.mrf.mxu0 }
 0xb9a   : > { %v7225_v61 = vpack.c.bf16 %v7193_v46, %v7193_v46  ;;  %7311 = vrot.lane.b32.xlu0 %v7224_v48, %s10749_s9  ;;  %10628 = vset.pattern.permute.xlu2 %v17601_v44  ;;  %v16004_v44 = vld [vmem:[%s16624_s1 + $0xf0] sm:$0xff] }
 0xb9b   : > { %v7513_v7 = vpop.permute.xlu0 %7512 }
 0xb9c   : > { %v7602_v2 = vmul.f32 %v7513_v7, %v17656_v54  ;;  %7313 = vrot.lane.b32.xlu1 %v7225_v61, %s10749_s9 }
 0xb9d   : > { %v8902_v20 = vpop.f32.mrf.mxu1 }
 0xb9e   : > { %v7634_v11 = vpack.c.bf16 %v7602_v2, %v7602_v2  ;;  %v7518_v59 = vpop.permute.xlu2 %7517  ;;  %v17659_v2 = vld [vmem:[#allocation90_spill] sm:$0xff] }
 0xb9f   : > { %v7603_v32 = vmul.f32 %v7518_v59, %v17657_v26 }
 0xba0   : > { %7666 = vst.msk [vmem:[#allocation2 + $0x164] sm:$0xf] %vm668_vm1, %v7634_v11  ;;  %v6829_v13 = vpop.permute.xlu1 %6828 }
 0xba1   : > { %v7635_v41 = vpack.c.bf16 %v7603_v32, %v7603_v32  ;;  %v6902_v46 = vmul.f32 %v6829_v13, %v17658_v5  ;;  %v8813_v9 = vpop.f32.mrf.mxu0  ;;  %v9926_v32 = vld [vmem:[#allocation2 + $0x150] sm:$0xf] }
 0xba2   : > { %7552 = vperm.xlu0 %10618, %v15928_v30   ;;  %v8814_v61 = vadd.f32 %v8813_v9, %v15646_v29 }
 0xba3   : > { %7667 = vst.msk [vmem:[#allocation2 + $0x178] sm:$0xf] %vm668_vm1, %v7635_v41  ;;  %v6934_v48 = vpack.c.bf16 %v6902_v46, %v6902_v46 }
 0xba4   : > { %v16009_v7 = vadd.f32 %v8902_v20, %v8814_v61  ;;  %7161 = vperm.xlu1 %10627, %v16004_v44   ;;  %v6794_v54 = vpop.permute.xlu0 %6793  ;;  %v17660_v61 = vld [vmem:[#allocation12_spill] sm:$0xff] }
 0xba5   : > { %6966 = vst.msk [vmem:[#allocation2 + $0x1b0] sm:$0xf] %vm668_vm1, %v6934_v48  ;;  %v6895_v11 = vmul.f32 %v6794_v54, %v17659_v2  ;;  %v8904_v29 = vpop.f32.mrf.mxu1 }
 0xba6   : > { %v7302_v59 = vpop.permute.xlu2 %7301 }
 0xba7   : > { %v6927_v26 = vpack.c.bf16 %v6895_v11, %v6895_v11  ;;  %v10396_v13 = vld [vmem:[#allocation2 + $0x160] sm:$0xf0] }
 0xba8   : > { %v16014_v5 = vpop.permute.xlu1 %7305  ;;  %v9927_v30 = vor.u32 %v10396_v13, %v9926_v32  ;;  %v9900_v13 = vld [vmem:[#allocation2 + $0x134] sm:$0xf0] }
 0xba9   : > { %6959 = vst.msk [vmem:[#allocation2 + $0x124] sm:$0xf] %vm668_vm1, %v6927_v26  ;;  %v8815_v9 = vpop.f32.mrf.mxu0 }
 0xbaa   : > { %7375 = vst.msk [vmem:[#allocation2 + $0x124] sm:$0xf] %vm1085_vm2, %v15923_v40  ;;  %10626 = vset.pattern.permute.xlu0 %v17591_v3  ;;  %v8816_v20 = vadd.f32 %v8815_v9, %v15657_v10  ;;  %10220 = vmatmul.msk.bf16.gmra.mxu1 %vm4147_vm4, %v9927_v30  ;;  %v17661_v40 = vld [vmem:[#allocation75_spill] sm:$0xff] }
 0xbab   : > { %6843 = vperm.xlu0 %10626, %v15855_v55  }
 0xbac   : > { %v16023_v41 = vadd.f32 %v8904_v29, %v8816_v20  ;;  %10629 = vset.pattern.permute.xlu1 %v17591_v3  ;;  %v6804_v46 = vpop.permute.xlu0 %6803 }
 0xbad   : > { %v6897_v48 = vmul.f32 %v6804_v46, %v17660_v61  ;;  %6858 = vperm.xlu1 %10629, %v15955_v18   ;;  %v17662_v46 = vld [vmem:[#allocation100_spill] sm:$0xff] }
 0xbae   : > { %v7137_v54 = vpop.permute.xlu2 %7136  ;;  %v8907_v30 = vpop.f32.mrf.mxu1 }
 0xbaf   : > { %v6929_v2 = vpack.c.bf16 %v6897_v48, %v6897_v48  ;;  %v7194_v11 = vmul.f32 %v7137_v54, %v17661_v40  ;;  %v9946_v48 = vld [vmem:[#allocation2 + $0x178] sm:$0xf]  ;;  %v10401_v40 = vld [vmem:[#allocation2 + $0x188] sm:$0xf0] }
 0xbb0   : > { %v7142_v26 = vpop.permute.xlu1 %7141 }
 0xbb1   : > { %6961 = vst.msk [vmem:[#allocation2 + $0x14c] sm:$0xf] %vm668_vm1, %v6929_v2  ;;  %v7226_v10 = vpack.c.bf16 %v7194_v11, %v7194_v11  ;;  %v10388_v32 = vld [vmem:[#allocation2 + $0x124] sm:$0xf] }
 0xbb2   : > { %7377 = vst.msk [vmem:[#allocation2 + $0x14c] sm:$0xf] %vm1085_vm2, %v15959_v60  ;;  %v9903_v55 = vor.u32 %v10388_v32, %v9900_v13  ;;  %v8818_v29 = vpop.f32.mrf.mxu0  ;;  %v17663_v11 = vld [vmem:[#allocation10_spill] sm:$0xff]  ;;  %v9947_v13 = vor.u32 %v10401_v40, %v9946_v48 }
 0xbb3   : > { %6853 = vperm.xlu0 %10626, %v15899_v19   ;;  %7315 = vrot.lane.b32.xlu2 %v7226_v10, %s10749_s9  ;;  %v8819_v9 = vadd.f32 %v8818_v29, %v15665_v51  ;;  %v16044_v51 = vld [vmem:[%s16624_s1 + $0xf8] sm:$0xff] }
 0xbb4   : > { %8827 = vmatmul.bf16.gmra.mxu0 %v9903_v55  ;;  %v6814_v20 = vpop.permute.xlu0 %6813 }
 0xbb5   : > { %v6899_v61 = vmul.f32 %v6814_v20, %v17662_v46  ;;  %10631 = vset.pattern.permute.xlu1 %v17602_v53  ;;  %v16037_v54 = vadd.f32 %v8907_v30, %v8819_v9  ;;  %v17664_v30 = vld [vmem:[#allocation85_spill] sm:$0xff] }
 0xbb6   : > { %7562 = vperm.xlu1 %10631, %v15955_v18  }
 0xbb7   : > { %v6931_v60 = vpack.c.bf16 %v6899_v61, %v6899_v61  ;;  %v7528_v2 = vpop.permute.xlu2 %7527  ;;  %v8909_v61 = vpop.f32.mrf.mxu1 }
 0xbb8   : > { %v7605_v32 = vmul.f32 %v7528_v2, %v17663_v11  ;;  %v9920_v2 = vld [vmem:[#allocation2 + $0x15c] sm:$0xf0] }
 0xbb9   : > { %6963 = vst.msk [vmem:[#allocation2 + $0x174] sm:$0xf] %vm668_vm1, %v6931_v60  ;;  %v6839_v10 = vpop.permute.xlu1 %6838  ;;  %v10393_v60 = vld [vmem:[#allocation2 + $0x14c] sm:$0xf] }
 0xbba   : > { %7379 = vst.msk [vmem:[#allocation2 + $0x174] sm:$0xf] %vm1085_vm2, %v7302_v59  ;;  %v7637_v55 = vpack.c.bf16 %v7605_v32, %v7605_v32  ;;  %v6904_v29 = vmul.f32 %v6839_v10, %v17664_v30  ;;  %10221 = vmatmul.msk.bf16.gmra.mxu1 %vm4147_vm4, %v9947_v13  ;;  %v8820_v18 = vpop.f32.mrf.mxu0  ;;  %v9923_v11 = vor.u32 %v10393_v60, %v9920_v2  ;;  %v17669_v2 = vld [vmem:[#allocation80_spill] sm:$0xff] }
 0xbbb   : > { %7166 = vperm.xlu2 %10628, %v16044_v51   ;;  %10634 = vset.pattern.permute.xlu0 %v17602_v53  ;;  %v8821_v20 = vadd.f32 %v8820_v18, %v15678_v42  ;;  %v17665_v42 = vld [vmem:[#allocation40_spill] sm:$0xff] }
 0xbbc   : > { %7669 = vst.msk [vmem:[#allocation2 + $0x1a0] sm:$0xf] %vm668_vm1, %v7637_v55  ;;  %v6936_v9 = vpack.c.bf16 %v6904_v29, %v6904_v29  ;;  %v7304_v46 = vpop.permute.xlu0 %7303  ;;  %v17666_v55 = vld [vmem:[#allocation99_spill] sm:$0xff]  ;;  %v17667_v29 = vld [vmem:[#allocation61_spill] sm:$0xff] }
 0xbbd   : > { %7380 = vst.msk [vmem:[#allocation2 + $0x188] sm:$0xf] %vm1085_vm2, %v7304_v46  ;;  %v16056_v59 = vadd.f32 %v8909_v61, %v8821_v20  ;;  %v7195_v18 = vmul.f32 %v7142_v26, %v17667_v29  ;;  %v17668_v46 = vld [vmem:[#allocation62_spill] sm:$0xff] }
 0xbbe   : > { %6968 = vst.msk [vmem:[#allocation2 + $0x1d8] sm:$0xf] %vm668_vm1, %v6936_v9  ;;  %10632 = vset.pattern.permute.xlu1 %v17591_v3 }
 0xbbf   : > { %6863 = vperm.xlu1 %10632, %v15935_v22   ;;  %v7308_v48 = vpop.permute.xlu2 %7307 }
 0xbc0   : > { %7382 = vst.msk [vmem:[#allocation2 + $0x1b0] sm:$0xf] %vm1085_vm2, %v7308_v48 }
 0xbc2   : > { %v7543_v40 = vpop.permute.xlu1 %7542 }
 0xbc3   : > { %v7608_v32 = vmul.f32 %v7543_v40, %v17665_v42  ;;  %10630 = vset.pattern.permute.xlu2 %v17602_v53 }
 0xbc4   : > { %7557 = vperm.xlu2 %10630, %v15899_v19   ;;  %8832 = vmatmul.bf16.gmra.mxu0 %v9923_v11  ;;  %v6824_v13 = vpop.permute.xlu0 %6823  ;;  %v7227_v19 = vpack.c.bf16 %v7195_v18, %v7195_v18  ;;  %v17671_v18 = vld [vmem:[#allocation7_spill] sm:$0xff] }
 0xbc5   : > { %v7640_v10 = vpack.c.bf16 %v7608_v32, %v7608_v32  ;;  %v6901_v30 = vmul.f32 %v6824_v13, %v17666_v55  ;;  %v9940_v32 = vld [vmem:[#allocation2 + $0x184] sm:$0xf0]  ;;  %v17670_v13 = vld [vmem:[#allocation60_spill] sm:$0xff] }
 0xbc6   : > { %v10398_v55 = vld [vmem:[#allocation2 + $0x174] sm:$0xf] }
 0xbc7   : > { %7672 = vst.msk [vmem:[#allocation2 + $0x1dc] sm:$0xf] %vm668_vm1, %v7640_v10  ;;  %v6933_v9 = vpack.c.bf16 %v6901_v30, %v6901_v30  ;;  %10635 = vset.pattern.permute.xlu1 %v17602_v53  ;;  %v7147_v20 = vpop.permute.xlu2 %7146  ;;  %v9943_v30 = vor.u32 %v10398_v55, %v9940_v32  ;;  %v17674_v55 = vld [vmem:[#allocation66_spill] sm:$0xff] }
 0xbc8   : > { %v7196_v61 = vmul.f32 %v7147_v20, %v17668_v46  ;;  %7572 = vperm.xlu1 %10635, %v15973_v16   ;;  %v17672_v46 = vld [vmem:[#allocation64_spill] sm:$0xff] }
 0xbc9   : > { %6965 = vst.msk [vmem:[#allocation2 + $0x19c] sm:$0xf] %vm668_vm1, %v6933_v9 }
 0xbca   : > { %7381 = vst.msk [vmem:[#allocation2 + $0x19c] sm:$0xf] %vm1085_vm2, %v16014_v5  ;;  %v7228_v48 = vpack.c.bf16 %v7196_v61, %v7196_v61 }
 0xbcb   : > { %v7152_v60 = vpop.permute.xlu1 %7151 }
 0xbcc   : > { %7317 = vrot.lane.b32.xlu2 %v7227_v19, %s10749_s9  ;;  %7319 = vrot.lane.b32.xlu0 %v7228_v48, %s10749_s9  ;;  %v6834_v26 = vpop.permute.xlu0 %6833  ;;  %v7197_v61 = vmul.f32 %v7152_v60, %v17672_v46  ;;  %v17673_v19 = vld [vmem:[#allocation23_spill] sm:$0xff]  ;;  %v9966_v60 = vld [vmem:[#allocation2 + $0x1a0] sm:$0xf] }
 0xbcd   : > { %v6903_v40 = vmul.f32 %v6834_v26, %v17669_v2  ;;  %10633 = vset.pattern.permute.xlu2 %v17591_v3 }
 0xbce   : > { %v10411_v46 = vld [vmem:[#allocation2 + $0x1d8] sm:$0xf0] }
 0xbcf   : > { %v6935_v11 = vpack.c.bf16 %v6903_v40, %v6903_v40  ;;  %v7229_v40 = vpack.c.bf16 %v7197_v61, %v7197_v61 }
 0xbd0   : > { %v7538_v42 = vpop.permute.xlu2 %7537 }
 0xbd1   : > { %6967 = vst.msk [vmem:[#allocation2 + $0x1c4] sm:$0xf] %vm668_vm1, %v6935_v11  ;;  %v7607_v10 = vmul.f32 %v7538_v42, %v17670_v13  ;;  %v9960_v42 = vld [vmem:[#allocation2 + $0x1ac] sm:$0xf0] }
 0xbd3   : > { %v7639_v5 = vpack.c.bf16 %v7607_v10, %v7607_v10 }
 0xbd4   : > { %v6849_v29 = vpop.permute.xlu1 %6848  ;;  %6868 = vperm.xlu2 %10633, %v15973_v16   ;;  %7567 = vperm.xlu0 %10634, %v15935_v22   ;;  %v10403_v22 = vld [vmem:[#allocation2 + $0x19c] sm:$0xf] }
 0xbd5   : > { %7671 = vst.msk [vmem:[#allocation2 + $0x1c8] sm:$0xf] %vm668_vm1, %v7639_v5  ;;  %v6906_v9 = vmul.f32 %v6849_v29, %v17671_v18  ;;  %8837 = vmatmul.bf16.gmra.mxu0 %v9943_v30  ;;  %v7533_v20 = vpop.permute.xlu0 %7532  ;;  %v9963_v10 = vor.u32 %v10403_v22, %v9960_v42  ;;  %v17675_v29 = vld [vmem:[#allocation38_spill] sm:$0xff] }
 0xbd6   : > { %v7606_v48 = vmul.f32 %v7533_v20, %v17673_v19  ;;  %v16102_v19 = vpop.f32.mrf.mxu1 }
 0xbd7   : > { %v6938_v26 = vpack.c.bf16 %v6906_v9, %v6906_v9 }
 0xbd8   : > { %v7638_v2 = vpack.c.bf16 %v7606_v48, %v7606_v48 }
 0xbd9   : > { %6970 = vst.msk [vmem:[#allocation2 + $0x200] sm:$0xf] %vm668_vm1, %v6938_v26 }
 0xbda   : > { %7670 = vst.msk [vmem:[#allocation2 + $0x1b4] sm:$0xf] %vm668_vm1, %v7638_v2 }
 0xbdb   : > { %v7310_v16 = vpop.permute.xlu2 %7309 }
 0xbdc   : > { %7383 = vst.msk [vmem:[#allocation2 + $0x1c4] sm:$0xf] %vm1085_vm2, %v7310_v16  ;;  %7321 = vrot.lane.b32.xlu2 %v7229_v40, %s10749_s9  ;;  %10636 = vset.pattern.permute.xlu0 %v17591_v3  ;;  %v9986_v20 = vld [vmem:[#allocation2 + $0x1c8] sm:$0xf] }
 0xbdd   : > { %6878 = vperm.xlu0 %10636, %v16044_v51   ;;  %v9987_v61 = vor.u32 %v10411_v46, %v9986_v20  ;;  %v17680_v46 = vld [vmem:[#allocation89_spill] sm:$0xff] }
 0xbde   : > { %v8914_v16 = vpop.f32.mrf.mxu1 }
 0xbe1   : > { %v10406_v11 = vld [vmem:[#allocation2 + $0x1b0] sm:$0xf0] }
 0xbe2   : > { %v9967_v32 = vor.u32 %v10406_v11, %v9966_v60 }
 0xbe3   : > { %v7157_v13 = vpop.permute.xlu2 %7156  ;;  %v10408_v11 = vld [vmem:[#allocation2 + $0x1c4] sm:$0xf] }
 0xbe4   : > { %v7198_v5 = vmul.f32 %v7157_v13, %v17674_v55  ;;  %6873 = vperm.xlu2 %10633, %v16004_v44   ;;  %10222 = vmatmul.msk.bf16.gmra.mxu1 %vm4147_vm4, %v9967_v32  ;;  %v17677_v32 = vld [vmem:[#allocation19_spill] sm:$0xff]  ;;  %v17678_v55 = vld [vmem:[#allocation36_spill] sm:$0xff] }
 0xbe5   : > { %8842 = vmatmul.bf16.gmra.mxu0 %v9963_v10  ;;  %10638 = vset.pattern.permute.xlu0 %v17602_v53 }
 0xbe6   : > { %v7230_v30 = vpack.c.bf16 %v7198_v5, %v7198_v5 }
 0xbe8   : > { %7323 = vrot.lane.b32.xlu1 %v7230_v30, %s10749_s9 }
 0xbec   : > { %10637 = vset.pattern.permute.xlu2 %v17602_v53  ;;  %v7548_v3 = vpop.permute.xlu2 %7547 }
 0xbed   : > { %v7609_v18 = vmul.f32 %v7548_v3, %v17675_v29  ;;  %7582 = vperm.xlu2 %10637, %v16044_v51   ;;  %v17679_v29 = vld [vmem:[#allocation51_spill] sm:$0xff] }
 0xbef   : > { %v7641_v9 = vpack.c.bf16 %v7609_v18, %v7609_v18 }
 0xbf0   : > { %7577 = vperm.xlu1 %10635, %v16004_v44  }
 0xbf1   : > { %7673 = vst.msk [vmem:[#allocation2 + $0x1f0] sm:$0xf] %vm668_vm1, %v7641_v9 }
 0xbf4   : > { %10223 = vmatmul.msk.bf16.gmra.mxu1 %vm4147_vm4, %v9987_v61 }
 0xc09   : > { %v8823_v48 = vpop.f32.mrf.mxu0 }
 0xc0a   : > { %v16105_v53 = vadd.f32 %v8823_v48, %v15686_v21 }
 0xc0c   : > { %v7312_v26 = vpop.permute.xlu0 %7311 }
 0xc0d   : > { %7384 = vst.msk [vmem:[#allocation2 + $0x1d8] sm:$0xf] %vm1085_vm2, %v7312_v26  ;;  %v7316_v51 = vpop.permute.xlu2 %7315  ;;  %v17681_v26 = vld [vmem:[#allocation82_spill] sm:$0xff] }
 0xc0e   : > { %7386 = vst.msk [vmem:[#allocation2 + $0x200] sm:$0xf] %vm1085_vm2, %v7316_v51  ;;  %v7314_v2 = vpop.permute.xlu1 %7313 }
 0xc11   : > { %v8825_v44 = vpop.f32.mrf.mxu0 }
 0xc12   : > { %v8826_v40 = vadd.f32 %v8825_v44, %v15707_v39 }
 0xc14   : > { %v16110_v22 = vadd.f32 %v8914_v16, %v8826_v40  ;;  %v7553_v60 = vpop.permute.xlu0 %7552  ;;  %v9980_v42 = vld [vmem:[#allocation2 + $0x1d4] sm:$0xf0]  ;;  %v17682_v16 = vld [vmem:[#allocation63_spill] sm:$0xff] }
 0xc15   : > { %v7610_v13 = vmul.f32 %v7553_v60, %v17677_v32  ;;  %v7167_v21 = vpop.permute.xlu2 %7166  ;;  %v9983_v10 = vor.u32 %v10408_v11, %v9980_v42  ;;  %v10006_v11 = vld [vmem:[#allocation2 + $0x1f0] sm:$0xf] }
 0xc16   : > { %17676 = vst [vmem:[#allocation46_spill] sm:$0xff] %v16110_v22  ;;  %v7200_v5 = vmul.f32 %v7167_v21, %v17678_v55  ;;  %v7162_v30 = vpop.permute.xlu1 %7161  ;;  %v17683_v55 = vld [vmem:[#allocation67_spill] sm:$0xff] }
 0xc17   : > { %v7642_v3 = vpack.c.bf16 %v7610_v13, %v7610_v13  ;;  %v7199_v18 = vmul.f32 %v7162_v30, %v17679_v29  ;;  %8847 = vmatmul.bf16.gmra.mxu0 %v9983_v10 }
 0xc18   : > { %v7232_v9 = vpack.c.bf16 %v7200_v5, %v7200_v5 }
 0xc19   : > { %7674 = vst.msk [vmem:[#allocation2 + $0x204] sm:$0xf] %vm668_vm1, %v7642_v3  ;;  %v7231_v39 = vpack.c.bf16 %v7199_v18, %v7199_v18  ;;  %v17684_v18 = vld [vmem:[#allocation34_spill] sm:$0xff] }
 0xc1a   : > { %7327 = vrot.lane.b32.xlu2 %v7232_v9, %s10749_s9 }
 0xc1b   : > { %7325 = vrot.lane.b32.xlu1 %v7231_v39, %s10749_s9  ;;  %s16450_s9 = scalar_lea.vmem [#allocation3], %s9265_s23 }
 0xc1d   : > { %v6844_v20 = vpop.permute.xlu0 %6843 }
 0xc1e   : > { %v6905_v61 = vmul.f32 %v6844_v20, %v17680_v46  ;;  %v7558_v48 = vpop.permute.xlu2 %7557  ;;  %v10000_v20 = vld [vmem:[#allocation2 + $0x1fc] sm:$0xf0]  ;;  %v16129_v46 = vpop.f32.mrf.mxu1 }
 0xc1f   : > { %v7611_v51 = vmul.f32 %v7558_v48, %v17681_v26  ;;  %v6859_v44 = vpop.permute.xlu1 %6858  ;;  %v17685_v26 = vld [vmem:[#allocation6_spill] sm:$0xff] }
 0xc20   : > { %v6937_v40 = vpack.c.bf16 %v6905_v61, %v6905_v61  ;;  %v6908_v60 = vmul.f32 %v6859_v44, %v17682_v16  ;;  %v10416_v42 = vld [vmem:[#allocation2 + $0x200] sm:$0xf0] }
 0xc21   : > { %v7643_v32 = vpack.c.bf16 %v7611_v51, %v7611_v51  ;;  %v10007_v13 = vor.u32 %v10416_v42, %v10006_v11 }
 0xc22   : > { %6969 = vst.msk [vmem:[#allocation2 + $0x1ec] sm:$0xf] %vm668_vm1, %v6937_v40  ;;  %v6940_v21 = vpack.c.bf16 %v6908_v60, %v6908_v60  ;;  %v17686_v60 = vld [vmem:[#allocation65_spill] sm:$0xff] }
 0xc23   : > { %7385 = vst.msk [vmem:[#allocation2 + $0x1ec] sm:$0xf] %vm1085_vm2, %v7314_v2  ;;  %10224 = vmatmul.msk.bf16.gmra.mxu1 %vm4147_vm4, %v10007_v13 }
 0xc24   : > { %7675 = vst.msk [vmem:[#allocation2 + $0x218] sm:$0xf] %vm668_vm1, %v7643_v32 }
 0xc25   : > { %6972 = vst.msk [vmem:[#allocation2 + $0x228] sm:$0xf] %vm668_vm1, %v6940_v21  ;;  %v6854_v10 = vpop.permute.xlu0 %6853 }
 0xc26   : > { %v6907_v5 = vmul.f32 %v6854_v10, %v17683_v55  ;;  %v7318_v30 = vpop.permute.xlu2 %7317  ;;  %v8919_v10 = vpop.f32.mrf.mxu1 }
 0xc28   : > { %v6939_v3 = vpack.c.bf16 %v6907_v5, %v6907_v5  ;;  %v7563_v29 = vpop.permute.xlu1 %7562 }
 0xc29   : > { %v7612_v9 = vmul.f32 %v7563_v29, %v17684_v18 }
 0xc2a   : > { %6971 = vst.msk [vmem:[#allocation2 + $0x214] sm:$0xf] %vm668_vm1, %v6939_v3  ;;  %v10413_v39 = vld [vmem:[#allocation2 + $0x1ec] sm:$0xf] }
 0xc2b   : > { %7387 = vst.msk [vmem:[#allocation2 + $0x214] sm:$0xf] %vm1085_vm2, %v7318_v30  ;;  %v7644_v2 = vpack.c.bf16 %v7612_v9, %v7612_v9  ;;  %v10003_v61 = vor.u32 %v10413_v39, %v10000_v20  ;;  %v10026_v13 = vld [vmem:[#allocation2 + $0x218] sm:$0xf] }
 0xc2d   : > { %7676 = vst.msk [vmem:[#allocation2 + $0x22c] sm:$0xf] %vm668_vm1, %v7644_v2  ;;  %8852 = vmatmul.bf16.gmra.mxu0 %v10003_v61 }
 0xc2e   : > { %v6869_v48 = vpop.permute.xlu2 %6868  ;;  %v8922_v39 = vpop.f32.mrf.mxu1 }
 0xc2f   : > { %v6910_v51 = vmul.f32 %v6869_v48, %v17685_v26  ;;  %v17688_v48 = vld [vmem:[#allocation68_spill] sm:$0xff] }
 0xc31   : > { %v6942_v44 = vpack.c.bf16 %v6910_v51, %v6910_v51  ;;  %v6864_v40 = vpop.permute.xlu1 %6863  ;;  %v8828_v16 = vpop.f32.mrf.mxu0 }
 0xc32   : > { %v6909_v11 = vmul.f32 %v6864_v40, %v17686_v60  ;;  %v16136_v42 = vadd.f32 %v8828_v16, %v15717_v0  ;;  %v17687_v0 = vld [vmem:[#allocation105_spill] sm:$0xff] }
 0xc33   : > { %6974 = vst.msk [vmem:[#allocation2 + $0x250] sm:$0xf] %vm668_vm1, %v6942_v44  ;;  %v17689_v60 = vld [vmem:[#allocation9_spill] sm:$0xff] }
 0xc34   : > { %v6941_v32 = vpack.c.bf16 %v6909_v11, %v6909_v11  ;;  %v10421_v21 = vld [vmem:[#allocation2 + $0x228] sm:$0xf0] }
 0xc35   : > { %v10027_v55 = vor.u32 %v10421_v21, %v10026_v13  ;;  %v10418_v13 = vld [vmem:[#allocation2 + $0x214] sm:$0xf] }
 0xc36   : > { %6973 = vst.msk [vmem:[#allocation2 + $0x23c] sm:$0xf] %vm668_vm1, %v6941_v32  ;;  %v7322_v5 = vpop.permute.xlu2 %7321 }
 0xc37   : > { %7389 = vst.msk [vmem:[#allocation2 + $0x23c] sm:$0xf] %vm1085_vm2, %v7322_v5  ;;  %10225 = vmatmul.msk.bf16.gmra.mxu1 %vm4147_vm4, %v10027_v55  ;;  %v17690_v55 = vld [vmem:[#allocation25_spill] sm:$0xff] }
 0xc39   : > { %v8830_v30 = vpop.f32.mrf.mxu0 }
 0xc3a   : > { %v8831_v3 = vadd.f32 %v8830_v30, %v15737_v63  ;;  %v7573_v29 = vpop.permute.xlu1 %7572 }
 0xc3b   : > { %v7614_v18 = vmul.f32 %v7573_v29, %v17687_v0 }
 0xc3c   : > { %v16144_v9 = vadd.f32 %v8919_v10, %v8831_v3  ;;  %v8924_v10 = vpop.f32.mrf.mxu1 }
 0xc3d   : > { %v7646_v20 = vpack.c.bf16 %v7614_v18, %v7614_v18 }
 0xc3e   : > { %v6874_v2 = vpop.permute.xlu2 %6873  ;;  %v7320_v61 = vpop.permute.xlu0 %7319 }
 0xc3f   : > { %7678 = vst.msk [vmem:[#allocation2 + $0x254] sm:$0xf] %vm668_vm1, %v7646_v20  ;;  %v6911_v26 = vmul.f32 %v6874_v2, %v17688_v48  ;;  %v17691_v20 = vld [vmem:[#allocation53_spill] sm:$0xff] }
 0xc40   : > { %7388 = vst.msk [vmem:[#allocation2 + $0x228] sm:$0xf] %vm1085_vm2, %v7320_v61 }
 0xc41   : > { %v6943_v51 = vpack.c.bf16 %v6911_v26, %v6911_v26  ;;  %v8833_v44 = vpop.f32.mrf.mxu0 }
 0xc42   : > { %v8834_v40 = vadd.f32 %v8833_v44, %v15755_v49 }
 0xc43   : > { %6975 = vst.msk [vmem:[#allocation2 + $0x264] sm:$0xf] %vm668_vm1, %v6943_v51 }
 0xc44   : > { %v16151_v63 = vadd.f32 %v8922_v39, %v8834_v40  ;;  %v8927_v61 = vpop.f32.mrf.mxu1 }
 0xc46   : > { %v7568_v16 = vpop.permute.xlu0 %7567  ;;  %v10426_v44 = vld [vmem:[#allocation2 + $0x250] sm:$0xf0] }
 0xc47   : > { %v7613_v11 = vmul.f32 %v7568_v16, %v17689_v60  ;;  %v7583_v32 = vpop.permute.xlu2 %7582  ;;  %v10020_v21 = vld [vmem:[#allocation2 + $0x224] sm:$0xf0] }
 0xc48   : > { %v7616_v5 = vmul.f32 %v7583_v32, %v17690_v55  ;;  %v10023_v30 = vor.u32 %v10418_v13, %v10020_v21 }
 0xc49   : > { %v7645_v3 = vpack.c.bf16 %v7613_v11, %v7613_v11  ;;  %v8835_v29 = vpop.f32.mrf.mxu0 }
 0xc4a   : > { %v7648_v0 = vpack.c.bf16 %v7616_v5, %v7616_v5  ;;  %v8836_v18 = vadd.f32 %v8835_v29, %v15764_v57  ;;  %8857 = vmatmul.bf16.gmra.mxu0 %v10023_v30  ;;  %v10423_v5 = vld [vmem:[#allocation2 + $0x23c] sm:$0xf] }
 0xc4b   : > { %7677 = vst.msk [vmem:[#allocation2 + $0x240] sm:$0xf] %vm668_vm1, %v7645_v3  ;;  %v17692_v3 = vld [vmem:[#allocation78_spill] sm:$0xff] }
 0xc4c   : > { %7680 = vst.msk [vmem:[#allocation2 + $0x27c] sm:$0xf] %vm668_vm1, %v7648_v0  ;;  %v16158_v49 = vadd.f32 %v8924_v10, %v8836_v18  ;;  %v8929_v13 = vpop.f32.mrf.mxu1 }
 0xc4f   : > { %v6879_v39 = vpop.permute.xlu0 %6878 }
 0xc50   : > { %v6912_v2 = vmul.f32 %v6879_v39, %v17691_v20 }
 0xc52   : > { %v6944_v48 = vpack.c.bf16 %v6912_v2, %v6912_v2  ;;  %v8838_v26 = vpop.f32.mrf.mxu0  ;;  %v10046_v51 = vld [vmem:[#allocation2 + $0x240] sm:$0xf] }
 0xc53   : > { %v8839_v40 = vadd.f32 %v8838_v26, %v15772_v34  ;;  %v10047_v16 = vor.u32 %v10426_v44, %v10046_v51  ;;  %v10431_v2 = vld [vmem:[#allocation2 + $0x278] sm:$0xf0] }
 0xc54   : > { %6976 = vst.msk [vmem:[#allocation2 + $0x278] sm:$0xf] %vm668_vm1, %v6944_v48 }
 0xc55   : > { %v16163_v57 = vadd.f32 %v8927_v61, %v8839_v40  ;;  %10226 = vmatmul.msk.bf16.gmra.mxu1 %vm4147_vm4, %v10047_v16  ;;  %v16178_v40 = vpop.f32.mrf.mxu2  ;;  %v16180_v16 = vpop.f32.mrf.mxu3 }
 0xc5a   : > { %v8840_v60 = vpop.f32.mrf.mxu0  ;;  %v7324_v11 = vpop.permute.xlu1 %7323 }
 0xc5b   : > { %v8841_v32 = vadd.f32 %v8840_v60, %v15782_v27  ;;  %7390 = vst.msk [vmem:[#allocation2 + $0x250] sm:$0xf] %vm1085_vm2, %v7324_v11 }
 0xc5d   : > { %v16168_v21 = vadd.f32 %v8929_v13, %v8841_v32  ;;  %v16182_v60 = vpop.f32.mrf.mxu2  ;;  %v16184_v11 = vpop.f32.mrf.mxu3 }
 0xc61   : > { %v8932_v18 = vpop.f32.mrf.mxu1 }
 0xc62   : > { %v8843_v10 = vpop.f32.mrf.mxu0  ;;  %v7578_v55 = vpop.permute.xlu1 %7577  ;;  %v10040_v34 = vld [vmem:[#allocation2 + $0x24c] sm:$0xf0] }
 0xc63   : > { %v8844_v30 = vadd.f32 %v8843_v10, %v15789_v17  ;;  %v7615_v29 = vmul.f32 %v7578_v55, %v17692_v3  ;;  %v10043_v0 = vor.u32 %v10423_v5, %v10040_v34 }
 0xc65   : > { %v16172_v39 = vadd.f32 %v8932_v18, %v8844_v30  ;;  %v7647_v20 = vpack.c.bf16 %v7615_v29, %v7615_v29  ;;  %8862 = vmatmul.bf16.gmra.mxu0 %v10043_v0  ;;  %v16190_v10 = vpop.f32.mrf.mxu2  ;;  %v16192_v55 = vpop.f32.mrf.mxu3 }
 0xc67   : > { %7679 = vst.msk [vmem:[#allocation2 + $0x268] sm:$0xf] %vm668_vm1, %v7647_v20 }
 0xc69   : > { %v16186_v32 = vpop.f32.mrf.mxu1 }
 0xc6a   : > { %v16188_v13 = vpop.f32.mrf.mxu0 }
 0xc6d   : > { %v16198_v30 = vpop.f32.mrf.mxu2  ;;  %v16200_v3 = vpop.f32.mrf.mxu3 }
 0xc6e   : > { %v10066_v27 = vld [vmem:[#allocation2 + $0x268] sm:$0xf] }
 0xc6f   : > { %v10067_v61 = vor.u32 %v10431_v2, %v10066_v27  ;;  %v8796_v27 = vadd.f32 %v15869_v33, %v15571_v24 }
 0xc71   : > { %10227 = vmatmul.msk.bf16.gmra.mxu1 %vm4147_vm4, %v10067_v61  ;;  %v16194_v5 = vpop.f32.mrf.mxu1 }
 0xc74   : > { %v7328_v48 = vpop.permute.xlu2 %7327 }
 0xc75   : > { %7392 = vst.msk [vmem:[#allocation2 + $0x278] sm:$0xf] %vm1085_vm2, %v7328_v48  ;;  %v16206_v18 = vpop.f32.mrf.mxu2  ;;  %v16208_v20 = vpop.f32.mrf.mxu3  ;;  %v16217_v48 = vadd.f32 %v15875_v35, %v8796_v27 }
 0xc77   : > { %17694 = vst [vmem:[#allocation106_spill] sm:$0xff] %v16217_v48 }
 0xc79   : > { %v16202_v29 = vpop.f32.mrf.mxu1 }
 0xc7c   : > { %v10060_v51 = vld [vmem:[#allocation2 + $0x274] sm:$0xf0] }
 0xc7d   : > { %v16232_v33 = vpop.f32.mrf.mxu3 }
 0xc8d   : > { %v7326_v26 = vpop.permute.xlu1 %7325 }
 0xc8e   : > { %7391 = vst.msk [vmem:[#allocation2 + $0x264] sm:$0xf] %vm1085_vm2, %v7326_v26  ;;  %v16221_v26 = vadd.f32 %v15863_v28, %v15859_v47  ;;  %v8965_v47 = vsel %vm4147_vm4, %v15892_v43, 0.0  ;;  %v8806_v28 = vadd.f32 %v15975_v8, %v15610_v38  ;;  %v8969_v43 = vsel %vm4147_vm4, %v15917_v25, 0.0 }
 0xc90   : > { %17695 = vst [vmem:[#allocation29_spill] sm:$0xff] %v16221_v26  ;;  %v8962_v35 = vsel %vm4147_vm4, %v16221_v26, 0.0  ;;  %v16243_v27 = vadd.f32 %v15967_v50, %v8806_v28 }
 0xc92   : > { %v8971_v38 = vsel %vm4147_vm4, %v16243_v27, 0.0 }
 0xc94   : > { %v16196_v34 = vpop.f32.mrf.mxu0 }
 0xc95   : > { %v10428_v17 = vld [vmem:[#allocation2 + $0x264] sm:$0xf] }
 0xc96   : > { %v10063_v44 = vor.u32 %v10428_v17, %v10060_v51  ;;  %v8801_v17 = vadd.f32 %v15901_v52, %v15590_v37  ;;  %v16225_v51 = vpop.f32.mrf.mxu2 }
 0xc98   : > { %8867 = vmatmul.bf16.gmra.mxu0 %v10063_v44  ;;  %v8963_v44 = vsel %vm4147_vm4, %v16217_v48, 0.0  ;;  %v16230_v24 = vadd.f32 %v15904_v36, %v8801_v17  ;;  %v8811_v36 = vadd.f32 %v15992_v15, %v15636_v58  ;;  %v8973_v58 = vsel %vm4147_vm4, %v15985_v23, 0.0 }
 0xc99   : > { %v8964_v37 = vadd.f32 %v8963_v44, %v8962_v35  ;;  %v16262_v35 = vpop.f32.mrf.mxu3 }
 0xc9a   : > { %v8967_v52 = vsel %vm4147_vm4, %v16230_v24, 0.0  ;;  %v16256_v8 = vadd.f32 %v15989_v62, %v8811_v36  ;;  %v8977_v62 = vsel %vm4147_vm4, %v16009_v7, 0.0 }
 0xc9b   : > { %v8966_v17 = vadd.f32 %v8965_v47, %v8964_v37 }
 0xc9c   : > { %v16204_v0 = vpop.f32.mrf.mxu0  ;;  %17696 = vst [vmem:[#allocation77_spill] sm:$0xff] %v16256_v8  ;;  %v8975_v47 = vsel %vm4147_vm4, %v16256_v8, 0.0 }
 0xc9e   : > { %v16258_v44 = vpop.f32.mrf.mxu2 }
 0xca0   : > { %v16212_v2 = vpop.f32.mrf.mxu1 }
 0xca1   : > { %17693 = vst [vmem:[#allocation72_spill] sm:$0xff] %v16212_v2  ;;  %v8968_v2 = vadd.f32 %v8967_v52, %v8966_v17  ;;  %v8981_v17 = vsel %vm4147_vm4, %v16037_v54, 0.0  ;;  %v16282_v23 = vpop.f32.mrf.mxu3 }
 0xca3   : > { %v8970_v50 = vadd.f32 %v8969_v43, %v8968_v2  ;;  %v8979_v2 = vsel %vm4147_vm4, %v16023_v41, 0.0 }
 0xca5   : > { %v8972_v15 = vadd.f32 %v8971_v38, %v8970_v50  ;;  %v16278_v38 = vadd.f32 %v16102_v19, %v16105_v53  ;;  %v8987_v53 = vsel %vm4147_vm4, %v16110_v22, 0.0 }
 0xca7   : > { %v8974_v28 = vadd.f32 %v8973_v58, %v8972_v15  ;;  %17697 = vst [vmem:[#allocation107_spill] sm:$0xff] %v16278_v38  ;;  %v8685_v58 = vpop.f32.mrf.mxu2  ;;  %v8983_v15 = vsel %vm4147_vm4, %v16056_v59, 0.0 }
 0xca8   : > { %v16247_v48 = vpop.f32.mrf.mxu1 }
 0xca9   : > { %v8976_v43 = vadd.f32 %v8975_v47, %v8974_v28  ;;  %v8985_v47 = vsel %vm4147_vm4, %v16278_v38, 0.0  ;;  %v16288_v28 = vadd.f32 %v16129_v46, %v16136_v42 }
 0xcaa   : > { %v16214_v61 = vpop.f32.mrf.mxu0 }
 0xcab   : > { %v8978_v36 = vadd.f32 %v8977_v62, %v8976_v43  ;;  %v8989_v46 = vsel %vm4147_vm4, %v16288_v28, 0.0 }
 0xcad   : > { %v8980_v50 = vadd.f32 %v8979_v2, %v8978_v36  ;;  %v16299_v36 = vld [vmem:[%s16628_s5] ss:$0 sm:$0xff] }
 0xcaf   : > { %v8982_v8 = vadd.f32 %v8981_v17, %v8980_v50  ;;  %v8579_v17 = vadd.f32 %v16299_v36, %v15733_v45  ;;  %v8687_v38 = vpop.f32.mrf.mxu2 }
 0xcb1   : > { %v8984_v62 = vadd.f32 %v8983_v15, %v8982_v8  ;;  %v8582_v8 = vadd.f32 %v16299_v36, %v15751_v4  ;;  %v8668_v50 = vadd.f32 %v16178_v40, %v8579_v17  ;;  %v8991_v15 = vsel %vm4147_vm4, %v16144_v9, 0.0 }
 0xcb2   : > { %v16249_v26 = vpop.f32.mrf.mxu0  ;;  %v8587_v4 = vadd.f32 %v16299_v36, %v15778_v6 }
 0xcb3   : > { %v8986_v2 = vadd.f32 %v8985_v47, %v8984_v62  ;;  %v8584_v62 = vadd.f32 %v16299_v36, %v15767_v14  ;;  %v8671_v22 = vadd.f32 %v16182_v60, %v8582_v8  ;;  %v8757_v45 = vadd.f32 %v16180_v16, %v8668_v50  ;;  %v8776_v8 = vpop.f32.mrf.mxu3 }
 0xcb4   : > { %v16266_v37 = vpop.f32.mrf.mxu1  ;;  %v8995_v14 = vsel %vm4147_vm4, %v16158_v49, 0.0  ;;  %v8589_v16 = vadd.f32 %v16299_v36, %v15786_v31  ;;  %v8676_v6 = vadd.f32 %v16198_v30, %v8587_v4  ;;  %v8999_v31 = vsel %vm4147_vm4, %v16168_v21, 0.0 }
 0xcb5   : > { %v8988_v42 = vadd.f32 %v8987_v53, %v8986_v2  ;;  %v8993_v53 = vsel %vm4147_vm4, %v16151_v63, 0.0  ;;  %v8846_v60 = vadd.f32 %v16188_v13, %v8757_v45  ;;  %v8594_v45 = vadd.f32 %v16299_v36, %v15802_v12 }
 0xcb7   : > { %v8990_v47 = vadd.f32 %v8989_v46, %v8988_v42  ;;  %v8673_v46 = vadd.f32 %v16190_v10, %v8584_v62  ;;  %v8760_v42 = vadd.f32 %v16184_v11, %v8671_v22  ;;  %v8592_v22 = vadd.f32 %v16299_v36, %v15796_v1  ;;  %v8690_v12 = vpop.f32.mrf.mxu2 }
 0xcb8   : > { %v8678_v11 = vadd.f32 %v16206_v18, %v8589_v16  ;;  %v8765_v62 = vadd.f32 %v16200_v3, %v8676_v6  ;;  %v16339_v30 = vadd.f32 %v16186_v32, %v8846_v60  ;;  %v9001_v18 = vsel %vm4147_vm4, %v16172_v39, 0.0 }
 0xcb9   : > { %v8992_v2 = vadd.f32 %v8991_v15, %v8990_v47  ;;  %v8762_v15 = vadd.f32 %v16192_v55, %v8673_v46  ;;  %v8997_v47 = vsel %vm4147_vm4, %v16163_v57, 0.0  ;;  %v8849_v10 = vadd.f32 %v16196_v34, %v8760_v42  ;;  %v17698_v42 = vld [vmem:[#allocation108_spill] sm:$0xff] }
 0xcba   : > { %v8681_v34 = vadd.f32 %v16225_v51, %v8592_v22  ;;  %v8767_v1 = vadd.f32 %v16208_v20, %v8678_v11  ;;  %v8854_v4 = vadd.f32 %v16214_v61, %v8765_v62  ;;  %v8597_v32 = vadd.f32 %v16299_v36, %v15814_v56 }
 0xcbb   : > { %v8994_v50 = vadd.f32 %v8993_v53, %v8992_v2  ;;  %v8851_v55 = vadd.f32 %v16204_v0, %v8762_v15  ;;  %v16349_v3 = vadd.f32 %v16194_v5, %v8849_v10  ;;  %v8683_v0 = vadd.f32 %v16258_v44, %v8594_v45  ;;  %v17700_v15 = vld [vmem:[#allocation54_spill] sm:$0xff]  ;;  %v8779_v10 = vpop.f32.mrf.mxu3 }
 0xcbc   : > { %v16290_v43 = vpop.f32.mrf.mxu1  ;;  %v8770_v51 = vadd.f32 %v16232_v33, %v8681_v34  ;;  %v9003_v20 = vsel %vm4147_vm4, %v16339_v30, 0.0  ;;  %v8856_v5 = vadd.f32 %v16249_v26, %v8767_v1  ;;  %v8599_v61 = vadd.f32 %v16299_v36, %v17698_v42 }
 0xcbd   : > { %v8996_v13 = vadd.f32 %v8995_v14, %v8994_v50  ;;  %v16359_v46 = vadd.f32 %v16202_v29, %v8851_v55  ;;  %v8686_v14 = vadd.f32 %v8685_v58, %v8597_v32  ;;  %v8772_v44 = vadd.f32 %v16262_v35, %v8683_v0  ;;  %v17699_v50 = vld [vmem:[#allocation72_spill] sm:$0xff] }
 0xcbe   : > { %v9005_v33 = vsel %vm4147_vm4, %v16349_v3, 0.0  ;;  %v16368_v6 = vadd.f32 %v17699_v50, %v8854_v4  ;;  %v8602_v26 = vadd.f32 %v16299_v36, %v17700_v15  ;;  %v16377_v35 = vadd.f32 %v16247_v48, %v8856_v5 }
 0xcbf   : > { %v8998_v53 = vadd.f32 %v8997_v47, %v8996_v13  ;;  %v8688_v47 = vadd.f32 %v8687_v38, %v8599_v61  ;;  %v8775_v58 = vadd.f32 %v16282_v23, %v8686_v14  ;;  %v9007_v11 = vsel %vm4147_vm4, %v16359_v46, 0.0  ;;  %v8692_v0 = vpop.f32.mrf.mxu2 }
 0xcc0   : > { %v8691_v62 = vadd.f32 %v8690_v12, %v8602_v26  ;;  %v10756_v4 = vmov 256.0   ;;  %v17701_v12 = vld [vmem:[#allocation104_spill] sm:$0xff] }
 0xcc1   : > { %v9000_v2 = vadd.f32 %v8999_v31, %v8998_v53  ;;  %v8777_v31 = vadd.f32 %v8776_v8, %v8688_v47  ;;  %v9011_v53 = vsel %vm4147_vm4, %v16377_v35, 0.0  ;;  %10641 = vrcp.f32 %v10756_v4 }
 0xcc2   : > { %v8780_v23 = vadd.f32 %v8779_v10, %v8691_v62 }
 0xcc3   : > { %v9002_v60 = vadd.f32 %v9001_v18, %v9000_v2  ;;  %v8781_v5 = vpop.f32.mrf.mxu3 }
 0xcc5   : > { %v9004_v22 = vadd.f32 %v9003_v20, %v9002_v60 }
 0xcc7   : > { %v16268_v52 = vpop.f32.mrf.mxu0  ;;  %v9006_v55 = vadd.f32 %v9005_v33, %v9004_v22 }
 0xcc8   : > { %v8859_v29 = vadd.f32 %v16268_v52, %v8770_v51  ;;  %v9009_v52 = vsel %vm4147_vm4, %v16368_v6, 0.0  ;;  %v8604_v51 = vadd.f32 %v16299_v36, %v17701_v12 }
 0xcc9   : > { %v9008_v34 = vadd.f32 %v9007_v11, %v9006_v55 }
 0xcca   : > { %v16383_v38 = vadd.f32 %v16266_v37, %v8859_v29  ;;  %v8693_v61 = vadd.f32 %v8692_v0, %v8604_v51  ;;  %v10229_v0 = vld [vmem:[%s16629_s6 + $0x2] sm:$0x1] }
 0xccc   : > { %v9013_v32 = vsel %vm4147_vm4, %v16383_v38, 0.0 }
 0xccf   : > { %v16292_v19 = vpop.f32.mrf.mxu0 }
 0xcd0   : > { %v8861_v13 = vadd.f32 %v16292_v19, %v8772_v44  ;;  %v9010_v19 = vadd.f32 %v9009_v52, %v9008_v34  ;;  %v8782_v44 = vadd.f32 %v8781_v5, %v8693_v61 }
 0xcd2   : > { %v16318_v40 = vpop.f32.mrf.mxu1  ;;  %v16388_v48 = vadd.f32 %v16290_v43, %v8861_v13  ;;  %v9012_v2 = vadd.f32 %v9011_v53, %v9010_v19 }
 0xcd4   : > { %v9015_v43 = vsel %vm4147_vm4, %v16388_v48, 0.0  ;;  %v9014_v42 = vadd.f32 %v9013_v32, %v9012_v2  ;;  %v9047_v32 = vld [vmem:[%s16629_s6] sm:$0x1] }
 0xcda   : > { %v8954_v56 = vpop.f32.mrf.mxu1 }
 0xce2   : > { %v8863_v17 = vpop.f32.mrf.mxu0 }
 0xce3   : > { %v8864_v45 = vadd.f32 %v8863_v17, %v8775_v58 }
 0xce5   : > { %v16393_v37 = vadd.f32 %v16318_v40, %v8864_v45  ;;  %v10642_v40 = vpop.eup %10641 }
 0xce6   : > { %v9032_v15 = vmul.f32 256.0, %v10642_v40  ;;  %vm9036_vm5 = vweird.f32 %v10642_v40 }
 0xce7   : > { %v9017_v14 = vsel %vm4147_vm4, %v16393_v37, 0.0 }
 0xce8   : > { %v9033_v11 = vsub.f32 1.0, %v9032_v15 }
 0xcea   : > { %v8865_v16 = vpop.f32.mrf.mxu0 }
 0xceb   : > { %v8866_v1 = vadd.f32 %v8865_v16, %v8777_v31  ;;  %v9016_v16 = vadd.f32 %v9015_v43, %v9014_v42  ;;  %v9034_v31 = vmul.f32 %v10642_v40, %v9033_v11  ;;  %v17702_v11 = vld [vmem:[#allocation29_spill] sm:$0xff] }
 0xced   : > { %v16399_v20 = vadd.f32 %v8954_v56, %v8866_v1  ;;  %v9018_v36 = vadd.f32 %v9017_v14, %v9016_v16  ;;  %v9035_v45 = vadd.f32 %v10642_v40, %v9034_v31 }
 0xcee   : > { %v8957_v18 = vpop.f32.mrf.mxu1 }
 0xcef   : > { %v9019_v33 = vsel %vm4147_vm4, %v16399_v20, 0.0  ;;  %v9037_v53 = vsel %vm9036_vm5, %v10642_v40, %v9035_v45 }
 0xcf0   : > { %v9020_v26 = vadd.f32 %v9019_v33, %v9018_v36 }
 0xcf6   : > { %v8959_v47 = vpop.f32.mrf.mxu1 }
 0xd15   : > { %v8868_v8 = vpop.f32.mrf.mxu0 }
 0xd16   : > { %v8869_v17 = vadd.f32 %v8868_v8, %v8780_v23 }
 0xd18   : > { %v16403_v60 = vadd.f32 %v8957_v18, %v8869_v17  ;;  %v10228_v17 = vld [vmem:[%s16629_s6 + $0x1] sm:$0x1] }
 0xd1a   : > { %v9021_v56 = vsel %vm4147_vm4, %v16403_v60, 0.0 }
 0xd1b   : > { %v9022_v22 = vadd.f32 %v9021_v56, %v9020_v26 }
 0xd1d   : > { %v8870_v50 = vpop.f32.mrf.mxu0 }
 0xd1e   : > { %v8871_v29 = vadd.f32 %v8870_v50, %v8782_v44 }
 0xd20   : > { %v16409_v10 = vadd.f32 %v8959_v47, %v8871_v29 }
 0xd22   : > { %v9023_v58 = vsel %vm4147_vm4, %v16409_v10, 0.0 }
 0xd23   : > { %v9024_v13 = vadd.f32 %v9023_v58, %v9022_v22 }
 0xd25   : > { %v9025_v62 = vrot.slane %v9024_v13, 4 }
 0xd27   : > { %v9026_v55 = vadd.f32 %v9025_v62, %v9024_v13  ;;  %v17703_v62 = vld [vmem:[#allocation106_spill] sm:$0xff] }
 0xd29   : > { %v9027_v52 = vrot.slane %v9026_v55, 2 }
 0xd2b   : > { %v9028_v34 = vadd.f32 %v9027_v52, %v9026_v55  ;;  %v17704_v55 = vld [vmem:[#allocation87_spill] sm:$0xff] }
 0xd2d   : > { %v9029_v23 = vrot.slane %v9028_v34, 1 }
 0xd2f   : > { %v9030_v1 = vadd.f32 %v9029_v23, %v9028_v34 }
 0xd31   : > { %v9038_v19 = vmul.f32 %v9037_v53, %v9030_v1  ;;  %v17705_v53 = vld [vmem:[#allocation20_spill] sm:$0xff] }
 0xd33   : > { %9040 = vrot.lane.b32.xlu0 %v9038_v19, %s10757_s8  ;;  %v10651_v19 = vld [vmem:[%s11036_s22] sm:$0xff] }
 0xda5   : > { %v9041_v18 = vpop.permute.xlu0 %9040 }
 0xda6   : > { %v9044_v8 = vsel %vm9043_vm6, 0.0, %v9041_v18 }
 0xda7   : > { %v9046_v4 = vsel %vm9045_vm7, %v9044_v8, 0.0  ;;  %v10652_v8 = vld [vmem:[%s11036_s22 + $0x8] sm:$0xff] }
 0xda8   : > { %9060 = vrot.lane.b32.xlu2 %v9046_v4, %s10758_s13  ;;  %9053 = vrot.lane.b32.xlu1 %v9046_v4, %s10759_s14  ;;  %v9048_v51 = vmul.f32 %v9047_v32, %v9046_v4  ;;  %v10653_v32 = vld [vmem:[%s11036_s22 + $0x10] sm:$0xff]  ;;  %s9195_s13 = scalar_lea.hbm %s16630_s7, %s10468_s29  ;;  %s9196_s14 = sshll.u32 %s16450_s9, 4  ;;  %s9197_s14 = int_to_ptr.vmem [resolvable:$true] %s9196_s14 }
 0xda9   : > { %s9198_s15 = sshll.u32 %s9195_s13, 4  ;;  %s9199_s15 = int_to_ptr.hbm [resolvable:$true] %s9198_s15 }
 0xdaa   : > { %s10697_s17 = sshra.s32 %s9199_s15, 4  ;;  %s10698_s17 = int_to_ptr.hbm [resolvable:$true] %s10697_s17 }
 0xdab   : > { %s10699_s18 = scalar_lea.hbm %s10698_s17, 256  ;;  %p10704_p0 = scmp.lt.s32.totalorder %s10698_s17, %s16630_s7 }
 0xdac   : > { %p10700_p11 = scmp.ne.s32.totalorder %s10698_s17, %s10699_s18  ;;  %p10705_p1 = scmp.lt.s32.totalorder %s10703_s21, %s10699_s18 }
 0xdae   : > { %p10701_p12 = pnand %p10700_p11, %p10840_p5  ;;  %p10706_p2 = por %p10705_p1, %p10704_p0 }
 0xdb0   : > { %p10702_p13 = pneg %p10701_p12 }
 0xdb2   : > { %p10707_p3 = pnand %p10706_p2, %p10702_p13 }
 0xe02   : > { %v9061_v2 = vpop.permute.xlu2 %9060 }
 0xe03   : > { %v9063_v5 = vmul.f32 %v10229_v0, %v9061_v2  ;;  %v17706_v0 = vld [vmem:[#allocation77_spill] sm:$0xff] }
 0xe04   : > { %v10654_v2 = vld [vmem:[%s11036_s22 + $0x18] sm:$0xff] }
 0xe1a   : > { %v9054_v12 = vpop.permute.xlu1 %9053 }
 0xe1b   : > { %v9056_v43 = vmul.f32 %v10228_v17, %v9054_v12  ;;  %v10655_v12 = vld [vmem:[%s11036_s22 + $0x20] sm:$0xff] }
 0xe1d   : > { %v9057_v42 = vadd.f32 %v9056_v43, %v9048_v51 }
 0xe1f   : > { %v9064_v61 = vadd.f32 %v9063_v5, %v9057_v42  ;;  %v10656_v5 = vld [vmem:[%s11036_s22 + $0x28] sm:$0xff] }
 0xe21   : > { %v10230_v14 = vmul.f32 -1.442695, %v9064_v61  ;;  %v10657_v61 = vld [vmem:[%s11036_s22 + $0x30] sm:$0xff] }
 0xe23   : > { %10643 = vpow2.f32 %v10230_v14 }
 0xe29   : > { %v10644_v40 = vpop.eup %10643 }
 0xe2a   : > { %v9068_v16 = vadd.f32 1.0, %v10644_v40 }
 0xe2c   : > { %10645 = vrcp.f32 %v9068_v16  ;;  %v9080_v50 = vand.u32 2147483648, %v9068_v16  ;;  %v9078_v29 = vand.u32 2147483647, %v9068_v16  ;;  %vm9074_vm9 = vweird.f32 %v9068_v16 }
 0xe2e   : > { %v9081_v26 = vor.u32 1.1754944e-38, %v9080_v50  ;;  %vm9079_vm11 = vcmp.eq.f32.partialorder %v9078_v29, 8.507059e+37  ;;  %v17708_v50 = vld [vmem:[#allocation46_spill] sm:$0xff]  ;;  %v10660_v29 = vld [vmem:[%s11036_s22 + $0x48] sm:$0xff] }
 0xe32   : > { %v10646_v44 = vpop.eup %10645 }
 0xe33   : > { %v9070_v33 = vmul.f32 %v10646_v44, %v9068_v16  ;;  %vm9075_vm8 = vweird.f32 %v10646_v44  ;;  %v10658_v16 = vld [vmem:[%s11036_s22 + $0x38] sm:$0xff] }
 0xe34   : > { %vm9076_vm10 = vmor %vm9074_vm9, %vm9075_vm8 }
 0xe35   : > { %v9071_v36 = vsub.f32 1.0, %v9070_v33 }
 0xe37   : > { %v9072_v56 = vmul.f32 %v10646_v44, %v9071_v36  ;;  %v10659_v36 = vld [vmem:[%s11036_s22 + $0x40] sm:$0xff] }
 0xe39   : > { %v9073_v15 = vadd.f32 %v10646_v44, %v9072_v56 }
 0xe3b   : > { %v9077_v47 = vsel %vm9076_vm10, %v10646_v44, %v9073_v15  ;;  %v17707_v44 = vld [vmem:[#allocation107_spill] sm:$0xff] }
 0xe3c   : > { %v9082_v22 = vsel %vm9079_vm11, %v9081_v26, %v9077_v47  ;;  %v10661_v26 = vld [vmem:[%s11036_s22 + $0x50] sm:$0xff] }
 0xe3d   : > { %v16422_v58 = vperm.slane %v9082_v22, 0 }
 0xe3f   : > { %v9087_v13 = vmul.f32 %v16422_v58, %v17702_v11  ;;  %v9088_v31 = vmul.f32 %v16422_v58, %v17703_v62  ;;  %v9089_v52 = vmul.f32 %v16422_v58, %v17704_v55  ;;  %v9090_v45 = vmul.f32 %v16422_v58, %v16230_v24  ;;  %v10662_v11 = vld [vmem:[%s11036_s22 + $0x58] sm:$0xff] }
 0xe40   : > { %v9091_v34 = vmul.f32 %v16422_v58, %v15917_v25  ;;  %v9092_v23 = vmul.f32 %v16422_v58, %v16243_v27  ;;  %v9093_v1 = vmul.f32 %v16422_v58, %v17705_v53  ;;  %v9094_v24 = vmul.f32 %v16422_v58, %v17706_v0  ;;  %v10666_v53 = vld [vmem:[%s11036_s22 + $0x78] sm:$0xff] }
 0xe41   : > { %v9119_v18 = vadd.f32 %v10651_v19, %v9087_v13  ;;  %v9120_v4 = vadd.f32 %v10652_v8, %v9088_v31  ;;  %v9121_v17 = vadd.f32 %v10653_v32, %v9089_v52  ;;  %v9122_v25 = vadd.f32 %v10654_v2, %v9090_v45  ;;  %v10663_v31 = vld [vmem:[%s11036_s22 + $0x60] sm:$0xff]  ;;  %v10664_v52 = vld [vmem:[%s11036_s22 + $0x68] sm:$0xff]  ;;  %v10669_v32 = vld [vmem:[%s11036_s22 + $0x90] sm:$0xff] }
 0xe42   : > { %v9095_v27 = vmul.f32 %v16422_v58, %v16009_v7  ;;  %v9123_v51 = vadd.f32 %v10655_v12, %v9091_v34  ;;  %v9096_v43 = vmul.f32 %v16422_v58, %v16023_v41  ;;  %v9124_v42 = vadd.f32 %v10656_v5, %v9092_v23  ;;  %v10665_v34 = vld [vmem:[%s11036_s22 + $0x70] sm:$0xff]  ;;  %v10667_v19 = vld [vmem:[%s11036_s22 + $0x80] sm:$0xff]  ;;  %v10668_v8 = vld [vmem:[%s11036_s22 + $0x88] sm:$0xff] }
 0xe43   : > { %9151 = vst.msk [vmem:[%s16450_s9] sm:$0xff] %vm4147_vm4, %v9119_v18  ;;  %v9097_v7 = vmul.f32 %v16422_v58, %v16037_v54  ;;  %v9125_v14 = vadd.f32 %v10657_v61, %v9093_v1  ;;  %v9098_v40 = vmul.f32 %v16422_v58, %v16056_v59  ;;  %v9126_v41 = vadd.f32 %v10658_v16, %v9094_v24  ;;  %v10670_v0 = vld [vmem:[%s11036_s22 + $0x98] sm:$0xff]  ;;  %v10676_v61 = vld [vmem:[%s11036_s22 + $0xc8] sm:$0xff] }
 0xe44   : > { %9152 = vst.msk [vmem:[%s16450_s9 + $0x8] sm:$0xff] %vm4147_vm4, %v9120_v4  ;;  %v9099_v33 = vmul.f32 %v16422_v58, %v17707_v44  ;;  %v9127_v54 = vadd.f32 %v10659_v36, %v9095_v27  ;;  %v9100_v56 = vmul.f32 %v16422_v58, %v17708_v50  ;;  %v9128_v59 = vadd.f32 %v10660_v29, %v9096_v43  ;;  %v10680_v36 = vld [vmem:[%s11036_s22 + $0xe8] sm:$0xff]  ;;  %v10682_v50 = vld [vmem:[%s11036_s22 + $0xf8] sm:$0xff] }
 0xe45   : > { %9153 = vst.msk [vmem:[%s16450_s9 + $0x10] sm:$0xff] %vm4147_vm4, %v9121_v17  ;;  %v9101_v15 = vmul.f32 %v16422_v58, %v16288_v28  ;;  %v9129_v47 = vadd.f32 %v10661_v26, %v9097_v7  ;;  %v9102_v22 = vmul.f32 %v16422_v58, %v16144_v9  ;;  %v9130_v13 = vadd.f32 %v10662_v11, %v9098_v40  ;;  %v10677_v40 = vld [vmem:[%s11036_s22 + $0xd0] sm:$0xff] }
 0xe46   : > { %9154 = vst.msk [vmem:[%s16450_s9 + $0x18] sm:$0xff] %vm4147_vm4, %v9122_v25  ;;  %v9103_v62 = vmul.f32 %v16422_v58, %v16151_v63  ;;  %v9131_v28 = vadd.f32 %v10663_v31, %v9099_v33  ;;  %v9104_v55 = vmul.f32 %v16422_v58, %v16158_v49  ;;  %v9132_v9 = vadd.f32 %v10664_v52, %v9100_v56 }
 0xe47   : > { %9155 = vst.msk [vmem:[%s16450_s9 + $0x20] sm:$0xff] %vm4147_vm4, %v9123_v51  ;;  %v9105_v45 = vmul.f32 %v16422_v58, %v16163_v57  ;;  %v9133_v63 = vadd.f32 %v10665_v34, %v9101_v15  ;;  %v9106_v23 = vmul.f32 %v16422_v58, %v16168_v21  ;;  %v9134_v49 = vadd.f32 %v10666_v53, %v9102_v22 }
 0xe48   : > { %9156 = vst.msk [vmem:[%s16450_s9 + $0x28] sm:$0xff] %vm4147_vm4, %v9124_v42  ;;  %v9107_v1 = vmul.f32 %v16422_v58, %v16172_v39  ;;  %v9135_v57 = vadd.f32 %v10667_v19, %v9103_v62  ;;  %v9108_v18 = vmul.f32 %v16422_v58, %v16339_v30  ;;  %v9136_v21 = vadd.f32 %v10668_v8, %v9104_v55 }
 0xe49   : > { %9157 = vst.msk [vmem:[%s16450_s9 + $0x30] sm:$0xff] %vm4147_vm4, %v9125_v14  ;;  %v9109_v4 = vmul.f32 %v16422_v58, %v16349_v3  ;;  %v9137_v39 = vadd.f32 %v10669_v32, %v9105_v45  ;;  %v9110_v17 = vmul.f32 %v16422_v58, %v16359_v46  ;;  %v9138_v30 = vadd.f32 %v10670_v0, %v9106_v23  ;;  %v10671_v3 = vld [vmem:[%s11036_s22 + $0xa0] sm:$0xff]  ;;  %v10672_v46 = vld [vmem:[%s11036_s22 + $0xa8] sm:$0xff] }
 0xe4a   : > { %9158 = vst.msk [vmem:[%s16450_s9 + $0x38] sm:$0xff] %vm4147_vm4, %v9126_v41  ;;  %v9111_v24 = vmul.f32 %v16422_v58, %v16368_v6  ;;  %v9139_v2 = vadd.f32 %v10671_v3, %v9107_v1  ;;  %v9112_v25 = vmul.f32 %v16422_v58, %v16377_v35  ;;  %v9140_v27 = vadd.f32 %v10672_v46, %v9108_v18  ;;  %v10673_v6 = vld [vmem:[%s11036_s22 + $0xb0] sm:$0xff]  ;;  %v10674_v35 = vld [vmem:[%s11036_s22 + $0xb8] sm:$0xff] }
 0xe4b   : > { %9159 = vst.msk [vmem:[%s16450_s9 + $0x40] sm:$0xff] %vm4147_vm4, %v9127_v54  ;;  %v9113_v12 = vmul.f32 %v16422_v58, %v16383_v38  ;;  %v9141_v51 = vadd.f32 %v10673_v6, %v9109_v4  ;;  %v9114_v43 = vmul.f32 %v16422_v58, %v16388_v48  ;;  %v9142_v5 = vadd.f32 %v10674_v35, %v9110_v17  ;;  %v10675_v38 = vld [vmem:[%s11036_s22 + $0xc0] sm:$0xff]  ;;  %v10678_v41 = vld [vmem:[%s11036_s22 + $0xd8] sm:$0xff] }
 0xe4c   : > { %9160 = vst.msk [vmem:[%s16450_s9 + $0x48] sm:$0xff] %vm4147_vm4, %v9128_v59  ;;  %v9115_v42 = vmul.f32 %v16422_v58, %v16393_v37  ;;  %v9143_v7 = vadd.f32 %v10675_v38, %v9111_v24  ;;  %v9116_v48 = vmul.f32 %v16422_v58, %v16399_v20  ;;  %v9144_v14 = vadd.f32 %v10676_v61, %v9112_v25 }
 0xe4d   : > { %9161 = vst.msk [vmem:[%s16450_s9 + $0x50] sm:$0xff] %vm4147_vm4, %v9129_v47  ;;  %v9117_v37 = vmul.f32 %v16422_v58, %v16403_v60  ;;  %v9145_v16 = vadd.f32 %v10677_v40, %v9113_v12  ;;  %v9118_v20 = vmul.f32 %v16422_v58, %v16409_v10  ;;  %v9146_v44 = vadd.f32 %v10678_v41, %v9114_v43  ;;  %v10679_v60 = vld [vmem:[%s11036_s22 + $0xe0] sm:$0xff]  ;;  %v10681_v10 = vld [vmem:[%s11036_s22 + $0xf0] sm:$0xff] }
 0xe4e   : > { %9162 = vst.msk [vmem:[%s16450_s9 + $0x58] sm:$0xff] %vm4147_vm4, %v9130_v13  ;;  %v9147_v33 = vadd.f32 %v10679_v60, %v9115_v42  ;;  %v9148_v54 = vadd.f32 %v10680_v36, %v9116_v48 }
 0xe4f   : > { %9163 = vst.msk [vmem:[%s16450_s9 + $0x60] sm:$0xff] %vm4147_vm4, %v9131_v28  ;;  %v9149_v58 = vadd.f32 %v10681_v10, %v9117_v37  ;;  %v9150_v56 = vadd.f32 %v10682_v50, %v9118_v20 }
 0xe50   : > { %9164 = vst.msk [vmem:[%s16450_s9 + $0x68] sm:$0xff] %vm4147_vm4, %v9132_v9 }
 0xe51   : > { %9165 = vst.msk [vmem:[%s16450_s9 + $0x70] sm:$0xff] %vm4147_vm4, %v9133_v63 }
 0xe52   : > { %9166 = vst.msk [vmem:[%s16450_s9 + $0x78] sm:$0xff] %vm4147_vm4, %v9134_v49 }
 0xe53   : > { %9167 = vst.msk [vmem:[%s16450_s9 + $0x80] sm:$0xff] %vm4147_vm4, %v9135_v57 }
 0xe54   : > { %9168 = vst.msk [vmem:[%s16450_s9 + $0x88] sm:$0xff] %vm4147_vm4, %v9136_v21 }
 0xe55   : > { %9169 = vst.msk [vmem:[%s16450_s9 + $0x90] sm:$0xff] %vm4147_vm4, %v9137_v39 }
 0xe56   : > { %9170 = vst.msk [vmem:[%s16450_s9 + $0x98] sm:$0xff] %vm4147_vm4, %v9138_v30 }
 0xe57   : > { %9171 = vst.msk [vmem:[%s16450_s9 + $0xa0] sm:$0xff] %vm4147_vm4, %v9139_v2 }
 0xe58   : > { %9172 = vst.msk [vmem:[%s16450_s9 + $0xa8] sm:$0xff] %vm4147_vm4, %v9140_v27 }
 0xe59   : > { %9173 = vst.msk [vmem:[%s16450_s9 + $0xb0] sm:$0xff] %vm4147_vm4, %v9141_v51 }
 0xe5a   : > { %9174 = vst.msk [vmem:[%s16450_s9 + $0xb8] sm:$0xff] %vm4147_vm4, %v9142_v5 }
 0xe5b   : > { %9175 = vst.msk [vmem:[%s16450_s9 + $0xc0] sm:$0xff] %vm4147_vm4, %v9143_v7 }
 0xe5c   : > { %9176 = vst.msk [vmem:[%s16450_s9 + $0xc8] sm:$0xff] %vm4147_vm4, %v9144_v14 }
 0xe5d   : > { %9177 = vst.msk [vmem:[%s16450_s9 + $0xd0] sm:$0xff] %vm4147_vm4, %v9145_v16 }
 0xe5e   : > { %9178 = vst.msk [vmem:[%s16450_s9 + $0xd8] sm:$0xff] %vm4147_vm4, %v9146_v44 }
 0xe5f   : > { %9179 = vst.msk [vmem:[%s16450_s9 + $0xe0] sm:$0xff] %vm4147_vm4, %v9147_v33 }
 0xe60   : > { %9180 = vst.msk [vmem:[%s16450_s9 + $0xe8] sm:$0xff] %vm4147_vm4, %v9148_v54 }
 0xe61   : > { %9181 = vst.msk [vmem:[%s16450_s9 + $0xf0] sm:$0xff] %vm4147_vm4, %v9149_v58 }
 0xe62   : > { %9182 = vst.msk [vmem:[%s16450_s9 + $0xf8] sm:$0xff] %vm4147_vm4, %v9150_v56 }
 0xe63   : > { %10710 = shalt.err (!%p10707_p3)
}
 0xe64   : > { %s10760_s19 = smov 128   ;;  %s10761_s9 = smov 8  }
 0xe65   : > { %10485 = dma.vmem_to_hbm [thread:$0]  (%p10840_p5), %s9197_s14, 4096, %s9199_s15, %s9184_s16, %s10760_s19, %s10760_s19, %s10761_s9  }
 0xe66 PF: > { %p10491_p4 = scmp.ge.s32.totalorder %s10745_s27, 2  ;;  %s9213_s28 = sand.u32 1, %s10733_s24  }
 0xe67   : > { %s9214_s8 = scalar_lea.sflag [#allocation4], %s9213_s28 }
 0xe68   : > { %p10488_p7 = pnand %p10491_p4, %p10844_p6 }
 0xe6a   : > { %p10489_p8 = pneg %p10488_p7 }
 0xe6c   : > { %10728 = dma.done.wait (%p10489_p8), %s9214_s8, 4096  }
 0xe6d   : > { %10730 = vsyncadd (%p10489_p8), %s9214_s8, 4294963200  ;;  %p17_p9 = scmp.ge.s32.totalorder %s10827_s30, 4   ;;  %s17709_s24 = smov %s10737_s25 }
 0xe6e   : > { %s17710_s25 = smov %s10741_s26  ;;  %s17711_s26 = smov %s10838_s10 }
 0xe6f   : > { %s17712_s27 = smov %s10827_s30  ;;  %19 = sbr.rel (!%p17_p9) target bundleno = 3 (0x3), region = 85 }
 0xe74   :  { %9220 = vsyncpa [#allocation4], 1 }
 0xe75   :  { %9222 = vsyncpa [#allocation4 + $0x1], 1 }

</bundles_post_ra>
